<compile_context>
chip_gen: v6e
topology: v6e:2x2x1
jax: 0.10.0
libtpu: 0.0.40
codegen_flags: <defaults>
</compile_context>

<pallas_src>
import functools
import numpy as np
import jax
import jax.numpy as jnp
from jax.experimental import pallas as pl
from jax.experimental.pallas import tpu as pltpu


# ----------------------------- fused forward kernel -----------------------------

def _fused_forward_kernel(
        t_enc, seq, bsz,
        # inputs
        xe_ref, enc_wih_ref, enc_whh_ref, enc_b_ref,
        ae_w1a_ref, ae_w1b_ref, ae_b1_ref, ae_w2_ref, ae_b2_ref,
        l_wih_ref, l_whh_ref, l_b_ref,
        a_w1a_ref, a_w1b_ref, a_b1_ref, a_w2_ref, a_b2_ref,
        d_w1_ref, d_b1_ref, d_w2_ref, d_b2_ref,
        # outputs
        out_ref,
        # scratch
        gx_enc_scr, enc_hs_scr, main_hs_scr):
    f32 = jnp.float32
    n_win = seq * bsz                      # number of windows = B*S
    h_enc = enc_whh_ref.shape[0]           # encoder hidden size
    h_main = l_whh_ref.shape[0]            # main hidden size

    # ---- hoisted encoder input projection: one (Tenc*N, C) @ (C, 4He) matmul ----
    gx_enc_scr[...] = (jnp.dot(xe_ref[...], enc_wih_ref[...],
                               preferred_element_type=f32) + enc_b_ref[...])

    def lstm_scan(n_steps, n_rows, hid, whh, gx_at, hs_scr):
        """Unrolled LSTM recurrence (gates order i,f,g,o like nn.LSTM).
        Input projection is precomputed; only h @ W_hh is on the serial path."""
        h = jnp.zeros((n_rows, hid), f32)
        c = jnp.zeros((n_rows, hid), f32)
        for t in range(n_steps):
            gates = gx_at(t) + jnp.dot(h, whh, preferred_element_type=f32)   # (n, 4H)
            sg = jax.nn.sigmoid(gates)        # full-width EUP op
            tg = jnp.tanh(gates)              # full-width EUP op
            i_g = sg[:, 0:hid]
            f_g = sg[:, hid:2 * hid]
            g_g = tg[:, 2 * hid:3 * hid]
            o_g = sg[:, 3 * hid:4 * hid]
            c = f_g * c + i_g * g_g
            h = o_g * jnp.tanh(c)
            hs_scr[t] = h                     # VMEM scratch, never HBM
        return h                              # hidden state of the last timestep

    def attention(n_steps, hs_at, last, w1a, w1b, b1, w2_row, b2):
        """Additive attention: score_t = w2 . relu(W1 @ [h_t ; h_last] + b1) + b2,
        softmax over t, weighted sum of h_t.  Pure 2-D ops (matmuls + (n,1)
        broadcasts + last-axis keepdims reductions)."""
        hlast = jnp.dot(last, w1b, preferred_element_type=f32) + b1          # (n, K)
        m = jnp.full((last.shape[0], 1), -jnp.inf, f32)
        scores = []
        for t in range(n_steps):
            a_t = jnp.maximum(
                jnp.dot(hs_at(t), w1a, preferred_element_type=f32) + hlast, 0.0)
            s_t = jnp.sum(a_t * w2_row, axis=-1, keepdims=True) + b2         # (n, 1)
            scores.append(s_t)
            m = jnp.maximum(m, s_t)
        denom = jnp.zeros_like(m)
        num = jnp.zeros_like(last)
        for t in range(n_steps):
            e_t = jnp.exp(scores[t] - m)                                     # (n, 1)
            denom = denom + e_t
            num = num + e_t * hs_at(t)                                       # (n, H)
        return num / denom                                                    # (n, H)

    # ---- encoder LSTM over every window (all B*S windows batched on the N dim) ----
    enc_whh = enc_whh_ref[...]
    h_enc_last = lstm_scan(
        t_enc, n_win, h_enc, enc_whh,
        lambda t: gx_enc_scr[t * n_win:(t + 1) * n_win, :],
        enc_hs_scr)

    # ---- encoder attention -> one context vector per window ----
    enc_ctx = attention(t_enc, lambda t: enc_hs_scr[t], h_enc_last,
                        ae_w1a_ref[...], ae_w1b_ref[...], ae_b1_ref[...],
                        ae_w2_ref[...], ae_b2_ref[...])                       # (N, He)

    # ---- hoisted main-LSTM input projection over all windows at once ----
    gx_main = (jnp.dot(enc_ctx, l_wih_ref[...], preferred_element_type=f32)
               + l_b_ref[...])                                                # (N, 4Hm)

    # windows are ordered n = s*B + b, so timestep s is a contiguous row block
    l_whh = l_whh_ref[...]
    h_main_last = lstm_scan(
        seq, bsz, h_main, l_whh,
        lambda s: gx_main[s * bsz:(s + 1) * bsz, :],
        main_hs_scr)

    # ---- attention over the window sequence ----
    ctx = attention(seq, lambda s: main_hs_scr[s], h_main_last,
                    a_w1a_ref[...], a_w1b_ref[...], a_b1_ref[...],
                    a_w2_ref[...], a_b2_ref[...])                             # (B, Hm)

    # ---- decoder MLP: Linear(H,200) -> ReLU -> Linear(200,out) -> Sigmoid ----
    d1 = jnp.maximum(jnp.dot(ctx, d_w1_ref[...], preferred_element_type=f32)
                     + d_b1_ref[...], 0.0)
    logits = jnp.dot(d1, d_w2_ref[...], preferred_element_type=f32) + d_b2_ref[...]
    out_ref[...] = jax.nn.sigmoid(logits)
    # TODO(synk): the PyTorch forward also computes an unused softmax of the output; omitted.


# ----------------------------- wrapper -----------------------------

_VMEM = pl.BlockSpec(memory_space=pltpu.MemorySpace.VMEM)


def lstm_model_forward(params, x):
    """Reproduces LSTM.forward: per-episode standardization -> encoder LSTM over
    each 20-sample window -> attention pooling -> LSTM over windows -> attention
    pooling -> decoder MLP with sigmoid.  Output: (B, output_size)."""
    B, S, C, W = x.shape
    x = x.astype(jnp.float32)
    # per-episode standardization (torch .std() is unbiased -> ddof=1)
    mean = jnp.mean(x, axis=(1, 2, 3), keepdims=True)
    sd = jnp.std(x, axis=(1, 2, 3), ddof=1, keepdims=True)
    xs = (x - mean) / sd

    # (B,S,C,W) -> (W,S,B,C) -> (W*S*B, C): time-major rows, window index n = s*B + b.
    xe = jnp.transpose(xs, (3, 1, 0, 2)).reshape(W * S * B, C)

    He = params['enc_whh'].shape[0]
    Hm = params['l_whh'].shape[0]
    O = params['d_w2'].shape[1]

    # Everything (inputs + scratch) is far below the scoped VMEM limit at these sizes.
    vmem_bytes = 4 * (W * S * B * (C + 4 * He + He) + S * B * Hm)
    assert vmem_bytes < 8 * 1024 * 1024, "activation footprint too large for VMEM"

    kernel = functools.partial(_fused_forward_kernel, W, S, B)
    return pl.pallas_call(
        kernel,
        out_shape=jax.ShapeDtypeStruct((B, O), jnp.float32),
        in_specs=[_VMEM] * 21,
        out_specs=_VMEM,
        scratch_shapes=[
            pltpu.VMEM((W * S * B, 4 * He), jnp.float32),   # hoisted encoder gates
            pltpu.VMEM((W, S * B, He), jnp.float32),        # encoder hidden states
            pltpu.VMEM((S, B, Hm), jnp.float32),            # main-LSTM hidden states
        ],
    )(xe,
      params['enc_wih'], params['enc_whh'], params['enc_b'],
      params['ae_w1a'], params['ae_w1b'], params['ae_b1'], params['ae_w2'], params['ae_b2'],
      params['l_wih'], params['l_whh'], params['l_b'],
      params['a_w1a'], params['a_w1b'], params['a_b1'], params['a_w2'], params['a_b2'],
      params['d_w1'], params['d_b1'], params['d_w2'], params['d_b2'])


# ----------------------------- parameter init -----------------------------

def init_params(key, enc_in, enc_out, hidden, out_size, gain):
    def xavier(k, shape, fan_in, fan_out):
        std = gain * np.sqrt(2.0 / (fan_in + fan_out))
        return jax.random.normal(k, shape, dtype=jnp.float32) * std

    def unif(k, shape, bound):
        return jax.random.uniform(k, shape, jnp.float32, -bound, bound)

    ks = jax.random.split(key, 20)
    p = {}
    # encoder nn.LSTM(enc_in, enc_out): weights pre-transposed to (in, 4H); b = b_ih + b_hh
    p['enc_wih'] = xavier(ks[0], (enc_in, 4 * enc_out), enc_in, 4 * enc_out)
    p['enc_whh'] = xavier(ks[1], (enc_out, 4 * enc_out), enc_out, 4 * enc_out)
    p['enc_b'] = unif(ks[2], (1, 4 * enc_out), 1.0 / np.sqrt(enc_out))
    # attnenc: Linear(2*enc_out, 64) -> ReLU -> Linear(64, 1); W1 split into [h_t ; h_last]
    p['ae_w1a'] = xavier(ks[3], (enc_out, 64), 2 * enc_out, 64)
    p['ae_w1b'] = xavier(ks[4], (enc_out, 64), 2 * enc_out, 64)
    p['ae_b1'] = unif(ks[5], (1, 64), 1.0 / np.sqrt(2 * enc_out))
    p['ae_w2'] = xavier(ks[6], (1, 64), 64, 1)
    p['ae_b2'] = unif(ks[7], (1, 1), 1.0 / np.sqrt(64))
    # main nn.LSTM(enc_out, hidden)
    p['l_wih'] = xavier(ks[8], (enc_out, 4 * hidden), enc_out, 4 * hidden)
    p['l_whh'] = xavier(ks[9], (hidden, 4 * hidden), hidden, 4 * hidden)
    p['l_b'] = unif(ks[10], (1, 4 * hidden), 1.0 / np.sqrt(hidden))
    # attn: Linear(2*hidden, 128) -> ReLU -> Linear(128, 1)
    p['a_w1a'] = xavier(ks[11], (hidden, 128), 2 * hidden, 128)
    p['a_w1b'] = xavier(ks[12], (hidden, 128), 2 * hidden, 128)
    p['a_b1'] = unif(ks[13], (1, 128), 1.0 / np.sqrt(2 * hidden))
    p['a_w2'] = xavier(ks[14], (1, 128), 128, 1)
    p['a_b2'] = unif(ks[15], (1, 1), 1.0 / np.sqrt(128))
    # decoder: Linear(hidden, 200) -> ReLU -> Linear(200, out) -> Sigmoid
    p['d_w1'] = xavier(ks[16], (hidden, 200), hidden, 200)
    p['d_b1'] = unif(ks[17], (1, 200), 1.0 / np.sqrt(hidden))
    p['d_w2'] = xavier(ks[18], (200, out_size), 200, out_size)
    p['d_b2'] = unif(ks[19], (1, out_size), 1.0 / np.sqrt(200))
    return p


# ----------------------------- main -----------------------------

if __name__ == "__main__":
    B, S = 2, 8            # batch, number of sliding windows (sequence_size)
    ENC_IN = 10            # enc_input_size (ICA components)
    ENC_OUT = 32           # input_size of the main LSTM (= encoder hidden size)
    HIDDEN = 32            # hidden_nodes
    OUT = 2                # output_size
    WIN = 20               # window length hard-coded in the PyTorch view(-1, C, 20)
    GAIN = 0.85            # e.g. gain['FBIRN'][0]

    key = jax.random.PRNGKey(0)
    kx, kp = jax.random.split(key)
    x = jax.random.normal(kx, (B, S, ENC_IN, WIN), dtype=jnp.float32)
    params = init_params(kp, ENC_IN, ENC_OUT, HIDDEN, OUT, GAIN)

    fwd = jax.jit(lstm_model_forward)
    out = fwd(params, x)
    jax.block_until_ready(out)
    assert out.shape == (B, OUT)
    assert bool(jnp.all(jnp.isfinite(out)))
    print("KERNEL_OK")
</pallas_src>

<mosaic_0001>
module attributes {stable_mosaic.version = 11 : i64} {
  func.func @_fused_forward_kernel(%arg0: memref<320x10xf32, #tpu.memory_space<vmem>>, %arg1: memref<10x128xf32, #tpu.memory_space<vmem>>, %arg2: memref<32x128xf32, #tpu.memory_space<vmem>>, %arg3: memref<1x128xf32, #tpu.memory_space<vmem>>, %arg4: memref<32x64xf32, #tpu.memory_space<vmem>>, %arg5: memref<32x64xf32, #tpu.memory_space<vmem>>, %arg6: memref<1x64xf32, #tpu.memory_space<vmem>>, %arg7: memref<1x64xf32, #tpu.memory_space<vmem>>, %arg8: memref<1x1xf32, #tpu.memory_space<vmem>>, %arg9: memref<32x128xf32, #tpu.memory_space<vmem>>, %arg10: memref<32x128xf32, #tpu.memory_space<vmem>>, %arg11: memref<1x128xf32, #tpu.memory_space<vmem>>, %arg12: memref<32x128xf32, #tpu.memory_space<vmem>>, %arg13: memref<32x128xf32, #tpu.memory_space<vmem>>, %arg14: memref<1x128xf32, #tpu.memory_space<vmem>>, %arg15: memref<1x128xf32, #tpu.memory_space<vmem>>, %arg16: memref<1x1xf32, #tpu.memory_space<vmem>>, %arg17: memref<32x200xf32, #tpu.memory_space<vmem>>, %arg18: memref<1x200xf32, #tpu.memory_space<vmem>>, %arg19: memref<200x2xf32, #tpu.memory_space<vmem>>, %arg20: memref<1x2xf32, #tpu.memory_space<vmem>>, %arg21: memref<2x2xf32, #tpu.memory_space<vmem>>, %arg22: memref<320x128xf32, #tpu.memory_space<vmem>>, %arg23: memref<20x16x32xf32, #tpu.memory_space<vmem>>, %arg24: memref<8x2x32xf32, #tpu.memory_space<vmem>>) attributes {dimension_semantics = [], scalar_prefetch = 0 : i64, scratch_operands = 3 : i64, tpu.core_type = #tpu.core_type<tc>} {
    %c0 = arith.constant 0 : index
    %c0_0 = arith.constant 0 : index
    %0 = vector.load %arg0[%c0, %c0_0] : memref<320x10xf32, #tpu.memory_space<vmem>>, vector<320x10xf32>
    %c0_1 = arith.constant 0 : index
    %c0_2 = arith.constant 0 : index
    %1 = vector.load %arg1[%c0_1, %c0_2] : memref<10x128xf32, #tpu.memory_space<vmem>>, vector<10x128xf32>
    %cst = arith.constant dense<0.000000e+00> : vector<320x128xf32>
    %2 = tpu.matmul %0, %1, %cst {dimension_numbers = #tpu.dot_dimension_numbers<[1], [0], [0], [1], [0, 0, 1, 1], [], []>} : vector<320x10xf32>, vector<10x128xf32>, vector<320x128xf32> -> vector<320x128xf32>
    %c0_3 = arith.constant 0 : index
    %c0_4 = arith.constant 0 : index
    %3 = vector.load %arg3[%c0_3, %c0_4] : memref<1x128xf32, #tpu.memory_space<vmem>>, vector<1x128xf32>
    %4 = vector.broadcast %3 : vector<1x128xf32> to vector<320x128xf32>
    %5 = arith.addf %2, %4 : vector<320x128xf32>
    %c0_5 = arith.constant 0 : index
    %c0_6 = arith.constant 0 : index
    %6 = vector.load %arg22[%c0_5, %c0_6] : memref<320x128xf32, #tpu.memory_space<vmem>>, vector<320x128xf32>
    tpu.vector_store %arg22[%c0_5, %c0_6], %5 {strides = array<i32>} : memref<320x128xf32, #tpu.memory_space<vmem>>, vector<320x128xf32>,
    %c0_7 = arith.constant 0 : index
    %c0_8 = arith.constant 0 : index
    %7 = vector.load %arg2[%c0_7, %c0_8] : memref<32x128xf32, #tpu.memory_space<vmem>>, vector<32x128xf32>
    %cst_9 = arith.constant 0.000000e+00 : f32
    %8 = vector.broadcast %cst_9 : f32 to vector<16x32xf32>
    %cst_10 = arith.constant 0.000000e+00 : f32
    %9 = vector.broadcast %cst_10 : f32 to vector<16x32xf32>
    %c0_11 = arith.constant 0 : index
    %c0_12 = arith.constant 0 : index
    %10 = vector.load %arg22[%c0_11, %c0_12] : memref<320x128xf32, #tpu.memory_space<vmem>>, vector<16x128xf32>
    %cst_13 = arith.constant dense<0.000000e+00> : vector<16x128xf32>
    %11 = tpu.matmul %8, %7, %cst_13 {dimension_numbers = #tpu.dot_dimension_numbers<[1], [0], [0], [1], [0, 0, 1, 1], [], []>} : vector<16x32xf32>, vector<32x128xf32>, vector<16x128xf32> -> vector<16x128xf32>
    %12 = arith.addf %10, %11 : vector<16x128xf32>
    %13 = arith.negf %12 : vector<16x128xf32>
    %14 = math.exp %13 : vector<16x128xf32>
    %cst_14 = arith.constant 1.000000e+00 : f32
    %15 = vector.broadcast %cst_14 : f32 to vector<16x128xf32>
    %16 = arith.addf %15, %14 : vector<16x128xf32>
    %17 = arith.divf %15, %16 : vector<16x128xf32>
    %18 = math.tanh %12 : vector<16x128xf32>
    %19 = vector.extract_strided_slice %17 {offsets = [0, 0], sizes = [16, 32], strides = [1, 1]} : vector<16x128xf32> to vector<16x32xf32>
    %20 = vector.extract_strided_slice %17 {offsets = [0, 32], sizes = [16, 32], strides = [1, 1]} : vector<16x128xf32> to vector<16x32xf32>
    %21 = vector.extract_strided_slice %18 {offsets = [0, 64], sizes = [16, 32], strides = [1, 1]} : vector<16x128xf32> to vector<16x32xf32>
    %22 = vector.extract_strided_slice %17 {offsets = [0, 96], sizes = [16, 32], strides = [1, 1]} : vector<16x128xf32> to vector<16x32xf32>
    %23 = arith.mulf %20, %9 : vector<16x32xf32>
    %24 = arith.mulf %19, %21 : vector<16x32xf32>
    %25 = arith.addf %23, %24 : vector<16x32xf32>
    %26 = math.tanh %25 : vector<16x32xf32>
    %27 = arith.mulf %22, %26 : vector<16x32xf32>
    %c0_15 = arith.constant 0 : index
    %c0_16 = arith.constant 0 : index
    %c0_17 = arith.constant 0 : index
    %28 = vector.load %arg23[%c0_15, %c0_16, %c0_17] : memref<20x16x32xf32, #tpu.memory_space<vmem>>, vector<1x16x32xf32>
    %29 = vector.shape_cast %28 : vector<1x16x32xf32> to vector<16x32xf32>
    %30 = vector.shape_cast %27 : vector<16x32xf32> to vector<1x16x32xf32>
    tpu.vector_store %arg23[%c0_15, %c0_16, %c0_17], %30 {strides = array<i32>} : memref<20x16x32xf32, #tpu.memory_space<vmem>>, vector<1x16x32xf32>,
    %c16 = arith.constant 16 : index
    %c0_18 = arith.constant 0 : index
    %31 = vector.load %arg22[%c16, %c0_18] : memref<320x128xf32, #tpu.memory_space<vmem>>, vector<16x128xf32>
    %cst_19 = arith.constant dense<0.000000e+00> : vector<16x128xf32>
    %32 = tpu.matmul %27, %7, %cst_19 {dimension_numbers = #tpu.dot_dimension_numbers<[1], [0], [0], [1], [0, 0, 1, 1], [], []>} : vector<16x32xf32>, vector<32x128xf32>, vector<16x128xf32> -> vector<16x128xf32>
    %33 = arith.addf %31, %32 : vector<16x128xf32>
    %34 = arith.negf %33 : vector<16x128xf32>
    %35 = math.exp %34 : vector<16x128xf32>
    %cst_20 = arith.constant 1.000000e+00 : f32
    %36 = vector.broadcast %cst_20 : f32 to vector<16x128xf32>
    %37 = arith.addf %36, %35 : vector<16x128xf32>
    %38 = arith.divf %36, %37 : vector<16x128xf32>
    %39 = math.tanh %33 : vector<16x128xf32>
    %40 = vector.extract_strided_slice %38 {offsets = [0, 0], sizes = [16, 32], strides = [1, 1]} : vector<16x128xf32> to vector<16x32xf32>
    %41 = vector.extract_strided_slice %38 {offsets = [0, 32], sizes = [16, 32], strides = [1, 1]} : vector<16x128xf32> to vector<16x32xf32>
    %42 = vector.extract_strided_slice %39 {offsets = [0, 64], sizes = [16, 32], strides = [1, 1]} : vector<16x128xf32> to vector<16x32xf32>
    %43 = vector.extract_strided_slice %38 {offsets = [0, 96], sizes = [16, 32], strides = [1, 1]} : vector<16x128xf32> to vector<16x32xf32>
    %44 = arith.mulf %41, %25 : vector<16x32xf32>
    %45 = arith.mulf %40, %42 : vector<16x32xf32>
    %46 = arith.addf %44, %45 : vector<16x32xf32>
    %47 = math.tanh %46 : vector<16x32xf32>
    %48 = arith.mulf %43, %47 : vector<16x32xf32>
    %c1 = arith.constant 1 : index
    %c0_21 = arith.constant 0 : index
    %c0_22 = arith.constant 0 : index
    %49 = vector.load %arg23[%c1, %c0_21, %c0_22] : memref<20x16x32xf32, #tpu.memory_space<vmem>>, vector<1x16x32xf32>
    %50 = vector.shape_cast %49 : vector<1x16x32xf32> to vector<16x32xf32>
    %51 = vector.shape_cast %48 : vector<16x32xf32> to vector<1x16x32xf32>
    tpu.vector_store %arg23[%c1, %c0_21, %c0_22], %51 {strides = array<i32>} : memref<20x16x32xf32, #tpu.memory_space<vmem>>, vector<1x16x32xf32>,
    %c32 = arith.constant 32 : index
    %c0_23 = arith.constant 0 : index
    %52 = vector.load %arg22[%c32, %c0_23] : memref<320x128xf32, #tpu.memory_space<vmem>>, vector<16x128xf32>
    %cst_24 = arith.constant dense<0.000000e+00> : vector<16x128xf32>
    %53 = tpu.matmul %48, %7, %cst_24 {dimension_numbers = #tpu.dot_dimension_numbers<[1], [0], [0], [1], [0, 0, 1, 1], [], []>} : vector<16x32xf32>, vector<32x128xf32>, vector<16x128xf32> -> vector<16x128xf32>
    %54 = arith.addf %52, %53 : vector<16x128xf32>
    %55 = arith.negf %54 : vector<16x128xf32>
    %56 = math.exp %55 : vector<16x128xf32>
    %cst_25 = arith.constant 1.000000e+00 : f32
    %57 = vector.broadcast %cst_25 : f32 to vector<16x128xf32>
    %58 = arith.addf %57, %56 : vector<16x128xf32>
    %59 = arith.divf %57, %58 : vector<16x128xf32>
    %60 = math.tanh %54 : vector<16x128xf32>
    %61 = vector.extract_strided_slice %59 {offsets = [0, 0], sizes = [16, 32], strides = [1, 1]} : vector<16x128xf32> to vector<16x32xf32>
    %62 = vector.extract_strided_slice %59 {offsets = [0, 32], sizes = [16, 32], strides = [1, 1]} : vector<16x128xf32> to vector<16x32xf32>
    %63 = vector.extract_strided_slice %60 {offsets = [0, 64], sizes = [16, 32], strides = [1, 1]} : vector<16x128xf32> to vector<16x32xf32>
    %64 = vector.extract_strided_slice %59 {offsets = [0, 96], sizes = [16, 32], strides = [1, 1]} : vector<16x128xf32> to vector<16x32xf32>
    %65 = arith.mulf %62, %46 : vector<16x32xf32>
    %66 = arith.mulf %61, %63 : vector<16x32xf32>
    %67 = arith.addf %65, %66 : vector<16x32xf32>
    %68 = math.tanh %67 : vector<16x32xf32>
    %69 = arith.mulf %64, %68 : vector<16x32xf32>
    %c2 = arith.constant 2 : index
    %c0_26 = arith.constant 0 : index
    %c0_27 = arith.constant 0 : index
    %70 = vector.load %arg23[%c2, %c0_26, %c0_27] : memref<20x16x32xf32, #tpu.memory_space<vmem>>, vector<1x16x32xf32>
    %71 = vector.shape_cast %70 : vector<1x16x32xf32> to vector<16x32xf32>
    %72 = vector.shape_cast %69 : vector<16x32xf32> to vector<1x16x32xf32>
    tpu.vector_store %arg23[%c2, %c0_26, %c0_27], %72 {strides = array<i32>} : memref<20x16x32xf32, #tpu.memory_space<vmem>>, vector<1x16x32xf32>,
    %c48 = arith.constant 48 : index
    %c0_28 = arith.constant 0 : index
    %73 = vector.load %arg22[%c48, %c0_28] : memref<320x128xf32, #tpu.memory_space<vmem>>, vector<16x128xf32>
    %cst_29 = arith.constant dense<0.000000e+00> : vector<16x128xf32>
    %74 = tpu.matmul %69, %7, %cst_29 {dimension_numbers = #tpu.dot_dimension_numbers<[1], [0], [0], [1], [0, 0, 1, 1], [], []>} : vector<16x32xf32>, vector<32x128xf32>, vector<16x128xf32> -> vector<16x128xf32>
    %75 = arith.addf %73, %74 : vector<16x128xf32>
    %76 = arith.negf %75 : vector<16x128xf32>
    %77 = math.exp %76 : vector<16x128xf32>
    %cst_30 = arith.constant 1.000000e+00 : f32
    %78 = vector.broadcast %cst_30 : f32 to vector<16x128xf32>
    %79 = arith.addf %78, %77 : vector<16x128xf32>
    %80 = arith.divf %78, %79 : vector<16x128xf32>
    %81 = math.tanh %75 : vector<16x128xf32>
    %82 = vector.extract_strided_slice %80 {offsets = [0, 0], sizes = [16, 32], strides = [1, 1]} : vector<16x128xf32> to vector<16x32xf32>
    %83 = vector.extract_strided_slice %80 {offsets = [0, 32], sizes = [16, 32], strides = [1, 1]} : vector<16x128xf32> to vector<16x32xf32>
    %84 = vector.extract_strided_slice %81 {offsets = [0, 64], sizes = [16, 32], strides = [1, 1]} : vector<16x128xf32> to vector<16x32xf32>
    %85 = vector.extract_strided_slice %80 {offsets = [0, 96], sizes = [16, 32], strides = [1, 1]} : vector<16x128xf32> to vector<16x32xf32>
    %86 = arith.mulf %83, %67 : vector<16x32xf32>
    %87 = arith.mulf %82, %84 : vector<16x32xf32>
    %88 = arith.addf %86, %87 : vector<16x32xf32>
    %89 = math.tanh %88 : vector<16x32xf32>
    %90 = arith.mulf %85, %89 : vector<16x32xf32>
    %c3 = arith.constant 3 : index
    %c0_31 = arith.constant 0 : index
    %c0_32 = arith.constant 0 : index
    %91 = vector.load %arg23[%c3, %c0_31, %c0_32] : memref<20x16x32xf32, #tpu.memory_space<vmem>>, vector<1x16x32xf32>
    %92 = vector.shape_cast %91 : vector<1x16x32xf32> to vector<16x32xf32>
    %93 = vector.shape_cast %90 : vector<16x32xf32> to vector<1x16x32xf32>
    tpu.vector_store %arg23[%c3, %c0_31, %c0_32], %93 {strides = array<i32>} : memref<20x16x32xf32, #tpu.memory_space<vmem>>, vector<1x16x32xf32>,
    %c64 = arith.constant 64 : index
    %c0_33 = arith.constant 0 : index
    %94 = vector.load %arg22[%c64, %c0_33] : memref<320x128xf32, #tpu.memory_space<vmem>>, vector<16x128xf32>
    %cst_34 = arith.constant dense<0.000000e+00> : vector<16x128xf32>
    %95 = tpu.matmul %90, %7, %cst_34 {dimension_numbers = #tpu.dot_dimension_numbers<[1], [0], [0], [1], [0, 0, 1, 1], [], []>} : vector<16x32xf32>, vector<32x128xf32>, vector<16x128xf32> -> vector<16x128xf32>
    %96 = arith.addf %94, %95 : vector<16x128xf32>
    %97 = arith.negf %96 : vector<16x128xf32>
    %98 = math.exp %97 : vector<16x128xf32>
    %cst_35 = arith.constant 1.000000e+00 : f32
    %99 = vector.broadcast %cst_35 : f32 to vector<16x128xf32>
    %100 = arith.addf %99, %98 : vector<16x128xf32>
    %101 = arith.divf %99, %100 : vector<16x128xf32>
    %102 = math.tanh %96 : vector<16x128xf32>
    %103 = vector.extract_strided_slice %101 {offsets = [0, 0], sizes = [16, 32], strides = [1, 1]} : vector<16x128xf32> to vector<16x32xf32>
    %104 = vector.extract_strided_slice %101 {offsets = [0, 32], sizes = [16, 32], strides = [1, 1]} : vector<16x128xf32> to vector<16x32xf32>
    %105 = vector.extract_strided_slice %102 {offsets = [0, 64], sizes = [16, 32], strides = [1, 1]} : vector<16x128xf32> to vector<16x32xf32>
    %106 = vector.extract_strided_slice %101 {offsets = [0, 96], sizes = [16, 32], strides = [1, 1]} : vector<16x128xf32> to vector<16x32xf32>
    %107 = arith.mulf %104, %88 : vector<16x32xf32>
    %108 = arith.mulf %103, %105 : vector<16x32xf32>
    %109 = arith.addf %107, %108 : vector<16x32xf32>
    %110 = math.tanh %109 : vector<16x32xf32>
    %111 = arith.mulf %106, %110 : vector<16x32xf32>
    %c4 = arith.constant 4 : index
    %c0_36 = arith.constant 0 : index
    %c0_37 = arith.constant 0 : index
    %112 = vector.load %arg23[%c4, %c0_36, %c0_37] : memref<20x16x32xf32, #tpu.memory_space<vmem>>, vector<1x16x32xf32>
    %113 = vector.shape_cast %112 : vector<1x16x32xf32> to vector<16x32xf32>
    %114 = vector.shape_cast %111 : vector<16x32xf32> to vector<1x16x32xf32>
    tpu.vector_store %arg23[%c4, %c0_36, %c0_37], %114 {strides = array<i32>} : memref<20x16x32xf32, #tpu.memory_space<vmem>>, vector<1x16x32xf32>,
    %c80 = arith.constant 80 : index
    %c0_38 = arith.constant 0 : index
    %115 = vector.load %arg22[%c80, %c0_38] : memref<320x128xf32, #tpu.memory_space<vmem>>, vector<16x128xf32>
    %cst_39 = arith.constant dense<0.000000e+00> : vector<16x128xf32>
    %116 = tpu.matmul %111, %7, %cst_39 {dimension_numbers = #tpu.dot_dimension_numbers<[1], [0], [0], [1], [0, 0, 1, 1], [], []>} : vector<16x32xf32>, vector<32x128xf32>, vector<16x128xf32> -> vector<16x128xf32>
    %117 = arith.addf %115, %116 : vector<16x128xf32>
    %118 = arith.negf %117 : vector<16x128xf32>
    %119 = math.exp %118 : vector<16x128xf32>
    %cst_40 = arith.constant 1.000000e+00 : f32
    %120 = vector.broadcast %cst_40 : f32 to vector<16x128xf32>
    %121 = arith.addf %120, %119 : vector<16x128xf32>
    %122 = arith.divf %120, %121 : vector<16x128xf32>
    %123 = math.tanh %117 : vector<16x128xf32>
    %124 = vector.extract_strided_slice %122 {offsets = [0, 0], sizes = [16, 32], strides = [1, 1]} : vector<16x128xf32> to vector<16x32xf32>
    %125 = vector.extract_strided_slice %122 {offsets = [0, 32], sizes = [16, 32], strides = [1, 1]} : vector<16x128xf32> to vector<16x32xf32>
    %126 = vector.extract_strided_slice %123 {offsets = [0, 64], sizes = [16, 32], strides = [1, 1]} : vector<16x128xf32> to vector<16x32xf32>
    %127 = vector.extract_strided_slice %122 {offsets = [0, 96], sizes = [16, 32], strides = [1, 1]} : vector<16x128xf32> to vector<16x32xf32>
    %128 = arith.mulf %125, %109 : vector<16x32xf32>
    %129 = arith.mulf %124, %126 : vector<16x32xf32>
    %130 = arith.addf %128, %129 : vector<16x32xf32>
    %131 = math.tanh %130 : vector<16x32xf32>
    %132 = arith.mulf %127, %131 : vector<16x32xf32>
    %c5 = arith.constant 5 : index
    %c0_41 = arith.constant 0 : index
    %c0_42 = arith.constant 0 : index
    %133 = vector.load %arg23[%c5, %c0_41, %c0_42] : memref<20x16x32xf32, #tpu.memory_space<vmem>>, vector<1x16x32xf32>
    %134 = vector.shape_cast %133 : vector<1x16x32xf32> to vector<16x32xf32>
    %135 = vector.shape_cast %132 : vector<16x32xf32> to vector<1x16x32xf32>
    tpu.vector_store %arg23[%c5, %c0_41, %c0_42], %135 {strides = array<i32>} : memref<20x16x32xf32, #tpu.memory_space<vmem>>, vector<1x16x32xf32>,
    %c96 = arith.constant 96 : index
    %c0_43 = arith.constant 0 : index
    %136 = vector.load %arg22[%c96, %c0_43] : memref<320x128xf32, #tpu.memory_space<vmem>>, vector<16x128xf32>
    %cst_44 = arith.constant dense<0.000000e+00> : vector<16x128xf32>
    %137 = tpu.matmul %132, %7, %cst_44 {dimension_numbers = #tpu.dot_dimension_numbers<[1], [0], [0], [1], [0, 0, 1, 1], [], []>} : vector<16x32xf32>, vector<32x128xf32>, vector<16x128xf32> -> vector<16x128xf32>
    %138 = arith.addf %136, %137 : vector<16x128xf32>
    %139 = arith.negf %138 : vector<16x128xf32>
    %140 = math.exp %139 : vector<16x128xf32>
    %cst_45 = arith.constant 1.000000e+00 : f32
    %141 = vector.broadcast %cst_45 : f32 to vector<16x128xf32>
    %142 = arith.addf %141, %140 : vector<16x128xf32>
    %143 = arith.divf %141, %142 : vector<16x128xf32>
    %144 = math.tanh %138 : vector<16x128xf32>
    %145 = vector.extract_strided_slice %143 {offsets = [0, 0], sizes = [16, 32], strides = [1, 1]} : vector<16x128xf32> to vector<16x32xf32>
    %146 = vector.extract_strided_slice %143 {offsets = [0, 32], sizes = [16, 32], strides = [1, 1]} : vector<16x128xf32> to vector<16x32xf32>
    %147 = vector.extract_strided_slice %144 {offsets = [0, 64], sizes = [16, 32], strides = [1, 1]} : vector<16x128xf32> to vector<16x32xf32>
    %148 = vector.extract_strided_slice %143 {offsets = [0, 96], sizes = [16, 32], strides = [1, 1]} : vector<16x128xf32> to vector<16x32xf32>
    %149 = arith.mulf %146, %130 : vector<16x32xf32>
    %150 = arith.mulf %145, %147 : vector<16x32xf32>
    %151 = arith.addf %149, %150 : vector<16x32xf32>
    %152 = math.tanh %151 : vector<16x32xf32>
    %153 = arith.mulf %148, %152 : vector<16x32xf32>
    %c6 = arith.constant 6 : index
    %c0_46 = arith.constant 0 : index
    %c0_47 = arith.constant 0 : index
    %154 = vector.load %arg23[%c6, %c0_46, %c0_47] : memref<20x16x32xf32, #tpu.memory_space<vmem>>, vector<1x16x32xf32>
    %155 = vector.shape_cast %154 : vector<1x16x32xf32> to vector<16x32xf32>
    %156 = vector.shape_cast %153 : vector<16x32xf32> to vector<1x16x32xf32>
    tpu.vector_store %arg23[%c6, %c0_46, %c0_47], %156 {strides = array<i32>} : memref<20x16x32xf32, #tpu.memory_space<vmem>>, vector<1x16x32xf32>,
    %c112 = arith.constant 112 : index
    %c0_48 = arith.constant 0 : index
    %157 = vector.load %arg22[%c112, %c0_48] : memref<320x128xf32, #tpu.memory_space<vmem>>, vector<16x128xf32>
    %cst_49 = arith.constant dense<0.000000e+00> : vector<16x128xf32>
    %158 = tpu.matmul %153, %7, %cst_49 {dimension_numbers = #tpu.dot_dimension_numbers<[1], [0], [0], [1], [0, 0, 1, 1], [], []>} : vector<16x32xf32>, vector<32x128xf32>, vector<16x128xf32> -> vector<16x128xf32>
    %159 = arith.addf %157, %158 : vector<16x128xf32>
    %160 = arith.negf %159 : vector<16x128xf32>
    %161 = math.exp %160 : vector<16x128xf32>
    %cst_50 = arith.constant 1.000000e+00 : f32
    %162 = vector.broadcast %cst_50 : f32 to vector<16x128xf32>
    %163 = arith.addf %162, %161 : vector<16x128xf32>
    %164 = arith.divf %162, %163 : vector<16x128xf32>
    %165 = math.tanh %159 : vector<16x128xf32>
    %166 = vector.extract_strided_slice %164 {offsets = [0, 0], sizes = [16, 32], strides = [1, 1]} : vector<16x128xf32> to vector<16x32xf32>
    %167 = vector.extract_strided_slice %164 {offsets = [0, 32], sizes = [16, 32], strides = [1, 1]} : vector<16x128xf32> to vector<16x32xf32>
    %168 = vector.extract_strided_slice %165 {offsets = [0, 64], sizes = [16, 32], strides = [1, 1]} : vector<16x128xf32> to vector<16x32xf32>
    %169 = vector.extract_strided_slice %164 {offsets = [0, 96], sizes = [16, 32], strides = [1, 1]} : vector<16x128xf32> to vector<16x32xf32>
    %170 = arith.mulf %167, %151 : vector<16x32xf32>
    %171 = arith.mulf %166, %168 : vector<16x32xf32>
    %172 = arith.addf %170, %171 : vector<16x32xf32>
    %173 = math.tanh %172 : vector<16x32xf32>
    %174 = arith.mulf %169, %173 : vector<16x32xf32>
    %c7 = arith.constant 7 : index
    %c0_51 = arith.constant 0 : index
    %c0_52 = arith.constant 0 : index
    %175 = vector.load %arg23[%c7, %c0_51, %c0_52] : memref<20x16x32xf32, #tpu.memory_space<vmem>>, vector<1x16x32xf32>
    %176 = vector.shape_cast %175 : vector<1x16x32xf32> to vector<16x32xf32>
    %177 = vector.shape_cast %174 : vector<16x32xf32> to vector<1x16x32xf32>
    tpu.vector_store %arg23[%c7, %c0_51, %c0_52], %177 {strides = array<i32>} : memref<20x16x32xf32, #tpu.memory_space<vmem>>, vector<1x16x32xf32>,
    %c128 = arith.constant 128 : index
    %c0_53 = arith.constant 0 : index
    %178 = vector.load %arg22[%c128, %c0_53] : memref<320x128xf32, #tpu.memory_space<vmem>>, vector<16x128xf32>
    %cst_54 = arith.constant dense<0.000000e+00> : vector<16x128xf32>
    %179 = tpu.matmul %174, %7, %cst_54 {dimension_numbers = #tpu.dot_dimension_numbers<[1], [0], [0], [1], [0, 0, 1, 1], [], []>} : vector<16x32xf32>, vector<32x128xf32>, vector<16x128xf32> -> vector<16x128xf32>
    %180 = arith.addf %178, %179 : vector<16x128xf32>
    %181 = arith.negf %180 : vector<16x128xf32>
    %182 = math.exp %181 : vector<16x128xf32>
    %cst_55 = arith.constant 1.000000e+00 : f32
    %183 = vector.broadcast %cst_55 : f32 to vector<16x128xf32>
    %184 = arith.addf %183, %182 : vector<16x128xf32>
    %185 = arith.divf %183, %184 : vector<16x128xf32>
    %186 = math.tanh %180 : vector<16x128xf32>
    %187 = vector.extract_strided_slice %185 {offsets = [0, 0], sizes = [16, 32], strides = [1, 1]} : vector<16x128xf32> to vector<16x32xf32>
    %188 = vector.extract_strided_slice %185 {offsets = [0, 32], sizes = [16, 32], strides = [1, 1]} : vector<16x128xf32> to vector<16x32xf32>
    %189 = vector.extract_strided_slice %186 {offsets = [0, 64], sizes = [16, 32], strides = [1, 1]} : vector<16x128xf32> to vector<16x32xf32>
    %190 = vector.extract_strided_slice %185 {offsets = [0, 96], sizes = [16, 32], strides = [1, 1]} : vector<16x128xf32> to vector<16x32xf32>
    %191 = arith.mulf %188, %172 : vector<16x32xf32>
    %192 = arith.mulf %187, %189 : vector<16x32xf32>
    %193 = arith.addf %191, %192 : vector<16x32xf32>
    %194 = math.tanh %193 : vector<16x32xf32>
    %195 = arith.mulf %190, %194 : vector<16x32xf32>
    %c8 = arith.constant 8 : index
    %c0_56 = arith.constant 0 : index
    %c0_57 = arith.constant 0 : index
    %196 = vector.load %arg23[%c8, %c0_56, %c0_57] : memref<20x16x32xf32, #tpu.memory_space<vmem>>, vector<1x16x32xf32>
    %197 = vector.shape_cast %196 : vector<1x16x32xf32> to vector<16x32xf32>
    %198 = vector.shape_cast %195 : vector<16x32xf32> to vector<1x16x32xf32>
    tpu.vector_store %arg23[%c8, %c0_56, %c0_57], %198 {strides = array<i32>} : memref<20x16x32xf32, #tpu.memory_space<vmem>>, vector<1x16x32xf32>,
    %c144 = arith.constant 144 : index
    %c0_58 = arith.constant 0 : index
    %199 = vector.load %arg22[%c144, %c0_58] : memref<320x128xf32, #tpu.memory_space<vmem>>, vector<16x128xf32>
    %cst_59 = arith.constant dense<0.000000e+00> : vector<16x128xf32>
    %200 = tpu.matmul %195, %7, %cst_59 {dimension_numbers = #tpu.dot_dimension_numbers<[1], [0], [0], [1], [0, 0, 1, 1], [], []>} : vector<16x32xf32>, vector<32x128xf32>, vector<16x128xf32> -> vector<16x128xf32>
    %201 = arith.addf %199, %200 : vector<16x128xf32>
    %202 = arith.negf %201 : vector<16x128xf32>
    %203 = math.exp %202 : vector<16x128xf32>
    %cst_60 = arith.constant 1.000000e+00 : f32
    %204 = vector.broadcast %cst_60 : f32 to vector<16x128xf32>
    %205 = arith.addf %204, %203 : vector<16x128xf32>
    %206 = arith.divf %204, %205 : vector<16x128xf32>
    %207 = math.tanh %201 : vector<16x128xf32>
    %208 = vector.extract_strided_slice %206 {offsets = [0, 0], sizes = [16, 32], strides = [1, 1]} : vector<16x128xf32> to vector<16x32xf32>
    %209 = vector.extract_strided_slice %206 {offsets = [0, 32], sizes = [16, 32], strides = [1, 1]} : vector<16x128xf32> to vector<16x32xf32>
    %210 = vector.extract_strided_slice %207 {offsets = [0, 64], sizes = [16, 32], strides = [1, 1]} : vector<16x128xf32> to vector<16x32xf32>
    %211 = vector.extract_strided_slice %206 {offsets = [0, 96], sizes = [16, 32], strides = [1, 1]} : vector<16x128xf32> to vector<16x32xf32>
    %212 = arith.mulf %209, %193 : vector<16x32xf32>
    %213 = arith.mulf %208, %210 : vector<16x32xf32>
    %214 = arith.addf %212, %213 : vector<16x32xf32>
    %215 = math.tanh %214 : vector<16x32xf32>
    %216 = arith.mulf %211, %215 : vector<16x32xf32>
    %c9 = arith.constant 9 : index
    %c0_61 = arith.constant 0 : index
    %c0_62 = arith.constant 0 : index
    %217 = vector.load %arg23[%c9, %c0_61, %c0_62] : memref<20x16x32xf32, #tpu.memory_space<vmem>>, vector<1x16x32xf32>
    %218 = vector.shape_cast %217 : vector<1x16x32xf32> to vector<16x32xf32>
    %219 = vector.shape_cast %216 : vector<16x32xf32> to vector<1x16x32xf32>
    tpu.vector_store %arg23[%c9, %c0_61, %c0_62], %219 {strides = array<i32>} : memref<20x16x32xf32, #tpu.memory_space<vmem>>, vector<1x16x32xf32>,
    %c160 = arith.constant 160 : index
    %c0_63 = arith.constant 0 : index
    %220 = vector.load %arg22[%c160, %c0_63] : memref<320x128xf32, #tpu.memory_space<vmem>>, vector<16x128xf32>
    %cst_64 = arith.constant dense<0.000000e+00> : vector<16x128xf32>
    %221 = tpu.matmul %216, %7, %cst_64 {dimension_numbers = #tpu.dot_dimension_numbers<[1], [0], [0], [1], [0, 0, 1, 1], [], []>} : vector<16x32xf32>, vector<32x128xf32>, vector<16x128xf32> -> vector<16x128xf32>
    %222 = arith.addf %220, %221 : vector<16x128xf32>
    %223 = arith.negf %222 : vector<16x128xf32>
    %224 = math.exp %223 : vector<16x128xf32>
    %cst_65 = arith.constant 1.000000e+00 : f32
    %225 = vector.broadcast %cst_65 : f32 to vector<16x128xf32>
    %226 = arith.addf %225, %224 : vector<16x128xf32>
    %227 = arith.divf %225, %226 : vector<16x128xf32>
    %228 = math.tanh %222 : vector<16x128xf32>
    %229 = vector.extract_strided_slice %227 {offsets = [0, 0], sizes = [16, 32], strides = [1, 1]} : vector<16x128xf32> to vector<16x32xf32>
    %230 = vector.extract_strided_slice %227 {offsets = [0, 32], sizes = [16, 32], strides = [1, 1]} : vector<16x128xf32> to vector<16x32xf32>
    %231 = vector.extract_strided_slice %228 {offsets = [0, 64], sizes = [16, 32], strides = [1, 1]} : vector<16x128xf32> to vector<16x32xf32>
    %232 = vector.extract_strided_slice %227 {offsets = [0, 96], sizes = [16, 32], strides = [1, 1]} : vector<16x128xf32> to vector<16x32xf32>
    %233 = arith.mulf %230, %214 : vector<16x32xf32>
    %234 = arith.mulf %229, %231 : vector<16x32xf32>
    %235 = arith.addf %233, %234 : vector<16x32xf32>
    %236 = math.tanh %235 : vector<16x32xf32>
    %237 = arith.mulf %232, %236 : vector<16x32xf32>
    %c10 = arith.constant 10 : index
    %c0_66 = arith.constant 0 : index
    %c0_67 = arith.constant 0 : index
    %238 = vector.load %arg23[%c10, %c0_66, %c0_67] : memref<20x16x32xf32, #tpu.memory_space<vmem>>, vector<1x16x32xf32>
    %239 = vector.shape_cast %238 : vector<1x16x32xf32> to vector<16x32xf32>
    %240 = vector.shape_cast %237 : vector<16x32xf32> to vector<1x16x32xf32>
    tpu.vector_store %arg23[%c10, %c0_66, %c0_67], %240 {strides = array<i32>} : memref<20x16x32xf32, #tpu.memory_space<vmem>>, vector<1x16x32xf32>,
    %c176 = arith.constant 176 : index
    %c0_68 = arith.constant 0 : index
    %241 = vector.load %arg22[%c176, %c0_68] : memref<320x128xf32, #tpu.memory_space<vmem>>, vector<16x128xf32>
    %cst_69 = arith.constant dense<0.000000e+00> : vector<16x128xf32>
    %242 = tpu.matmul %237, %7, %cst_69 {dimension_numbers = #tpu.dot_dimension_numbers<[1], [0], [0], [1], [0, 0, 1, 1], [], []>} : vector<16x32xf32>, vector<32x128xf32>, vector<16x128xf32> -> vector<16x128xf32>
    %243 = arith.addf %241, %242 : vector<16x128xf32>
    %244 = arith.negf %243 : vector<16x128xf32>
    %245 = math.exp %244 : vector<16x128xf32>
    %cst_70 = arith.constant 1.000000e+00 : f32
    %246 = vector.broadcast %cst_70 : f32 to vector<16x128xf32>
    %247 = arith.addf %246, %245 : vector<16x128xf32>
    %248 = arith.divf %246, %247 : vector<16x128xf32>
    %249 = math.tanh %243 : vector<16x128xf32>
    %250 = vector.extract_strided_slice %248 {offsets = [0, 0], sizes = [16, 32], strides = [1, 1]} : vector<16x128xf32> to vector<16x32xf32>
    %251 = vector.extract_strided_slice %248 {offsets = [0, 32], sizes = [16, 32], strides = [1, 1]} : vector<16x128xf32> to vector<16x32xf32>
    %252 = vector.extract_strided_slice %249 {offsets = [0, 64], sizes = [16, 32], strides = [1, 1]} : vector<16x128xf32> to vector<16x32xf32>
    %253 = vector.extract_strided_slice %248 {offsets = [0, 96], sizes = [16, 32], strides = [1, 1]} : vector<16x128xf32> to vector<16x32xf32>
    %254 = arith.mulf %251, %235 : vector<16x32xf32>
    %255 = arith.mulf %250, %252 : vector<16x32xf32>
    %256 = arith.addf %254, %255 : vector<16x32xf32>
    %257 = math.tanh %256 : vector<16x32xf32>
    %258 = arith.mulf %253, %257 : vector<16x32xf32>
    %c11 = arith.constant 11 : index
    %c0_71 = arith.constant 0 : index
    %c0_72 = arith.constant 0 : index
    %259 = vector.load %arg23[%c11, %c0_71, %c0_72] : memref<20x16x32xf32, #tpu.memory_space<vmem>>, vector<1x16x32xf32>
    %260 = vector.shape_cast %259 : vector<1x16x32xf32> to vector<16x32xf32>
    %261 = vector.shape_cast %258 : vector<16x32xf32> to vector<1x16x32xf32>
    tpu.vector_store %arg23[%c11, %c0_71, %c0_72], %261 {strides = array<i32>} : memref<20x16x32xf32, #tpu.memory_space<vmem>>, vector<1x16x32xf32>,
    %c192 = arith.constant 192 : index
    %c0_73 = arith.constant 0 : index
    %262 = vector.load %arg22[%c192, %c0_73] : memref<320x128xf32, #tpu.memory_space<vmem>>, vector<16x128xf32>
    %cst_74 = arith.constant dense<0.000000e+00> : vector<16x128xf32>
    %263 = tpu.matmul %258, %7, %cst_74 {dimension_numbers = #tpu.dot_dimension_numbers<[1], [0], [0], [1], [0, 0, 1, 1], [], []>} : vector<16x32xf32>, vector<32x128xf32>, vector<16x128xf32> -> vector<16x128xf32>
    %264 = arith.addf %262, %263 : vector<16x128xf32>
    %265 = arith.negf %264 : vector<16x128xf32>
    %266 = math.exp %265 : vector<16x128xf32>
    %cst_75 = arith.constant 1.000000e+00 : f32
    %267 = vector.broadcast %cst_75 : f32 to vector<16x128xf32>
    %268 = arith.addf %267, %266 : vector<16x128xf32>
    %269 = arith.divf %267, %268 : vector<16x128xf32>
    %270 = math.tanh %264 : vector<16x128xf32>
    %271 = vector.extract_strided_slice %269 {offsets = [0, 0], sizes = [16, 32], strides = [1, 1]} : vector<16x128xf32> to vector<16x32xf32>
    %272 = vector.extract_strided_slice %269 {offsets = [0, 32], sizes = [16, 32], strides = [1, 1]} : vector<16x128xf32> to vector<16x32xf32>
    %273 = vector.extract_strided_slice %270 {offsets = [0, 64], sizes = [16, 32], strides = [1, 1]} : vector<16x128xf32> to vector<16x32xf32>
    %274 = vector.extract_strided_slice %269 {offsets = [0, 96], sizes = [16, 32], strides = [1, 1]} : vector<16x128xf32> to vector<16x32xf32>
    %275 = arith.mulf %272, %256 : vector<16x32xf32>
    %276 = arith.mulf %271, %273 : vector<16x32xf32>
    %277 = arith.addf %275, %276 : vector<16x32xf32>
    %278 = math.tanh %277 : vector<16x32xf32>
    %279 = arith.mulf %274, %278 : vector<16x32xf32>
    %c12 = arith.constant 12 : index
    %c0_76 = arith.constant 0 : index
    %c0_77 = arith.constant 0 : index
    %280 = vector.load %arg23[%c12, %c0_76, %c0_77] : memref<20x16x32xf32, #tpu.memory_space<vmem>>, vector<1x16x32xf32>
    %281 = vector.shape_cast %280 : vector<1x16x32xf32> to vector<16x32xf32>
    %282 = vector.shape_cast %279 : vector<16x32xf32> to vector<1x16x32xf32>
    tpu.vector_store %arg23[%c12, %c0_76, %c0_77], %282 {strides = array<i32>} : memref<20x16x32xf32, #tpu.memory_space<vmem>>, vector<1x16x32xf32>,
    %c208 = arith.constant 208 : index
    %c0_78 = arith.constant 0 : index
    %283 = vector.load %arg22[%c208, %c0_78] : memref<320x128xf32, #tpu.memory_space<vmem>>, vector<16x128xf32>
    %cst_79 = arith.constant dense<0.000000e+00> : vector<16x128xf32>
    %284 = tpu.matmul %279, %7, %cst_79 {dimension_numbers = #tpu.dot_dimension_numbers<[1], [0], [0], [1], [0, 0, 1, 1], [], []>} : vector<16x32xf32>, vector<32x128xf32>, vector<16x128xf32> -> vector<16x128xf32>
    %285 = arith.addf %283, %284 : vector<16x128xf32>
    %286 = arith.negf %285 : vector<16x128xf32>
    %287 = math.exp %286 : vector<16x128xf32>
    %cst_80 = arith.constant 1.000000e+00 : f32
    %288 = vector.broadcast %cst_80 : f32 to vector<16x128xf32>
    %289 = arith.addf %288, %287 : vector<16x128xf32>
    %290 = arith.divf %288, %289 : vector<16x128xf32>
    %291 = math.tanh %285 : vector<16x128xf32>
    %292 = vector.extract_strided_slice %290 {offsets = [0, 0], sizes = [16, 32], strides = [1, 1]} : vector<16x128xf32> to vector<16x32xf32>
    %293 = vector.extract_strided_slice %290 {offsets = [0, 32], sizes = [16, 32], strides = [1, 1]} : vector<16x128xf32> to vector<16x32xf32>
    %294 = vector.extract_strided_slice %291 {offsets = [0, 64], sizes = [16, 32], strides = [1, 1]} : vector<16x128xf32> to vector<16x32xf32>
    %295 = vector.extract_strided_slice %290 {offsets = [0, 96], sizes = [16, 32], strides = [1, 1]} : vector<16x128xf32> to vector<16x32xf32>
    %296 = arith.mulf %293, %277 : vector<16x32xf32>
    %297 = arith.mulf %292, %294 : vector<16x32xf32>
    %298 = arith.addf %296, %297 : vector<16x32xf32>
    %299 = math.tanh %298 : vector<16x32xf32>
    %300 = arith.mulf %295, %299 : vector<16x32xf32>
    %c13 = arith.constant 13 : index
    %c0_81 = arith.constant 0 : index
    %c0_82 = arith.constant 0 : index
    %301 = vector.load %arg23[%c13, %c0_81, %c0_82] : memref<20x16x32xf32, #tpu.memory_space<vmem>>, vector<1x16x32xf32>
    %302 = vector.shape_cast %301 : vector<1x16x32xf32> to vector<16x32xf32>
    %303 = vector.shape_cast %300 : vector<16x32xf32> to vector<1x16x32xf32>
    tpu.vector_store %arg23[%c13, %c0_81, %c0_82], %303 {strides = array<i32>} : memref<20x16x32xf32, #tpu.memory_space<vmem>>, vector<1x16x32xf32>,
    %c224 = arith.constant 224 : index
    %c0_83 = arith.constant 0 : index
    %304 = vector.load %arg22[%c224, %c0_83] : memref<320x128xf32, #tpu.memory_space<vmem>>, vector<16x128xf32>
    %cst_84 = arith.constant dense<0.000000e+00> : vector<16x128xf32>
    %305 = tpu.matmul %300, %7, %cst_84 {dimension_numbers = #tpu.dot_dimension_numbers<[1], [0], [0], [1], [0, 0, 1, 1], [], []>} : vector<16x32xf32>, vector<32x128xf32>, vector<16x128xf32> -> vector<16x128xf32>
    %306 = arith.addf %304, %305 : vector<16x128xf32>
    %307 = arith.negf %306 : vector<16x128xf32>
    %308 = math.exp %307 : vector<16x128xf32>
    %cst_85 = arith.constant 1.000000e+00 : f32
    %309 = vector.broadcast %cst_85 : f32 to vector<16x128xf32>
    %310 = arith.addf %309, %308 : vector<16x128xf32>
    %311 = arith.divf %309, %310 : vector<16x128xf32>
    %312 = math.tanh %306 : vector<16x128xf32>
    %313 = vector.extract_strided_slice %311 {offsets = [0, 0], sizes = [16, 32], strides = [1, 1]} : vector<16x128xf32> to vector<16x32xf32>
    %314 = vector.extract_strided_slice %311 {offsets = [0, 32], sizes = [16, 32], strides = [1, 1]} : vector<16x128xf32> to vector<16x32xf32>
    %315 = vector.extract_strided_slice %312 {offsets = [0, 64], sizes = [16, 32], strides = [1, 1]} : vector<16x128xf32> to vector<16x32xf32>
    %316 = vector.extract_strided_slice %311 {offsets = [0, 96], sizes = [16, 32], strides = [1, 1]} : vector<16x128xf32> to vector<16x32xf32>
    %317 = arith.mulf %314, %298 : vector<16x32xf32>
    %318 = arith.mulf %313, %315 : vector<16x32xf32>
    %319 = arith.addf %317, %318 : vector<16x32xf32>
    %320 = math.tanh %319 : vector<16x32xf32>
    %321 = arith.mulf %316, %320 : vector<16x32xf32>
    %c14 = arith.constant 14 : index
    %c0_86 = arith.constant 0 : index
    %c0_87 = arith.constant 0 : index
    %322 = vector.load %arg23[%c14, %c0_86, %c0_87] : memref<20x16x32xf32, #tpu.memory_space<vmem>>, vector<1x16x32xf32>
    %323 = vector.shape_cast %322 : vector<1x16x32xf32> to vector<16x32xf32>
    %324 = vector.shape_cast %321 : vector<16x32xf32> to vector<1x16x32xf32>
    tpu.vector_store %arg23[%c14, %c0_86, %c0_87], %324 {strides = array<i32>} : memref<20x16x32xf32, #tpu.memory_space<vmem>>, vector<1x16x32xf32>,
    %c240 = arith.constant 240 : index
    %c0_88 = arith.constant 0 : index
    %325 = vector.load %arg22[%c240, %c0_88] : memref<320x128xf32, #tpu.memory_space<vmem>>, vector<16x128xf32>
    %cst_89 = arith.constant dense<0.000000e+00> : vector<16x128xf32>
    %326 = tpu.matmul %321, %7, %cst_89 {dimension_numbers = #tpu.dot_dimension_numbers<[1], [0], [0], [1], [0, 0, 1, 1], [], []>} : vector<16x32xf32>, vector<32x128xf32>, vector<16x128xf32> -> vector<16x128xf32>
    %327 = arith.addf %325, %326 : vector<16x128xf32>
    %328 = arith.negf %327 : vector<16x128xf32>
    %329 = math.exp %328 : vector<16x128xf32>
    %cst_90 = arith.constant 1.000000e+00 : f32
    %330 = vector.broadcast %cst_90 : f32 to vector<16x128xf32>
    %331 = arith.addf %330, %329 : vector<16x128xf32>
    %332 = arith.divf %330, %331 : vector<16x128xf32>
    %333 = math.tanh %327 : vector<16x128xf32>
    %334 = vector.extract_strided_slice %332 {offsets = [0, 0], sizes = [16, 32], strides = [1, 1]} : vector<16x128xf32> to vector<16x32xf32>
    %335 = vector.extract_strided_slice %332 {offsets = [0, 32], sizes = [16, 32], strides = [1, 1]} : vector<16x128xf32> to vector<16x32xf32>
    %336 = vector.extract_strided_slice %333 {offsets = [0, 64], sizes = [16, 32], strides = [1, 1]} : vector<16x128xf32> to vector<16x32xf32>
    %337 = vector.extract_strided_slice %332 {offsets = [0, 96], sizes = [16, 32], strides = [1, 1]} : vector<16x128xf32> to vector<16x32xf32>
    %338 = arith.mulf %335, %319 : vector<16x32xf32>
    %339 = arith.mulf %334, %336 : vector<16x32xf32>
    %340 = arith.addf %338, %339 : vector<16x32xf32>
    %341 = math.tanh %340 : vector<16x32xf32>
    %342 = arith.mulf %337, %341 : vector<16x32xf32>
    %c15 = arith.constant 15 : index
    %c0_91 = arith.constant 0 : index
    %c0_92 = arith.constant 0 : index
    %343 = vector.load %arg23[%c15, %c0_91, %c0_92] : memref<20x16x32xf32, #tpu.memory_space<vmem>>, vector<1x16x32xf32>
    %344 = vector.shape_cast %343 : vector<1x16x32xf32> to vector<16x32xf32>
    %345 = vector.shape_cast %342 : vector<16x32xf32> to vector<1x16x32xf32>
    tpu.vector_store %arg23[%c15, %c0_91, %c0_92], %345 {strides = array<i32>} : memref<20x16x32xf32, #tpu.memory_space<vmem>>, vector<1x16x32xf32>,
    %c256 = arith.constant 256 : index
    %c0_93 = arith.constant 0 : index
    %346 = vector.load %arg22[%c256, %c0_93] : memref<320x128xf32, #tpu.memory_space<vmem>>, vector<16x128xf32>
    %cst_94 = arith.constant dense<0.000000e+00> : vector<16x128xf32>
    %347 = tpu.matmul %342, %7, %cst_94 {dimension_numbers = #tpu.dot_dimension_numbers<[1], [0], [0], [1], [0, 0, 1, 1], [], []>} : vector<16x32xf32>, vector<32x128xf32>, vector<16x128xf32> -> vector<16x128xf32>
    %348 = arith.addf %346, %347 : vector<16x128xf32>
    %349 = arith.negf %348 : vector<16x128xf32>
    %350 = math.exp %349 : vector<16x128xf32>
    %cst_95 = arith.constant 1.000000e+00 : f32
    %351 = vector.broadcast %cst_95 : f32 to vector<16x128xf32>
    %352 = arith.addf %351, %350 : vector<16x128xf32>
    %353 = arith.divf %351, %352 : vector<16x128xf32>
    %354 = math.tanh %348 : vector<16x128xf32>
    %355 = vector.extract_strided_slice %353 {offsets = [0, 0], sizes = [16, 32], strides = [1, 1]} : vector<16x128xf32> to vector<16x32xf32>
    %356 = vector.extract_strided_slice %353 {offsets = [0, 32], sizes = [16, 32], strides = [1, 1]} : vector<16x128xf32> to vector<16x32xf32>
    %357 = vector.extract_strided_slice %354 {offsets = [0, 64], sizes = [16, 32], strides = [1, 1]} : vector<16x128xf32> to vector<16x32xf32>
    %358 = vector.extract_strided_slice %353 {offsets = [0, 96], sizes = [16, 32], strides = [1, 1]} : vector<16x128xf32> to vector<16x32xf32>
    %359 = arith.mulf %356, %340 : vector<16x32xf32>
    %360 = arith.mulf %355, %357 : vector<16x32xf32>
    %361 = arith.addf %359, %360 : vector<16x32xf32>
    %362 = math.tanh %361 : vector<16x32xf32>
    %363 = arith.mulf %358, %362 : vector<16x32xf32>
    %c16_96 = arith.constant 16 : index
    %c0_97 = arith.constant 0 : index
    %c0_98 = arith.constant 0 : index
    %364 = vector.load %arg23[%c16_96, %c0_97, %c0_98] : memref<20x16x32xf32, #tpu.memory_space<vmem>>, vector<1x16x32xf32>
    %365 = vector.shape_cast %364 : vector<1x16x32xf32> to vector<16x32xf32>
    %366 = vector.shape_cast %363 : vector<16x32xf32> to vector<1x16x32xf32>
    tpu.vector_store %arg23[%c16_96, %c0_97, %c0_98], %366 {strides = array<i32>} : memref<20x16x32xf32, #tpu.memory_space<vmem>>, vector<1x16x32xf32>,
    %c272 = arith.constant 272 : index
    %c0_99 = arith.constant 0 : index
    %367 = vector.load %arg22[%c272, %c0_99] : memref<320x128xf32, #tpu.memory_space<vmem>>, vector<16x128xf32>
    %cst_100 = arith.constant dense<0.000000e+00> : vector<16x128xf32>
    %368 = tpu.matmul %363, %7, %cst_100 {dimension_numbers = #tpu.dot_dimension_numbers<[1], [0], [0], [1], [0, 0, 1, 1], [], []>} : vector<16x32xf32>, vector<32x128xf32>, vector<16x128xf32> -> vector<16x128xf32>
    %369 = arith.addf %367, %368 : vector<16x128xf32>
    %370 = arith.negf %369 : vector<16x128xf32>
    %371 = math.exp %370 : vector<16x128xf32>
    %cst_101 = arith.constant 1.000000e+00 : f32
    %372 = vector.broadcast %cst_101 : f32 to vector<16x128xf32>
    %373 = arith.addf %372, %371 : vector<16x128xf32>
    %374 = arith.divf %372, %373 : vector<16x128xf32>
    %375 = math.tanh %369 : vector<16x128xf32>
    %376 = vector.extract_strided_slice %374 {offsets = [0, 0], sizes = [16, 32], strides = [1, 1]} : vector<16x128xf32> to vector<16x32xf32>
    %377 = vector.extract_strided_slice %374 {offsets = [0, 32], sizes = [16, 32], strides = [1, 1]} : vector<16x128xf32> to vector<16x32xf32>
    %378 = vector.extract_strided_slice %375 {offsets = [0, 64], sizes = [16, 32], strides = [1, 1]} : vector<16x128xf32> to vector<16x32xf32>
    %379 = vector.extract_strided_slice %374 {offsets = [0, 96], sizes = [16, 32], strides = [1, 1]} : vector<16x128xf32> to vector<16x32xf32>
    %380 = arith.mulf %377, %361 : vector<16x32xf32>
    %381 = arith.mulf %376, %378 : vector<16x32xf32>
    %382 = arith.addf %380, %381 : vector<16x32xf32>
    %383 = math.tanh %382 : vector<16x32xf32>
    %384 = arith.mulf %379, %383 : vector<16x32xf32>
    %c17 = arith.constant 17 : index
    %c0_102 = arith.constant 0 : index
    %c0_103 = arith.constant 0 : index
    %385 = vector.load %arg23[%c17, %c0_102, %c0_103] : memref<20x16x32xf32, #tpu.memory_space<vmem>>, vector<1x16x32xf32>
    %386 = vector.shape_cast %385 : vector<1x16x32xf32> to vector<16x32xf32>
    %387 = vector.shape_cast %384 : vector<16x32xf32> to vector<1x16x32xf32>
    tpu.vector_store %arg23[%c17, %c0_102, %c0_103], %387 {strides = array<i32>} : memref<20x16x32xf32, #tpu.memory_space<vmem>>, vector<1x16x32xf32>,
    %c288 = arith.constant 288 : index
    %c0_104 = arith.constant 0 : index
    %388 = vector.load %arg22[%c288, %c0_104] : memref<320x128xf32, #tpu.memory_space<vmem>>, vector<16x128xf32>
    %cst_105 = arith.constant dense<0.000000e+00> : vector<16x128xf32>
    %389 = tpu.matmul %384, %7, %cst_105 {dimension_numbers = #tpu.dot_dimension_numbers<[1], [0], [0], [1], [0, 0, 1, 1], [], []>} : vector<16x32xf32>, vector<32x128xf32>, vector<16x128xf32> -> vector<16x128xf32>
    %390 = arith.addf %388, %389 : vector<16x128xf32>
    %391 = arith.negf %390 : vector<16x128xf32>
    %392 = math.exp %391 : vector<16x128xf32>
    %cst_106 = arith.constant 1.000000e+00 : f32
    %393 = vector.broadcast %cst_106 : f32 to vector<16x128xf32>
    %394 = arith.addf %393, %392 : vector<16x128xf32>
    %395 = arith.divf %393, %394 : vector<16x128xf32>
    %396 = math.tanh %390 : vector<16x128xf32>
    %397 = vector.extract_strided_slice %395 {offsets = [0, 0], sizes = [16, 32], strides = [1, 1]} : vector<16x128xf32> to vector<16x32xf32>
    %398 = vector.extract_strided_slice %395 {offsets = [0, 32], sizes = [16, 32], strides = [1, 1]} : vector<16x128xf32> to vector<16x32xf32>
    %399 = vector.extract_strided_slice %396 {offsets = [0, 64], sizes = [16, 32], strides = [1, 1]} : vector<16x128xf32> to vector<16x32xf32>
    %400 = vector.extract_strided_slice %395 {offsets = [0, 96], sizes = [16, 32], strides = [1, 1]} : vector<16x128xf32> to vector<16x32xf32>
    %401 = arith.mulf %398, %382 : vector<16x32xf32>
    %402 = arith.mulf %397, %399 : vector<16x32xf32>
    %403 = arith.addf %401, %402 : vector<16x32xf32>
    %404 = math.tanh %403 : vector<16x32xf32>
    %405 = arith.mulf %400, %404 : vector<16x32xf32>
    %c18 = arith.constant 18 : index
    %c0_107 = arith.constant 0 : index
    %c0_108 = arith.constant 0 : index
    %406 = vector.load %arg23[%c18, %c0_107, %c0_108] : memref<20x16x32xf32, #tpu.memory_space<vmem>>, vector<1x16x32xf32>
    %407 = vector.shape_cast %406 : vector<1x16x32xf32> to vector<16x32xf32>
    %408 = vector.shape_cast %405 : vector<16x32xf32> to vector<1x16x32xf32>
    tpu.vector_store %arg23[%c18, %c0_107, %c0_108], %408 {strides = array<i32>} : memref<20x16x32xf32, #tpu.memory_space<vmem>>, vector<1x16x32xf32>,
    %c304 = arith.constant 304 : index
    %c0_109 = arith.constant 0 : index
    %409 = vector.load %arg22[%c304, %c0_109] : memref<320x128xf32, #tpu.memory_space<vmem>>, vector<16x128xf32>
    %cst_110 = arith.constant dense<0.000000e+00> : vector<16x128xf32>
    %410 = tpu.matmul %405, %7, %cst_110 {dimension_numbers = #tpu.dot_dimension_numbers<[1], [0], [0], [1], [0, 0, 1, 1], [], []>} : vector<16x32xf32>, vector<32x128xf32>, vector<16x128xf32> -> vector<16x128xf32>
    %411 = arith.addf %409, %410 : vector<16x128xf32>
    %412 = arith.negf %411 : vector<16x128xf32>
    %413 = math.exp %412 : vector<16x128xf32>
    %cst_111 = arith.constant 1.000000e+00 : f32
    %414 = vector.broadcast %cst_111 : f32 to vector<16x128xf32>
    %415 = arith.addf %414, %413 : vector<16x128xf32>
    %416 = arith.divf %414, %415 : vector<16x128xf32>
    %417 = math.tanh %411 : vector<16x128xf32>
    %418 = vector.extract_strided_slice %416 {offsets = [0, 0], sizes = [16, 32], strides = [1, 1]} : vector<16x128xf32> to vector<16x32xf32>
    %419 = vector.extract_strided_slice %416 {offsets = [0, 32], sizes = [16, 32], strides = [1, 1]} : vector<16x128xf32> to vector<16x32xf32>
    %420 = vector.extract_strided_slice %417 {offsets = [0, 64], sizes = [16, 32], strides = [1, 1]} : vector<16x128xf32> to vector<16x32xf32>
    %421 = vector.extract_strided_slice %416 {offsets = [0, 96], sizes = [16, 32], strides = [1, 1]} : vector<16x128xf32> to vector<16x32xf32>
    %422 = arith.mulf %419, %403 : vector<16x32xf32>
    %423 = arith.mulf %418, %420 : vector<16x32xf32>
    %424 = arith.addf %422, %423 : vector<16x32xf32>
    %425 = math.tanh %424 : vector<16x32xf32>
    %426 = arith.mulf %421, %425 : vector<16x32xf32>
    %c19 = arith.constant 19 : index
    %c0_112 = arith.constant 0 : index
    %c0_113 = arith.constant 0 : index
    %427 = vector.load %arg23[%c19, %c0_112, %c0_113] : memref<20x16x32xf32, #tpu.memory_space<vmem>>, vector<1x16x32xf32>
    %428 = vector.shape_cast %427 : vector<1x16x32xf32> to vector<16x32xf32>
    %429 = vector.shape_cast %426 : vector<16x32xf32> to vector<1x16x32xf32>
    tpu.vector_store %arg23[%c19, %c0_112, %c0_113], %429 {strides = array<i32>} : memref<20x16x32xf32, #tpu.memory_space<vmem>>, vector<1x16x32xf32>,
    %c0_114 = arith.constant 0 : index
    %c0_115 = arith.constant 0 : index
    %430 = vector.load %arg4[%c0_114, %c0_115] : memref<32x64xf32, #tpu.memory_space<vmem>>, vector<32x64xf32>
    %c0_116 = arith.constant 0 : index
    %c0_117 = arith.constant 0 : index
    %431 = vector.load %arg5[%c0_116, %c0_117] : memref<32x64xf32, #tpu.memory_space<vmem>>, vector<32x64xf32>
    %c0_118 = arith.constant 0 : index
    %c0_119 = arith.constant 0 : index
    %432 = vector.load %arg6[%c0_118, %c0_119] : memref<1x64xf32, #tpu.memory_space<vmem>>, vector<1x64xf32>
    %c0_120 = arith.constant 0 : index
    %c0_121 = arith.constant 0 : index
    %433 = vector.load %arg7[%c0_120, %c0_121] : memref<1x64xf32, #tpu.memory_space<vmem>>, vector<1x64xf32>
    %c0_122 = arith.constant 0 : index
    %c0_123 = arith.constant 0 : index
    %434 = vector.load %arg8[%c0_122, %c0_123] : memref<1x1xf32, #tpu.memory_space<vmem>>, vector<1x1xf32>
    %cst_124 = arith.constant dense<0.000000e+00> : vector<16x64xf32>
    %435 = tpu.matmul %426, %431, %cst_124 {dimension_numbers = #tpu.dot_dimension_numbers<[1], [0], [0], [1], [0, 0, 1, 1], [], []>} : vector<16x32xf32>, vector<32x64xf32>, vector<16x64xf32> -> vector<16x64xf32>
    %436 = vector.broadcast %432 : vector<1x64xf32> to vector<16x64xf32>
    %437 = arith.addf %435, %436 : vector<16x64xf32>
    %cst_125 = arith.constant 0xFF800000 : f32
    %438 = vector.broadcast %cst_125 : f32 to vector<16x1xf32>
    %c0_126 = arith.constant 0 : index
    %c0_127 = arith.constant 0 : index
    %c0_128 = arith.constant 0 : index
    %439 = vector.load %arg23[%c0_126, %c0_127, %c0_128] : memref<20x16x32xf32, #tpu.memory_space<vmem>>, vector<1x16x32xf32>
    %440 = vector.shape_cast %439 : vector<1x16x32xf32> to vector<16x32xf32>
    %cst_129 = arith.constant dense<0.000000e+00> : vector<16x64xf32>
    %441 = tpu.matmul %440, %430, %cst_129 {dimension_numbers = #tpu.dot_dimension_numbers<[1], [0], [0], [1], [0, 0, 1, 1], [], []>} : vector<16x32xf32>, vector<32x64xf32>, vector<16x64xf32> -> vector<16x64xf32>
    %442 = arith.addf %441, %437 : vector<16x64xf32>
    %cst_130 = arith.constant 0.000000e+00 : f32
    %443 = vector.broadcast %cst_130 : f32 to vector<16x64xf32>
    %444 = arith.maximumf %442, %443 : vector<16x64xf32>
    %445 = vector.broadcast %433 : vector<1x64xf32> to vector<16x64xf32>
    %446 = arith.mulf %444, %445 : vector<16x64xf32>
    %cst_131 = arith.constant dense<0.000000e+00> : vector<16xf32>
    %447 = vector.multi_reduction <add>, %446, %cst_131 [1] : vector<16x64xf32> to vector<16xf32>
    %448 = vector.shape_cast %447 : vector<16xf32> to vector<16x1xf32>
    %449 = vector.broadcast %434 : vector<1x1xf32> to vector<16x1xf32>
    %450 = arith.addf %448, %449 : vector<16x1xf32>
    %451 = arith.maximumf %438, %450 : vector<16x1xf32>
    %c1_132 = arith.constant 1 : index
    %c0_133 = arith.constant 0 : index
    %c0_134 = arith.constant 0 : index
    %452 = vector.load %arg23[%c1_132, %c0_133, %c0_134] : memref<20x16x32xf32, #tpu.memory_space<vmem>>, vector<1x16x32xf32>
    %453 = vector.shape_cast %452 : vector<1x16x32xf32> to vector<16x32xf32>
    %cst_135 = arith.constant dense<0.000000e+00> : vector<16x64xf32>
    %454 = tpu.matmul %453, %430, %cst_135 {dimension_numbers = #tpu.dot_dimension_numbers<[1], [0], [0], [1], [0, 0, 1, 1], [], []>} : vector<16x32xf32>, vector<32x64xf32>, vector<16x64xf32> -> vector<16x64xf32>
    %455 = arith.addf %454, %437 : vector<16x64xf32>
    %cst_136 = arith.constant 0.000000e+00 : f32
    %456 = vector.broadcast %cst_136 : f32 to vector<16x64xf32>
    %457 = arith.maximumf %455, %456 : vector<16x64xf32>
    %458 = vector.broadcast %433 : vector<1x64xf32> to vector<16x64xf32>
    %459 = arith.mulf %457, %458 : vector<16x64xf32>
    %cst_137 = arith.constant dense<0.000000e+00> : vector<16xf32>
    %460 = vector.multi_reduction <add>, %459, %cst_137 [1] : vector<16x64xf32> to vector<16xf32>
    %461 = vector.shape_cast %460 : vector<16xf32> to vector<16x1xf32>
    %462 = vector.broadcast %434 : vector<1x1xf32> to vector<16x1xf32>
    %463 = arith.addf %461, %462 : vector<16x1xf32>
    %464 = arith.maximumf %451, %463 : vector<16x1xf32>
    %c2_138 = arith.constant 2 : index
    %c0_139 = arith.constant 0 : index
    %c0_140 = arith.constant 0 : index
    %465 = vector.load %arg23[%c2_138, %c0_139, %c0_140] : memref<20x16x32xf32, #tpu.memory_space<vmem>>, vector<1x16x32xf32>
    %466 = vector.shape_cast %465 : vector<1x16x32xf32> to vector<16x32xf32>
    %cst_141 = arith.constant dense<0.000000e+00> : vector<16x64xf32>
    %467 = tpu.matmul %466, %430, %cst_141 {dimension_numbers = #tpu.dot_dimension_numbers<[1], [0], [0], [1], [0, 0, 1, 1], [], []>} : vector<16x32xf32>, vector<32x64xf32>, vector<16x64xf32> -> vector<16x64xf32>
    %468 = arith.addf %467, %437 : vector<16x64xf32>
    %cst_142 = arith.constant 0.000000e+00 : f32
    %469 = vector.broadcast %cst_142 : f32 to vector<16x64xf32>
    %470 = arith.maximumf %468, %469 : vector<16x64xf32>
    %471 = vector.broadcast %433 : vector<1x64xf32> to vector<16x64xf32>
    %472 = arith.mulf %470, %471 : vector<16x64xf32>
    %cst_143 = arith.constant dense<0.000000e+00> : vector<16xf32>
    %473 = vector.multi_reduction <add>, %472, %cst_143 [1] : vector<16x64xf32> to vector<16xf32>
    %474 = vector.shape_cast %473 : vector<16xf32> to vector<16x1xf32>
    %475 = vector.broadcast %434 : vector<1x1xf32> to vector<16x1xf32>
    %476 = arith.addf %474, %475 : vector<16x1xf32>
    %477 = arith.maximumf %464, %476 : vector<16x1xf32>
    %c3_144 = arith.constant 3 : index
    %c0_145 = arith.constant 0 : index
    %c0_146 = arith.constant 0 : index
    %478 = vector.load %arg23[%c3_144, %c0_145, %c0_146] : memref<20x16x32xf32, #tpu.memory_space<vmem>>, vector<1x16x32xf32>
    %479 = vector.shape_cast %478 : vector<1x16x32xf32> to vector<16x32xf32>
    %cst_147 = arith.constant dense<0.000000e+00> : vector<16x64xf32>
    %480 = tpu.matmul %479, %430, %cst_147 {dimension_numbers = #tpu.dot_dimension_numbers<[1], [0], [0], [1], [0, 0, 1, 1], [], []>} : vector<16x32xf32>, vector<32x64xf32>, vector<16x64xf32> -> vector<16x64xf32>
    %481 = arith.addf %480, %437 : vector<16x64xf32>
    %cst_148 = arith.constant 0.000000e+00 : f32
    %482 = vector.broadcast %cst_148 : f32 to vector<16x64xf32>
    %483 = arith.maximumf %481, %482 : vector<16x64xf32>
    %484 = vector.broadcast %433 : vector<1x64xf32> to vector<16x64xf32>
    %485 = arith.mulf %483, %484 : vector<16x64xf32>
    %cst_149 = arith.constant dense<0.000000e+00> : vector<16xf32>
    %486 = vector.multi_reduction <add>, %485, %cst_149 [1] : vector<16x64xf32> to vector<16xf32>
    %487 = vector.shape_cast %486 : vector<16xf32> to vector<16x1xf32>
    %488 = vector.broadcast %434 : vector<1x1xf32> to vector<16x1xf32>
    %489 = arith.addf %487, %488 : vector<16x1xf32>
    %490 = arith.maximumf %477, %489 : vector<16x1xf32>
    %c4_150 = arith.constant 4 : index
    %c0_151 = arith.constant 0 : index
    %c0_152 = arith.constant 0 : index
    %491 = vector.load %arg23[%c4_150, %c0_151, %c0_152] : memref<20x16x32xf32, #tpu.memory_space<vmem>>, vector<1x16x32xf32>
    %492 = vector.shape_cast %491 : vector<1x16x32xf32> to vector<16x32xf32>
    %cst_153 = arith.constant dense<0.000000e+00> : vector<16x64xf32>
    %493 = tpu.matmul %492, %430, %cst_153 {dimension_numbers = #tpu.dot_dimension_numbers<[1], [0], [0], [1], [0, 0, 1, 1], [], []>} : vector<16x32xf32>, vector<32x64xf32>, vector<16x64xf32> -> vector<16x64xf32>
    %494 = arith.addf %493, %437 : vector<16x64xf32>
    %cst_154 = arith.constant 0.000000e+00 : f32
    %495 = vector.broadcast %cst_154 : f32 to vector<16x64xf32>
    %496 = arith.maximumf %494, %495 : vector<16x64xf32>
    %497 = vector.broadcast %433 : vector<1x64xf32> to vector<16x64xf32>
    %498 = arith.mulf %496, %497 : vector<16x64xf32>
    %cst_155 = arith.constant dense<0.000000e+00> : vector<16xf32>
    %499 = vector.multi_reduction <add>, %498, %cst_155 [1] : vector<16x64xf32> to vector<16xf32>
    %500 = vector.shape_cast %499 : vector<16xf32> to vector<16x1xf32>
    %501 = vector.broadcast %434 : vector<1x1xf32> to vector<16x1xf32>
    %502 = arith.addf %500, %501 : vector<16x1xf32>
    %503 = arith.maximumf %490, %502 : vector<16x1xf32>
    %c5_156 = arith.constant 5 : index
    %c0_157 = arith.constant 0 : index
    %c0_158 = arith.constant 0 : index
    %504 = vector.load %arg23[%c5_156, %c0_157, %c0_158] : memref<20x16x32xf32, #tpu.memory_space<vmem>>, vector<1x16x32xf32>
    %505 = vector.shape_cast %504 : vector<1x16x32xf32> to vector<16x32xf32>
    %cst_159 = arith.constant dense<0.000000e+00> : vector<16x64xf32>
    %506 = tpu.matmul %505, %430, %cst_159 {dimension_numbers = #tpu.dot_dimension_numbers<[1], [0], [0], [1], [0, 0, 1, 1], [], []>} : vector<16x32xf32>, vector<32x64xf32>, vector<16x64xf32> -> vector<16x64xf32>
    %507 = arith.addf %506, %437 : vector<16x64xf32>
    %cst_160 = arith.constant 0.000000e+00 : f32
    %508 = vector.broadcast %cst_160 : f32 to vector<16x64xf32>
    %509 = arith.maximumf %507, %508 : vector<16x64xf32>
    %510 = vector.broadcast %433 : vector<1x64xf32> to vector<16x64xf32>
    %511 = arith.mulf %509, %510 : vector<16x64xf32>
    %cst_161 = arith.constant dense<0.000000e+00> : vector<16xf32>
    %512 = vector.multi_reduction <add>, %511, %cst_161 [1] : vector<16x64xf32> to vector<16xf32>
    %513 = vector.shape_cast %512 : vector<16xf32> to vector<16x1xf32>
    %514 = vector.broadcast %434 : vector<1x1xf32> to vector<16x1xf32>
    %515 = arith.addf %513, %514 : vector<16x1xf32>
    %516 = arith.maximumf %503, %515 : vector<16x1xf32>
    %c6_162 = arith.constant 6 : index
    %c0_163 = arith.constant 0 : index
    %c0_164 = arith.constant 0 : index
    %517 = vector.load %arg23[%c6_162, %c0_163, %c0_164] : memref<20x16x32xf32, #tpu.memory_space<vmem>>, vector<1x16x32xf32>
    %518 = vector.shape_cast %517 : vector<1x16x32xf32> to vector<16x32xf32>
    %cst_165 = arith.constant dense<0.000000e+00> : vector<16x64xf32>
    %519 = tpu.matmul %518, %430, %cst_165 {dimension_numbers = #tpu.dot_dimension_numbers<[1], [0], [0], [1], [0, 0, 1, 1], [], []>} : vector<16x32xf32>, vector<32x64xf32>, vector<16x64xf32> -> vector<16x64xf32>
    %520 = arith.addf %519, %437 : vector<16x64xf32>
    %cst_166 = arith.constant 0.000000e+00 : f32
    %521 = vector.broadcast %cst_166 : f32 to vector<16x64xf32>
    %522 = arith.maximumf %520, %521 : vector<16x64xf32>
    %523 = vector.broadcast %433 : vector<1x64xf32> to vector<16x64xf32>
    %524 = arith.mulf %522, %523 : vector<16x64xf32>
    %cst_167 = arith.constant dense<0.000000e+00> : vector<16xf32>
    %525 = vector.multi_reduction <add>, %524, %cst_167 [1] : vector<16x64xf32> to vector<16xf32>
    %526 = vector.shape_cast %525 : vector<16xf32> to vector<16x1xf32>
    %527 = vector.broadcast %434 : vector<1x1xf32> to vector<16x1xf32>
    %528 = arith.addf %526, %527 : vector<16x1xf32>
    %529 = arith.maximumf %516, %528 : vector<16x1xf32>
    %c7_168 = arith.constant 7 : index
    %c0_169 = arith.constant 0 : index
    %c0_170 = arith.constant 0 : index
    %530 = vector.load %arg23[%c7_168, %c0_169, %c0_170] : memref<20x16x32xf32, #tpu.memory_space<vmem>>, vector<1x16x32xf32>
    %531 = vector.shape_cast %530 : vector<1x16x32xf32> to vector<16x32xf32>
    %cst_171 = arith.constant dense<0.000000e+00> : vector<16x64xf32>
    %532 = tpu.matmul %531, %430, %cst_171 {dimension_numbers = #tpu.dot_dimension_numbers<[1], [0], [0], [1], [0, 0, 1, 1], [], []>} : vector<16x32xf32>, vector<32x64xf32>, vector<16x64xf32> -> vector<16x64xf32>
    %533 = arith.addf %532, %437 : vector<16x64xf32>
    %cst_172 = arith.constant 0.000000e+00 : f32
    %534 = vector.broadcast %cst_172 : f32 to vector<16x64xf32>
    %535 = arith.maximumf %533, %534 : vector<16x64xf32>
    %536 = vector.broadcast %433 : vector<1x64xf32> to vector<16x64xf32>
    %537 = arith.mulf %535, %536 : vector<16x64xf32>
    %cst_173 = arith.constant dense<0.000000e+00> : vector<16xf32>
    %538 = vector.multi_reduction <add>, %537, %cst_173 [1] : vector<16x64xf32> to vector<16xf32>
    %539 = vector.shape_cast %538 : vector<16xf32> to vector<16x1xf32>
    %540 = vector.broadcast %434 : vector<1x1xf32> to vector<16x1xf32>
    %541 = arith.addf %539, %540 : vector<16x1xf32>
    %542 = arith.maximumf %529, %541 : vector<16x1xf32>
    %c8_174 = arith.constant 8 : index
    %c0_175 = arith.constant 0 : index
    %c0_176 = arith.constant 0 : index
    %543 = vector.load %arg23[%c8_174, %c0_175, %c0_176] : memref<20x16x32xf32, #tpu.memory_space<vmem>>, vector<1x16x32xf32>
    %544 = vector.shape_cast %543 : vector<1x16x32xf32> to vector<16x32xf32>
    %cst_177 = arith.constant dense<0.000000e+00> : vector<16x64xf32>
    %545 = tpu.matmul %544, %430, %cst_177 {dimension_numbers = #tpu.dot_dimension_numbers<[1], [0], [0], [1], [0, 0, 1, 1], [], []>} : vector<16x32xf32>, vector<32x64xf32>, vector<16x64xf32> -> vector<16x64xf32>
    %546 = arith.addf %545, %437 : vector<16x64xf32>
    %cst_178 = arith.constant 0.000000e+00 : f32
    %547 = vector.broadcast %cst_178 : f32 to vector<16x64xf32>
    %548 = arith.maximumf %546, %547 : vector<16x64xf32>
    %549 = vector.broadcast %433 : vector<1x64xf32> to vector<16x64xf32>
    %550 = arith.mulf %548, %549 : vector<16x64xf32>
    %cst_179 = arith.constant dense<0.000000e+00> : vector<16xf32>
    %551 = vector.multi_reduction <add>, %550, %cst_179 [1] : vector<16x64xf32> to vector<16xf32>
    %552 = vector.shape_cast %551 : vector<16xf32> to vector<16x1xf32>
    %553 = vector.broadcast %434 : vector<1x1xf32> to vector<16x1xf32>
    %554 = arith.addf %552, %553 : vector<16x1xf32>
    %555 = arith.maximumf %542, %554 : vector<16x1xf32>
    %c9_180 = arith.constant 9 : index
    %c0_181 = arith.constant 0 : index
    %c0_182 = arith.constant 0 : index
    %556 = vector.load %arg23[%c9_180, %c0_181, %c0_182] : memref<20x16x32xf32, #tpu.memory_space<vmem>>, vector<1x16x32xf32>
    %557 = vector.shape_cast %556 : vector<1x16x32xf32> to vector<16x32xf32>
    %cst_183 = arith.constant dense<0.000000e+00> : vector<16x64xf32>
    %558 = tpu.matmul %557, %430, %cst_183 {dimension_numbers = #tpu.dot_dimension_numbers<[1], [0], [0], [1], [0, 0, 1, 1], [], []>} : vector<16x32xf32>, vector<32x64xf32>, vector<16x64xf32> -> vector<16x64xf32>
    %559 = arith.addf %558, %437 : vector<16x64xf32>
    %cst_184 = arith.constant 0.000000e+00 : f32
    %560 = vector.broadcast %cst_184 : f32 to vector<16x64xf32>
    %561 = arith.maximumf %559, %560 : vector<16x64xf32>
    %562 = vector.broadcast %433 : vector<1x64xf32> to vector<16x64xf32>
    %563 = arith.mulf %561, %562 : vector<16x64xf32>
    %cst_185 = arith.constant dense<0.000000e+00> : vector<16xf32>
    %564 = vector.multi_reduction <add>, %563, %cst_185 [1] : vector<16x64xf32> to vector<16xf32>
    %565 = vector.shape_cast %564 : vector<16xf32> to vector<16x1xf32>
    %566 = vector.broadcast %434 : vector<1x1xf32> to vector<16x1xf32>
    %567 = arith.addf %565, %566 : vector<16x1xf32>
    %568 = arith.maximumf %555, %567 : vector<16x1xf32>
    %c10_186 = arith.constant 10 : index
    %c0_187 = arith.constant 0 : index
    %c0_188 = arith.constant 0 : index
    %569 = vector.load %arg23[%c10_186, %c0_187, %c0_188] : memref<20x16x32xf32, #tpu.memory_space<vmem>>, vector<1x16x32xf32>
    %570 = vector.shape_cast %569 : vector<1x16x32xf32> to vector<16x32xf32>
    %cst_189 = arith.constant dense<0.000000e+00> : vector<16x64xf32>
    %571 = tpu.matmul %570, %430, %cst_189 {dimension_numbers = #tpu.dot_dimension_numbers<[1], [0], [0], [1], [0, 0, 1, 1], [], []>} : vector<16x32xf32>, vector<32x64xf32>, vector<16x64xf32> -> vector<16x64xf32>
    %572 = arith.addf %571, %437 : vector<16x64xf32>
    %cst_190 = arith.constant 0.000000e+00 : f32
    %573 = vector.broadcast %cst_190 : f32 to vector<16x64xf32>
    %574 = arith.maximumf %572, %573 : vector<16x64xf32>
    %575 = vector.broadcast %433 : vector<1x64xf32> to vector<16x64xf32>
    %576 = arith.mulf %574, %575 : vector<16x64xf32>
    %cst_191 = arith.constant dense<0.000000e+00> : vector<16xf32>
    %577 = vector.multi_reduction <add>, %576, %cst_191 [1] : vector<16x64xf32> to vector<16xf32>
    %578 = vector.shape_cast %577 : vector<16xf32> to vector<16x1xf32>
    %579 = vector.broadcast %434 : vector<1x1xf32> to vector<16x1xf32>
    %580 = arith.addf %578, %579 : vector<16x1xf32>
    %581 = arith.maximumf %568, %580 : vector<16x1xf32>
    %c11_192 = arith.constant 11 : index
    %c0_193 = arith.constant 0 : index
    %c0_194 = arith.constant 0 : index
    %582 = vector.load %arg23[%c11_192, %c0_193, %c0_194] : memref<20x16x32xf32, #tpu.memory_space<vmem>>, vector<1x16x32xf32>
    %583 = vector.shape_cast %582 : vector<1x16x32xf32> to vector<16x32xf32>
    %cst_195 = arith.constant dense<0.000000e+00> : vector<16x64xf32>
    %584 = tpu.matmul %583, %430, %cst_195 {dimension_numbers = #tpu.dot_dimension_numbers<[1], [0], [0], [1], [0, 0, 1, 1], [], []>} : vector<16x32xf32>, vector<32x64xf32>, vector<16x64xf32> -> vector<16x64xf32>
    %585 = arith.addf %584, %437 : vector<16x64xf32>
    %cst_196 = arith.constant 0.000000e+00 : f32
    %586 = vector.broadcast %cst_196 : f32 to vector<16x64xf32>
    %587 = arith.maximumf %585, %586 : vector<16x64xf32>
    %588 = vector.broadcast %433 : vector<1x64xf32> to vector<16x64xf32>
    %589 = arith.mulf %587, %588 : vector<16x64xf32>
    %cst_197 = arith.constant dense<0.000000e+00> : vector<16xf32>
    %590 = vector.multi_reduction <add>, %589, %cst_197 [1] : vector<16x64xf32> to vector<16xf32>
    %591 = vector.shape_cast %590 : vector<16xf32> to vector<16x1xf32>
    %592 = vector.broadcast %434 : vector<1x1xf32> to vector<16x1xf32>
    %593 = arith.addf %591, %592 : vector<16x1xf32>
    %594 = arith.maximumf %581, %593 : vector<16x1xf32>
    %c12_198 = arith.constant 12 : index
    %c0_199 = arith.constant 0 : index
    %c0_200 = arith.constant 0 : index
    %595 = vector.load %arg23[%c12_198, %c0_199, %c0_200] : memref<20x16x32xf32, #tpu.memory_space<vmem>>, vector<1x16x32xf32>
    %596 = vector.shape_cast %595 : vector<1x16x32xf32> to vector<16x32xf32>
    %cst_201 = arith.constant dense<0.000000e+00> : vector<16x64xf32>
    %597 = tpu.matmul %596, %430, %cst_201 {dimension_numbers = #tpu.dot_dimension_numbers<[1], [0], [0], [1], [0, 0, 1, 1], [], []>} : vector<16x32xf32>, vector<32x64xf32>, vector<16x64xf32> -> vector<16x64xf32>
    %598 = arith.addf %597, %437 : vector<16x64xf32>
    %cst_202 = arith.constant 0.000000e+00 : f32
    %599 = vector.broadcast %cst_202 : f32 to vector<16x64xf32>
    %600 = arith.maximumf %598, %599 : vector<16x64xf32>
    %601 = vector.broadcast %433 : vector<1x64xf32> to vector<16x64xf32>
    %602 = arith.mulf %600, %601 : vector<16x64xf32>
    %cst_203 = arith.constant dense<0.000000e+00> : vector<16xf32>
    %603 = vector.multi_reduction <add>, %602, %cst_203 [1] : vector<16x64xf32> to vector<16xf32>
    %604 = vector.shape_cast %603 : vector<16xf32> to vector<16x1xf32>
    %605 = vector.broadcast %434 : vector<1x1xf32> to vector<16x1xf32>
    %606 = arith.addf %604, %605 : vector<16x1xf32>
    %607 = arith.maximumf %594, %606 : vector<16x1xf32>
    %c13_204 = arith.constant 13 : index
    %c0_205 = arith.constant 0 : index
    %c0_206 = arith.constant 0 : index
    %608 = vector.load %arg23[%c13_204, %c0_205, %c0_206] : memref<20x16x32xf32, #tpu.memory_space<vmem>>, vector<1x16x32xf32>
    %609 = vector.shape_cast %608 : vector<1x16x32xf32> to vector<16x32xf32>
    %cst_207 = arith.constant dense<0.000000e+00> : vector<16x64xf32>
    %610 = tpu.matmul %609, %430, %cst_207 {dimension_numbers = #tpu.dot_dimension_numbers<[1], [0], [0], [1], [0, 0, 1, 1], [], []>} : vector<16x32xf32>, vector<32x64xf32>, vector<16x64xf32> -> vector<16x64xf32>
    %611 = arith.addf %610, %437 : vector<16x64xf32>
    %cst_208 = arith.constant 0.000000e+00 : f32
    %612 = vector.broadcast %cst_208 : f32 to vector<16x64xf32>
    %613 = arith.maximumf %611, %612 : vector<16x64xf32>
    %614 = vector.broadcast %433 : vector<1x64xf32> to vector<16x64xf32>
    %615 = arith.mulf %613, %614 : vector<16x64xf32>
    %cst_209 = arith.constant dense<0.000000e+00> : vector<16xf32>
    %616 = vector.multi_reduction <add>, %615, %cst_209 [1] : vector<16x64xf32> to vector<16xf32>
    %617 = vector.shape_cast %616 : vector<16xf32> to vector<16x1xf32>
    %618 = vector.broadcast %434 : vector<1x1xf32> to vector<16x1xf32>
    %619 = arith.addf %617, %618 : vector<16x1xf32>
    %620 = arith.maximumf %607, %619 : vector<16x1xf32>
    %c14_210 = arith.constant 14 : index
    %c0_211 = arith.constant 0 : index
    %c0_212 = arith.constant 0 : index
    %621 = vector.load %arg23[%c14_210, %c0_211, %c0_212] : memref<20x16x32xf32, #tpu.memory_space<vmem>>, vector<1x16x32xf32>
    %622 = vector.shape_cast %621 : vector<1x16x32xf32> to vector<16x32xf32>
    %cst_213 = arith.constant dense<0.000000e+00> : vector<16x64xf32>
    %623 = tpu.matmul %622, %430, %cst_213 {dimension_numbers = #tpu.dot_dimension_numbers<[1], [0], [0], [1], [0, 0, 1, 1], [], []>} : vector<16x32xf32>, vector<32x64xf32>, vector<16x64xf32> -> vector<16x64xf32>
    %624 = arith.addf %623, %437 : vector<16x64xf32>
    %cst_214 = arith.constant 0.000000e+00 : f32
    %625 = vector.broadcast %cst_214 : f32 to vector<16x64xf32>
    %626 = arith.maximumf %624, %625 : vector<16x64xf32>
    %627 = vector.broadcast %433 : vector<1x64xf32> to vector<16x64xf32>
    %628 = arith.mulf %626, %627 : vector<16x64xf32>
    %cst_215 = arith.constant dense<0.000000e+00> : vector<16xf32>
    %629 = vector.multi_reduction <add>, %628, %cst_215 [1] : vector<16x64xf32> to vector<16xf32>
    %630 = vector.shape_cast %629 : vector<16xf32> to vector<16x1xf32>
    %631 = vector.broadcast %434 : vector<1x1xf32> to vector<16x1xf32>
    %632 = arith.addf %630, %631 : vector<16x1xf32>
    %633 = arith.maximumf %620, %632 : vector<16x1xf32>
    %c15_216 = arith.constant 15 : index
    %c0_217 = arith.constant 0 : index
    %c0_218 = arith.constant 0 : index
    %634 = vector.load %arg23[%c15_216, %c0_217, %c0_218] : memref<20x16x32xf32, #tpu.memory_space<vmem>>, vector<1x16x32xf32>
    %635 = vector.shape_cast %634 : vector<1x16x32xf32> to vector<16x32xf32>
    %cst_219 = arith.constant dense<0.000000e+00> : vector<16x64xf32>
    %636 = tpu.matmul %635, %430, %cst_219 {dimension_numbers = #tpu.dot_dimension_numbers<[1], [0], [0], [1], [0, 0, 1, 1], [], []>} : vector<16x32xf32>, vector<32x64xf32>, vector<16x64xf32> -> vector<16x64xf32>
    %637 = arith.addf %636, %437 : vector<16x64xf32>
    %cst_220 = arith.constant 0.000000e+00 : f32
    %638 = vector.broadcast %cst_220 : f32 to vector<16x64xf32>
    %639 = arith.maximumf %637, %638 : vector<16x64xf32>
    %640 = vector.broadcast %433 : vector<1x64xf32> to vector<16x64xf32>
    %641 = arith.mulf %639, %640 : vector<16x64xf32>
    %cst_221 = arith.constant dense<0.000000e+00> : vector<16xf32>
    %642 = vector.multi_reduction <add>, %641, %cst_221 [1] : vector<16x64xf32> to vector<16xf32>
    %643 = vector.shape_cast %642 : vector<16xf32> to vector<16x1xf32>
    %644 = vector.broadcast %434 : vector<1x1xf32> to vector<16x1xf32>
    %645 = arith.addf %643, %644 : vector<16x1xf32>
    %646 = arith.maximumf %633, %645 : vector<16x1xf32>
    %c16_222 = arith.constant 16 : index
    %c0_223 = arith.constant 0 : index
    %c0_224 = arith.constant 0 : index
    %647 = vector.load %arg23[%c16_222, %c0_223, %c0_224] : memref<20x16x32xf32, #tpu.memory_space<vmem>>, vector<1x16x32xf32>
    %648 = vector.shape_cast %647 : vector<1x16x32xf32> to vector<16x32xf32>
    %cst_225 = arith.constant dense<0.000000e+00> : vector<16x64xf32>
    %649 = tpu.matmul %648, %430, %cst_225 {dimension_numbers = #tpu.dot_dimension_numbers<[1], [0], [0], [1], [0, 0, 1, 1], [], []>} : vector<16x32xf32>, vector<32x64xf32>, vector<16x64xf32> -> vector<16x64xf32>
    %650 = arith.addf %649, %437 : vector<16x64xf32>
    %cst_226 = arith.constant 0.000000e+00 : f32
    %651 = vector.broadcast %cst_226 : f32 to vector<16x64xf32>
    %652 = arith.maximumf %650, %651 : vector<16x64xf32>
    %653 = vector.broadcast %433 : vector<1x64xf32> to vector<16x64xf32>
    %654 = arith.mulf %652, %653 : vector<16x64xf32>
    %cst_227 = arith.constant dense<0.000000e+00> : vector<16xf32>
    %655 = vector.multi_reduction <add>, %654, %cst_227 [1] : vector<16x64xf32> to vector<16xf32>
    %656 = vector.shape_cast %655 : vector<16xf32> to vector<16x1xf32>
    %657 = vector.broadcast %434 : vector<1x1xf32> to vector<16x1xf32>
    %658 = arith.addf %656, %657 : vector<16x1xf32>
    %659 = arith.maximumf %646, %658 : vector<16x1xf32>
    %c17_228 = arith.constant 17 : index
    %c0_229 = arith.constant 0 : index
    %c0_230 = arith.constant 0 : index
    %660 = vector.load %arg23[%c17_228, %c0_229, %c0_230] : memref<20x16x32xf32, #tpu.memory_space<vmem>>, vector<1x16x32xf32>
    %661 = vector.shape_cast %660 : vector<1x16x32xf32> to vector<16x32xf32>
    %cst_231 = arith.constant dense<0.000000e+00> : vector<16x64xf32>
    %662 = tpu.matmul %661, %430, %cst_231 {dimension_numbers = #tpu.dot_dimension_numbers<[1], [0], [0], [1], [0, 0, 1, 1], [], []>} : vector<16x32xf32>, vector<32x64xf32>, vector<16x64xf32> -> vector<16x64xf32>
    %663 = arith.addf %662, %437 : vector<16x64xf32>
    %cst_232 = arith.constant 0.000000e+00 : f32
    %664 = vector.broadcast %cst_232 : f32 to vector<16x64xf32>
    %665 = arith.maximumf %663, %664 : vector<16x64xf32>
    %666 = vector.broadcast %433 : vector<1x64xf32> to vector<16x64xf32>
    %667 = arith.mulf %665, %666 : vector<16x64xf32>
    %cst_233 = arith.constant dense<0.000000e+00> : vector<16xf32>
    %668 = vector.multi_reduction <add>, %667, %cst_233 [1] : vector<16x64xf32> to vector<16xf32>
    %669 = vector.shape_cast %668 : vector<16xf32> to vector<16x1xf32>
    %670 = vector.broadcast %434 : vector<1x1xf32> to vector<16x1xf32>
    %671 = arith.addf %669, %670 : vector<16x1xf32>
    %672 = arith.maximumf %659, %671 : vector<16x1xf32>
    %c18_234 = arith.constant 18 : index
    %c0_235 = arith.constant 0 : index
    %c0_236 = arith.constant 0 : index
    %673 = vector.load %arg23[%c18_234, %c0_235, %c0_236] : memref<20x16x32xf32, #tpu.memory_space<vmem>>, vector<1x16x32xf32>
    %674 = vector.shape_cast %673 : vector<1x16x32xf32> to vector<16x32xf32>
    %cst_237 = arith.constant dense<0.000000e+00> : vector<16x64xf32>
    %675 = tpu.matmul %674, %430, %cst_237 {dimension_numbers = #tpu.dot_dimension_numbers<[1], [0], [0], [1], [0, 0, 1, 1], [], []>} : vector<16x32xf32>, vector<32x64xf32>, vector<16x64xf32> -> vector<16x64xf32>
    %676 = arith.addf %675, %437 : vector<16x64xf32>
    %cst_238 = arith.constant 0.000000e+00 : f32
    %677 = vector.broadcast %cst_238 : f32 to vector<16x64xf32>
    %678 = arith.maximumf %676, %677 : vector<16x64xf32>
    %679 = vector.broadcast %433 : vector<1x64xf32> to vector<16x64xf32>
    %680 = arith.mulf %678, %679 : vector<16x64xf32>
    %cst_239 = arith.constant dense<0.000000e+00> : vector<16xf32>
    %681 = vector.multi_reduction <add>, %680, %cst_239 [1] : vector<16x64xf32> to vector<16xf32>
    %682 = vector.shape_cast %681 : vector<16xf32> to vector<16x1xf32>
    %683 = vector.broadcast %434 : vector<1x1xf32> to vector<16x1xf32>
    %684 = arith.addf %682, %683 : vector<16x1xf32>
    %685 = arith.maximumf %672, %684 : vector<16x1xf32>
    %c19_240 = arith.constant 19 : index
    %c0_241 = arith.constant 0 : index
    %c0_242 = arith.constant 0 : index
    %686 = vector.load %arg23[%c19_240, %c0_241, %c0_242] : memref<20x16x32xf32, #tpu.memory_space<vmem>>, vector<1x16x32xf32>
    %687 = vector.shape_cast %686 : vector<1x16x32xf32> to vector<16x32xf32>
    %cst_243 = arith.constant dense<0.000000e+00> : vector<16x64xf32>
    %688 = tpu.matmul %687, %430, %cst_243 {dimension_numbers = #tpu.dot_dimension_numbers<[1], [0], [0], [1], [0, 0, 1, 1], [], []>} : vector<16x32xf32>, vector<32x64xf32>, vector<16x64xf32> -> vector<16x64xf32>
    %689 = arith.addf %688, %437 : vector<16x64xf32>
    %cst_244 = arith.constant 0.000000e+00 : f32
    %690 = vector.broadcast %cst_244 : f32 to vector<16x64xf32>
    %691 = arith.maximumf %689, %690 : vector<16x64xf32>
    %692 = vector.broadcast %433 : vector<1x64xf32> to vector<16x64xf32>
    %693 = arith.mulf %691, %692 : vector<16x64xf32>
    %cst_245 = arith.constant dense<0.000000e+00> : vector<16xf32>
    %694 = vector.multi_reduction <add>, %693, %cst_245 [1] : vector<16x64xf32> to vector<16xf32>
    %695 = vector.shape_cast %694 : vector<16xf32> to vector<16x1xf32>
    %696 = vector.broadcast %434 : vector<1x1xf32> to vector<16x1xf32>
    %697 = arith.addf %695, %696 : vector<16x1xf32>
    %698 = arith.maximumf %685, %697 : vector<16x1xf32>
    %cst_246 = arith.constant 0.000000e+00 : f32
    %699 = vector.broadcast %cst_246 : f32 to vector<16x1xf32>
    %cst_247 = arith.constant 0.000000e+00 : f32
    %700 = vector.broadcast %cst_247 : f32 to vector<16x32xf32>
    %701 = arith.subf %450, %698 : vector<16x1xf32>
    %702 = math.exp %701 : vector<16x1xf32>
    %703 = arith.addf %699, %702 : vector<16x1xf32>
    %c0_248 = arith.constant 0 : index
    %c0_249 = arith.constant 0 : index
    %c0_250 = arith.constant 0 : index
    %704 = vector.load %arg23[%c0_248, %c0_249, %c0_250] : memref<20x16x32xf32, #tpu.memory_space<vmem>>, vector<1x16x32xf32>
    %705 = vector.shape_cast %704 : vector<1x16x32xf32> to vector<16x32xf32>
    %706 = vector.broadcast %702 : vector<16x1xf32> to vector<16x32xf32>
    %707 = arith.mulf %706, %705 : vector<16x32xf32>
    %708 = arith.addf %700, %707 : vector<16x32xf32>
    %709 = arith.subf %463, %698 : vector<16x1xf32>
    %710 = math.exp %709 : vector<16x1xf32>
    %711 = arith.addf %703, %710 : vector<16x1xf32>
    %c1_251 = arith.constant 1 : index
    %c0_252 = arith.constant 0 : index
    %c0_253 = arith.constant 0 : index
    %712 = vector.load %arg23[%c1_251, %c0_252, %c0_253] : memref<20x16x32xf32, #tpu.memory_space<vmem>>, vector<1x16x32xf32>
    %713 = vector.shape_cast %712 : vector<1x16x32xf32> to vector<16x32xf32>
    %714 = vector.broadcast %710 : vector<16x1xf32> to vector<16x32xf32>
    %715 = arith.mulf %714, %713 : vector<16x32xf32>
    %716 = arith.addf %708, %715 : vector<16x32xf32>
    %717 = arith.subf %476, %698 : vector<16x1xf32>
    %718 = math.exp %717 : vector<16x1xf32>
    %719 = arith.addf %711, %718 : vector<16x1xf32>
    %c2_254 = arith.constant 2 : index
    %c0_255 = arith.constant 0 : index
    %c0_256 = arith.constant 0 : index
    %720 = vector.load %arg23[%c2_254, %c0_255, %c0_256] : memref<20x16x32xf32, #tpu.memory_space<vmem>>, vector<1x16x32xf32>
    %721 = vector.shape_cast %720 : vector<1x16x32xf32> to vector<16x32xf32>
    %722 = vector.broadcast %718 : vector<16x1xf32> to vector<16x32xf32>
    %723 = arith.mulf %722, %721 : vector<16x32xf32>
    %724 = arith.addf %716, %723 : vector<16x32xf32>
    %725 = arith.subf %489, %698 : vector<16x1xf32>
    %726 = math.exp %725 : vector<16x1xf32>
    %727 = arith.addf %719, %726 : vector<16x1xf32>
    %c3_257 = arith.constant 3 : index
    %c0_258 = arith.constant 0 : index
    %c0_259 = arith.constant 0 : index
    %728 = vector.load %arg23[%c3_257, %c0_258, %c0_259] : memref<20x16x32xf32, #tpu.memory_space<vmem>>, vector<1x16x32xf32>
    %729 = vector.shape_cast %728 : vector<1x16x32xf32> to vector<16x32xf32>
    %730 = vector.broadcast %726 : vector<16x1xf32> to vector<16x32xf32>
    %731 = arith.mulf %730, %729 : vector<16x32xf32>
    %732 = arith.addf %724, %731 : vector<16x32xf32>
    %733 = arith.subf %502, %698 : vector<16x1xf32>
    %734 = math.exp %733 : vector<16x1xf32>
    %735 = arith.addf %727, %734 : vector<16x1xf32>
    %c4_260 = arith.constant 4 : index
    %c0_261 = arith.constant 0 : index
    %c0_262 = arith.constant 0 : index
    %736 = vector.load %arg23[%c4_260, %c0_261, %c0_262] : memref<20x16x32xf32, #tpu.memory_space<vmem>>, vector<1x16x32xf32>
    %737 = vector.shape_cast %736 : vector<1x16x32xf32> to vector<16x32xf32>
    %738 = vector.broadcast %734 : vector<16x1xf32> to vector<16x32xf32>
    %739 = arith.mulf %738, %737 : vector<16x32xf32>
    %740 = arith.addf %732, %739 : vector<16x32xf32>
    %741 = arith.subf %515, %698 : vector<16x1xf32>
    %742 = math.exp %741 : vector<16x1xf32>
    %743 = arith.addf %735, %742 : vector<16x1xf32>
    %c5_263 = arith.constant 5 : index
    %c0_264 = arith.constant 0 : index
    %c0_265 = arith.constant 0 : index
    %744 = vector.load %arg23[%c5_263, %c0_264, %c0_265] : memref<20x16x32xf32, #tpu.memory_space<vmem>>, vector<1x16x32xf32>
    %745 = vector.shape_cast %744 : vector<1x16x32xf32> to vector<16x32xf32>
    %746 = vector.broadcast %742 : vector<16x1xf32> to vector<16x32xf32>
    %747 = arith.mulf %746, %745 : vector<16x32xf32>
    %748 = arith.addf %740, %747 : vector<16x32xf32>
    %749 = arith.subf %528, %698 : vector<16x1xf32>
    %750 = math.exp %749 : vector<16x1xf32>
    %751 = arith.addf %743, %750 : vector<16x1xf32>
    %c6_266 = arith.constant 6 : index
    %c0_267 = arith.constant 0 : index
    %c0_268 = arith.constant 0 : index
    %752 = vector.load %arg23[%c6_266, %c0_267, %c0_268] : memref<20x16x32xf32, #tpu.memory_space<vmem>>, vector<1x16x32xf32>
    %753 = vector.shape_cast %752 : vector<1x16x32xf32> to vector<16x32xf32>
    %754 = vector.broadcast %750 : vector<16x1xf32> to vector<16x32xf32>
    %755 = arith.mulf %754, %753 : vector<16x32xf32>
    %756 = arith.addf %748, %755 : vector<16x32xf32>
    %757 = arith.subf %541, %698 : vector<16x1xf32>
    %758 = math.exp %757 : vector<16x1xf32>
    %759 = arith.addf %751, %758 : vector<16x1xf32>
    %c7_269 = arith.constant 7 : index
    %c0_270 = arith.constant 0 : index
    %c0_271 = arith.constant 0 : index
    %760 = vector.load %arg23[%c7_269, %c0_270, %c0_271] : memref<20x16x32xf32, #tpu.memory_space<vmem>>, vector<1x16x32xf32>
    %761 = vector.shape_cast %760 : vector<1x16x32xf32> to vector<16x32xf32>
    %762 = vector.broadcast %758 : vector<16x1xf32> to vector<16x32xf32>
    %763 = arith.mulf %762, %761 : vector<16x32xf32>
    %764 = arith.addf %756, %763 : vector<16x32xf32>
    %765 = arith.subf %554, %698 : vector<16x1xf32>
    %766 = math.exp %765 : vector<16x1xf32>
    %767 = arith.addf %759, %766 : vector<16x1xf32>
    %c8_272 = arith.constant 8 : index
    %c0_273 = arith.constant 0 : index
    %c0_274 = arith.constant 0 : index
    %768 = vector.load %arg23[%c8_272, %c0_273, %c0_274] : memref<20x16x32xf32, #tpu.memory_space<vmem>>, vector<1x16x32xf32>
    %769 = vector.shape_cast %768 : vector<1x16x32xf32> to vector<16x32xf32>
    %770 = vector.broadcast %766 : vector<16x1xf32> to vector<16x32xf32>
    %771 = arith.mulf %770, %769 : vector<16x32xf32>
    %772 = arith.addf %764, %771 : vector<16x32xf32>
    %773 = arith.subf %567, %698 : vector<16x1xf32>
    %774 = math.exp %773 : vector<16x1xf32>
    %775 = arith.addf %767, %774 : vector<16x1xf32>
    %c9_275 = arith.constant 9 : index
    %c0_276 = arith.constant 0 : index
    %c0_277 = arith.constant 0 : index
    %776 = vector.load %arg23[%c9_275, %c0_276, %c0_277] : memref<20x16x32xf32, #tpu.memory_space<vmem>>, vector<1x16x32xf32>
    %777 = vector.shape_cast %776 : vector<1x16x32xf32> to vector<16x32xf32>
    %778 = vector.broadcast %774 : vector<16x1xf32> to vector<16x32xf32>
    %779 = arith.mulf %778, %777 : vector<16x32xf32>
    %780 = arith.addf %772, %779 : vector<16x32xf32>
    %781 = arith.subf %580, %698 : vector<16x1xf32>
    %782 = math.exp %781 : vector<16x1xf32>
    %783 = arith.addf %775, %782 : vector<16x1xf32>
    %c10_278 = arith.constant 10 : index
    %c0_279 = arith.constant 0 : index
    %c0_280 = arith.constant 0 : index
    %784 = vector.load %arg23[%c10_278, %c0_279, %c0_280] : memref<20x16x32xf32, #tpu.memory_space<vmem>>, vector<1x16x32xf32>
    %785 = vector.shape_cast %784 : vector<1x16x32xf32> to vector<16x32xf32>
    %786 = vector.broadcast %782 : vector<16x1xf32> to vector<16x32xf32>
    %787 = arith.mulf %786, %785 : vector<16x32xf32>
    %788 = arith.addf %780, %787 : vector<16x32xf32>
    %789 = arith.subf %593, %698 : vector<16x1xf32>
    %790 = math.exp %789 : vector<16x1xf32>
    %791 = arith.addf %783, %790 : vector<16x1xf32>
    %c11_281 = arith.constant 11 : index
    %c0_282 = arith.constant 0 : index
    %c0_283 = arith.constant 0 : index
    %792 = vector.load %arg23[%c11_281, %c0_282, %c0_283] : memref<20x16x32xf32, #tpu.memory_space<vmem>>, vector<1x16x32xf32>
    %793 = vector.shape_cast %792 : vector<1x16x32xf32> to vector<16x32xf32>
    %794 = vector.broadcast %790 : vector<16x1xf32> to vector<16x32xf32>
    %795 = arith.mulf %794, %793 : vector<16x32xf32>
    %796 = arith.addf %788, %795 : vector<16x32xf32>
    %797 = arith.subf %606, %698 : vector<16x1xf32>
    %798 = math.exp %797 : vector<16x1xf32>
    %799 = arith.addf %791, %798 : vector<16x1xf32>
    %c12_284 = arith.constant 12 : index
    %c0_285 = arith.constant 0 : index
    %c0_286 = arith.constant 0 : index
    %800 = vector.load %arg23[%c12_284, %c0_285, %c0_286] : memref<20x16x32xf32, #tpu.memory_space<vmem>>, vector<1x16x32xf32>
    %801 = vector.shape_cast %800 : vector<1x16x32xf32> to vector<16x32xf32>
    %802 = vector.broadcast %798 : vector<16x1xf32> to vector<16x32xf32>
    %803 = arith.mulf %802, %801 : vector<16x32xf32>
    %804 = arith.addf %796, %803 : vector<16x32xf32>
    %805 = arith.subf %619, %698 : vector<16x1xf32>
    %806 = math.exp %805 : vector<16x1xf32>
    %807 = arith.addf %799, %806 : vector<16x1xf32>
    %c13_287 = arith.constant 13 : index
    %c0_288 = arith.constant 0 : index
    %c0_289 = arith.constant 0 : index
    %808 = vector.load %arg23[%c13_287, %c0_288, %c0_289] : memref<20x16x32xf32, #tpu.memory_space<vmem>>, vector<1x16x32xf32>
    %809 = vector.shape_cast %808 : vector<1x16x32xf32> to vector<16x32xf32>
    %810 = vector.broadcast %806 : vector<16x1xf32> to vector<16x32xf32>
    %811 = arith.mulf %810, %809 : vector<16x32xf32>
    %812 = arith.addf %804, %811 : vector<16x32xf32>
    %813 = arith.subf %632, %698 : vector<16x1xf32>
    %814 = math.exp %813 : vector<16x1xf32>
    %815 = arith.addf %807, %814 : vector<16x1xf32>
    %c14_290 = arith.constant 14 : index
    %c0_291 = arith.constant 0 : index
    %c0_292 = arith.constant 0 : index
    %816 = vector.load %arg23[%c14_290, %c0_291, %c0_292] : memref<20x16x32xf32, #tpu.memory_space<vmem>>, vector<1x16x32xf32>
    %817 = vector.shape_cast %816 : vector<1x16x32xf32> to vector<16x32xf32>
    %818 = vector.broadcast %814 : vector<16x1xf32> to vector<16x32xf32>
    %819 = arith.mulf %818, %817 : vector<16x32xf32>
    %820 = arith.addf %812, %819 : vector<16x32xf32>
    %821 = arith.subf %645, %698 : vector<16x1xf32>
    %822 = math.exp %821 : vector<16x1xf32>
    %823 = arith.addf %815, %822 : vector<16x1xf32>
    %c15_293 = arith.constant 15 : index
    %c0_294 = arith.constant 0 : index
    %c0_295 = arith.constant 0 : index
    %824 = vector.load %arg23[%c15_293, %c0_294, %c0_295] : memref<20x16x32xf32, #tpu.memory_space<vmem>>, vector<1x16x32xf32>
    %825 = vector.shape_cast %824 : vector<1x16x32xf32> to vector<16x32xf32>
    %826 = vector.broadcast %822 : vector<16x1xf32> to vector<16x32xf32>
    %827 = arith.mulf %826, %825 : vector<16x32xf32>
    %828 = arith.addf %820, %827 : vector<16x32xf32>
    %829 = arith.subf %658, %698 : vector<16x1xf32>
    %830 = math.exp %829 : vector<16x1xf32>
    %831 = arith.addf %823, %830 : vector<16x1xf32>
    %c16_296 = arith.constant 16 : index
    %c0_297 = arith.constant 0 : index
    %c0_298 = arith.constant 0 : index
    %832 = vector.load %arg23[%c16_296, %c0_297, %c0_298] : memref<20x16x32xf32, #tpu.memory_space<vmem>>, vector<1x16x32xf32>
    %833 = vector.shape_cast %832 : vector<1x16x32xf32> to vector<16x32xf32>
    %834 = vector.broadcast %830 : vector<16x1xf32> to vector<16x32xf32>
    %835 = arith.mulf %834, %833 : vector<16x32xf32>
    %836 = arith.addf %828, %835 : vector<16x32xf32>
    %837 = arith.subf %671, %698 : vector<16x1xf32>
    %838 = math.exp %837 : vector<16x1xf32>
    %839 = arith.addf %831, %838 : vector<16x1xf32>
    %c17_299 = arith.constant 17 : index
    %c0_300 = arith.constant 0 : index
    %c0_301 = arith.constant 0 : index
    %840 = vector.load %arg23[%c17_299, %c0_300, %c0_301] : memref<20x16x32xf32, #tpu.memory_space<vmem>>, vector<1x16x32xf32>
    %841 = vector.shape_cast %840 : vector<1x16x32xf32> to vector<16x32xf32>
    %842 = vector.broadcast %838 : vector<16x1xf32> to vector<16x32xf32>
    %843 = arith.mulf %842, %841 : vector<16x32xf32>
    %844 = arith.addf %836, %843 : vector<16x32xf32>
    %845 = arith.subf %684, %698 : vector<16x1xf32>
    %846 = math.exp %845 : vector<16x1xf32>
    %847 = arith.addf %839, %846 : vector<16x1xf32>
    %c18_302 = arith.constant 18 : index
    %c0_303 = arith.constant 0 : index
    %c0_304 = arith.constant 0 : index
    %848 = vector.load %arg23[%c18_302, %c0_303, %c0_304] : memref<20x16x32xf32, #tpu.memory_space<vmem>>, vector<1x16x32xf32>
    %849 = vector.shape_cast %848 : vector<1x16x32xf32> to vector<16x32xf32>
    %850 = vector.broadcast %846 : vector<16x1xf32> to vector<16x32xf32>
    %851 = arith.mulf %850, %849 : vector<16x32xf32>
    %852 = arith.addf %844, %851 : vector<16x32xf32>
    %853 = arith.subf %697, %698 : vector<16x1xf32>
    %854 = math.exp %853 : vector<16x1xf32>
    %855 = arith.addf %847, %854 : vector<16x1xf32>
    %c19_305 = arith.constant 19 : index
    %c0_306 = arith.constant 0 : index
    %c0_307 = arith.constant 0 : index
    %856 = vector.load %arg23[%c19_305, %c0_306, %c0_307] : memref<20x16x32xf32, #tpu.memory_space<vmem>>, vector<1x16x32xf32>
    %857 = vector.shape_cast %856 : vector<1x16x32xf32> to vector<16x32xf32>
    %858 = vector.broadcast %854 : vector<16x1xf32> to vector<16x32xf32>
    %859 = arith.mulf %858, %857 : vector<16x32xf32>
    %860 = arith.addf %852, %859 : vector<16x32xf32>
    %861 = vector.broadcast %855 : vector<16x1xf32> to vector<16x32xf32>
    %862 = arith.divf %860, %861 : vector<16x32xf32>
    %c0_308 = arith.constant 0 : index
    %c0_309 = arith.constant 0 : index
    %863 = vector.load %arg9[%c0_308, %c0_309] : memref<32x128xf32, #tpu.memory_space<vmem>>, vector<32x128xf32>
    %cst_310 = arith.constant dense<0.000000e+00> : vector<16x128xf32>
    %864 = tpu.matmul %862, %863, %cst_310 {dimension_numbers = #tpu.dot_dimension_numbers<[1], [0], [0], [1], [0, 0, 1, 1], [], []>} : vector<16x32xf32>, vector<32x128xf32>, vector<16x128xf32> -> vector<16x128xf32>
    %c0_311 = arith.constant 0 : index
    %c0_312 = arith.constant 0 : index
    %865 = vector.load %arg11[%c0_311, %c0_312] : memref<1x128xf32, #tpu.memory_space<vmem>>, vector<1x128xf32>
    %866 = vector.broadcast %865 : vector<1x128xf32> to vector<16x128xf32>
    %867 = arith.addf %864, %866 : vector<16x128xf32>
    %c0_313 = arith.constant 0 : index
    %c0_314 = arith.constant 0 : index
    %868 = vector.load %arg10[%c0_313, %c0_314] : memref<32x128xf32, #tpu.memory_space<vmem>>, vector<32x128xf32>
    %cst_315 = arith.constant 0.000000e+00 : f32
    %869 = vector.broadcast %cst_315 : f32 to vector<2x32xf32>
    %cst_316 = arith.constant 0.000000e+00 : f32
    %870 = vector.broadcast %cst_316 : f32 to vector<2x32xf32>
    %871 = vector.extract_strided_slice %867 {offsets = [0, 0], sizes = [2, 128], strides = [1, 1]} : vector<16x128xf32> to vector<2x128xf32>
    %cst_317 = arith.constant dense<0.000000e+00> : vector<2x128xf32>
    %872 = tpu.matmul %869, %868, %cst_317 {dimension_numbers = #tpu.dot_dimension_numbers<[1], [0], [0], [1], [0, 0, 1, 1], [], []>} : vector<2x32xf32>, vector<32x128xf32>, vector<2x128xf32> -> vector<2x128xf32>
    %873 = arith.addf %871, %872 : vector<2x128xf32>
    %874 = arith.negf %873 : vector<2x128xf32>
    %875 = math.exp %874 : vector<2x128xf32>
    %cst_318 = arith.constant 1.000000e+00 : f32
    %876 = vector.broadcast %cst_318 : f32 to vector<2x128xf32>
    %877 = arith.addf %876, %875 : vector<2x128xf32>
    %878 = arith.divf %876, %877 : vector<2x128xf32>
    %879 = math.tanh %873 : vector<2x128xf32>
    %880 = vector.extract_strided_slice %878 {offsets = [0, 0], sizes = [2, 32], strides = [1, 1]} : vector<2x128xf32> to vector<2x32xf32>
    %881 = vector.extract_strided_slice %878 {offsets = [0, 32], sizes = [2, 32], strides = [1, 1]} : vector<2x128xf32> to vector<2x32xf32>
    %882 = vector.extract_strided_slice %879 {offsets = [0, 64], sizes = [2, 32], strides = [1, 1]} : vector<2x128xf32> to vector<2x32xf32>
    %883 = vector.extract_strided_slice %878 {offsets = [0, 96], sizes = [2, 32], strides = [1, 1]} : vector<2x128xf32> to vector<2x32xf32>
    %884 = arith.mulf %881, %870 : vector<2x32xf32>
    %885 = arith.mulf %880, %882 : vector<2x32xf32>
    %886 = arith.addf %884, %885 : vector<2x32xf32>
    %887 = math.tanh %886 : vector<2x32xf32>
    %888 = arith.mulf %883, %887 : vector<2x32xf32>
    %c0_319 = arith.constant 0 : index
    %c0_320 = arith.constant 0 : index
    %c0_321 = arith.constant 0 : index
    %889 = vector.load %arg24[%c0_319, %c0_320, %c0_321] : memref<8x2x32xf32, #tpu.memory_space<vmem>>, vector<1x2x32xf32>
    %890 = vector.shape_cast %889 : vector<1x2x32xf32> to vector<2x32xf32>
    %891 = vector.shape_cast %888 : vector<2x32xf32> to vector<1x2x32xf32>
    tpu.vector_store %arg24[%c0_319, %c0_320, %c0_321], %891 {strides = array<i32>} : memref<8x2x32xf32, #tpu.memory_space<vmem>>, vector<1x2x32xf32>,
    %892 = vector.extract_strided_slice %867 {offsets = [2, 0], sizes = [2, 128], strides = [1, 1]} : vector<16x128xf32> to vector<2x128xf32>
    %cst_322 = arith.constant dense<0.000000e+00> : vector<2x128xf32>
    %893 = tpu.matmul %888, %868, %cst_322 {dimension_numbers = #tpu.dot_dimension_numbers<[1], [0], [0], [1], [0, 0, 1, 1], [], []>} : vector<2x32xf32>, vector<32x128xf32>, vector<2x128xf32> -> vector<2x128xf32>
    %894 = arith.addf %892, %893 : vector<2x128xf32>
    %895 = arith.negf %894 : vector<2x128xf32>
    %896 = math.exp %895 : vector<2x128xf32>
    %cst_323 = arith.constant 1.000000e+00 : f32
    %897 = vector.broadcast %cst_323 : f32 to vector<2x128xf32>
    %898 = arith.addf %897, %896 : vector<2x128xf32>
    %899 = arith.divf %897, %898 : vector<2x128xf32>
    %900 = math.tanh %894 : vector<2x128xf32>
    %901 = vector.extract_strided_slice %899 {offsets = [0, 0], sizes = [2, 32], strides = [1, 1]} : vector<2x128xf32> to vector<2x32xf32>
    %902 = vector.extract_strided_slice %899 {offsets = [0, 32], sizes = [2, 32], strides = [1, 1]} : vector<2x128xf32> to vector<2x32xf32>
    %903 = vector.extract_strided_slice %900 {offsets = [0, 64], sizes = [2, 32], strides = [1, 1]} : vector<2x128xf32> to vector<2x32xf32>
    %904 = vector.extract_strided_slice %899 {offsets = [0, 96], sizes = [2, 32], strides = [1, 1]} : vector<2x128xf32> to vector<2x32xf32>
    %905 = arith.mulf %902, %886 : vector<2x32xf32>
    %906 = arith.mulf %901, %903 : vector<2x32xf32>
    %907 = arith.addf %905, %906 : vector<2x32xf32>
    %908 = math.tanh %907 : vector<2x32xf32>
    %909 = arith.mulf %904, %908 : vector<2x32xf32>
    %c1_324 = arith.constant 1 : index
    %c0_325 = arith.constant 0 : index
    %c0_326 = arith.constant 0 : index
    %910 = vector.load %arg24[%c1_324, %c0_325, %c0_326] : memref<8x2x32xf32, #tpu.memory_space<vmem>>, vector<1x2x32xf32>
    %911 = vector.shape_cast %910 : vector<1x2x32xf32> to vector<2x32xf32>
    %912 = vector.shape_cast %909 : vector<2x32xf32> to vector<1x2x32xf32>
    tpu.vector_store %arg24[%c1_324, %c0_325, %c0_326], %912 {strides = array<i32>} : memref<8x2x32xf32, #tpu.memory_space<vmem>>, vector<1x2x32xf32>,
    %913 = vector.extract_strided_slice %867 {offsets = [4, 0], sizes = [2, 128], strides = [1, 1]} : vector<16x128xf32> to vector<2x128xf32>
    %cst_327 = arith.constant dense<0.000000e+00> : vector<2x128xf32>
    %914 = tpu.matmul %909, %868, %cst_327 {dimension_numbers = #tpu.dot_dimension_numbers<[1], [0], [0], [1], [0, 0, 1, 1], [], []>} : vector<2x32xf32>, vector<32x128xf32>, vector<2x128xf32> -> vector<2x128xf32>
    %915 = arith.addf %913, %914 : vector<2x128xf32>
    %916 = arith.negf %915 : vector<2x128xf32>
    %917 = math.exp %916 : vector<2x128xf32>
    %cst_328 = arith.constant 1.000000e+00 : f32
    %918 = vector.broadcast %cst_328 : f32 to vector<2x128xf32>
    %919 = arith.addf %918, %917 : vector<2x128xf32>
    %920 = arith.divf %918, %919 : vector<2x128xf32>
    %921 = math.tanh %915 : vector<2x128xf32>
    %922 = vector.extract_strided_slice %920 {offsets = [0, 0], sizes = [2, 32], strides = [1, 1]} : vector<2x128xf32> to vector<2x32xf32>
    %923 = vector.extract_strided_slice %920 {offsets = [0, 32], sizes = [2, 32], strides = [1, 1]} : vector<2x128xf32> to vector<2x32xf32>
    %924 = vector.extract_strided_slice %921 {offsets = [0, 64], sizes = [2, 32], strides = [1, 1]} : vector<2x128xf32> to vector<2x32xf32>
    %925 = vector.extract_strided_slice %920 {offsets = [0, 96], sizes = [2, 32], strides = [1, 1]} : vector<2x128xf32> to vector<2x32xf32>
    %926 = arith.mulf %923, %907 : vector<2x32xf32>
    %927 = arith.mulf %922, %924 : vector<2x32xf32>
    %928 = arith.addf %926, %927 : vector<2x32xf32>
    %929 = math.tanh %928 : vector<2x32xf32>
    %930 = arith.mulf %925, %929 : vector<2x32xf32>
    %c2_329 = arith.constant 2 : index
    %c0_330 = arith.constant 0 : index
    %c0_331 = arith.constant 0 : index
    %931 = vector.load %arg24[%c2_329, %c0_330, %c0_331] : memref<8x2x32xf32, #tpu.memory_space<vmem>>, vector<1x2x32xf32>
    %932 = vector.shape_cast %931 : vector<1x2x32xf32> to vector<2x32xf32>
    %933 = vector.shape_cast %930 : vector<2x32xf32> to vector<1x2x32xf32>
    tpu.vector_store %arg24[%c2_329, %c0_330, %c0_331], %933 {strides = array<i32>} : memref<8x2x32xf32, #tpu.memory_space<vmem>>, vector<1x2x32xf32>,
    %934 = vector.extract_strided_slice %867 {offsets = [6, 0], sizes = [2, 128], strides = [1, 1]} : vector<16x128xf32> to vector<2x128xf32>
    %cst_332 = arith.constant dense<0.000000e+00> : vector<2x128xf32>
    %935 = tpu.matmul %930, %868, %cst_332 {dimension_numbers = #tpu.dot_dimension_numbers<[1], [0], [0], [1], [0, 0, 1, 1], [], []>} : vector<2x32xf32>, vector<32x128xf32>, vector<2x128xf32> -> vector<2x128xf32>
    %936 = arith.addf %934, %935 : vector<2x128xf32>
    %937 = arith.negf %936 : vector<2x128xf32>
    %938 = math.exp %937 : vector<2x128xf32>
    %cst_333 = arith.constant 1.000000e+00 : f32
    %939 = vector.broadcast %cst_333 : f32 to vector<2x128xf32>
    %940 = arith.addf %939, %938 : vector<2x128xf32>
    %941 = arith.divf %939, %940 : vector<2x128xf32>
    %942 = math.tanh %936 : vector<2x128xf32>
    %943 = vector.extract_strided_slice %941 {offsets = [0, 0], sizes = [2, 32], strides = [1, 1]} : vector<2x128xf32> to vector<2x32xf32>
    %944 = vector.extract_strided_slice %941 {offsets = [0, 32], sizes = [2, 32], strides = [1, 1]} : vector<2x128xf32> to vector<2x32xf32>
    %945 = vector.extract_strided_slice %942 {offsets = [0, 64], sizes = [2, 32], strides = [1, 1]} : vector<2x128xf32> to vector<2x32xf32>
    %946 = vector.extract_strided_slice %941 {offsets = [0, 96], sizes = [2, 32], strides = [1, 1]} : vector<2x128xf32> to vector<2x32xf32>
    %947 = arith.mulf %944, %928 : vector<2x32xf32>
    %948 = arith.mulf %943, %945 : vector<2x32xf32>
    %949 = arith.addf %947, %948 : vector<2x32xf32>
    %950 = math.tanh %949 : vector<2x32xf32>
    %951 = arith.mulf %946, %950 : vector<2x32xf32>
    %c3_334 = arith.constant 3 : index
    %c0_335 = arith.constant 0 : index
    %c0_336 = arith.constant 0 : index
    %952 = vector.load %arg24[%c3_334, %c0_335, %c0_336] : memref<8x2x32xf32, #tpu.memory_space<vmem>>, vector<1x2x32xf32>
    %953 = vector.shape_cast %952 : vector<1x2x32xf32> to vector<2x32xf32>
    %954 = vector.shape_cast %951 : vector<2x32xf32> to vector<1x2x32xf32>
    tpu.vector_store %arg24[%c3_334, %c0_335, %c0_336], %954 {strides = array<i32>} : memref<8x2x32xf32, #tpu.memory_space<vmem>>, vector<1x2x32xf32>,
    %955 = vector.extract_strided_slice %867 {offsets = [8, 0], sizes = [2, 128], strides = [1, 1]} : vector<16x128xf32> to vector<2x128xf32>
    %cst_337 = arith.constant dense<0.000000e+00> : vector<2x128xf32>
    %956 = tpu.matmul %951, %868, %cst_337 {dimension_numbers = #tpu.dot_dimension_numbers<[1], [0], [0], [1], [0, 0, 1, 1], [], []>} : vector<2x32xf32>, vector<32x128xf32>, vector<2x128xf32> -> vector<2x128xf32>
    %957 = arith.addf %955, %956 : vector<2x128xf32>
    %958 = arith.negf %957 : vector<2x128xf32>
    %959 = math.exp %958 : vector<2x128xf32>
    %cst_338 = arith.constant 1.000000e+00 : f32
    %960 = vector.broadcast %cst_338 : f32 to vector<2x128xf32>
    %961 = arith.addf %960, %959 : vector<2x128xf32>
    %962 = arith.divf %960, %961 : vector<2x128xf32>
    %963 = math.tanh %957 : vector<2x128xf32>
    %964 = vector.extract_strided_slice %962 {offsets = [0, 0], sizes = [2, 32], strides = [1, 1]} : vector<2x128xf32> to vector<2x32xf32>
    %965 = vector.extract_strided_slice %962 {offsets = [0, 32], sizes = [2, 32], strides = [1, 1]} : vector<2x128xf32> to vector<2x32xf32>
    %966 = vector.extract_strided_slice %963 {offsets = [0, 64], sizes = [2, 32], strides = [1, 1]} : vector<2x128xf32> to vector<2x32xf32>
    %967 = vector.extract_strided_slice %962 {offsets = [0, 96], sizes = [2, 32], strides = [1, 1]} : vector<2x128xf32> to vector<2x32xf32>
    %968 = arith.mulf %965, %949 : vector<2x32xf32>
    %969 = arith.mulf %964, %966 : vector<2x32xf32>
    %970 = arith.addf %968, %969 : vector<2x32xf32>
    %971 = math.tanh %970 : vector<2x32xf32>
    %972 = arith.mulf %967, %971 : vector<2x32xf32>
    %c4_339 = arith.constant 4 : index
    %c0_340 = arith.constant 0 : index
    %c0_341 = arith.constant 0 : index
    %973 = vector.load %arg24[%c4_339, %c0_340, %c0_341] : memref<8x2x32xf32, #tpu.memory_space<vmem>>, vector<1x2x32xf32>
    %974 = vector.shape_cast %973 : vector<1x2x32xf32> to vector<2x32xf32>
    %975 = vector.shape_cast %972 : vector<2x32xf32> to vector<1x2x32xf32>
    tpu.vector_store %arg24[%c4_339, %c0_340, %c0_341], %975 {strides = array<i32>} : memref<8x2x32xf32, #tpu.memory_space<vmem>>, vector<1x2x32xf32>,
    %976 = vector.extract_strided_slice %867 {offsets = [10, 0], sizes = [2, 128], strides = [1, 1]} : vector<16x128xf32> to vector<2x128xf32>
    %cst_342 = arith.constant dense<0.000000e+00> : vector<2x128xf32>
    %977 = tpu.matmul %972, %868, %cst_342 {dimension_numbers = #tpu.dot_dimension_numbers<[1], [0], [0], [1], [0, 0, 1, 1], [], []>} : vector<2x32xf32>, vector<32x128xf32>, vector<2x128xf32> -> vector<2x128xf32>
    %978 = arith.addf %976, %977 : vector<2x128xf32>
    %979 = arith.negf %978 : vector<2x128xf32>
    %980 = math.exp %979 : vector<2x128xf32>
    %cst_343 = arith.constant 1.000000e+00 : f32
    %981 = vector.broadcast %cst_343 : f32 to vector<2x128xf32>
    %982 = arith.addf %981, %980 : vector<2x128xf32>
    %983 = arith.divf %981, %982 : vector<2x128xf32>
    %984 = math.tanh %978 : vector<2x128xf32>
    %985 = vector.extract_strided_slice %983 {offsets = [0, 0], sizes = [2, 32], strides = [1, 1]} : vector<2x128xf32> to vector<2x32xf32>
    %986 = vector.extract_strided_slice %983 {offsets = [0, 32], sizes = [2, 32], strides = [1, 1]} : vector<2x128xf32> to vector<2x32xf32>
    %987 = vector.extract_strided_slice %984 {offsets = [0, 64], sizes = [2, 32], strides = [1, 1]} : vector<2x128xf32> to vector<2x32xf32>
    %988 = vector.extract_strided_slice %983 {offsets = [0, 96], sizes = [2, 32], strides = [1, 1]} : vector<2x128xf32> to vector<2x32xf32>
    %989 = arith.mulf %986, %970 : vector<2x32xf32>
    %990 = arith.mulf %985, %987 : vector<2x32xf32>
    %991 = arith.addf %989, %990 : vector<2x32xf32>
    %992 = math.tanh %991 : vector<2x32xf32>
    %993 = arith.mulf %988, %992 : vector<2x32xf32>
    %c5_344 = arith.constant 5 : index
    %c0_345 = arith.constant 0 : index
    %c0_346 = arith.constant 0 : index
    %994 = vector.load %arg24[%c5_344, %c0_345, %c0_346] : memref<8x2x32xf32, #tpu.memory_space<vmem>>, vector<1x2x32xf32>
    %995 = vector.shape_cast %994 : vector<1x2x32xf32> to vector<2x32xf32>
    %996 = vector.shape_cast %993 : vector<2x32xf32> to vector<1x2x32xf32>
    tpu.vector_store %arg24[%c5_344, %c0_345, %c0_346], %996 {strides = array<i32>} : memref<8x2x32xf32, #tpu.memory_space<vmem>>, vector<1x2x32xf32>,
    %997 = vector.extract_strided_slice %867 {offsets = [12, 0], sizes = [2, 128], strides = [1, 1]} : vector<16x128xf32> to vector<2x128xf32>
    %cst_347 = arith.constant dense<0.000000e+00> : vector<2x128xf32>
    %998 = tpu.matmul %993, %868, %cst_347 {dimension_numbers = #tpu.dot_dimension_numbers<[1], [0], [0], [1], [0, 0, 1, 1], [], []>} : vector<2x32xf32>, vector<32x128xf32>, vector<2x128xf32> -> vector<2x128xf32>
    %999 = arith.addf %997, %998 : vector<2x128xf32>
    %1000 = arith.negf %999 : vector<2x128xf32>
    %1001 = math.exp %1000 : vector<2x128xf32>
    %cst_348 = arith.constant 1.000000e+00 : f32
    %1002 = vector.broadcast %cst_348 : f32 to vector<2x128xf32>
    %1003 = arith.addf %1002, %1001 : vector<2x128xf32>
    %1004 = arith.divf %1002, %1003 : vector<2x128xf32>
    %1005 = math.tanh %999 : vector<2x128xf32>
    %1006 = vector.extract_strided_slice %1004 {offsets = [0, 0], sizes = [2, 32], strides = [1, 1]} : vector<2x128xf32> to vector<2x32xf32>
    %1007 = vector.extract_strided_slice %1004 {offsets = [0, 32], sizes = [2, 32], strides = [1, 1]} : vector<2x128xf32> to vector<2x32xf32>
    %1008 = vector.extract_strided_slice %1005 {offsets = [0, 64], sizes = [2, 32], strides = [1, 1]} : vector<2x128xf32> to vector<2x32xf32>
    %1009 = vector.extract_strided_slice %1004 {offsets = [0, 96], sizes = [2, 32], strides = [1, 1]} : vector<2x128xf32> to vector<2x32xf32>
    %1010 = arith.mulf %1007, %991 : vector<2x32xf32>
    %1011 = arith.mulf %1006, %1008 : vector<2x32xf32>
    %1012 = arith.addf %1010, %1011 : vector<2x32xf32>
    %1013 = math.tanh %1012 : vector<2x32xf32>
    %1014 = arith.mulf %1009, %1013 : vector<2x32xf32>
    %c6_349 = arith.constant 6 : index
    %c0_350 = arith.constant 0 : index
    %c0_351 = arith.constant 0 : index
    %1015 = vector.load %arg24[%c6_349, %c0_350, %c0_351] : memref<8x2x32xf32, #tpu.memory_space<vmem>>, vector<1x2x32xf32>
    %1016 = vector.shape_cast %1015 : vector<1x2x32xf32> to vector<2x32xf32>
    %1017 = vector.shape_cast %1014 : vector<2x32xf32> to vector<1x2x32xf32>
    tpu.vector_store %arg24[%c6_349, %c0_350, %c0_351], %1017 {strides = array<i32>} : memref<8x2x32xf32, #tpu.memory_space<vmem>>, vector<1x2x32xf32>,
    %1018 = vector.extract_strided_slice %867 {offsets = [14, 0], sizes = [2, 128], strides = [1, 1]} : vector<16x128xf32> to vector<2x128xf32>
    %cst_352 = arith.constant dense<0.000000e+00> : vector<2x128xf32>
    %1019 = tpu.matmul %1014, %868, %cst_352 {dimension_numbers = #tpu.dot_dimension_numbers<[1], [0], [0], [1], [0, 0, 1, 1], [], []>} : vector<2x32xf32>, vector<32x128xf32>, vector<2x128xf32> -> vector<2x128xf32>
    %1020 = arith.addf %1018, %1019 : vector<2x128xf32>
    %1021 = arith.negf %1020 : vector<2x128xf32>
    %1022 = math.exp %1021 : vector<2x128xf32>
    %cst_353 = arith.constant 1.000000e+00 : f32
    %1023 = vector.broadcast %cst_353 : f32 to vector<2x128xf32>
    %1024 = arith.addf %1023, %1022 : vector<2x128xf32>
    %1025 = arith.divf %1023, %1024 : vector<2x128xf32>
    %1026 = math.tanh %1020 : vector<2x128xf32>
    %1027 = vector.extract_strided_slice %1025 {offsets = [0, 0], sizes = [2, 32], strides = [1, 1]} : vector<2x128xf32> to vector<2x32xf32>
    %1028 = vector.extract_strided_slice %1025 {offsets = [0, 32], sizes = [2, 32], strides = [1, 1]} : vector<2x128xf32> to vector<2x32xf32>
    %1029 = vector.extract_strided_slice %1026 {offsets = [0, 64], sizes = [2, 32], strides = [1, 1]} : vector<2x128xf32> to vector<2x32xf32>
    %1030 = vector.extract_strided_slice %1025 {offsets = [0, 96], sizes = [2, 32], strides = [1, 1]} : vector<2x128xf32> to vector<2x32xf32>
    %1031 = arith.mulf %1028, %1012 : vector<2x32xf32>
    %1032 = arith.mulf %1027, %1029 : vector<2x32xf32>
    %1033 = arith.addf %1031, %1032 : vector<2x32xf32>
    %1034 = math.tanh %1033 : vector<2x32xf32>
    %1035 = arith.mulf %1030, %1034 : vector<2x32xf32>
    %c7_354 = arith.constant 7 : index
    %c0_355 = arith.constant 0 : index
    %c0_356 = arith.constant 0 : index
    %1036 = vector.load %arg24[%c7_354, %c0_355, %c0_356] : memref<8x2x32xf32, #tpu.memory_space<vmem>>, vector<1x2x32xf32>
    %1037 = vector.shape_cast %1036 : vector<1x2x32xf32> to vector<2x32xf32>
    %1038 = vector.shape_cast %1035 : vector<2x32xf32> to vector<1x2x32xf32>
    tpu.vector_store %arg24[%c7_354, %c0_355, %c0_356], %1038 {strides = array<i32>} : memref<8x2x32xf32, #tpu.memory_space<vmem>>, vector<1x2x32xf32>,
    %c0_357 = arith.constant 0 : index
    %c0_358 = arith.constant 0 : index
    %1039 = vector.load %arg12[%c0_357, %c0_358] : memref<32x128xf32, #tpu.memory_space<vmem>>, vector<32x128xf32>
    %c0_359 = arith.constant 0 : index
    %c0_360 = arith.constant 0 : index
    %1040 = vector.load %arg13[%c0_359, %c0_360] : memref<32x128xf32, #tpu.memory_space<vmem>>, vector<32x128xf32>
    %c0_361 = arith.constant 0 : index
    %c0_362 = arith.constant 0 : index
    %1041 = vector.load %arg14[%c0_361, %c0_362] : memref<1x128xf32, #tpu.memory_space<vmem>>, vector<1x128xf32>
    %c0_363 = arith.constant 0 : index
    %c0_364 = arith.constant 0 : index
    %1042 = vector.load %arg15[%c0_363, %c0_364] : memref<1x128xf32, #tpu.memory_space<vmem>>, vector<1x128xf32>
    %c0_365 = arith.constant 0 : index
    %c0_366 = arith.constant 0 : index
    %1043 = vector.load %arg16[%c0_365, %c0_366] : memref<1x1xf32, #tpu.memory_space<vmem>>, vector<1x1xf32>
    %cst_367 = arith.constant dense<0.000000e+00> : vector<2x128xf32>
    %1044 = tpu.matmul %1035, %1040, %cst_367 {dimension_numbers = #tpu.dot_dimension_numbers<[1], [0], [0], [1], [0, 0, 1, 1], [], []>} : vector<2x32xf32>, vector<32x128xf32>, vector<2x128xf32> -> vector<2x128xf32>
    %1045 = vector.broadcast %1041 : vector<1x128xf32> to vector<2x128xf32>
    %1046 = arith.addf %1044, %1045 : vector<2x128xf32>
    %cst_368 = arith.constant 0xFF800000 : f32
    %1047 = vector.broadcast %cst_368 : f32 to vector<2x1xf32>
    %c0_369 = arith.constant 0 : index
    %c0_370 = arith.constant 0 : index
    %c0_371 = arith.constant 0 : index
    %1048 = vector.load %arg24[%c0_369, %c0_370, %c0_371] : memref<8x2x32xf32, #tpu.memory_space<vmem>>, vector<1x2x32xf32>
    %1049 = vector.shape_cast %1048 : vector<1x2x32xf32> to vector<2x32xf32>
    %cst_372 = arith.constant dense<0.000000e+00> : vector<2x128xf32>
    %1050 = tpu.matmul %1049, %1039, %cst_372 {dimension_numbers = #tpu.dot_dimension_numbers<[1], [0], [0], [1], [0, 0, 1, 1], [], []>} : vector<2x32xf32>, vector<32x128xf32>, vector<2x128xf32> -> vector<2x128xf32>
    %1051 = arith.addf %1050, %1046 : vector<2x128xf32>
    %cst_373 = arith.constant 0.000000e+00 : f32
    %1052 = vector.broadcast %cst_373 : f32 to vector<2x128xf32>
    %1053 = arith.maximumf %1051, %1052 : vector<2x128xf32>
    %1054 = vector.broadcast %1042 : vector<1x128xf32> to vector<2x128xf32>
    %1055 = arith.mulf %1053, %1054 : vector<2x128xf32>
    %cst_374 = arith.constant dense<0.000000e+00> : vector<2xf32>
    %1056 = vector.multi_reduction <add>, %1055, %cst_374 [1] : vector<2x128xf32> to vector<2xf32>
    %1057 = vector.shape_cast %1056 : vector<2xf32> to vector<2x1xf32>
    %1058 = vector.broadcast %1043 : vector<1x1xf32> to vector<2x1xf32>
    %1059 = arith.addf %1057, %1058 : vector<2x1xf32>
    %1060 = arith.maximumf %1047, %1059 : vector<2x1xf32>
    %c1_375 = arith.constant 1 : index
    %c0_376 = arith.constant 0 : index
    %c0_377 = arith.constant 0 : index
    %1061 = vector.load %arg24[%c1_375, %c0_376, %c0_377] : memref<8x2x32xf32, #tpu.memory_space<vmem>>, vector<1x2x32xf32>
    %1062 = vector.shape_cast %1061 : vector<1x2x32xf32> to vector<2x32xf32>
    %cst_378 = arith.constant dense<0.000000e+00> : vector<2x128xf32>
    %1063 = tpu.matmul %1062, %1039, %cst_378 {dimension_numbers = #tpu.dot_dimension_numbers<[1], [0], [0], [1], [0, 0, 1, 1], [], []>} : vector<2x32xf32>, vector<32x128xf32>, vector<2x128xf32> -> vector<2x128xf32>
    %1064 = arith.addf %1063, %1046 : vector<2x128xf32>
    %cst_379 = arith.constant 0.000000e+00 : f32
    %1065 = vector.broadcast %cst_379 : f32 to vector<2x128xf32>
    %1066 = arith.maximumf %1064, %1065 : vector<2x128xf32>
    %1067 = vector.broadcast %1042 : vector<1x128xf32> to vector<2x128xf32>
    %1068 = arith.mulf %1066, %1067 : vector<2x128xf32>
    %cst_380 = arith.constant dense<0.000000e+00> : vector<2xf32>
    %1069 = vector.multi_reduction <add>, %1068, %cst_380 [1] : vector<2x128xf32> to vector<2xf32>
    %1070 = vector.shape_cast %1069 : vector<2xf32> to vector<2x1xf32>
    %1071 = vector.broadcast %1043 : vector<1x1xf32> to vector<2x1xf32>
    %1072 = arith.addf %1070, %1071 : vector<2x1xf32>
    %1073 = arith.maximumf %1060, %1072 : vector<2x1xf32>
    %c2_381 = arith.constant 2 : index
    %c0_382 = arith.constant 0 : index
    %c0_383 = arith.constant 0 : index
    %1074 = vector.load %arg24[%c2_381, %c0_382, %c0_383] : memref<8x2x32xf32, #tpu.memory_space<vmem>>, vector<1x2x32xf32>
    %1075 = vector.shape_cast %1074 : vector<1x2x32xf32> to vector<2x32xf32>
    %cst_384 = arith.constant dense<0.000000e+00> : vector<2x128xf32>
    %1076 = tpu.matmul %1075, %1039, %cst_384 {dimension_numbers = #tpu.dot_dimension_numbers<[1], [0], [0], [1], [0, 0, 1, 1], [], []>} : vector<2x32xf32>, vector<32x128xf32>, vector<2x128xf32> -> vector<2x128xf32>
    %1077 = arith.addf %1076, %1046 : vector<2x128xf32>
    %cst_385 = arith.constant 0.000000e+00 : f32
    %1078 = vector.broadcast %cst_385 : f32 to vector<2x128xf32>
    %1079 = arith.maximumf %1077, %1078 : vector<2x128xf32>
    %1080 = vector.broadcast %1042 : vector<1x128xf32> to vector<2x128xf32>
    %1081 = arith.mulf %1079, %1080 : vector<2x128xf32>
    %cst_386 = arith.constant dense<0.000000e+00> : vector<2xf32>
    %1082 = vector.multi_reduction <add>, %1081, %cst_386 [1] : vector<2x128xf32> to vector<2xf32>
    %1083 = vector.shape_cast %1082 : vector<2xf32> to vector<2x1xf32>
    %1084 = vector.broadcast %1043 : vector<1x1xf32> to vector<2x1xf32>
    %1085 = arith.addf %1083, %1084 : vector<2x1xf32>
    %1086 = arith.maximumf %1073, %1085 : vector<2x1xf32>
    %c3_387 = arith.constant 3 : index
    %c0_388 = arith.constant 0 : index
    %c0_389 = arith.constant 0 : index
    %1087 = vector.load %arg24[%c3_387, %c0_388, %c0_389] : memref<8x2x32xf32, #tpu.memory_space<vmem>>, vector<1x2x32xf32>
    %1088 = vector.shape_cast %1087 : vector<1x2x32xf32> to vector<2x32xf32>
    %cst_390 = arith.constant dense<0.000000e+00> : vector<2x128xf32>
    %1089 = tpu.matmul %1088, %1039, %cst_390 {dimension_numbers = #tpu.dot_dimension_numbers<[1], [0], [0], [1], [0, 0, 1, 1], [], []>} : vector<2x32xf32>, vector<32x128xf32>, vector<2x128xf32> -> vector<2x128xf32>
    %1090 = arith.addf %1089, %1046 : vector<2x128xf32>
    %cst_391 = arith.constant 0.000000e+00 : f32
    %1091 = vector.broadcast %cst_391 : f32 to vector<2x128xf32>
    %1092 = arith.maximumf %1090, %1091 : vector<2x128xf32>
    %1093 = vector.broadcast %1042 : vector<1x128xf32> to vector<2x128xf32>
    %1094 = arith.mulf %1092, %1093 : vector<2x128xf32>
    %cst_392 = arith.constant dense<0.000000e+00> : vector<2xf32>
    %1095 = vector.multi_reduction <add>, %1094, %cst_392 [1] : vector<2x128xf32> to vector<2xf32>
    %1096 = vector.shape_cast %1095 : vector<2xf32> to vector<2x1xf32>
    %1097 = vector.broadcast %1043 : vector<1x1xf32> to vector<2x1xf32>
    %1098 = arith.addf %1096, %1097 : vector<2x1xf32>
    %1099 = arith.maximumf %1086, %1098 : vector<2x1xf32>
    %c4_393 = arith.constant 4 : index
    %c0_394 = arith.constant 0 : index
    %c0_395 = arith.constant 0 : index
    %1100 = vector.load %arg24[%c4_393, %c0_394, %c0_395] : memref<8x2x32xf32, #tpu.memory_space<vmem>>, vector<1x2x32xf32>
    %1101 = vector.shape_cast %1100 : vector<1x2x32xf32> to vector<2x32xf32>
    %cst_396 = arith.constant dense<0.000000e+00> : vector<2x128xf32>
    %1102 = tpu.matmul %1101, %1039, %cst_396 {dimension_numbers = #tpu.dot_dimension_numbers<[1], [0], [0], [1], [0, 0, 1, 1], [], []>} : vector<2x32xf32>, vector<32x128xf32>, vector<2x128xf32> -> vector<2x128xf32>
    %1103 = arith.addf %1102, %1046 : vector<2x128xf32>
    %cst_397 = arith.constant 0.000000e+00 : f32
    %1104 = vector.broadcast %cst_397 : f32 to vector<2x128xf32>
    %1105 = arith.maximumf %1103, %1104 : vector<2x128xf32>
    %1106 = vector.broadcast %1042 : vector<1x128xf32> to vector<2x128xf32>
    %1107 = arith.mulf %1105, %1106 : vector<2x128xf32>
    %cst_398 = arith.constant dense<0.000000e+00> : vector<2xf32>
    %1108 = vector.multi_reduction <add>, %1107, %cst_398 [1] : vector<2x128xf32> to vector<2xf32>
    %1109 = vector.shape_cast %1108 : vector<2xf32> to vector<2x1xf32>
    %1110 = vector.broadcast %1043 : vector<1x1xf32> to vector<2x1xf32>
    %1111 = arith.addf %1109, %1110 : vector<2x1xf32>
    %1112 = arith.maximumf %1099, %1111 : vector<2x1xf32>
    %c5_399 = arith.constant 5 : index
    %c0_400 = arith.constant 0 : index
    %c0_401 = arith.constant 0 : index
    %1113 = vector.load %arg24[%c5_399, %c0_400, %c0_401] : memref<8x2x32xf32, #tpu.memory_space<vmem>>, vector<1x2x32xf32>
    %1114 = vector.shape_cast %1113 : vector<1x2x32xf32> to vector<2x32xf32>
    %cst_402 = arith.constant dense<0.000000e+00> : vector<2x128xf32>
    %1115 = tpu.matmul %1114, %1039, %cst_402 {dimension_numbers = #tpu.dot_dimension_numbers<[1], [0], [0], [1], [0, 0, 1, 1], [], []>} : vector<2x32xf32>, vector<32x128xf32>, vector<2x128xf32> -> vector<2x128xf32>
    %1116 = arith.addf %1115, %1046 : vector<2x128xf32>
    %cst_403 = arith.constant 0.000000e+00 : f32
    %1117 = vector.broadcast %cst_403 : f32 to vector<2x128xf32>
    %1118 = arith.maximumf %1116, %1117 : vector<2x128xf32>
    %1119 = vector.broadcast %1042 : vector<1x128xf32> to vector<2x128xf32>
    %1120 = arith.mulf %1118, %1119 : vector<2x128xf32>
    %cst_404 = arith.constant dense<0.000000e+00> : vector<2xf32>
    %1121 = vector.multi_reduction <add>, %1120, %cst_404 [1] : vector<2x128xf32> to vector<2xf32>
    %1122 = vector.shape_cast %1121 : vector<2xf32> to vector<2x1xf32>
    %1123 = vector.broadcast %1043 : vector<1x1xf32> to vector<2x1xf32>
    %1124 = arith.addf %1122, %1123 : vector<2x1xf32>
    %1125 = arith.maximumf %1112, %1124 : vector<2x1xf32>
    %c6_405 = arith.constant 6 : index
    %c0_406 = arith.constant 0 : index
    %c0_407 = arith.constant 0 : index
    %1126 = vector.load %arg24[%c6_405, %c0_406, %c0_407] : memref<8x2x32xf32, #tpu.memory_space<vmem>>, vector<1x2x32xf32>
    %1127 = vector.shape_cast %1126 : vector<1x2x32xf32> to vector<2x32xf32>
    %cst_408 = arith.constant dense<0.000000e+00> : vector<2x128xf32>
    %1128 = tpu.matmul %1127, %1039, %cst_408 {dimension_numbers = #tpu.dot_dimension_numbers<[1], [0], [0], [1], [0, 0, 1, 1], [], []>} : vector<2x32xf32>, vector<32x128xf32>, vector<2x128xf32> -> vector<2x128xf32>
    %1129 = arith.addf %1128, %1046 : vector<2x128xf32>
    %cst_409 = arith.constant 0.000000e+00 : f32
    %1130 = vector.broadcast %cst_409 : f32 to vector<2x128xf32>
    %1131 = arith.maximumf %1129, %1130 : vector<2x128xf32>
    %1132 = vector.broadcast %1042 : vector<1x128xf32> to vector<2x128xf32>
    %1133 = arith.mulf %1131, %1132 : vector<2x128xf32>
    %cst_410 = arith.constant dense<0.000000e+00> : vector<2xf32>
    %1134 = vector.multi_reduction <add>, %1133, %cst_410 [1] : vector<2x128xf32> to vector<2xf32>
    %1135 = vector.shape_cast %1134 : vector<2xf32> to vector<2x1xf32>
    %1136 = vector.broadcast %1043 : vector<1x1xf32> to vector<2x1xf32>
    %1137 = arith.addf %1135, %1136 : vector<2x1xf32>
    %1138 = arith.maximumf %1125, %1137 : vector<2x1xf32>
    %c7_411 = arith.constant 7 : index
    %c0_412 = arith.constant 0 : index
    %c0_413 = arith.constant 0 : index
    %1139 = vector.load %arg24[%c7_411, %c0_412, %c0_413] : memref<8x2x32xf32, #tpu.memory_space<vmem>>, vector<1x2x32xf32>
    %1140 = vector.shape_cast %1139 : vector<1x2x32xf32> to vector<2x32xf32>
    %cst_414 = arith.constant dense<0.000000e+00> : vector<2x128xf32>
    %1141 = tpu.matmul %1140, %1039, %cst_414 {dimension_numbers = #tpu.dot_dimension_numbers<[1], [0], [0], [1], [0, 0, 1, 1], [], []>} : vector<2x32xf32>, vector<32x128xf32>, vector<2x128xf32> -> vector<2x128xf32>
    %1142 = arith.addf %1141, %1046 : vector<2x128xf32>
    %cst_415 = arith.constant 0.000000e+00 : f32
    %1143 = vector.broadcast %cst_415 : f32 to vector<2x128xf32>
    %1144 = arith.maximumf %1142, %1143 : vector<2x128xf32>
    %1145 = vector.broadcast %1042 : vector<1x128xf32> to vector<2x128xf32>
    %1146 = arith.mulf %1144, %1145 : vector<2x128xf32>
    %cst_416 = arith.constant dense<0.000000e+00> : vector<2xf32>
    %1147 = vector.multi_reduction <add>, %1146, %cst_416 [1] : vector<2x128xf32> to vector<2xf32>
    %1148 = vector.shape_cast %1147 : vector<2xf32> to vector<2x1xf32>
    %1149 = vector.broadcast %1043 : vector<1x1xf32> to vector<2x1xf32>
    %1150 = arith.addf %1148, %1149 : vector<2x1xf32>
    %1151 = arith.maximumf %1138, %1150 : vector<2x1xf32>
    %cst_417 = arith.constant 0.000000e+00 : f32
    %1152 = vector.broadcast %cst_417 : f32 to vector<2x1xf32>
    %cst_418 = arith.constant 0.000000e+00 : f32
    %1153 = vector.broadcast %cst_418 : f32 to vector<2x32xf32>
    %1154 = arith.subf %1059, %1151 : vector<2x1xf32>
    %1155 = math.exp %1154 : vector<2x1xf32>
    %1156 = arith.addf %1152, %1155 : vector<2x1xf32>
    %c0_419 = arith.constant 0 : index
    %c0_420 = arith.constant 0 : index
    %c0_421 = arith.constant 0 : index
    %1157 = vector.load %arg24[%c0_419, %c0_420, %c0_421] : memref<8x2x32xf32, #tpu.memory_space<vmem>>, vector<1x2x32xf32>
    %1158 = vector.shape_cast %1157 : vector<1x2x32xf32> to vector<2x32xf32>
    %1159 = vector.broadcast %1155 : vector<2x1xf32> to vector<2x32xf32>
    %1160 = arith.mulf %1159, %1158 : vector<2x32xf32>
    %1161 = arith.addf %1153, %1160 : vector<2x32xf32>
    %1162 = arith.subf %1072, %1151 : vector<2x1xf32>
    %1163 = math.exp %1162 : vector<2x1xf32>
    %1164 = arith.addf %1156, %1163 : vector<2x1xf32>
    %c1_422 = arith.constant 1 : index
    %c0_423 = arith.constant 0 : index
    %c0_424 = arith.constant 0 : index
    %1165 = vector.load %arg24[%c1_422, %c0_423, %c0_424] : memref<8x2x32xf32, #tpu.memory_space<vmem>>, vector<1x2x32xf32>
    %1166 = vector.shape_cast %1165 : vector<1x2x32xf32> to vector<2x32xf32>
    %1167 = vector.broadcast %1163 : vector<2x1xf32> to vector<2x32xf32>
    %1168 = arith.mulf %1167, %1166 : vector<2x32xf32>
    %1169 = arith.addf %1161, %1168 : vector<2x32xf32>
    %1170 = arith.subf %1085, %1151 : vector<2x1xf32>
    %1171 = math.exp %1170 : vector<2x1xf32>
    %1172 = arith.addf %1164, %1171 : vector<2x1xf32>
    %c2_425 = arith.constant 2 : index
    %c0_426 = arith.constant 0 : index
    %c0_427 = arith.constant 0 : index
    %1173 = vector.load %arg24[%c2_425, %c0_426, %c0_427] : memref<8x2x32xf32, #tpu.memory_space<vmem>>, vector<1x2x32xf32>
    %1174 = vector.shape_cast %1173 : vector<1x2x32xf32> to vector<2x32xf32>
    %1175 = vector.broadcast %1171 : vector<2x1xf32> to vector<2x32xf32>
    %1176 = arith.mulf %1175, %1174 : vector<2x32xf32>
    %1177 = arith.addf %1169, %1176 : vector<2x32xf32>
    %1178 = arith.subf %1098, %1151 : vector<2x1xf32>
    %1179 = math.exp %1178 : vector<2x1xf32>
    %1180 = arith.addf %1172, %1179 : vector<2x1xf32>
    %c3_428 = arith.constant 3 : index
    %c0_429 = arith.constant 0 : index
    %c0_430 = arith.constant 0 : index
    %1181 = vector.load %arg24[%c3_428, %c0_429, %c0_430] : memref<8x2x32xf32, #tpu.memory_space<vmem>>, vector<1x2x32xf32>
    %1182 = vector.shape_cast %1181 : vector<1x2x32xf32> to vector<2x32xf32>
    %1183 = vector.broadcast %1179 : vector<2x1xf32> to vector<2x32xf32>
    %1184 = arith.mulf %1183, %1182 : vector<2x32xf32>
    %1185 = arith.addf %1177, %1184 : vector<2x32xf32>
    %1186 = arith.subf %1111, %1151 : vector<2x1xf32>
    %1187 = math.exp %1186 : vector<2x1xf32>
    %1188 = arith.addf %1180, %1187 : vector<2x1xf32>
    %c4_431 = arith.constant 4 : index
    %c0_432 = arith.constant 0 : index
    %c0_433 = arith.constant 0 : index
    %1189 = vector.load %arg24[%c4_431, %c0_432, %c0_433] : memref<8x2x32xf32, #tpu.memory_space<vmem>>, vector<1x2x32xf32>
    %1190 = vector.shape_cast %1189 : vector<1x2x32xf32> to vector<2x32xf32>
    %1191 = vector.broadcast %1187 : vector<2x1xf32> to vector<2x32xf32>
    %1192 = arith.mulf %1191, %1190 : vector<2x32xf32>
    %1193 = arith.addf %1185, %1192 : vector<2x32xf32>
    %1194 = arith.subf %1124, %1151 : vector<2x1xf32>
    %1195 = math.exp %1194 : vector<2x1xf32>
    %1196 = arith.addf %1188, %1195 : vector<2x1xf32>
    %c5_434 = arith.constant 5 : index
    %c0_435 = arith.constant 0 : index
    %c0_436 = arith.constant 0 : index
    %1197 = vector.load %arg24[%c5_434, %c0_435, %c0_436] : memref<8x2x32xf32, #tpu.memory_space<vmem>>, vector<1x2x32xf32>
    %1198 = vector.shape_cast %1197 : vector<1x2x32xf32> to vector<2x32xf32>
    %1199 = vector.broadcast %1195 : vector<2x1xf32> to vector<2x32xf32>
    %1200 = arith.mulf %1199, %1198 : vector<2x32xf32>
    %1201 = arith.addf %1193, %1200 : vector<2x32xf32>
    %1202 = arith.subf %1137, %1151 : vector<2x1xf32>
    %1203 = math.exp %1202 : vector<2x1xf32>
    %1204 = arith.addf %1196, %1203 : vector<2x1xf32>
    %c6_437 = arith.constant 6 : index
    %c0_438 = arith.constant 0 : index
    %c0_439 = arith.constant 0 : index
    %1205 = vector.load %arg24[%c6_437, %c0_438, %c0_439] : memref<8x2x32xf32, #tpu.memory_space<vmem>>, vector<1x2x32xf32>
    %1206 = vector.shape_cast %1205 : vector<1x2x32xf32> to vector<2x32xf32>
    %1207 = vector.broadcast %1203 : vector<2x1xf32> to vector<2x32xf32>
    %1208 = arith.mulf %1207, %1206 : vector<2x32xf32>
    %1209 = arith.addf %1201, %1208 : vector<2x32xf32>
    %1210 = arith.subf %1150, %1151 : vector<2x1xf32>
    %1211 = math.exp %1210 : vector<2x1xf32>
    %1212 = arith.addf %1204, %1211 : vector<2x1xf32>
    %c7_440 = arith.constant 7 : index
    %c0_441 = arith.constant 0 : index
    %c0_442 = arith.constant 0 : index
    %1213 = vector.load %arg24[%c7_440, %c0_441, %c0_442] : memref<8x2x32xf32, #tpu.memory_space<vmem>>, vector<1x2x32xf32>
    %1214 = vector.shape_cast %1213 : vector<1x2x32xf32> to vector<2x32xf32>
    %1215 = vector.broadcast %1211 : vector<2x1xf32> to vector<2x32xf32>
    %1216 = arith.mulf %1215, %1214 : vector<2x32xf32>
    %1217 = arith.addf %1209, %1216 : vector<2x32xf32>
    %1218 = vector.broadcast %1212 : vector<2x1xf32> to vector<2x32xf32>
    %1219 = arith.divf %1217, %1218 : vector<2x32xf32>
    %c0_443 = arith.constant 0 : index
    %c0_444 = arith.constant 0 : index
    %1220 = vector.load %arg17[%c0_443, %c0_444] : memref<32x200xf32, #tpu.memory_space<vmem>>, vector<32x200xf32>
    %cst_445 = arith.constant dense<0.000000e+00> : vector<2x200xf32>
    %1221 = tpu.matmul %1219, %1220, %cst_445 {dimension_numbers = #tpu.dot_dimension_numbers<[1], [0], [0], [1], [0, 0, 1, 1], [], []>} : vector<2x32xf32>, vector<32x200xf32>, vector<2x200xf32> -> vector<2x200xf32>
    %c0_446 = arith.constant 0 : index
    %c0_447 = arith.constant 0 : index
    %1222 = vector.load %arg18[%c0_446, %c0_447] : memref<1x200xf32, #tpu.memory_space<vmem>>, vector<1x200xf32>
    %1223 = vector.broadcast %1222 : vector<1x200xf32> to vector<2x200xf32>
    %1224 = arith.addf %1221, %1223 : vector<2x200xf32>
    %cst_448 = arith.constant 0.000000e+00 : f32
    %1225 = vector.broadcast %cst_448 : f32 to vector<2x200xf32>
    %1226 = arith.maximumf %1224, %1225 : vector<2x200xf32>
    %c0_449 = arith.constant 0 : index
    %c0_450 = arith.constant 0 : index
    %1227 = vector.load %arg19[%c0_449, %c0_450] : memref<200x2xf32, #tpu.memory_space<vmem>>, vector<200x2xf32>
    %cst_451 = arith.constant dense<0.000000e+00> : vector<2x2xf32>
    %1228 = tpu.matmul %1226, %1227, %cst_451 {dimension_numbers = #tpu.dot_dimension_numbers<[1], [0], [0], [1], [0, 0, 1, 1], [], []>} : vector<2x200xf32>, vector<200x2xf32>, vector<2x2xf32> -> vector<2x2xf32>
    %c0_452 = arith.constant 0 : index
    %c0_453 = arith.constant 0 : index
    %1229 = vector.load %arg20[%c0_452, %c0_453] : memref<1x2xf32, #tpu.memory_space<vmem>>, vector<1x2xf32>
    %1230 = vector.broadcast %1229 : vector<1x2xf32> to vector<2x2xf32>
    %1231 = arith.addf %1228, %1230 : vector<2x2xf32>
    %1232 = arith.negf %1231 : vector<2x2xf32>
    %1233 = math.exp %1232 : vector<2x2xf32>
    %cst_454 = arith.constant 1.000000e+00 : f32
    %1234 = vector.broadcast %cst_454 : f32 to vector<2x2xf32>
    %1235 = arith.addf %1234, %1233 : vector<2x2xf32>
    %1236 = arith.divf %1234, %1235 : vector<2x2xf32>
    %c0_455 = arith.constant 0 : index
    %c0_456 = arith.constant 0 : index
    %1237 = vector.load %arg21[%c0_455, %c0_456] : memref<2x2xf32, #tpu.memory_space<vmem>>, vector<2x2xf32>
    tpu.vector_store %arg21[%c0_455, %c0_456], %1236 {strides = array<i32>} : memref<2x2xf32, #tpu.memory_space<vmem>>, vector<2x2xf32>,
    return
  }
}

</mosaic_0001>

<bundles_post_ra>
// kernel: lstm_model_forward.1
= control target key start
LH: loop header
LB: loop body
LE: loop exit
PB: predicated region body
PF: predicated region fallthrough
CT: control target
= control target key end

     0   :  { %s12034_s0 = inlined_call_operand.vmem [shape: f32[320,10], index: 0, kind: input, shape index: {}]   ;;  %s12035_s1 = inlined_call_operand.vmem [shape: f32[10,128], index: 1, kind: input, shape index: {}]   ;;  %s12036_s2 = inlined_call_operand.vmem [shape: f32[32,128], index: 2, kind: input, shape index: {}]   ;;  %s12037_s3 = inlined_call_operand.vmem [shape: f32[1,128], index: 3, kind: input, shape index: {}]   ;;  %s12038_s4 = inlined_call_operand.vmem [shape: f32[32,64], index: 4, kind: input, shape index: {}]   ;;  %s12039_s5 = inlined_call_operand.vmem [shape: f32[32,64], index: 5, kind: input, shape index: {}]   ;;  %s12040_s6 = inlined_call_operand.vmem [shape: f32[1,64], index: 6, kind: input, shape index: {}]   ;;  %s12041_s7 = inlined_call_operand.vmem [shape: f32[1,64], index: 7, kind: input, shape index: {}]   ;;  %s12042_s8 = inlined_call_operand.<no memory space> [shape: f32[1,1], index: 8, kind: input, shape index: {}]   ;;  %s12043_s9 = inlined_call_operand.vmem [shape: f32[32,128], index: 9, kind: input, shape index: {}]   ;;  %s12044_s10 = inlined_call_operand.vmem [shape: f32[32,128], index: 10, kind: input, shape index: {}]   ;;  %s12045_s11 = inlined_call_operand.vmem [shape: f32[1,128], index: 11, kind: input, shape index: {}]   ;;  %s12046_s12 = inlined_call_operand.vmem [shape: f32[32,128], index: 12, kind: input, shape index: {}]   ;;  %s12047_s13 = inlined_call_operand.vmem [shape: f32[32,128], index: 13, kind: input, shape index: {}]   ;;  %s12048_s14 = inlined_call_operand.vmem [shape: f32[1,128], index: 14, kind: input, shape index: {}]   ;;  %s12049_s15 = inlined_call_operand.vmem [shape: f32[1,128], index: 15, kind: input, shape index: {}]   ;;  %s12050_s17 = inlined_call_operand.vmem [shape: f32[32,200], index: 17, kind: input, shape index: {}]   ;;  %s12051_s18 = inlined_call_operand.vmem [shape: f32[1,200], index: 18, kind: input, shape index: {}]   ;;  %s12052_s19 = inlined_call_operand.vmem [shape: f32[200,2], index: 19, kind: input, shape index: {}]   ;;  %s12053_s20 = inlined_call_operand.vmem [shape: f32[1,2], index: 20, kind: input, shape index: {}]   ;;  %s12054_s21 = inlined_call_operand.hbm [shape: f32[2,2], index: 21, kind: output, shape index: {}]   ;;  %s12055_s16 = inlined_call_operand.<no memory space> [shape: f32[1,1], index: 16, kind: input, shape index: {}]  }
   0x1   :  { %12062 = sst [smem:[#allocation10_spill]] %s12034_s0  ;;  %v26_v0 = vstv %s12042_s8  ;;  %v28_v1 = vstv %s12055_s16 }
   0x2   :  { %12063 = sst [smem:[#allocation11_spill]] %s12035_s1  ;;  %27 = vst [vmem:[#allocation5] sm:$0x1] %v26_v0  ;;  %29 = vst [vmem:[#allocation6] sm:$0x1] %v28_v1 }
   0x3   :  { %12064 = sst [smem:[#allocation12_spill]] %s12036_s2 }
   0x4   :  { %12065 = sst [smem:[#allocation13_spill]] %s12037_s3 }
   0x5   :  { %12066 = sst [smem:[#allocation14_spill]] %s12038_s4 }
   0x6   :  { %12067 = sst [smem:[#allocation15_spill]] %s12039_s5 }
   0x7   :  { %s12068_s29 = sld [smem:[#allocation11_spill]]  ;;  %vm243_vm0 = vcmask 1041408   ;;  %vm122_vm1 = vcmask 80896  }
   0x8   :  { %s12069_s22 = sld [smem:[#allocation10_spill]] }
   0x9   :  { %s12070_s24 = sld [smem:[#allocation12_spill]] }
   0xd   :  { %v114_v2 = vld [vmem:[%s12068_s29 + $0x8] sm:$0x3]  ;;  %v113_v3 = vld [vmem:[%s12068_s29] sm:$0xff] }
   0xe   :  { %v101_v4 = vld [vmem:[%s12069_s22 + $0xe0] sm:$0xff]  ;;  %9232 = vmatprep.subr.msk.mxu1 %vm243_vm0, %v114_v2  ;;  %v102_v5 = vld [vmem:[%s12069_s22 + $0xe8] sm:$0xff]  ;;  %8519 = vmatprep.subr.msk.mxu0 %vm243_vm0, %v114_v2  ;;  %v103_v7 = vld [vmem:[%s12069_s22 + $0xf0] sm:$0xff] }
   0xf   :  { %8565 = vmatprep.mubr.msk.f32.mxu1 %vm122_vm1, %v101_v4  ;;  %9234 = vmatpush3.msk.msra.mxu1 %vm243_vm0, %v114_v2  ;;  %v9946_v6 = vld [vmem:[%s12070_s24 + $0x18] sm:$0xff]  ;;  %v9956_v8 = vld [vmem:[%s12070_s24 + $0x10] sm:$0xff]  ;;  %v73_v9 = vld [vmem:[%s12069_s22] sm:$0xff] }
  0x10   :  { %9233 = vmatprep.subr.mxu1 %v113_v3  ;;  %8520 = vmatpush3.msk.msra.mxu0 %vm243_vm0, %v114_v2  ;;  %v104_v10 = vld [vmem:[%s12069_s22 + $0xf8] sm:$0xff]  ;;  %v9971_v11 = vld [vmem:[%s12070_s24 + $0x8] sm:$0xff]  ;;  %v105_v12 = vld [vmem:[%s12069_s22 + $0x100] sm:$0xff] }
  0x11   :  { %9235 = vmatpush3.msra.mxu1 %v113_v3  ;;  %8521 = vmatprep.subr.mxu0 %v113_v3 }
  0x12   :  { %8566 = vmatmul.mubr.msk.f32.vlgmr.msra.gmra.mxu1 %vm122_vm1, %v102_v5  ;;  %8583 = vmatprep.subr.mxu1 %v9946_v6 }
  0x13   :  { %8584 = vmatpush3.msra.mxu1 %v9946_v6  ;;  %8568 = vmatprep.mubr.msk.f32.mxu1 %vm122_vm1, %v103_v7 }
  0x14   :  { %8585 = vmatprep.subr.mxu1 %v9956_v8  ;;  %8522 = vmatpush3.msra.mxu0 %v113_v3 }
  0x15   :  { %30 = vsyncpa [#allocation8], 0  ;;  %8586 = vmatpush3.msra.mxu1 %v9956_v8  ;;  %v9981_v13 = vld [vmem:[%s12070_s24] sm:$0xff]  ;;  %8523 = vmatprep.mubr.msk.f32.mxu0 %vm122_vm1, %v73_v9  ;;  %v74_v14 = vld [vmem:[%s12069_s22 + $0x8] sm:$0xff]  ;;  %v9806_v22 = vmov 0.0   ;;  %s12071_s26 = sld [smem:[#allocation13_spill]] }
  0x16   :  { %8569 = vmatmul.mubr.msk.f32.gmra.mxu1 %vm122_vm1, %v104_v10  ;;  %8587 = vmatprep.subr.mxu1 %v9971_v11  ;;  %v106_v15 = vld [vmem:[%s12069_s22 + $0x108] sm:$0xff]  ;;  %v107_v16 = vld [vmem:[%s12069_s22 + $0x110] sm:$0xff]  ;;  %v108_v17 = vld [vmem:[%s12069_s22 + $0x118] sm:$0xff]  ;;  %s9807_s27 = smov 64   ;;  %s9808_s3 = smov 32   ;;  %vm558_vm2 = vcmask 261120  }
  0x17   :  { %8571 = vmatprep.mubr.msk.f32.mxu1 %vm122_vm1, %v105_v12  ;;  %8588 = vmatpush3.msra.mxu1 %v9971_v11  ;;  %v109_v18 = vld [vmem:[%s12069_s22 + $0x120] sm:$0xff]  ;;  %v110_v19 = vld [vmem:[%s12069_s22 + $0x128] sm:$0xff]  ;;  %v111_v20 = vld [vmem:[%s12069_s22 + $0x130] sm:$0xff]  ;;  %s12072_s25 = sld [smem:[#allocation14_spill]]  ;;  %vm3584_vm3 = vcmask 523264   ;;  %vm9810_vm4 = vmmov 0  }
  0x18   :  { %8589 = vmatprep.subr.mxu1 %v9981_v13  ;;  %8524 = vmatmul.mubr.msk.f32.vlgmr.msra.gmra.mxu0 %vm122_vm1, %v74_v14  ;;  %v112_v21 = vld [vmem:[%s12069_s22 + $0x138] sm:$0xff]  ;;  %v75_v2 = vld [vmem:[%s12069_s22 + $0x10] sm:$0xff]  ;;  %s12073_s16 = sld [smem:[#allocation15_spill]]  ;;  %vm6091_vm5 = vcmask 254976   ;;  %vm6201_vm6 = vcmask 257026   ;;  %vm6314_vm7 = vcmask 259076  }
  0x19   :  { %8590 = vmatpush3.msra.mxu1 %v9981_v13  ;;  %8693 = vmatprep.subr.mxu0 %v9946_v6  ;;  %v76_v3 = vld [vmem:[%s12069_s22 + $0x18] sm:$0xff]  ;;  %vm6427_vm8 = vcmask 261126   ;;  %vm7845_vm9 = vcmask 588800   ;;  %vm7925_vm10 = vcmask 9216  }
  0x1a   :  { %8572 = vmatmul.mubr.msk.f32.gmra.mxu1 %vm122_vm1, %v106_v15  ;;  %8594 = vmatprep.subr.mxu1 %v9946_v6 }
  0x1b   :  { %8574 = vmatprep.mubr.msk.f32.mxu1 %vm122_vm1, %v107_v16  ;;  %8694 = vmatpush3.msra.mxu0 %v9946_v6  ;;  %v10069_v37 = vld [vmem:[%s12071_s26] ss:$0 sm:$0xff] }
  0x1c   :  { %8695 = vmatprep.subr.mxu0 %v9956_v8  ;;  %8526 = vmatprep.mubr.msk.f32.mxu0 %vm122_vm1, %v75_v2 }
  0x1d   :  { %8696 = vmatpush3.msra.mxu0 %v9956_v8 }
  0x1e   :  { %8575 = vmatmul.mubr.msk.f32.gmra.mxu1 %vm122_vm1, %v108_v17  ;;  %8697 = vmatprep.subr.mxu0 %v9971_v11 }
  0x1f   :  { %8577 = vmatprep.mubr.msk.f32.mxu1 %vm122_vm1, %v109_v18  ;;  %8698 = vmatpush3.msra.mxu0 %v9971_v11 }
  0x20   :  { %8699 = vmatprep.subr.mxu0 %v9981_v13  ;;  %8527 = vmatmul.mubr.msk.f32.gmra.mxu0 %vm122_vm1, %v76_v3 }
  0x21   :  { %8700 = vmatpush3.msra.mxu0 %v9981_v13 }
  0x22   :  { %8578 = vmatmul.mubr.msk.f32.gmra.mxu1 %vm122_vm1, %v110_v19  ;;  %8715 = vmatprep.subr.mxu0 %v9946_v6 }
  0x23   :  { %8580 = vmatprep.mubr.msk.f32.mxu1 %vm122_vm1, %v111_v20 }
  0x26   :  { %8581 = vmatmul.mubr.msk.f32.gmra.mxu1 %vm122_vm1, %v112_v21 }
  0x27   :  { %8591 = vmatprep.mubr.f32.mxu1 %v9806_v22 }
  0x2a   :  { %8592 = vmatmul.mubr.f32.vlgmr.msra.gmra.mxu1 %v9806_v22 }
  0x2b   :  { %8595 = vmatpush3.msra.mxu1 %v9946_v6 }
  0x2c   :  { %8596 = vmatprep.subr.mxu1 %v9956_v8 }
  0x2d   :  { %8597 = vmatpush3.msra.mxu1 %v9956_v8 }
  0x2e   :  { %8598 = vmatprep.subr.mxu1 %v9971_v11 }
  0x2f   :  { %8599 = vmatpush3.msra.mxu1 %v9971_v11 }
  0x30   :  { %8600 = vmatprep.subr.mxu1 %v9981_v13 }
  0x31   :  { %8601 = vmatpush3.msra.mxu1 %v9981_v13 }
  0x32   :  { %8605 = vmatprep.subr.mxu1 %v9946_v6 }
  0xd2   :  { %v10042_v23 = vpop.f32.mrf.mxu1 }
  0xd4   :  { %v10044_v24 = vpop.f32.mrf.mxu1 }
  0xd6   :  { %v10046_v25 = vpop.f32.mrf.mxu1 }
  0xd8   :  { %v10048_v26 = vpop.f32.mrf.mxu1  ;;  %v8525_v33 = vpop.f32.mrf.mxu0 }
  0xd9   :  { %v319_v40 = vadd.f32 %v8525_v33, %v10069_v37 }
  0xda   :  { %v10050_v27 = vpop.f32.mrf.mxu1  ;;  %v313_v36 = vpop.f32.mrf.mxu0 }
  0xdb   :  { %v314_v39 = vadd.f32 %v10069_v37, %v313_v36 }
  0xdc   :  { %v10052_v28 = vpop.f32.mrf.mxu1 }
  0xde   :  { %v10054_v29 = vpop.f32.mrf.mxu1 }
  0xe0   :  { %v10056_v30 = vpop.f32.mrf.mxu1  ;;  %v8528_v14 = vpop.f32.mrf.mxu0 }
  0xe1   :  { %v329_v15 = vadd.f32 %v8528_v14, %v10069_v37 }
  0xe2   :  { %v10058_v31 = vpop.f32.mrf.mxu1  ;;  %v323_v16 = vpop.f32.mrf.mxu0 }
  0xe3   :  { %v324_v18 = vadd.f32 %v10069_v37, %v323_v16 }
  0xe4   :  { %v10060_v32 = vpop.f32.mrf.mxu1 }
  0xe6   :  { %v10062_v34 = vpop.f32.mrf.mxu1 }
  0xe8   :  { %v10064_v35 = vpop.f32.mrf.mxu1 }
  0xea   :  { %v8593_v38 = vpop.f32.mrf.mxu1 }
  0xeb   :  { %v638_v43 = vadd.f32 %v8593_v38, %v319_v40 }
  0xec   :  { %v628_v41 = vpop.f32.mrf.mxu1 }
  0xed   :  { %v637_v42 = vadd.f32 %v628_v41, %v314_v39  ;;  %v7984_v47 = vmul.f32 -1.442695, %v638_v43 }
  0xef   :  { %9244 = vtanh.f32 %v637_v42  ;;  %v7983_v46 = vmul.f32 -1.442695, %v637_v42 }
  0xf0   :  { %9246 = vtanh.f32 %v638_v43 }
  0xf1   :  { %9248 = vpow2.f32 %v7983_v46 }
  0xf2   :  { %9250 = vpow2.f32 %v7984_v47 }
  0xfc   :  { %v9245_v44 = vpop.eup %9244 }
  0xfd   :  { %657 = vrot.lane.b32.xlu0 %v9245_v44, %s9807_s27  ;;  %v9247_v45 = vpop.eup %9246 }
  0xfe   :  { %v9249_v48 = vpop.eup %9248 }
  0xff   :  { %v645_v49 = vadd.f32 1.0, %v9249_v48  ;;  %v9251_v50 = vpop.eup %9250 }
 0x100   :  { %v646_v51 = vadd.f32 1.0, %v9251_v50 }
 0x101   :  { %659 = vrot.lane.b32.xlu0 %v9247_v45, %s9807_s27  ;;  %9252 = vrcp.f32 %v645_v49 }
 0x102   :  { %9254 = vrcp.f32 %v646_v51 }
 0x10e   :  { %v9253_v52 = vpop.eup %9252 }
 0x10f   :  { %v9255_v55 = vpop.eup %9254  ;;  %v653_v58 = vmul.f32 0.0, %v9253_v52 }
 0x110   :  { %v654_v61 = vmul.f32 0.0, %v9255_v55 }
 0x16f   :  { %v658_v53 = vpop.permute.xlu0 %657 }
 0x170   :  { %v663_v54 = vmul.f32 %v9253_v52, %v658_v53 }
 0x172   :  { %667 = vrot.lane.b32.xlu1 %v663_v54, %s9808_s3 }
 0x173   :  { %v660_v56 = vpop.permute.xlu0 %659 }
 0x174   :  { %v664_v57 = vmul.f32 %v9255_v55, %v660_v56  ;;  %v77_v56 = vld [vmem:[%s12069_s22 + $0x20] sm:$0xff] }
 0x175   :  { %8529 = vmatprep.mubr.msk.f32.mxu0 %vm122_vm1, %v77_v56 }
 0x176   :  { %669 = vrot.lane.b32.xlu1 %v664_v57, %s9808_s3 }
 0x1e4   :  { %v668_v59 = vpop.permute.xlu1 %667 }
 0x1e5   :  { %v10077_v60 = vadd.f32 %v668_v59, %v653_v58  ;;  %v78_v59 = vld [vmem:[%s12069_s22 + $0x28] sm:$0xff] }
 0x1e6   :  { %8530 = vmatmul.mubr.msk.f32.gmra.mxu0 %vm122_vm1, %v78_v59 }
 0x1e7   :  { %9256 = vtanh.f32 %v10077_v60 }
 0x1e8   :  { %v670_v62 = vpop.permute.xlu1 %669 }
 0x1e9   :  { %v10080_v63 = vadd.f32 %v670_v62, %v654_v61 }
 0x1eb   :  { %9258 = vtanh.f32 %v10080_v63 }
 0x1f4   :  { %v9257_v0 = vpop.eup %9256 }
 0x1f5   :  { %679 = vrot.lane.b32.xlu0 %v9257_v0, %s9807_s27 }
 0x1f8   :  { %v9259_v1 = vpop.eup %9258 }
 0x1f9   :  { %681 = vrot.lane.b32.xlu1 %v9259_v1, %s9807_s27 }
 0x267   :  { %v680_v4 = vpop.permute.xlu0 %679 }
 0x268   :  { %v685_v5 = vmul.f32 %v9253_v52, %v680_v4 }
 0x26a   :  { %689 = vrot.lane.b32.xlu0 %v685_v5, %s9808_s3 }
 0x26b   :  { %v682_v7 = vpop.permute.xlu1 %681 }
 0x26c   :  { %v686_v9 = vmul.f32 %v9255_v55, %v682_v7 }
 0x26e   :  { %691 = vrot.lane.b32.xlu1 %v686_v9, %s9808_s3 }
 0x2a6   :  { %v8531_v2 = vpop.f32.mrf.mxu0 }
 0x2a7   :  { %v339_v3 = vadd.f32 %v8531_v2, %v10069_v37 }
 0x2a8   :  { %v333_v4 = vpop.f32.mrf.mxu0 }
 0x2a9   :  { %v334_v7 = vadd.f32 %v10069_v37, %v333_v4 }
 0x2dc   :  { %v690_v10 = vpop.permute.xlu0 %689 }
 0x2dd   :  { %695 = vst.msk [vmem:[#allocation3] sm:$0xff] %vm558_vm2, %v690_v10  ;;  %8602 = vmatprep.mubr.msk.f32.mxu1 %vm558_vm2, %v690_v10 }
 0x2e0   :  { %v692_v12 = vpop.permute.xlu1 %691 }
 0x2e1   :  { %696 = vst.msk [vmem:[#allocation3 + $0x8] sm:$0xff] %vm558_vm2, %v692_v12  ;;  %8603 = vmatmul.mubr.msk.f32.vlgmr.msra.gmra.mxu1 %vm558_vm2, %v692_v12 }
 0x2e2   :  { %8606 = vmatpush3.msra.mxu1 %v9946_v6 }
 0x2e3   :  { %8607 = vmatprep.subr.mxu1 %v9956_v8 }
 0x2e4   :  { %8608 = vmatpush3.msra.mxu1 %v9956_v8 }
 0x2e5   :  { %8609 = vmatprep.subr.mxu1 %v9971_v11 }
 0x2e6   :  { %8610 = vmatpush3.msra.mxu1 %v9971_v11 }
 0x2e7   :  { %8611 = vmatprep.subr.mxu1 %v9981_v13 }
 0x2e8   :  { %8612 = vmatpush3.msra.mxu1 %v9981_v13 }
 0x2e9   :  { %8616 = vmatprep.subr.mxu1 %v9946_v6 }
 0x3a1   :  { %v8604_v17 = vpop.f32.mrf.mxu1 }
 0x3a2   :  { %v779_v19 = vadd.f32 %v8604_v17, %v329_v15 }
 0x3a3   :  { %v769_v20 = vpop.f32.mrf.mxu1 }
 0x3a4   :  { %9260 = vtanh.f32 %v779_v19  ;;  %v778_v21 = vadd.f32 %v769_v20, %v324_v18  ;;  %v7988_v38 = vmul.f32 -1.442695, %v779_v19 }
 0x3a6   :  { %9262 = vtanh.f32 %v778_v21  ;;  %v7987_v39 = vmul.f32 -1.442695, %v778_v21 }
 0x3a7   :  { %9264 = vpow2.f32 %v7988_v38 }
 0x3a8   :  { %9266 = vpow2.f32 %v7987_v39 }
 0x3b1   :  { %v9261_v33 = vpop.eup %9260 }
 0x3b2   :  { %800 = vrot.lane.b32.xlu1 %v9261_v33, %s9807_s27 }
 0x3b3   :  { %v9263_v36 = vpop.eup %9262 }
 0x3b4   :  { %798 = vrot.lane.b32.xlu0 %v9263_v36, %s9807_s27  ;;  %v9265_v40 = vpop.eup %9264 }
 0x3b5   :  { %v9267_v41 = vpop.eup %9266  ;;  %v787_v42 = vadd.f32 1.0, %v9265_v40 }
 0x3b6   :  { %v786_v43 = vadd.f32 1.0, %v9267_v41 }
 0x3b7   :  { %9268 = vrcp.f32 %v787_v42 }
 0x3b8   :  { %9270 = vrcp.f32 %v786_v43 }
 0x3c4   :  { %v9269_v44 = vpop.eup %9268 }
 0x3c5   :  { %v9271_v47 = vpop.eup %9270  ;;  %v795_v50 = vmul.f32 %v9269_v44, %v10080_v63 }
 0x3c6   :  { %v794_v53 = vmul.f32 %v9271_v47, %v10077_v60 }
 0x424   :  { %v801_v45 = vpop.permute.xlu1 %800 }
 0x425   :  { %v805_v46 = vmul.f32 %v9269_v44, %v801_v45 }
 0x426   :  { %v799_v48 = vpop.permute.xlu0 %798 }
 0x427   :  { %810 = vrot.lane.b32.xlu1 %v805_v46, %s9808_s3  ;;  %v804_v49 = vmul.f32 %v9271_v47, %v799_v48  ;;  %v79_v48 = vld [vmem:[%s12069_s22 + $0x30] sm:$0xff] }
 0x428   :  { %8532 = vmatprep.mubr.msk.f32.mxu0 %vm122_vm1, %v79_v48 }
 0x429   :  { %808 = vrot.lane.b32.xlu0 %v804_v49, %s9808_s3 }
 0x499   :  { %v811_v51 = vpop.permute.xlu1 %810 }
 0x49a   :  { %v10114_v52 = vadd.f32 %v811_v51, %v795_v50  ;;  %v80_v51 = vld [vmem:[%s12069_s22 + $0x38] sm:$0xff] }
 0x49b   :  { %v809_v54 = vpop.permute.xlu0 %808  ;;  %8533 = vmatmul.mubr.msk.f32.gmra.mxu0 %vm122_vm1, %v80_v51 }
 0x49c   :  { %9272 = vtanh.f32 %v10114_v52  ;;  %v10118_v55 = vadd.f32 %v809_v54, %v794_v53 }
 0x49e   :  { %9274 = vtanh.f32 %v10118_v55 }
 0x4a9   :  { %v9273_v57 = vpop.eup %9272 }
 0x4aa   :  { %822 = vrot.lane.b32.xlu1 %v9273_v57, %s9807_s27 }
 0x4ab   :  { %v9275_v58 = vpop.eup %9274 }
 0x4ac   :  { %820 = vrot.lane.b32.xlu0 %v9275_v58, %s9807_s27 }
 0x51c   :  { %v823_v60 = vpop.permute.xlu1 %822 }
 0x51d   :  { %v827_v61 = vmul.f32 %v9269_v44, %v823_v60 }
 0x51e   :  { %v821_v62 = vpop.permute.xlu0 %820 }
 0x51f   :  { %832 = vrot.lane.b32.xlu1 %v827_v61, %s9808_s3  ;;  %v826_v63 = vmul.f32 %v9271_v47, %v821_v62 }
 0x521   :  { %830 = vrot.lane.b32.xlu0 %v826_v63, %s9808_s3 }
 0x55b   :  { %v8534_v58 = vpop.f32.mrf.mxu0 }
 0x55c   :  { %v349_v59 = vadd.f32 %v8534_v58, %v10069_v37 }
 0x55d   :  { %v343_v60 = vpop.f32.mrf.mxu0 }
 0x55e   :  { %v344_v62 = vadd.f32 %v10069_v37, %v343_v60 }
 0x591   :  { %v833_v0 = vpop.permute.xlu1 %832 }
 0x592   :  { %838 = vst.msk [vmem:[#allocation3 + $0x18] sm:$0xff] %vm558_vm2, %v833_v0 }
 0x593   :  { %v831_v1 = vpop.permute.xlu0 %830 }
 0x594   :  { %837 = vst.msk [vmem:[#allocation3 + $0x10] sm:$0xff] %vm558_vm2, %v831_v1  ;;  %8613 = vmatprep.mubr.msk.f32.mxu1 %vm558_vm2, %v831_v1 }
 0x595   :  { %8614 = vmatmul.mubr.msk.f32.vlgmr.msra.gmra.mxu1 %vm558_vm2, %v833_v0 }
 0x596   :  { %8617 = vmatpush3.msra.mxu1 %v9946_v6 }
 0x597   :  { %8618 = vmatprep.subr.mxu1 %v9956_v8 }
 0x598   :  { %8619 = vmatpush3.msra.mxu1 %v9956_v8 }
 0x599   :  { %8620 = vmatprep.subr.mxu1 %v9971_v11 }
 0x59a   :  { %8621 = vmatpush3.msra.mxu1 %v9971_v11 }
 0x59b   :  { %8622 = vmatprep.subr.mxu1 %v9981_v13 }
 0x59c   :  { %8623 = vmatpush3.msra.mxu1 %v9981_v13 }
 0x59d   :  { %8627 = vmatprep.subr.mxu1 %v9946_v6 }
 0x655   :  { %v8615_v5 = vpop.f32.mrf.mxu1 }
 0x656   :  { %v921_v9 = vadd.f32 %v8615_v5, %v339_v3 }
 0x657   :  { %v911_v10 = vpop.f32.mrf.mxu1 }
 0x658   :  { %9276 = vtanh.f32 %v921_v9  ;;  %v920_v12 = vadd.f32 %v911_v10, %v334_v7  ;;  %v7992_v16 = vmul.f32 -1.442695, %v921_v9 }
 0x65a   :  { %9278 = vtanh.f32 %v920_v12  ;;  %v7991_v17 = vmul.f32 -1.442695, %v920_v12 }
 0x65b   :  { %9280 = vpow2.f32 %v7992_v16 }
 0x65c   :  { %9282 = vpow2.f32 %v7991_v17 }
 0x665   :  { %v9277_v14 = vpop.eup %9276 }
 0x666   :  { %942 = vrot.lane.b32.xlu1 %v9277_v14, %s9807_s27 }
 0x667   :  { %v9279_v15 = vpop.eup %9278 }
 0x668   :  { %940 = vrot.lane.b32.xlu0 %v9279_v15, %s9807_s27  ;;  %v9281_v18 = vpop.eup %9280 }
 0x669   :  { %v9283_v19 = vpop.eup %9282  ;;  %v929_v20 = vadd.f32 1.0, %v9281_v18 }
 0x66a   :  { %v928_v21 = vadd.f32 1.0, %v9283_v19 }
 0x66b   :  { %9284 = vrcp.f32 %v929_v20 }
 0x66c   :  { %9286 = vrcp.f32 %v928_v21 }
 0x678   :  { %v9285_v33 = vpop.eup %9284 }
 0x679   :  { %v9287_v39 = vpop.eup %9286  ;;  %v937_v42 = vmul.f32 %v9285_v33, %v10114_v52 }
 0x67a   :  { %v936_v45 = vmul.f32 %v9287_v39, %v10118_v55 }
 0x6d8   :  { %v943_v36 = vpop.permute.xlu1 %942 }
 0x6d9   :  { %v947_v38 = vmul.f32 %v9285_v33, %v943_v36 }
 0x6da   :  { %v941_v40 = vpop.permute.xlu0 %940 }
 0x6db   :  { %952 = vrot.lane.b32.xlu1 %v947_v38, %s9808_s3  ;;  %v946_v41 = vmul.f32 %v9287_v39, %v941_v40  ;;  %v81_v40 = vld [vmem:[%s12069_s22 + $0x40] sm:$0xff] }
 0x6dc   :  { %8535 = vmatprep.mubr.msk.f32.mxu0 %vm122_vm1, %v81_v40 }
 0x6dd   :  { %950 = vrot.lane.b32.xlu0 %v946_v41, %s9808_s3 }
 0x74d   :  { %v953_v43 = vpop.permute.xlu1 %952 }
 0x74e   :  { %v10152_v44 = vadd.f32 %v953_v43, %v937_v42  ;;  %v82_v43 = vld [vmem:[%s12069_s22 + $0x48] sm:$0xff] }
 0x74f   :  { %v951_v46 = vpop.permute.xlu0 %950  ;;  %8536 = vmatmul.mubr.msk.f32.gmra.mxu0 %vm122_vm1, %v82_v43 }
 0x750   :  { %9288 = vtanh.f32 %v10152_v44  ;;  %v10156_v47 = vadd.f32 %v951_v46, %v936_v45 }
 0x752   :  { %9290 = vtanh.f32 %v10156_v47 }
 0x75d   :  { %v9289_v49 = vpop.eup %9288 }
 0x75e   :  { %964 = vrot.lane.b32.xlu1 %v9289_v49, %s9807_s27 }
 0x75f   :  { %v9291_v50 = vpop.eup %9290 }
 0x760   :  { %962 = vrot.lane.b32.xlu0 %v9291_v50, %s9807_s27 }
 0x7d0   :  { %v965_v52 = vpop.permute.xlu1 %964 }
 0x7d1   :  { %v969_v53 = vmul.f32 %v9285_v33, %v965_v52 }
 0x7d2   :  { %v963_v54 = vpop.permute.xlu0 %962 }
 0x7d3   :  { %974 = vrot.lane.b32.xlu1 %v969_v53, %s9808_s3  ;;  %v968_v55 = vmul.f32 %v9287_v39, %v963_v54 }
 0x7d5   :  { %972 = vrot.lane.b32.xlu0 %v968_v55, %s9808_s3 }
 0x80f   :  { %v8537_v50 = vpop.f32.mrf.mxu0 }
 0x810   :  { %v359_v51 = vadd.f32 %v8537_v50, %v10069_v37 }
 0x811   :  { %v353_v52 = vpop.f32.mrf.mxu0 }
 0x812   :  { %v354_v54 = vadd.f32 %v10069_v37, %v353_v52 }
 0x845   :  { %v975_v56 = vpop.permute.xlu1 %974 }
 0x846   :  { %980 = vst.msk [vmem:[#allocation3 + $0x28] sm:$0xff] %vm558_vm2, %v975_v56 }
 0x847   :  { %v973_v57 = vpop.permute.xlu0 %972 }
 0x848   :  { %979 = vst.msk [vmem:[#allocation3 + $0x20] sm:$0xff] %vm558_vm2, %v973_v57  ;;  %8624 = vmatprep.mubr.msk.f32.mxu1 %vm558_vm2, %v973_v57 }
 0x849   :  { %8625 = vmatmul.mubr.msk.f32.vlgmr.msra.gmra.mxu1 %vm558_vm2, %v975_v56 }
 0x84a   :  { %8628 = vmatpush3.msra.mxu1 %v9946_v6 }
 0x84b   :  { %8629 = vmatprep.subr.mxu1 %v9956_v8 }
 0x84c   :  { %8630 = vmatpush3.msra.mxu1 %v9956_v8 }
 0x84d   :  { %8631 = vmatprep.subr.mxu1 %v9971_v11 }
 0x84e   :  { %8632 = vmatpush3.msra.mxu1 %v9971_v11 }
 0x84f   :  { %8633 = vmatprep.subr.mxu1 %v9981_v13 }
 0x850   :  { %8634 = vmatpush3.msra.mxu1 %v9981_v13 }
 0x851   :  { %8638 = vmatprep.subr.mxu1 %v9946_v6 }
 0x909   :  { %v8626_v61 = vpop.f32.mrf.mxu1 }
 0x90a   :  { %v1063_v63 = vadd.f32 %v8626_v61, %v349_v59 }
 0x90b   :  { %v1053_v0 = vpop.f32.mrf.mxu1 }
 0x90c   :  { %9292 = vtanh.f32 %v1063_v63  ;;  %v1062_v1 = vadd.f32 %v1053_v0, %v344_v62  ;;  %v7996_v4 = vmul.f32 -1.442695, %v1063_v63 }
 0x90e   :  { %9294 = vtanh.f32 %v1062_v1  ;;  %v7995_v5 = vmul.f32 -1.442695, %v1062_v1 }
 0x90f   :  { %9296 = vpow2.f32 %v7996_v4 }
 0x910   :  { %9298 = vpow2.f32 %v7995_v5 }
 0x919   :  { %v9293_v2 = vpop.eup %9292 }
 0x91a   :  { %1084 = vrot.lane.b32.xlu1 %v9293_v2, %s9807_s27 }
 0x91b   :  { %v9295_v3 = vpop.eup %9294 }
 0x91c   :  { %1082 = vrot.lane.b32.xlu0 %v9295_v3, %s9807_s27  ;;  %v9297_v7 = vpop.eup %9296 }
 0x91d   :  { %v9299_v9 = vpop.eup %9298  ;;  %v1071_v10 = vadd.f32 1.0, %v9297_v7 }
 0x91e   :  { %v1070_v12 = vadd.f32 1.0, %v9299_v9 }
 0x91f   :  { %9300 = vrcp.f32 %v1071_v10 }
 0x920   :  { %9302 = vrcp.f32 %v1070_v12 }
 0x92c   :  { %v9301_v14 = vpop.eup %9300 }
 0x92d   :  { %v9303_v17 = vpop.eup %9302  ;;  %v1079_v20 = vmul.f32 %v9301_v14, %v10152_v44 }
 0x92e   :  { %v1078_v36 = vmul.f32 %v9303_v17, %v10156_v47 }
 0x98c   :  { %v1085_v15 = vpop.permute.xlu1 %1084 }
 0x98d   :  { %v1089_v16 = vmul.f32 %v9301_v14, %v1085_v15 }
 0x98e   :  { %v1083_v18 = vpop.permute.xlu0 %1082 }
 0x98f   :  { %1094 = vrot.lane.b32.xlu1 %v1089_v16, %s9808_s3  ;;  %v1088_v19 = vmul.f32 %v9303_v17, %v1083_v18  ;;  %v83_v18 = vld [vmem:[%s12069_s22 + $0x50] sm:$0xff] }
 0x990   :  { %8538 = vmatprep.mubr.msk.f32.mxu0 %vm122_vm1, %v83_v18 }
 0x991   :  { %1092 = vrot.lane.b32.xlu0 %v1088_v19, %s9808_s3 }
 0xa01   :  { %v1095_v21 = vpop.permute.xlu1 %1094 }
 0xa02   :  { %v10190_v33 = vadd.f32 %v1095_v21, %v1079_v20  ;;  %v84_v21 = vld [vmem:[%s12069_s22 + $0x58] sm:$0xff] }
 0xa03   :  { %v1093_v38 = vpop.permute.xlu0 %1092  ;;  %8539 = vmatmul.mubr.msk.f32.gmra.mxu0 %vm122_vm1, %v84_v21 }
 0xa04   :  { %9304 = vtanh.f32 %v10190_v33  ;;  %v10194_v39 = vadd.f32 %v1093_v38, %v1078_v36 }
 0xa06   :  { %9306 = vtanh.f32 %v10194_v39 }
 0xa11   :  { %v9305_v41 = vpop.eup %9304 }
 0xa12   :  { %1106 = vrot.lane.b32.xlu1 %v9305_v41, %s9807_s27 }
 0xa13   :  { %v9307_v42 = vpop.eup %9306 }
 0xa14   :  { %1104 = vrot.lane.b32.xlu0 %v9307_v42, %s9807_s27 }
 0xa84   :  { %v1107_v44 = vpop.permute.xlu1 %1106 }
 0xa85   :  { %v1111_v45 = vmul.f32 %v9301_v14, %v1107_v44 }
 0xa86   :  { %v1105_v46 = vpop.permute.xlu0 %1104 }
 0xa87   :  { %1116 = vrot.lane.b32.xlu1 %v1111_v45, %s9808_s3  ;;  %v1110_v47 = vmul.f32 %v9303_v17, %v1105_v46 }
 0xa89   :  { %1114 = vrot.lane.b32.xlu0 %v1110_v47, %s9808_s3 }
 0xac3   :  { %v8540_v42 = vpop.f32.mrf.mxu0 }
 0xac4   :  { %v369_v43 = vadd.f32 %v8540_v42, %v10069_v37 }
 0xac5   :  { %v363_v44 = vpop.f32.mrf.mxu0 }
 0xac6   :  { %v364_v46 = vadd.f32 %v10069_v37, %v363_v44 }
 0xaf9   :  { %v1117_v48 = vpop.permute.xlu1 %1116 }
 0xafa   :  { %1122 = vst.msk [vmem:[#allocation3 + $0x38] sm:$0xff] %vm558_vm2, %v1117_v48 }
 0xafb   :  { %v1115_v49 = vpop.permute.xlu0 %1114 }
 0xafc   :  { %1121 = vst.msk [vmem:[#allocation3 + $0x30] sm:$0xff] %vm558_vm2, %v1115_v49  ;;  %8635 = vmatprep.mubr.msk.f32.mxu1 %vm558_vm2, %v1115_v49 }
 0xafd   :  { %8636 = vmatmul.mubr.msk.f32.vlgmr.msra.gmra.mxu1 %vm558_vm2, %v1117_v48 }
 0xafe   :  { %8639 = vmatpush3.msra.mxu1 %v9946_v6 }
 0xaff   :  { %8640 = vmatprep.subr.mxu1 %v9956_v8 }
 0xb00   :  { %8641 = vmatpush3.msra.mxu1 %v9956_v8 }
 0xb01   :  { %8642 = vmatprep.subr.mxu1 %v9971_v11 }
 0xb02   :  { %8643 = vmatpush3.msra.mxu1 %v9971_v11 }
 0xb03   :  { %8644 = vmatprep.subr.mxu1 %v9981_v13 }
 0xb04   :  { %8645 = vmatpush3.msra.mxu1 %v9981_v13 }
 0xb05   :  { %8649 = vmatprep.subr.mxu1 %v9946_v6 }
 0xbbd   :  { %v8637_v53 = vpop.f32.mrf.mxu1 }
 0xbbe   :  { %v1205_v55 = vadd.f32 %v8637_v53, %v359_v51 }
 0xbbf   :  { %v1195_v56 = vpop.f32.mrf.mxu1 }
 0xbc0   :  { %9308 = vtanh.f32 %v1205_v55  ;;  %v1204_v57 = vadd.f32 %v1195_v56, %v354_v54  ;;  %v8000_v60 = vmul.f32 -1.442695, %v1205_v55 }
 0xbc2   :  { %9310 = vtanh.f32 %v1204_v57  ;;  %v7999_v61 = vmul.f32 -1.442695, %v1204_v57 }
 0xbc3   :  { %9312 = vpow2.f32 %v8000_v60 }
 0xbc4   :  { %9314 = vpow2.f32 %v7999_v61 }
 0xbcd   :  { %v9309_v58 = vpop.eup %9308 }
 0xbce   :  { %1226 = vrot.lane.b32.xlu1 %v9309_v58, %s9807_s27 }
 0xbcf   :  { %v9311_v59 = vpop.eup %9310 }
 0xbd0   :  { %1224 = vrot.lane.b32.xlu0 %v9311_v59, %s9807_s27  ;;  %v9313_v62 = vpop.eup %9312 }
 0xbd1   :  { %v9315_v63 = vpop.eup %9314  ;;  %v1213_v0 = vadd.f32 1.0, %v9313_v62 }
 0xbd2   :  { %v1212_v1 = vadd.f32 1.0, %v9315_v63 }
 0xbd3   :  { %9316 = vrcp.f32 %v1213_v0 }
 0xbd4   :  { %9318 = vrcp.f32 %v1212_v1 }
 0xbe0   :  { %v9317_v2 = vpop.eup %9316 }
 0xbe1   :  { %v9319_v5 = vpop.eup %9318  ;;  %v1221_v10 = vmul.f32 %v9317_v2, %v10190_v33 }
 0xbe2   :  { %v1220_v15 = vmul.f32 %v9319_v5, %v10194_v39 }
 0xc40   :  { %v1227_v3 = vpop.permute.xlu1 %1226 }
 0xc41   :  { %v1231_v4 = vmul.f32 %v9317_v2, %v1227_v3 }
 0xc42   :  { %v1225_v7 = vpop.permute.xlu0 %1224 }
 0xc43   :  { %1236 = vrot.lane.b32.xlu1 %v1231_v4, %s9808_s3  ;;  %v1230_v9 = vmul.f32 %v9319_v5, %v1225_v7  ;;  %v85_v7 = vld [vmem:[%s12069_s22 + $0x60] sm:$0xff] }
 0xc44   :  { %8541 = vmatprep.mubr.msk.f32.mxu0 %vm122_vm1, %v85_v7  ;;  %v10343_v7 = vld [vmem:[%s12070_s24 + $0x8] sm:$0xff] }
 0xc45   :  { %1234 = vrot.lane.b32.xlu0 %v1230_v9, %s9808_s3 }
 0xcb5   :  { %v1237_v12 = vpop.permute.xlu1 %1236 }
 0xcb6   :  { %v10228_v14 = vadd.f32 %v1237_v12, %v1221_v10  ;;  %v86_v12 = vld [vmem:[%s12069_s22 + $0x68] sm:$0xff] }
 0xcb7   :  { %v1235_v16 = vpop.permute.xlu0 %1234  ;;  %8542 = vmatmul.mubr.msk.f32.gmra.mxu0 %vm122_vm1, %v86_v12 }
 0xcb8   :  { %9320 = vtanh.f32 %v10228_v14  ;;  %v10232_v17 = vadd.f32 %v1235_v16, %v1220_v15 }
 0xcba   :  { %9322 = vtanh.f32 %v10232_v17 }
 0xcc5   :  { %v9321_v19 = vpop.eup %9320 }
 0xcc6   :  { %1248 = vrot.lane.b32.xlu1 %v9321_v19, %s9807_s27 }
 0xcc7   :  { %v9323_v20 = vpop.eup %9322 }
 0xcc8   :  { %1246 = vrot.lane.b32.xlu0 %v9323_v20, %s9807_s27 }
 0xd38   :  { %v1249_v33 = vpop.permute.xlu1 %1248 }
 0xd39   :  { %v1253_v36 = vmul.f32 %v9317_v2, %v1249_v33 }
 0xd3a   :  { %v1247_v38 = vpop.permute.xlu0 %1246 }
 0xd3b   :  { %1258 = vrot.lane.b32.xlu1 %v1253_v36, %s9808_s3  ;;  %v1252_v39 = vmul.f32 %v9319_v5, %v1247_v38 }
 0xd3d   :  { %1256 = vrot.lane.b32.xlu0 %v1252_v39, %s9808_s3 }
 0xd77   :  { %v8543_v20 = vpop.f32.mrf.mxu0 }
 0xd78   :  { %v379_v21 = vadd.f32 %v8543_v20, %v10069_v37 }
 0xd79   :  { %v373_v33 = vpop.f32.mrf.mxu0 }
 0xd7a   :  { %v374_v38 = vadd.f32 %v10069_v37, %v373_v33 }
 0xdad   :  { %v1259_v40 = vpop.permute.xlu1 %1258 }
 0xdae   :  { %1264 = vst.msk [vmem:[#allocation3 + $0x48] sm:$0xff] %vm558_vm2, %v1259_v40 }
 0xdaf   :  { %v1257_v41 = vpop.permute.xlu0 %1256 }
 0xdb0   :  { %1263 = vst.msk [vmem:[#allocation3 + $0x40] sm:$0xff] %vm558_vm2, %v1257_v41  ;;  %8646 = vmatprep.mubr.msk.f32.mxu1 %vm558_vm2, %v1257_v41 }
 0xdb1   :  { %8647 = vmatmul.mubr.msk.f32.vlgmr.msra.gmra.mxu1 %vm558_vm2, %v1259_v40 }
 0xdb2   :  { %8650 = vmatpush3.msra.mxu1 %v9946_v6 }
 0xdb3   :  { %8651 = vmatprep.subr.mxu1 %v9956_v8 }
 0xdb4   :  { %8652 = vmatpush3.msra.mxu1 %v9956_v8 }
 0xdb5   :  { %8653 = vmatprep.subr.mxu1 %v9971_v11 }
 0xdb6   :  { %8654 = vmatpush3.msra.mxu1 %v9971_v11 }
 0xdb7   :  { %8655 = vmatprep.subr.mxu1 %v9981_v13 }
 0xdb8   :  { %8656 = vmatpush3.msra.mxu1 %v9981_v13 }
 0xdb9   :  { %8660 = vmatprep.subr.mxu1 %v9946_v6 }
 0xe71   :  { %v8648_v45 = vpop.f32.mrf.mxu1 }
 0xe72   :  { %v1347_v47 = vadd.f32 %v8648_v45, %v369_v43 }
 0xe73   :  { %v1337_v48 = vpop.f32.mrf.mxu1 }
 0xe74   :  { %9324 = vtanh.f32 %v1347_v47  ;;  %v1346_v49 = vadd.f32 %v1337_v48, %v364_v46  ;;  %v8004_v52 = vmul.f32 -1.442695, %v1347_v47 }
 0xe76   :  { %9326 = vtanh.f32 %v1346_v49  ;;  %v8003_v53 = vmul.f32 -1.442695, %v1346_v49 }
 0xe77   :  { %9328 = vpow2.f32 %v8004_v52 }
 0xe78   :  { %9330 = vpow2.f32 %v8003_v53 }
 0xe81   :  { %v9325_v50 = vpop.eup %9324 }
 0xe82   :  { %1368 = vrot.lane.b32.xlu1 %v9325_v50, %s9807_s27 }
 0xe83   :  { %v9327_v51 = vpop.eup %9326 }
 0xe84   :  { %1366 = vrot.lane.b32.xlu0 %v9327_v51, %s9807_s27  ;;  %v9329_v54 = vpop.eup %9328 }
 0xe85   :  { %v9331_v55 = vpop.eup %9330  ;;  %v1355_v56 = vadd.f32 1.0, %v9329_v54 }
 0xe86   :  { %v1354_v57 = vadd.f32 1.0, %v9331_v55 }
 0xe87   :  { %9332 = vrcp.f32 %v1355_v56 }
 0xe88   :  { %9334 = vrcp.f32 %v1354_v57 }
 0xe94   :  { %v9333_v58 = vpop.eup %9332 }
 0xe95   :  { %v9335_v61 = vpop.eup %9334  ;;  %v1363_v0 = vmul.f32 %v9333_v58, %v10228_v14 }
 0xe96   :  { %v1362_v3 = vmul.f32 %v9335_v61, %v10232_v17 }
 0xef4   :  { %v1369_v59 = vpop.permute.xlu1 %1368 }
 0xef5   :  { %v1373_v60 = vmul.f32 %v9333_v58, %v1369_v59 }
 0xef6   :  { %v1367_v62 = vpop.permute.xlu0 %1366 }
 0xef7   :  { %1378 = vrot.lane.b32.xlu1 %v1373_v60, %s9808_s3  ;;  %v1372_v63 = vmul.f32 %v9335_v61, %v1367_v62 }
 0xef9   :  { %1376 = vrot.lane.b32.xlu0 %v1372_v63, %s9808_s3 }
 0xf69   :  { %v1379_v1 = vpop.permute.xlu1 %1378 }
 0xf6a   :  { %v10266_v2 = vadd.f32 %v1379_v1, %v1363_v0 }
 0xf6b   :  { %v1377_v4 = vpop.permute.xlu0 %1376 }
 0xf6c   :  { %9336 = vtanh.f32 %v10266_v2  ;;  %v10270_v5 = vadd.f32 %v1377_v4, %v1362_v3  ;;  %v10330_v4 = vld [vmem:[%s12070_s24 + $0x18] sm:$0xff] }
 0xf6e   :  { %9338 = vtanh.f32 %v10270_v5 }
 0xf79   :  { %v9337_v9 = vpop.eup %9336 }
 0xf7a   :  { %1390 = vrot.lane.b32.xlu1 %v9337_v9, %s9807_s27  ;;  %v10350_v9 = vld [vmem:[%s12070_s24] sm:$0xff] }
 0xf7b   :  { %v9339_v10 = vpop.eup %9338 }
 0xf7c   :  { %1388 = vrot.lane.b32.xlu0 %v9339_v10, %s9807_s27 }
 0xfec   :  { %v1391_v14 = vpop.permute.xlu1 %1390 }
 0xfed   :  { %v1395_v15 = vmul.f32 %v9333_v58, %v1391_v14  ;;  %v87_v58 = vld [vmem:[%s12069_s22 + $0x70] sm:$0xff] }
 0xfee   :  { %v1389_v16 = vpop.permute.xlu0 %1388  ;;  %8544 = vmatprep.mubr.msk.f32.mxu0 %vm122_vm1, %v87_v58 }
 0xfef   :  { %1400 = vrot.lane.b32.xlu1 %v1395_v15, %s9808_s3  ;;  %v1394_v17 = vmul.f32 %v9335_v61, %v1389_v16  ;;  %v88_v61 = vld [vmem:[%s12069_s22 + $0x78] sm:$0xff] }
 0xff0   :  { %8545 = vmatmul.mubr.msk.f32.gmra.mxu0 %vm122_vm1, %v88_v61 }
 0xff1   :  { %1398 = vrot.lane.b32.xlu0 %v1394_v17, %s9808_s3 }
0x1061   :  { %v1401_v18 = vpop.permute.xlu1 %1400 }
0x1062   :  { %1406 = vst.msk [vmem:[#allocation3 + $0x58] sm:$0xff] %vm558_vm2, %v1401_v18 }
0x1063   :  { %v1399_v19 = vpop.permute.xlu0 %1398 }
0x1064   :  { %1405 = vst.msk [vmem:[#allocation3 + $0x50] sm:$0xff] %vm558_vm2, %v1399_v19  ;;  %8657 = vmatprep.mubr.msk.f32.mxu1 %vm558_vm2, %v1399_v19 }
0x1065   :  { %8658 = vmatmul.mubr.msk.f32.vlgmr.msra.gmra.mxu1 %vm558_vm2, %v1401_v18 }
0x1066   :  { %8661 = vmatpush3.msra.mxu1 %v9946_v6 }
0x1067   :  { %8662 = vmatprep.subr.mxu1 %v9956_v8 }
0x1068   :  { %8663 = vmatpush3.msra.mxu1 %v9956_v8 }
0x1069   :  { %8664 = vmatprep.subr.mxu1 %v9971_v11 }
0x106a   :  { %8665 = vmatpush3.msra.mxu1 %v9971_v11 }
0x106b   :  { %8666 = vmatprep.subr.mxu1 %v9981_v13 }
0x106c   :  { %8667 = vmatpush3.msra.mxu1 %v9981_v13 }
0x106d   :  { %8671 = vmatprep.subr.mxu1 %v9946_v6 }
0x10b0   :  { %v8546_v10 = vpop.f32.mrf.mxu0 }
0x10b1   :  { %v389_v12 = vadd.f32 %v8546_v10, %v10069_v37 }
0x10b2   :  { %v383_v14 = vpop.f32.mrf.mxu0 }
0x10b3   :  { %v384_v16 = vadd.f32 %v10069_v37, %v383_v14 }
0x1125   :  { %v8659_v36 = vpop.f32.mrf.mxu1 }
0x1126   :  { %v1489_v39 = vadd.f32 %v8659_v36, %v379_v21 }
0x1127   :  { %v1479_v40 = vpop.f32.mrf.mxu1 }
0x1128   :  { %9340 = vtanh.f32 %v1489_v39  ;;  %v1488_v8 = vadd.f32 %v1479_v40, %v374_v38  ;;  %v8008_v13 = vmul.f32 -1.442695, %v1489_v39 }
0x112a   :  { %9342 = vtanh.f32 %v1488_v8  ;;  %v8007_v6 = vmul.f32 -1.442695, %v1488_v8 }
0x112b   :  { %9344 = vpow2.f32 %v8008_v13 }
0x112c   :  { %9346 = vpow2.f32 %v8007_v6 }
0x1135   :  { %v9341_v41 = vpop.eup %9340 }
0x1136   :  { %1510 = vrot.lane.b32.xlu1 %v9341_v41, %s9807_s27 }
0x1137   :  { %v9343_v11 = vpop.eup %9342 }
0x1138   :  { %1508 = vrot.lane.b32.xlu0 %v9343_v11, %s9807_s27  ;;  %v9345_v42 = vpop.eup %9344 }
0x1139   :  { %v9347_v43 = vpop.eup %9346  ;;  %v1497_v44 = vadd.f32 1.0, %v9345_v42 }
0x113a   :  { %v1496_v45 = vadd.f32 1.0, %v9347_v43 }
0x113b   :  { %9348 = vrcp.f32 %v1497_v44 }
0x113c   :  { %9350 = vrcp.f32 %v1496_v45 }
0x1148   :  { %v9349_v46 = vpop.eup %9348 }
0x1149   :  { %v9351_v49 = vpop.eup %9350  ;;  %v1505_v52 = vmul.f32 %v9349_v46, %v10266_v2 }
0x114a   :  { %v1504_v55 = vmul.f32 %v9351_v49, %v10270_v5  ;;  %v10336_v5 = vld [vmem:[%s12070_s24 + $0x10] sm:$0xff] }
0x11a8   :  { %v1511_v47 = vpop.permute.xlu1 %1510 }
0x11a9   :  { %v1515_v48 = vmul.f32 %v9349_v46, %v1511_v47 }
0x11aa   :  { %v1509_v50 = vpop.permute.xlu0 %1508 }
0x11ab   :  { %1520 = vrot.lane.b32.xlu1 %v1515_v48, %s9808_s3  ;;  %v1514_v51 = vmul.f32 %v9351_v49, %v1509_v50 }
0x11ad   :  { %1518 = vrot.lane.b32.xlu0 %v1514_v51, %s9808_s3 }
0x121d   :  { %v1521_v53 = vpop.permute.xlu1 %1520 }
0x121e   :  { %v10304_v54 = vadd.f32 %v1521_v53, %v1505_v52  ;;  %v90_v52 = vld [vmem:[%s12069_s22 + $0x88] sm:$0xff] }
0x121f   :  { %v1519_v56 = vpop.permute.xlu0 %1518 }
0x1220   :  { %9352 = vtanh.f32 %v10304_v54  ;;  %v10308_v57 = vadd.f32 %v1519_v56, %v1504_v55 }
0x1222   :  { %9354 = vtanh.f32 %v10308_v57 }
0x122d   :  { %v9353_v59 = vpop.eup %9352 }
0x122e   :  { %1532 = vrot.lane.b32.xlu1 %v9353_v59, %s9807_s27 }
0x122f   :  { %v9355_v60 = vpop.eup %9354 }
0x1230   :  { %1530 = vrot.lane.b32.xlu0 %v9355_v60, %s9807_s27  ;;  %v10396_v60 = vld [vmem:[%s12071_s26] ss:$0 sm:$0xff] }
0x12a0   :  { %v1533_v62 = vpop.permute.xlu1 %1532 }
0x12a1   :  { %v1537_v63 = vmul.f32 %v9349_v46, %v1533_v62 }
0x12a2   :  { %v1531_v0 = vpop.permute.xlu0 %1530 }
0x12a3   :  { %1542 = vrot.lane.b32.xlu1 %v1537_v63, %s9808_s3  ;;  %v1536_v1 = vmul.f32 %v9351_v49, %v1531_v0  ;;  %v89_v49 = vld [vmem:[%s12069_s22 + $0x80] sm:$0xff] }
0x12a4   :  { %8547 = vmatprep.mubr.msk.f32.mxu0 %vm122_vm1, %v89_v49 }
0x12a5   :  { %1540 = vrot.lane.b32.xlu0 %v1536_v1, %s9808_s3  ;;  %8548 = vmatmul.mubr.msk.f32.gmra.mxu0 %vm122_vm1, %v90_v52 }
0x1315   :  { %v1543_v2 = vpop.permute.xlu1 %1542 }
0x1316   :  { %1548 = vst.msk [vmem:[#allocation3 + $0x68] sm:$0xff] %vm558_vm2, %v1543_v2 }
0x1317   :  { %v1541_v3 = vpop.permute.xlu0 %1540 }
0x1318   :  { %1547 = vst.msk [vmem:[#allocation3 + $0x60] sm:$0xff] %vm558_vm2, %v1541_v3  ;;  %8668 = vmatprep.mubr.msk.f32.mxu1 %vm558_vm2, %v1541_v3 }
0x1319   :  { %8669 = vmatmul.mubr.msk.f32.vlgmr.msra.gmra.mxu1 %vm558_vm2, %v1543_v2 }
0x131a   :  { %8672 = vmatpush3.msra.mxu1 %v10330_v4 }
0x131b   :  { %8673 = vmatprep.subr.mxu1 %v10336_v5 }
0x131c   :  { %8674 = vmatpush3.msra.mxu1 %v10336_v5 }
0x131d   :  { %8675 = vmatprep.subr.mxu1 %v10343_v7 }
0x131e   :  { %8676 = vmatpush3.msra.mxu1 %v10343_v7 }
0x131f   :  { %8677 = vmatprep.subr.mxu1 %v10350_v9 }
0x1320   :  { %8678 = vmatpush3.msra.mxu1 %v10350_v9 }
0x1321   :  { %8682 = vmatprep.subr.mxu1 %v10330_v4 }
0x1365   :  { %v8549_v59 = vpop.f32.mrf.mxu0 }
0x1366   :  { %v399_v61 = vadd.f32 %v10396_v60, %v8549_v59 }
0x1367   :  { %v393_v62 = vpop.f32.mrf.mxu0 }
0x1368   :  { %v394_v0 = vadd.f32 %v10396_v60, %v393_v62 }
0x13d9   :  { %v8670_v15 = vpop.f32.mrf.mxu1 }
0x13da   :  { %v1631_v17 = vadd.f32 %v8670_v15, %v389_v12 }
0x13db   :  { %v1621_v18 = vpop.f32.mrf.mxu1 }
0x13dc   :  { %9356 = vtanh.f32 %v1631_v17  ;;  %v1630_v19 = vadd.f32 %v1621_v18, %v384_v16  ;;  %v8012_v33 = vmul.f32 -1.442695, %v1631_v17 }
0x13de   :  { %9358 = vtanh.f32 %v1630_v19  ;;  %v8011_v36 = vmul.f32 -1.442695, %v1630_v19 }
0x13df   :  { %9360 = vpow2.f32 %v8012_v33 }
0x13e0   :  { %9362 = vpow2.f32 %v8011_v36 }
0x13e9   :  { %v9357_v20 = vpop.eup %9356 }
0x13ea   :  { %1652 = vrot.lane.b32.xlu1 %v9357_v20, %s9807_s27 }
0x13eb   :  { %v9359_v21 = vpop.eup %9358 }
0x13ec   :  { %1650 = vrot.lane.b32.xlu0 %v9359_v21, %s9807_s27  ;;  %v9361_v38 = vpop.eup %9360 }
0x13ed   :  { %v9363_v39 = vpop.eup %9362  ;;  %v1639_v40 = vadd.f32 1.0, %v9361_v38 }
0x13ee   :  { %v1638_v8 = vadd.f32 1.0, %v9363_v39 }
0x13ef   :  { %9364 = vrcp.f32 %v1639_v40 }
0x13f0   :  { %9366 = vrcp.f32 %v1638_v8 }
0x13fc   :  { %v9365_v37 = vpop.eup %9364 }
0x13fd   :  { %v9367_v13 = vpop.eup %9366  ;;  %v1647_v43 = vmul.f32 %v9365_v37, %v10304_v54 }
0x13fe   :  { %v1646_v46 = vmul.f32 %v9367_v13, %v10308_v57 }
0x145c   :  { %v1653_v41 = vpop.permute.xlu1 %1652 }
0x145d   :  { %v1657_v11 = vmul.f32 %v9365_v37, %v1653_v41 }
0x145e   :  { %v1651_v6 = vpop.permute.xlu0 %1650 }
0x145f   :  { %1662 = vrot.lane.b32.xlu1 %v1657_v11, %s9808_s3  ;;  %v1656_v42 = vmul.f32 %v9367_v13, %v1651_v6  ;;  %v91_v6 = vld [vmem:[%s12069_s22 + $0x90] sm:$0xff] }
0x1460   :  { %8550 = vmatprep.mubr.msk.f32.mxu0 %vm122_vm1, %v91_v6 }
0x1461   :  { %1660 = vrot.lane.b32.xlu0 %v1656_v42, %s9808_s3 }
0x14d1   :  { %v1663_v44 = vpop.permute.xlu1 %1662 }
0x14d2   :  { %v10362_v45 = vadd.f32 %v1663_v44, %v1647_v43  ;;  %v92_v44 = vld [vmem:[%s12069_s22 + $0x98] sm:$0xff] }
0x14d3   :  { %v1661_v47 = vpop.permute.xlu0 %1660  ;;  %8551 = vmatmul.mubr.msk.f32.gmra.mxu0 %vm122_vm1, %v92_v44 }
0x14d4   :  { %9368 = vtanh.f32 %v10362_v45  ;;  %v10366_v48 = vadd.f32 %v1661_v47, %v1646_v46 }
0x14d6   :  { %9370 = vtanh.f32 %v10366_v48 }
0x14e1   :  { %v9369_v50 = vpop.eup %9368 }
0x14e2   :  { %1674 = vrot.lane.b32.xlu1 %v9369_v50, %s9807_s27 }
0x14e3   :  { %v9371_v51 = vpop.eup %9370 }
0x14e4   :  { %1672 = vrot.lane.b32.xlu0 %v9371_v51, %s9807_s27 }
0x1554   :  { %v1675_v53 = vpop.permute.xlu1 %1674 }
0x1555   :  { %v1679_v54 = vmul.f32 %v9365_v37, %v1675_v53 }
0x1556   :  { %v1673_v55 = vpop.permute.xlu0 %1672 }
0x1557   :  { %1684 = vrot.lane.b32.xlu1 %v1679_v54, %s9808_s3  ;;  %v1678_v56 = vmul.f32 %v9367_v13, %v1673_v55 }
0x1559   :  { %1682 = vrot.lane.b32.xlu0 %v1678_v56, %s9808_s3 }
0x1593   :  { %v8552_v51 = vpop.f32.mrf.mxu0 }
0x1594   :  { %v409_v52 = vadd.f32 %v10396_v60, %v8552_v51 }
0x1595   :  { %v403_v53 = vpop.f32.mrf.mxu0 }
0x1596   :  { %v404_v55 = vadd.f32 %v10396_v60, %v403_v53 }
0x15c9   :  { %v1685_v57 = vpop.permute.xlu1 %1684 }
0x15ca   :  { %1690 = vst.msk [vmem:[#allocation3 + $0x78] sm:$0xff] %vm558_vm2, %v1685_v57 }
0x15cb   :  { %v1683_v58 = vpop.permute.xlu0 %1682 }
0x15cc   :  { %1689 = vst.msk [vmem:[#allocation3 + $0x70] sm:$0xff] %vm558_vm2, %v1683_v58  ;;  %8679 = vmatprep.mubr.msk.f32.mxu1 %vm558_vm2, %v1683_v58 }
0x15cd   :  { %8680 = vmatmul.mubr.msk.f32.vlgmr.msra.gmra.mxu1 %vm558_vm2, %v1685_v57 }
0x15ce   :  { %8683 = vmatpush3.msra.mxu1 %v10330_v4 }
0x15cf   :  { %8684 = vmatprep.subr.mxu1 %v10336_v5 }
0x15d0   :  { %8685 = vmatpush3.msra.mxu1 %v10336_v5 }
0x15d1   :  { %8686 = vmatprep.subr.mxu1 %v10343_v7 }
0x15d2   :  { %8687 = vmatpush3.msra.mxu1 %v10343_v7 }
0x15d3   :  { %8688 = vmatprep.subr.mxu1 %v10350_v9 }
0x15d4   :  { %8689 = vmatpush3.msra.mxu1 %v10350_v9 }
0x15d5   :  { %8704 = vmatprep.subr.mxu1 %v10330_v4 }
0x168d   :  { %v8681_v63 = vpop.f32.mrf.mxu1 }
0x168e   :  { %v1773_v1 = vadd.f32 %v8681_v63, %v399_v61 }
0x168f   :  { %v1763_v2 = vpop.f32.mrf.mxu1 }
0x1690   :  { %9372 = vtanh.f32 %v1773_v1  ;;  %v1772_v3 = vadd.f32 %v1763_v2, %v394_v0  ;;  %v8016_v14 = vmul.f32 -1.442695, %v1773_v1 }
0x1692   :  { %9374 = vtanh.f32 %v1772_v3  ;;  %v8015_v15 = vmul.f32 -1.442695, %v1772_v3 }
0x1693   :  { %9376 = vpow2.f32 %v8016_v14 }
0x1694   :  { %9378 = vpow2.f32 %v8015_v15 }
0x169d   :  { %v9373_v10 = vpop.eup %9372 }
0x169e   :  { %1794 = vrot.lane.b32.xlu1 %v9373_v10, %s9807_s27 }
0x169f   :  { %v9375_v12 = vpop.eup %9374 }
0x16a0   :  { %1792 = vrot.lane.b32.xlu0 %v9375_v12, %s9807_s27  ;;  %v9377_v16 = vpop.eup %9376 }
0x16a1   :  { %v9379_v17 = vpop.eup %9378  ;;  %v1781_v18 = vadd.f32 1.0, %v9377_v16 }
0x16a2   :  { %v1780_v19 = vadd.f32 1.0, %v9379_v17 }
0x16a3   :  { %9380 = vrcp.f32 %v1781_v18 }
0x16a4   :  { %9382 = vrcp.f32 %v1780_v19 }
0x16b0   :  { %v9381_v20 = vpop.eup %9380 }
0x16b1   :  { %v9383_v36 = vpop.eup %9382  ;;  %v1789_v40 = vmul.f32 %v9381_v20, %v10362_v45 }
0x16b2   :  { %v1788_v41 = vmul.f32 %v9383_v36, %v10366_v48 }
0x1710   :  { %v1795_v21 = vpop.permute.xlu1 %1794 }
0x1711   :  { %v1799_v33 = vmul.f32 %v9381_v20, %v1795_v21 }
0x1712   :  { %v1793_v38 = vpop.permute.xlu0 %1792 }
0x1713   :  { %1804 = vrot.lane.b32.xlu1 %v1799_v33, %s9808_s3  ;;  %v1798_v39 = vmul.f32 %v9383_v36, %v1793_v38  ;;  %v93_v38 = vld [vmem:[%s12069_s22 + $0xa0] sm:$0xff] }
0x1714   :  { %8553 = vmatprep.mubr.msk.f32.mxu0 %vm122_vm1, %v93_v38 }
0x1715   :  { %1802 = vrot.lane.b32.xlu0 %v1798_v39, %s9808_s3  ;;  %v94_v39 = vld [vmem:[%s12069_s22 + $0xa8] sm:$0xff] }
0x1716   :  { %8554 = vmatmul.mubr.msk.f32.gmra.mxu0 %vm122_vm1, %v94_v39 }
0x1785   :  { %v1805_v8 = vpop.permute.xlu1 %1804 }
0x1786   :  { %v10405_v37 = vadd.f32 %v1805_v8, %v1789_v40  ;;  %v95_v40 = vld [vmem:[%s12069_s22 + $0xb0] sm:$0xff]  ;;  %v96_v8 = vld [vmem:[%s12069_s22 + $0xb8] sm:$0xff] }
0x1787   :  { %v1803_v11 = vpop.permute.xlu0 %1802  ;;  %8556 = vmatprep.mubr.msk.f32.mxu0 %vm122_vm1, %v95_v40 }
0x1788   :  { %9384 = vtanh.f32 %v10405_v37  ;;  %v10409_v13 = vadd.f32 %v1803_v11, %v1788_v41  ;;  %8557 = vmatmul.mubr.msk.f32.gmra.mxu0 %vm122_vm1, %v96_v8  ;;  %v98_v11 = vld [vmem:[%s12069_s22 + $0xc8] sm:$0xff] }
0x178a   :  { %9386 = vtanh.f32 %v10409_v13 }
0x1795   :  { %v9385_v42 = vpop.eup %9384 }
0x1796   :  { %1816 = vrot.lane.b32.xlu1 %v9385_v42, %s9807_s27  ;;  %v100_v42 = vld [vmem:[%s12069_s22 + $0xd8] sm:$0xff] }
0x1797   :  { %v9387_v43 = vpop.eup %9386 }
0x1798   :  { %1814 = vrot.lane.b32.xlu0 %v9387_v43, %s9807_s27 }
0x1808   :  { %v1817_v45 = vpop.permute.xlu1 %1816 }
0x1809   :  { %v1821_v46 = vmul.f32 %v9381_v20, %v1817_v45 }
0x180a   :  { %v1815_v47 = vpop.permute.xlu0 %1814 }
0x180b   :  { %1826 = vrot.lane.b32.xlu1 %v1821_v46, %s9808_s3  ;;  %v1820_v48 = vmul.f32 %v9383_v36, %v1815_v47 }
0x180d   :  { %1824 = vrot.lane.b32.xlu0 %v1820_v48, %s9808_s3 }
0x187d   :  { %v1827_v49 = vpop.permute.xlu1 %1826 }
0x187e   :  { %1832 = vst.msk [vmem:[#allocation3 + $0x88] sm:$0xff] %vm558_vm2, %v1827_v49 }
0x187f   :  { %v1825_v50 = vpop.permute.xlu0 %1824 }
0x1880   :  { %1831 = vst.msk [vmem:[#allocation3 + $0x80] sm:$0xff] %vm558_vm2, %v1825_v50  ;;  %8690 = vmatprep.mubr.msk.f32.mxu1 %vm558_vm2, %v1825_v50 }
0x1881   :  { %8691 = vmatmul.mubr.msk.f32.vlgmr.msra.gmra.mxu1 %vm558_vm2, %v1827_v49  ;;  %v8555_v49 = vpop.f32.mrf.mxu0 }
0x1882   :  { %8705 = vmatpush3.msra.mxu1 %v10330_v4 }
0x1883   :  { %8706 = vmatprep.subr.mxu1 %v10336_v5  ;;  %v413_v50 = vpop.f32.mrf.mxu0 }
0x1884   :  { %8707 = vmatpush3.msra.mxu1 %v10336_v5 }
0x1885   :  { %8708 = vmatprep.subr.mxu1 %v10343_v7  ;;  %v10498_v51 = vpop.f32.mrf.mxu0 }
0x1886   :  { %8709 = vmatpush3.msra.mxu1 %v10343_v7 }
0x1887   :  { %8710 = vmatprep.subr.mxu1 %v10350_v9 }
0x1888   :  { %8711 = vmatpush3.msra.mxu1 %v10350_v9 }
0x1889   :  { %8726 = vmatprep.subr.mxu1 %v10330_v4 }
0x1941   :  { %v8692_v54 = vpop.f32.mrf.mxu1 }
0x1942   :  { %v1915_v56 = vadd.f32 %v8692_v54, %v409_v52  ;;  %v10500_v52 = vpop.f32.mrf.mxu0 }
0x1943   :  { %v1905_v57 = vpop.f32.mrf.mxu1 }
0x1944   :  { %9388 = vtanh.f32 %v1915_v56  ;;  %v1914_v58 = vadd.f32 %v1905_v57, %v404_v55  ;;  %v8020_v62 = vmul.f32 -1.442695, %v1915_v56  ;;  %v419_v57 = vadd.f32 %v10396_v60, %v8555_v49 }
0x1946   :  { %9390 = vtanh.f32 %v1914_v58  ;;  %v8019_v63 = vmul.f32 -1.442695, %v1914_v58 }
0x1947   :  { %9392 = vpow2.f32 %v8020_v62 }
0x1948   :  { %9394 = vpow2.f32 %v8019_v63 }
0x1951   :  { %v9389_v59 = vpop.eup %9388 }
0x1952   :  { %1936 = vrot.lane.b32.xlu1 %v9389_v59, %s9807_s27  ;;  %v414_v59 = vadd.f32 %v10396_v60, %v413_v50 }
0x1953   :  { %v9391_v61 = vpop.eup %9390 }
0x1954   :  { %1934 = vrot.lane.b32.xlu0 %v9391_v61, %s9807_s27  ;;  %v9393_v0 = vpop.eup %9392 }
0x1955   :  { %v9395_v1 = vpop.eup %9394  ;;  %v1923_v2 = vadd.f32 1.0, %v9393_v0 }
0x1956   :  { %v1922_v3 = vadd.f32 1.0, %v9395_v1 }
0x1957   :  { %9396 = vrcp.f32 %v1923_v2 }
0x1958   :  { %9398 = vrcp.f32 %v1922_v3 }
0x1964   :  { %v9397_v10 = vpop.eup %9396 }
0x1965   :  { %v9399_v15 = vpop.eup %9398  ;;  %v1931_v18 = vmul.f32 %v9397_v10, %v10405_v37  ;;  %v97_v37 = vld [vmem:[%s12069_s22 + $0xc0] sm:$0xff] }
0x1966   :  { %v1930_v21 = vmul.f32 %v9399_v15, %v10409_v13  ;;  %8559 = vmatprep.mubr.msk.f32.mxu0 %vm122_vm1, %v97_v37  ;;  %v99_v13 = vld [vmem:[%s12069_s22 + $0xd0] sm:$0xff] }
0x1967   :  { %8560 = vmatmul.mubr.msk.f32.gmra.mxu0 %vm122_vm1, %v98_v11 }
0x1968   :  { %8562 = vmatprep.mubr.msk.f32.mxu0 %vm122_vm1, %v99_v13 }
0x196b   :  { %8563 = vmatmul.mubr.msk.f32.gmra.mxu0 %vm122_vm1, %v100_v42 }
0x19c4   :  { %v1937_v12 = vpop.permute.xlu1 %1936 }
0x19c5   :  { %v1941_v14 = vmul.f32 %v9397_v10, %v1937_v12 }
0x19c6   :  { %v1935_v16 = vpop.permute.xlu0 %1934 }
0x19c7   :  { %1946 = vrot.lane.b32.xlu1 %v1941_v14, %s9808_s3  ;;  %v1940_v17 = vmul.f32 %v9399_v15, %v1935_v16 }
0x19c9   :  { %1944 = vrot.lane.b32.xlu0 %v1940_v17, %s9808_s3 }
0x1a27   :  { %v10502_v53 = vpop.f32.mrf.mxu0 }
0x1a29   :  { %v10504_v54 = vpop.f32.mrf.mxu0 }
0x1a2b   :  { %v10506_v55 = vpop.f32.mrf.mxu0 }
0x1a2d   :  { %v10508_v56 = vpop.f32.mrf.mxu0 }
0x1a39   :  { %v1947_v19 = vpop.permute.xlu1 %1946 }
0x1a3a   :  { %v10443_v20 = vadd.f32 %v1947_v19, %v1931_v18 }
0x1a3b   :  { %v1945_v33 = vpop.permute.xlu0 %1944 }
0x1a3c   :  { %9400 = vtanh.f32 %v10443_v20  ;;  %v10447_v36 = vadd.f32 %v1945_v33, %v1930_v21 }
0x1a3e   :  { %9402 = vtanh.f32 %v10447_v36 }
0x1a49   :  { %v9401_v41 = vpop.eup %9400 }
0x1a4a   :  { %1958 = vrot.lane.b32.xlu1 %v9401_v41, %s9807_s27 }
0x1a4b   :  { %v9403_v6 = vpop.eup %9402 }
0x1a4c   :  { %1956 = vrot.lane.b32.xlu0 %v9403_v6, %s9807_s27 }
0x1abc   :  { %v1959_v43 = vpop.permute.xlu1 %1958 }
0x1abd   :  { %v1963_v44 = vmul.f32 %v9397_v10, %v1959_v43 }
0x1abe   :  { %v1957_v45 = vpop.permute.xlu0 %1956 }
0x1abf   :  { %1968 = vrot.lane.b32.xlu1 %v1963_v44, %s9808_s3  ;;  %v1962_v46 = vmul.f32 %v9399_v15, %v1957_v45  ;;  %v429_v45 = vadd.f32 %v10396_v60, %v10498_v51 }
0x1ac1   :  { %1966 = vrot.lane.b32.xlu0 %v1962_v46, %s9808_s3 }
0x1b31   :  { %v1969_v47 = vpop.permute.xlu1 %1968 }
0x1b32   :  { %1974 = vst.msk [vmem:[#allocation3 + $0x98] sm:$0xff] %vm558_vm2, %v1969_v47 }
0x1b33   :  { %v1967_v48 = vpop.permute.xlu0 %1966 }
0x1b34   :  { %1973 = vst.msk [vmem:[#allocation3 + $0x90] sm:$0xff] %vm558_vm2, %v1967_v48  ;;  %8701 = vmatprep.mubr.msk.f32.mxu0 %vm558_vm2, %v1967_v48 }
0x1b35   :  { %8702 = vmatmul.mubr.msk.f32.vlgmr.msra.gmra.mxu0 %vm558_vm2, %v1969_v47  ;;  %v424_v47 = vadd.f32 %v10396_v60, %v10500_v52 }
0x1b36   :  { %8716 = vmatpush3.msra.mxu0 %v10330_v4 }
0x1b37   :  { %8717 = vmatprep.subr.mxu0 %v10336_v5 }
0x1b38   :  { %8718 = vmatpush3.msra.mxu0 %v10336_v5 }
0x1b39   :  { %8719 = vmatprep.subr.mxu0 %v10343_v7 }
0x1b3a   :  { %8720 = vmatpush3.msra.mxu0 %v10343_v7 }
0x1b3b   :  { %8721 = vmatprep.subr.mxu0 %v10350_v9 }
0x1b3c   :  { %8722 = vmatpush3.msra.mxu0 %v10350_v9 }
0x1b3d   :  { %8737 = vmatprep.subr.mxu0 %v10330_v4 }
0x1bf5   :  { %v8703_v58 = vpop.f32.mrf.mxu0 }
0x1bf6   :  { %v2057_v61 = vadd.f32 %v8703_v58, %v419_v57 }
0x1bf7   :  { %v2047_v62 = vpop.f32.mrf.mxu0 }
0x1bf8   :  { %9404 = vtanh.f32 %v2057_v61  ;;  %v2056_v63 = vadd.f32 %v2047_v62, %v414_v59  ;;  %v8024_v2 = vmul.f32 -1.442695, %v2057_v61 }
0x1bfa   :  { %9406 = vtanh.f32 %v2056_v63  ;;  %v8023_v3 = vmul.f32 -1.442695, %v2056_v63 }
0x1bfb   :  { %9408 = vpow2.f32 %v8024_v2 }
0x1bfc   :  { %9410 = vpow2.f32 %v8023_v3 }
0x1c05   :  { %v9405_v0 = vpop.eup %9404 }
0x1c06   :  { %2078 = vrot.lane.b32.xlu1 %v9405_v0, %s9807_s27 }
0x1c07   :  { %v9407_v1 = vpop.eup %9406 }
0x1c08   :  { %2076 = vrot.lane.b32.xlu0 %v9407_v1, %s9807_s27  ;;  %v9409_v10 = vpop.eup %9408 }
0x1c09   :  { %v9411_v12 = vpop.eup %9410  ;;  %v2065_v14 = vadd.f32 1.0, %v9409_v10 }
0x1c0a   :  { %v2064_v15 = vadd.f32 1.0, %v9411_v12 }
0x1c0b   :  { %9412 = vrcp.f32 %v2065_v14 }
0x1c0c   :  { %9414 = vrcp.f32 %v2064_v15 }
0x1c18   :  { %v9413_v16 = vpop.eup %9412 }
0x1c19   :  { %v9415_v19 = vpop.eup %9414  ;;  %v2073_v38 = vmul.f32 %v9413_v16, %v10443_v20 }
0x1c1a   :  { %v2072_v8 = vmul.f32 %v9415_v19, %v10447_v36 }
0x1c78   :  { %v2079_v17 = vpop.permute.xlu1 %2078 }
0x1c79   :  { %v2083_v18 = vmul.f32 %v9413_v16, %v2079_v17 }
0x1c7a   :  { %v2077_v21 = vpop.permute.xlu0 %2076 }
0x1c7b   :  { %2088 = vrot.lane.b32.xlu1 %v2083_v18, %s9808_s3  ;;  %v2082_v33 = vmul.f32 %v9415_v19, %v2077_v21 }
0x1c7d   :  { %2086 = vrot.lane.b32.xlu0 %v2082_v33, %s9808_s3 }
0x1ced   :  { %v2089_v39 = vpop.permute.xlu1 %2088 }
0x1cee   :  { %v2093_v40 = vadd.f32 %v2089_v39, %v2073_v38 }
0x1cef   :  { %v2087_v37 = vpop.permute.xlu0 %2086 }
0x1cf0   :  { %9416 = vtanh.f32 %v2093_v40  ;;  %v2092_v41 = vadd.f32 %v2087_v37, %v2072_v8 }
0x1cf2   :  { %9418 = vtanh.f32 %v2092_v41 }
0x1cfd   :  { %v9417_v11 = vpop.eup %9416 }
0x1cfe   :  { %2100 = vrot.lane.b32.xlu1 %v9417_v11, %s9807_s27  ;;  %v439_v11 = vadd.f32 %v10396_v60, %v10502_v53 }
0x1cff   :  { %v9419_v13 = vpop.eup %9418 }
0x1d00   :  { %2098 = vrot.lane.b32.xlu0 %v9419_v13, %s9807_s27 }
0x1d70   :  { %v2101_v6 = vpop.permute.xlu1 %2100 }
0x1d71   :  { %v2105_v42 = vmul.f32 %v9413_v16, %v2101_v6  ;;  %v434_v6 = vadd.f32 %v10396_v60, %v10504_v54 }
0x1d72   :  { %v2099_v43 = vpop.permute.xlu0 %2098 }
0x1d73   :  { %2110 = vrot.lane.b32.xlu1 %v2105_v42, %s9808_s3  ;;  %v2104_v20 = vmul.f32 %v9415_v19, %v2099_v43 }
0x1d75   :  { %2108 = vrot.lane.b32.xlu0 %v2104_v20, %s9808_s3 }
0x1de5   :  { %v2111_v44 = vpop.permute.xlu1 %2110 }
0x1de6   :  { %2116 = vst.msk [vmem:[#allocation3 + $0xa8] sm:$0xff] %vm558_vm2, %v2111_v44 }
0x1de7   :  { %v2109_v36 = vpop.permute.xlu0 %2108 }
0x1de8   :  { %2115 = vst.msk [vmem:[#allocation3 + $0xa0] sm:$0xff] %vm558_vm2, %v2109_v36  ;;  %8712 = vmatprep.mubr.msk.f32.mxu1 %vm558_vm2, %v2109_v36 }
0x1de9   :  { %8713 = vmatmul.mubr.msk.f32.vlgmr.msra.gmra.mxu1 %vm558_vm2, %v2111_v44 }
0x1dea   :  { %8727 = vmatpush3.msra.mxu1 %v10330_v4 }
0x1deb   :  { %8728 = vmatprep.subr.mxu1 %v10336_v5 }
0x1dec   :  { %8729 = vmatpush3.msra.mxu1 %v10336_v5 }
0x1ded   :  { %8730 = vmatprep.subr.mxu1 %v10343_v7 }
0x1dee   :  { %8731 = vmatpush3.msra.mxu1 %v10343_v7 }
0x1def   :  { %8732 = vmatprep.subr.mxu1 %v10350_v9 }
0x1df0   :  { %8733 = vmatpush3.msra.mxu1 %v10350_v9 }
0x1df1   :  { %8748 = vmatprep.subr.mxu1 %v10330_v4 }
0x1ea9   :  { %v8714_v46 = vpop.f32.mrf.mxu1 }
0x1eaa   :  { %v2199_v48 = vadd.f32 %v8714_v46, %v429_v45 }
0x1eab   :  { %v2189_v49 = vpop.f32.mrf.mxu1 }
0x1eac   :  { %9420 = vtanh.f32 %v2199_v48  ;;  %v2198_v50 = vadd.f32 %v2189_v49, %v424_v47  ;;  %v8028_v59 = vmul.f32 -1.442695, %v2199_v48 }
0x1eae   :  { %9422 = vtanh.f32 %v2198_v50  ;;  %v8027_v61 = vmul.f32 -1.442695, %v2198_v50 }
0x1eaf   :  { %9424 = vpow2.f32 %v8028_v59 }
0x1eb0   :  { %9426 = vpow2.f32 %v8027_v61 }
0x1eb9   :  { %v9421_v57 = vpop.eup %9420 }
0x1eba   :  { %2220 = vrot.lane.b32.xlu1 %v9421_v57, %s9807_s27 }
0x1ebb   :  { %v9423_v58 = vpop.eup %9422 }
0x1ebc   :  { %2218 = vrot.lane.b32.xlu0 %v9423_v58, %s9807_s27  ;;  %v9425_v51 = vpop.eup %9424 }
0x1ebd   :  { %v9427_v62 = vpop.eup %9426  ;;  %v2207_v63 = vadd.f32 1.0, %v9425_v51 }
0x1ebe   :  { %v2206_v0 = vadd.f32 1.0, %v9427_v62 }
0x1ebf   :  { %9428 = vrcp.f32 %v2207_v63 }
0x1ec0   :  { %9430 = vrcp.f32 %v2206_v0 }
0x1ecc   :  { %v9429_v52 = vpop.eup %9428 }
0x1ecd   :  { %v9431_v3 = vpop.eup %9430  ;;  %v2215_v14 = vmul.f32 %v9429_v52, %v2093_v40 }
0x1ece   :  { %v2214_v17 = vmul.f32 %v9431_v3, %v2092_v41 }
0x1f2c   :  { %v2221_v1 = vpop.permute.xlu1 %2220 }
0x1f2d   :  { %v2225_v2 = vmul.f32 %v9429_v52, %v2221_v1 }
0x1f2e   :  { %v2219_v10 = vpop.permute.xlu0 %2218 }
0x1f2f   :  { %2230 = vrot.lane.b32.xlu1 %v2225_v2, %s9808_s3  ;;  %v2224_v12 = vmul.f32 %v9431_v3, %v2219_v10 }
0x1f31   :  { %2228 = vrot.lane.b32.xlu0 %v2224_v12, %s9808_s3 }
0x1fa1   :  { %v2231_v15 = vpop.permute.xlu1 %2230 }
0x1fa2   :  { %v2235_v16 = vadd.f32 %v2231_v15, %v2215_v14 }
0x1fa3   :  { %v2229_v18 = vpop.permute.xlu0 %2228 }
0x1fa4   :  { %9432 = vtanh.f32 %v2235_v16  ;;  %v2234_v19 = vadd.f32 %v2229_v18, %v2214_v17  ;;  %v449_v18 = vadd.f32 %v10396_v60, %v10506_v55 }
0x1fa6   :  { %9434 = vtanh.f32 %v2234_v19 }
0x1fb1   :  { %v9433_v21 = vpop.eup %9432 }
0x1fb2   :  { %2242 = vrot.lane.b32.xlu1 %v9433_v21, %s9807_s27  ;;  %v444_v21 = vadd.f32 %v10396_v60, %v10508_v56 }
0x1fb3   :  { %v9435_v33 = vpop.eup %9434 }
0x1fb4   :  { %2240 = vrot.lane.b32.xlu0 %v9435_v33, %s9807_s27 }
0x2024   :  { %v2243_v38 = vpop.permute.xlu1 %2242 }
0x2025   :  { %v2247_v39 = vmul.f32 %v9429_v52, %v2243_v38 }
0x2026   :  { %v2241_v8 = vpop.permute.xlu0 %2240 }
0x2027   :  { %2252 = vrot.lane.b32.xlu1 %v2247_v39, %s9808_s3  ;;  %v2246_v37 = vmul.f32 %v9431_v3, %v2241_v8 }
0x2029   :  { %2250 = vrot.lane.b32.xlu0 %v2246_v37, %s9808_s3 }
0x2099   :  { %v2253_v40 = vpop.permute.xlu1 %2252 }
0x209a   :  { %2258 = vst.msk [vmem:[#allocation3 + $0xb8] sm:$0xff] %vm558_vm2, %v2253_v40 }
0x209b   :  { %v2251_v41 = vpop.permute.xlu0 %2250 }
0x209c   :  { %2257 = vst.msk [vmem:[#allocation3 + $0xb0] sm:$0xff] %vm558_vm2, %v2251_v41  ;;  %8723 = vmatprep.mubr.msk.f32.mxu0 %vm558_vm2, %v2251_v41 }
0x209d   :  { %8724 = vmatmul.mubr.msk.f32.vlgmr.msra.gmra.mxu0 %vm558_vm2, %v2253_v40 }
0x209e   :  { %8738 = vmatpush3.msra.mxu0 %v10330_v4 }
0x209f   :  { %8739 = vmatprep.subr.mxu0 %v10336_v5 }
0x20a0   :  { %8740 = vmatpush3.msra.mxu0 %v10336_v5 }
0x20a1   :  { %8741 = vmatprep.subr.mxu0 %v10343_v7 }
0x20a2   :  { %8742 = vmatpush3.msra.mxu0 %v10343_v7 }
0x20a3   :  { %8743 = vmatprep.subr.mxu0 %v10350_v9 }
0x20a4   :  { %8744 = vmatpush3.msra.mxu0 %v10350_v9 }
0x20a5   :  { %8759 = vmatprep.subr.mxu0 %v10330_v4 }
0x215d   :  { %v8725_v13 = vpop.f32.mrf.mxu0 }
0x215e   :  { %v2341_v42 = vadd.f32 %v8725_v13, %v439_v11 }
0x215f   :  { %v2331_v43 = vpop.f32.mrf.mxu0 }
0x2160   :  { %9436 = vtanh.f32 %v2341_v42  ;;  %v2340_v20 = vadd.f32 %v2331_v43, %v434_v6  ;;  %v8032_v45 = vmul.f32 -1.442695, %v2341_v42 }
0x2162   :  { %9438 = vtanh.f32 %v2340_v20  ;;  %v8031_v46 = vmul.f32 -1.442695, %v2340_v20 }
0x2163   :  { %9440 = vpow2.f32 %v8032_v45 }
0x2164   :  { %9442 = vpow2.f32 %v8031_v46 }
0x216d   :  { %v9437_v44 = vpop.eup %9436 }
0x216e   :  { %2362 = vrot.lane.b32.xlu1 %v9437_v44, %s9807_s27 }
0x216f   :  { %v9439_v36 = vpop.eup %9438 }
0x2170   :  { %2360 = vrot.lane.b32.xlu0 %v9439_v36, %s9807_s27  ;;  %v9441_v53 = vpop.eup %9440 }
0x2171   :  { %v9443_v47 = vpop.eup %9442  ;;  %v2349_v48 = vadd.f32 1.0, %v9441_v53 }
0x2172   :  { %v2348_v49 = vadd.f32 1.0, %v9443_v47 }
0x2173   :  { %9444 = vrcp.f32 %v2349_v48 }
0x2174   :  { %9446 = vrcp.f32 %v2348_v49 }
0x2180   :  { %v9445_v54 = vpop.eup %9444 }
0x2181   :  { %v9447_v58 = vpop.eup %9446  ;;  %v2357_v51 = vmul.f32 %v9445_v54, %v2235_v16 }
0x2182   :  { %v2356_v0 = vmul.f32 %v9447_v58, %v2234_v19 }
0x21e0   :  { %v2363_v50 = vpop.permute.xlu1 %2362 }
0x21e1   :  { %v2367_v57 = vmul.f32 %v9445_v54, %v2363_v50 }
0x21e2   :  { %v2361_v59 = vpop.permute.xlu0 %2360 }
0x21e3   :  { %2372 = vrot.lane.b32.xlu1 %v2367_v57, %s9808_s3  ;;  %v2366_v61 = vmul.f32 %v9447_v58, %v2361_v59 }
0x21e5   :  { %2370 = vrot.lane.b32.xlu0 %v2366_v61, %s9808_s3 }
0x2255   :  { %v2373_v62 = vpop.permute.xlu1 %2372 }
0x2256   :  { %v2377_v63 = vadd.f32 %v2373_v62, %v2357_v51 }
0x2257   :  { %v2371_v52 = vpop.permute.xlu0 %2370 }
0x2258   :  { %9448 = vtanh.f32 %v2377_v63  ;;  %v2376_v1 = vadd.f32 %v2371_v52, %v2356_v0  ;;  %v454_v52 = vadd.f32 %v10396_v60, %v10044_v24 }
0x225a   :  { %9450 = vtanh.f32 %v2376_v1 }
0x2265   :  { %v9449_v2 = vpop.eup %9448 }
0x2266   :  { %2384 = vrot.lane.b32.xlu1 %v9449_v2, %s9807_s27 }
0x2267   :  { %v9451_v3 = vpop.eup %9450 }
0x2268   :  { %2382 = vrot.lane.b32.xlu0 %v9451_v3, %s9807_s27 }
0x22d8   :  { %v2385_v10 = vpop.permute.xlu1 %2384 }
0x22d9   :  { %v2389_v12 = vmul.f32 %v9445_v54, %v2385_v10 }
0x22da   :  { %v2383_v14 = vpop.permute.xlu0 %2382 }
0x22db   :  { %2394 = vrot.lane.b32.xlu1 %v2389_v12, %s9808_s3  ;;  %v2388_v15 = vmul.f32 %v9447_v58, %v2383_v14 }
0x22dd   :  { %2392 = vrot.lane.b32.xlu0 %v2388_v15, %s9808_s3 }
0x234d   :  { %v2395_v16 = vpop.permute.xlu1 %2394 }
0x234e   :  { %2400 = vst.msk [vmem:[#allocation3 + $0xc8] sm:$0xff] %vm558_vm2, %v2395_v16 }
0x234f   :  { %v2393_v17 = vpop.permute.xlu0 %2392 }
0x2350   :  { %2399 = vst.msk [vmem:[#allocation3 + $0xc0] sm:$0xff] %vm558_vm2, %v2393_v17  ;;  %8734 = vmatprep.mubr.msk.f32.mxu1 %vm558_vm2, %v2393_v17 }
0x2351   :  { %8735 = vmatmul.mubr.msk.f32.vlgmr.msra.gmra.mxu1 %vm558_vm2, %v2395_v16 }
0x2352   :  { %8749 = vmatpush3.msra.mxu1 %v10330_v4 }
0x2353   :  { %8750 = vmatprep.subr.mxu1 %v10336_v5 }
0x2354   :  { %8751 = vmatpush3.msra.mxu1 %v10336_v5 }
0x2355   :  { %8752 = vmatprep.subr.mxu1 %v10343_v7 }
0x2356   :  { %8753 = vmatpush3.msra.mxu1 %v10343_v7 }
0x2357   :  { %8754 = vmatprep.subr.mxu1 %v10350_v9 }
0x2358   :  { %8755 = vmatpush3.msra.mxu1 %v10350_v9 }
0x2359   :  { %8770 = vmatprep.subr.mxu1 %v10330_v4 }
0x2411   :  { %v8736_v19 = vpop.f32.mrf.mxu1 }
0x2412   :  { %v2483_v33 = vadd.f32 %v8736_v19, %v449_v18 }
0x2413   :  { %v2473_v38 = vpop.f32.mrf.mxu1 }
0x2414   :  { %9452 = vtanh.f32 %v2483_v33  ;;  %v2482_v39 = vadd.f32 %v2473_v38, %v444_v21  ;;  %v8036_v40 = vmul.f32 -1.442695, %v2483_v33 }
0x2416   :  { %9454 = vtanh.f32 %v2482_v39  ;;  %v8035_v41 = vmul.f32 -1.442695, %v2482_v39 }
0x2417   :  { %9456 = vpow2.f32 %v8036_v40 }
0x2418   :  { %9458 = vpow2.f32 %v8035_v41 }
0x2421   :  { %v9453_v8 = vpop.eup %9452 }
0x2422   :  { %2504 = vrot.lane.b32.xlu1 %v9453_v8, %s9807_s27 }
0x2423   :  { %v9455_v37 = vpop.eup %9454 }
0x2424   :  { %2502 = vrot.lane.b32.xlu0 %v9455_v37, %s9807_s27  ;;  %v9457_v55 = vpop.eup %9456 }
0x2425   :  { %v9459_v11 = vpop.eup %9458  ;;  %v2491_v13 = vadd.f32 1.0, %v9457_v55 }
0x2426   :  { %v2490_v6 = vadd.f32 1.0, %v9459_v11 }
0x2427   :  { %9460 = vrcp.f32 %v2491_v13 }
0x2428   :  { %9462 = vrcp.f32 %v2490_v6 }
0x2434   :  { %v9461_v56 = vpop.eup %9460 }
0x2435   :  { %v9463_v20 = vpop.eup %9462  ;;  %v2499_v45 = vmul.f32 %v9461_v56, %v2377_v63  ;;  %v459_v63 = vadd.f32 %v10396_v60, %v10042_v23 }
0x2436   :  { %v2498_v47 = vmul.f32 %v9463_v20, %v2376_v1 }
0x2494   :  { %v2505_v42 = vpop.permute.xlu1 %2504 }
0x2495   :  { %v2509_v43 = vmul.f32 %v9461_v56, %v2505_v42 }
0x2496   :  { %v2503_v44 = vpop.permute.xlu0 %2502 }
0x2497   :  { %2514 = vrot.lane.b32.xlu1 %v2509_v43, %s9808_s3  ;;  %v2508_v36 = vmul.f32 %v9463_v20, %v2503_v44  ;;  %v10631_v43 = vld [vmem:[%s12070_s24 + $0x18] sm:$0xff]  ;;  %v10644_v44 = vld [vmem:[%s12070_s24 + $0x8] sm:$0xff] }
0x2499   :  { %2512 = vrot.lane.b32.xlu0 %v2508_v36, %s9808_s3  ;;  %v10651_v36 = vld [vmem:[%s12070_s24] sm:$0xff] }
0x2509   :  { %v2515_v46 = vpop.permute.xlu1 %2514 }
0x250a   :  { %v2519_v53 = vadd.f32 %v2515_v46, %v2499_v45  ;;  %v469_v45 = vadd.f32 %v10396_v60, %v10046_v25 }
0x250b   :  { %v2513_v48 = vpop.permute.xlu0 %2512 }
0x250c   :  { %9464 = vtanh.f32 %v2519_v53  ;;  %v2518_v49 = vadd.f32 %v2513_v48, %v2498_v47 }
0x250e   :  { %9466 = vtanh.f32 %v2518_v49 }
0x2519   :  { %v9465_v54 = vpop.eup %9464 }
0x251a   :  { %2526 = vrot.lane.b32.xlu1 %v9465_v54, %s9807_s27 }
0x251b   :  { %v9467_v50 = vpop.eup %9466 }
0x251c   :  { %2524 = vrot.lane.b32.xlu0 %v9467_v50, %s9807_s27 }
0x258c   :  { %v2527_v57 = vpop.permute.xlu1 %2526 }
0x258d   :  { %v2531_v58 = vmul.f32 %v9461_v56, %v2527_v57 }
0x258e   :  { %v2525_v59 = vpop.permute.xlu0 %2524 }
0x258f   :  { %2536 = vrot.lane.b32.xlu1 %v2531_v58, %s9808_s3  ;;  %v2530_v61 = vmul.f32 %v9463_v20, %v2525_v59  ;;  %v10637_v20 = vld [vmem:[%s12070_s24 + $0x10] sm:$0xff] }
0x2591   :  { %2534 = vrot.lane.b32.xlu0 %v2530_v61, %s9808_s3 }
0x2601   :  { %v2537_v51 = vpop.permute.xlu1 %2536 }
0x2602   :  { %2542 = vst.msk [vmem:[#allocation3 + $0xd8] sm:$0xff] %vm558_vm2, %v2537_v51 }
0x2603   :  { %v2535_v62 = vpop.permute.xlu0 %2534 }
0x2604   :  { %2541 = vst.msk [vmem:[#allocation3 + $0xd0] sm:$0xff] %vm558_vm2, %v2535_v62  ;;  %8745 = vmatprep.mubr.msk.f32.mxu0 %vm558_vm2, %v2535_v62 }
0x2605   :  { %8746 = vmatmul.mubr.msk.f32.vlgmr.msra.gmra.mxu0 %vm558_vm2, %v2537_v51 }
0x2606   :  { %8760 = vmatpush3.msra.mxu0 %v10330_v4 }
0x2607   :  { %8761 = vmatprep.subr.mxu0 %v10336_v5 }
0x2608   :  { %8762 = vmatpush3.msra.mxu0 %v10336_v5 }
0x2609   :  { %8763 = vmatprep.subr.mxu0 %v10343_v7 }
0x260a   :  { %8764 = vmatpush3.msra.mxu0 %v10343_v7 }
0x260b   :  { %8765 = vmatprep.subr.mxu0 %v10350_v9 }
0x260c   :  { %8766 = vmatpush3.msra.mxu0 %v10350_v9 }
0x260d   :  { %8781 = vmatprep.subr.mxu0 %v10330_v4 }
0x26c5   :  { %v8747_v0 = vpop.f32.mrf.mxu0 }
0x26c6   :  { %v2625_v1 = vadd.f32 %v8747_v0, %v459_v63 }
0x26c7   :  { %v2615_v2 = vpop.f32.mrf.mxu0 }
0x26c8   :  { %9468 = vtanh.f32 %v2625_v1  ;;  %v2624_v5 = vadd.f32 %v2615_v2, %v454_v52  ;;  %v8040_v9 = vmul.f32 -1.442695, %v2625_v1 }
0x26ca   :  { %9470 = vtanh.f32 %v2624_v5  ;;  %v8039_v4 = vmul.f32 -1.442695, %v2624_v5 }
0x26cb   :  { %9472 = vpow2.f32 %v8040_v9 }
0x26cc   :  { %9474 = vpow2.f32 %v8039_v4 }
0x26d5   :  { %v9469_v3 = vpop.eup %9468 }
0x26d6   :  { %2646 = vrot.lane.b32.xlu1 %v9469_v3, %s9807_s27 }
0x26d7   :  { %v9471_v7 = vpop.eup %9470 }
0x26d8   :  { %2644 = vrot.lane.b32.xlu0 %v9471_v7, %s9807_s27  ;;  %v9473_v23 = vpop.eup %9472 }
0x26d9   :  { %v9475_v10 = vpop.eup %9474  ;;  %v2633_v12 = vadd.f32 1.0, %v9473_v23 }
0x26da   :  { %v2632_v14 = vadd.f32 1.0, %v9475_v10 }
0x26db   :  { %9476 = vrcp.f32 %v2633_v12 }
0x26dc   :  { %9478 = vrcp.f32 %v2632_v14 }
0x26e8   :  { %v9477_v24 = vpop.eup %9476 }
0x26e9   :  { %v9479_v17 = vpop.eup %9478  ;;  %v2641_v21 = vmul.f32 %v9477_v24, %v2519_v53  ;;  %v464_v53 = vadd.f32 %v10396_v60, %v10048_v26 }
0x26ea   :  { %v2640_v39 = vmul.f32 %v9479_v17, %v2518_v49 }
0x2748   :  { %v2647_v15 = vpop.permute.xlu1 %2646 }
0x2749   :  { %v2651_v16 = vmul.f32 %v9477_v24, %v2647_v15 }
0x274a   :  { %v2645_v18 = vpop.permute.xlu0 %2644 }
0x274b   :  { %2656 = vrot.lane.b32.xlu1 %v2651_v16, %s9808_s3  ;;  %v2650_v19 = vmul.f32 %v9479_v17, %v2645_v18 }
0x274d   :  { %2654 = vrot.lane.b32.xlu0 %v2650_v19, %s9808_s3 }
0x27bd   :  { %v2657_v33 = vpop.permute.xlu1 %2656 }
0x27be   :  { %v10614_v38 = vadd.f32 %v2657_v33, %v2641_v21 }
0x27bf   :  { %v2655_v8 = vpop.permute.xlu0 %2654 }
0x27c0   :  { %9480 = vtanh.f32 %v10614_v38  ;;  %v10617_v37 = vadd.f32 %v2655_v8, %v2640_v39 }
0x27c2   :  { %9482 = vtanh.f32 %v10617_v37 }
0x27cd   :  { %v9481_v40 = vpop.eup %9480 }
0x27ce   :  { %2668 = vrot.lane.b32.xlu1 %v9481_v40, %s9807_s27 }
0x27cf   :  { %v9483_v41 = vpop.eup %9482 }
0x27d0   :  { %2666 = vrot.lane.b32.xlu0 %v9483_v41, %s9807_s27 }
0x2840   :  { %v2669_v55 = vpop.permute.xlu1 %2668 }
0x2841   :  { %v2673_v11 = vmul.f32 %v9477_v24, %v2669_v55 }
0x2842   :  { %v2667_v13 = vpop.permute.xlu0 %2666 }
0x2843   :  { %2678 = vrot.lane.b32.xlu1 %v2673_v11, %s9808_s3  ;;  %v2672_v6 = vmul.f32 %v9479_v17, %v2667_v13  ;;  %v10684_v17 = vld [vmem:[%s12071_s26] ss:$0 sm:$0xff] }
0x2844   :  { %v479_v18 = vadd.f32 %v10684_v17, %v10050_v27  ;;  %v474_v21 = vadd.f32 %v10684_v17, %v10052_v28 }
0x2845   :  { %2676 = vrot.lane.b32.xlu0 %v2672_v6, %s9808_s3 }
0x28b5   :  { %v2679_v56 = vpop.permute.xlu1 %2678 }
0x28b6   :  { %2684 = vst.msk [vmem:[#allocation3 + $0xe8] sm:$0xff] %vm558_vm2, %v2679_v56 }
0x28b7   :  { %v2677_v42 = vpop.permute.xlu0 %2676 }
0x28b8   :  { %2683 = vst.msk [vmem:[#allocation3 + $0xe0] sm:$0xff] %vm558_vm2, %v2677_v42  ;;  %8756 = vmatprep.mubr.msk.f32.mxu1 %vm558_vm2, %v2677_v42 }
0x28b9   :  { %8757 = vmatmul.mubr.msk.f32.vlgmr.msra.gmra.mxu1 %vm558_vm2, %v2679_v56 }
0x28ba   :  { %8771 = vmatpush3.msra.mxu1 %v10631_v43 }
0x28bb   :  { %8772 = vmatprep.subr.mxu1 %v10637_v20 }
0x28bc   :  { %8773 = vmatpush3.msra.mxu1 %v10637_v20 }
0x28bd   :  { %8774 = vmatprep.subr.mxu1 %v10644_v44 }
0x28be   :  { %8775 = vmatpush3.msra.mxu1 %v10644_v44 }
0x28bf   :  { %8776 = vmatprep.subr.mxu1 %v10651_v36 }
0x28c0   :  { %8777 = vmatpush3.msra.mxu1 %v10651_v36 }
0x28c1   :  { %8792 = vmatprep.subr.mxu1 %v10631_v43 }
0x2979   :  { %v8758_v46 = vpop.f32.mrf.mxu1 }
0x297a   :  { %v2767_v47 = vadd.f32 %v8758_v46, %v469_v45 }
0x297b   :  { %v2757_v48 = vpop.f32.mrf.mxu1 }
0x297c   :  { %9484 = vtanh.f32 %v2767_v47  ;;  %v2766_v49 = vadd.f32 %v2757_v48, %v464_v53  ;;  %v8044_v57 = vmul.f32 -1.442695, %v2767_v47 }
0x297e   :  { %9486 = vtanh.f32 %v2766_v49  ;;  %v8043_v58 = vmul.f32 -1.442695, %v2766_v49 }
0x297f   :  { %9488 = vpow2.f32 %v8044_v57 }
0x2980   :  { %9490 = vpow2.f32 %v8043_v58 }
0x2989   :  { %v9485_v54 = vpop.eup %9484 }
0x298a   :  { %2788 = vrot.lane.b32.xlu1 %v9485_v54, %s9807_s27 }
0x298b   :  { %v9487_v50 = vpop.eup %9486 }
0x298c   :  { %2786 = vrot.lane.b32.xlu0 %v9487_v50, %s9807_s27  ;;  %v9489_v25 = vpop.eup %9488 }
0x298d   :  { %v9491_v59 = vpop.eup %9490  ;;  %v2775_v61 = vadd.f32 1.0, %v9489_v25 }
0x298e   :  { %v2774_v51 = vadd.f32 1.0, %v9491_v59 }
0x298f   :  { %9492 = vrcp.f32 %v2775_v61 }
0x2990   :  { %9494 = vrcp.f32 %v2774_v51 }
0x299c   :  { %v9493_v26 = vpop.eup %9492 }
0x299d   :  { %v9495_v63 = vpop.eup %9494  ;;  %v2783_v1 = vmul.f32 %v9493_v26, %v10614_v38 }
0x299e   :  { %v2782_v3 = vmul.f32 %v9495_v63, %v10617_v37 }
0x29fc   :  { %v2789_v60 = vpop.permute.xlu1 %2788 }
0x29fd   :  { %v2793_v62 = vmul.f32 %v9493_v26, %v2789_v60 }
0x29fe   :  { %v2787_v0 = vpop.permute.xlu0 %2786 }
0x29ff   :  { %2798 = vrot.lane.b32.xlu1 %v2793_v62, %s9808_s3  ;;  %v2792_v52 = vmul.f32 %v9495_v63, %v2787_v0  ;;  %v489_v62 = vadd.f32 %v10684_v17, %v10054_v29  ;;  %v484_v0 = vadd.f32 %v10684_v17, %v10056_v30 }
0x2a01   :  { %2796 = vrot.lane.b32.xlu0 %v2792_v52, %s9808_s3 }
0x2a71   :  { %v2799_v2 = vpop.permute.xlu1 %2798 }
0x2a72   :  { %v2803_v5 = vadd.f32 %v2799_v2, %v2783_v1 }
0x2a73   :  { %v2797_v7 = vpop.permute.xlu0 %2796 }
0x2a74   :  { %9496 = vtanh.f32 %v2803_v5  ;;  %v2802_v9 = vadd.f32 %v2797_v7, %v2782_v3 }
0x2a76   :  { %9498 = vtanh.f32 %v2802_v9 }
0x2a81   :  { %v9497_v4 = vpop.eup %9496 }
0x2a82   :  { %2810 = vrot.lane.b32.xlu1 %v9497_v4, %s9807_s27 }
0x2a83   :  { %v9499_v23 = vpop.eup %9498 }
0x2a84   :  { %2808 = vrot.lane.b32.xlu0 %v9499_v23, %s9807_s27 }
0x2af4   :  { %v2811_v10 = vpop.permute.xlu1 %2810 }
0x2af5   :  { %v2815_v12 = vmul.f32 %v9493_v26, %v2811_v10 }
0x2af6   :  { %v2809_v14 = vpop.permute.xlu0 %2808 }
0x2af7   :  { %2820 = vrot.lane.b32.xlu1 %v2815_v12, %s9808_s3  ;;  %v2814_v24 = vmul.f32 %v9495_v63, %v2809_v14 }
0x2af9   :  { %2818 = vrot.lane.b32.xlu0 %v2814_v24, %s9808_s3 }
0x2b69   :  { %v2821_v15 = vpop.permute.xlu1 %2820 }
0x2b6a   :  { %2826 = vst.msk [vmem:[#allocation3 + $0xf8] sm:$0xff] %vm558_vm2, %v2821_v15 }
0x2b6b   :  { %v2819_v16 = vpop.permute.xlu0 %2818 }
0x2b6c   :  { %2825 = vst.msk [vmem:[#allocation3 + $0xf0] sm:$0xff] %vm558_vm2, %v2819_v16  ;;  %8767 = vmatprep.mubr.msk.f32.mxu0 %vm558_vm2, %v2819_v16 }
0x2b6d   :  { %8768 = vmatmul.mubr.msk.f32.vlgmr.msra.gmra.mxu0 %vm558_vm2, %v2821_v15 }
0x2b6e   :  { %8782 = vmatpush3.msra.mxu0 %v10631_v43 }
0x2b6f   :  { %8783 = vmatprep.subr.mxu0 %v10637_v20 }
0x2b70   :  { %8784 = vmatpush3.msra.mxu0 %v10637_v20 }
0x2b71   :  { %8785 = vmatprep.subr.mxu0 %v10644_v44 }
0x2b72   :  { %8786 = vmatpush3.msra.mxu0 %v10644_v44 }
0x2b73   :  { %8787 = vmatprep.subr.mxu0 %v10651_v36 }
0x2b74   :  { %8788 = vmatpush3.msra.mxu0 %v10651_v36 }
0x2c2d   :  { %v8769_v19 = vpop.f32.mrf.mxu0 }
0x2c2e   :  { %v2909_v33 = vadd.f32 %v8769_v19, %v479_v18 }
0x2c2f   :  { %v2899_v38 = vpop.f32.mrf.mxu0 }
0x2c30   :  { %9500 = vtanh.f32 %v2909_v33  ;;  %v2908_v39 = vadd.f32 %v2899_v38, %v474_v21  ;;  %v8048_v40 = vmul.f32 -1.442695, %v2909_v33 }
0x2c32   :  { %9502 = vtanh.f32 %v2908_v39  ;;  %v8047_v41 = vmul.f32 -1.442695, %v2908_v39 }
0x2c33   :  { %9504 = vpow2.f32 %v8048_v40 }
0x2c34   :  { %9506 = vpow2.f32 %v8047_v41 }
0x2c3d   :  { %v9501_v8 = vpop.eup %9500 }
0x2c3e   :  { %2930 = vrot.lane.b32.xlu1 %v9501_v8, %s9807_s27 }
0x2c3f   :  { %v9503_v37 = vpop.eup %9502 }
0x2c40   :  { %2928 = vrot.lane.b32.xlu0 %v9503_v37, %s9807_s27  ;;  %v9505_v27 = vpop.eup %9504 }
0x2c41   :  { %v9507_v55 = vpop.eup %9506  ;;  %v2917_v11 = vadd.f32 1.0, %v9505_v27  ;;  %v499_v27 = vadd.f32 %v10684_v17, %v10058_v31 }
0x2c42   :  { %v2916_v13 = vadd.f32 1.0, %v9507_v55 }
0x2c43   :  { %9508 = vrcp.f32 %v2917_v11  ;;  %v494_v11 = vadd.f32 %v10684_v17, %v10060_v32 }
0x2c44   :  { %9510 = vrcp.f32 %v2916_v13 }
0x2c50   :  { %v9509_v28 = vpop.eup %9508 }
0x2c51   :  { %v9511_v42 = vpop.eup %9510  ;;  %v2925_v53 = vmul.f32 %v9509_v28, %v2803_v5 }
0x2c52   :  { %v2924_v49 = vmul.f32 %v9511_v42, %v2802_v9 }
0x2cb0   :  { %v2931_v6 = vpop.permute.xlu1 %2930 }
0x2cb1   :  { %v2935_v56 = vmul.f32 %v9509_v28, %v2931_v6 }
0x2cb2   :  { %v2929_v45 = vpop.permute.xlu0 %2928 }
0x2cb3   :  { %2940 = vrot.lane.b32.xlu1 %v2935_v56, %s9808_s3  ;;  %v2934_v46 = vmul.f32 %v9511_v42, %v2929_v45 }
0x2cb5   :  { %2938 = vrot.lane.b32.xlu0 %v2934_v46, %s9808_s3 }
0x2d25   :  { %v2941_v47 = vpop.permute.xlu1 %2940 }
0x2d26   :  { %v2945_v48 = vadd.f32 %v2941_v47, %v2925_v53 }
0x2d27   :  { %v2939_v54 = vpop.permute.xlu0 %2938 }
0x2d28   :  { %9512 = vtanh.f32 %v2945_v48  ;;  %v2944_v50 = vadd.f32 %v2939_v54, %v2924_v49 }
0x2d2a   :  { %9514 = vtanh.f32 %v2944_v50 }
0x2d35   :  { %v9513_v57 = vpop.eup %9512 }
0x2d36   :  { %2952 = vrot.lane.b32.xlu1 %v9513_v57, %s9807_s27 }
0x2d37   :  { %v9515_v58 = vpop.eup %9514 }
0x2d38   :  { %2950 = vrot.lane.b32.xlu0 %v9515_v58, %s9807_s27 }
0x2da8   :  { %v2953_v25 = vpop.permute.xlu1 %2952 }
0x2da9   :  { %v2957_v59 = vmul.f32 %v9509_v28, %v2953_v25 }
0x2daa   :  { %v2951_v61 = vpop.permute.xlu0 %2950 }
0x2dab   :  { %2962 = vrot.lane.b32.xlu1 %v2957_v59, %s9808_s3  ;;  %v2956_v51 = vmul.f32 %v9511_v42, %v2951_v61 }
0x2dad   :  { %2960 = vrot.lane.b32.xlu0 %v2956_v51, %s9808_s3 }
0x2e1d   :  { %v2963_v26 = vpop.permute.xlu1 %2962 }
0x2e1e   :  { %2968 = vst.msk [vmem:[#allocation3 + $0x108] sm:$0xff] %vm558_vm2, %v2963_v26 }
0x2e1f   :  { %v2961_v60 = vpop.permute.xlu0 %2960 }
0x2e20   :  { %2967 = vst.msk [vmem:[#allocation3 + $0x100] sm:$0xff] %vm558_vm2, %v2961_v60  ;;  %8778 = vmatprep.mubr.msk.f32.mxu1 %vm558_vm2, %v2961_v60 }
0x2e21   :  { %8779 = vmatmul.mubr.msk.f32.vlgmr.msra.gmra.mxu1 %vm558_vm2, %v2963_v26 }
0x2e22   :  { %8793 = vmatpush3.msra.mxu1 %v10631_v43 }
0x2e23   :  { %8794 = vmatprep.subr.mxu1 %v10637_v20 }
0x2e24   :  { %8795 = vmatpush3.msra.mxu1 %v10637_v20 }
0x2e25   :  { %8796 = vmatprep.subr.mxu1 %v10644_v44 }
0x2e26   :  { %8797 = vmatpush3.msra.mxu1 %v10644_v44 }
0x2e27   :  { %8798 = vmatprep.subr.mxu1 %v10651_v36 }
0x2e28   :  { %8799 = vmatpush3.msra.mxu1 %v10651_v36 }
0x2ee1   :  { %v8780_v63 = vpop.f32.mrf.mxu1 }
0x2ee2   :  { %v3051_v43 = vadd.f32 %v8780_v63, %v489_v62 }
0x2ee3   :  { %v3041_v52 = vpop.f32.mrf.mxu1 }
0x2ee4   :  { %9516 = vtanh.f32 %v3051_v43  ;;  %v3050_v1 = vadd.f32 %v3041_v52, %v484_v0  ;;  %v8052_v2 = vmul.f32 -1.442695, %v3051_v43  ;;  %v10744_v0 = vld [vmem:[%s12072_s25 + $0x18] sm:$0xff] }
0x2ee5   :  { %8814 = vmatprep.subr.mxu1 %v10744_v0 }
0x2ee6   :  { %9518 = vtanh.f32 %v3050_v1  ;;  %v8051_v36 = vmul.f32 -1.442695, %v3050_v1 }
0x2ee7   :  { %9520 = vpow2.f32 %v8052_v2 }
0x2ee8   :  { %9522 = vpow2.f32 %v8051_v36  ;;  %v10755_v36 = vld [vmem:[%s12072_s25 + $0x10] sm:$0xff] }
0x2ef1   :  { %v9517_v20 = vpop.eup %9516 }
0x2ef2   :  { %3072 = vrot.lane.b32.xlu1 %v9517_v20, %s9807_s27 }
0x2ef3   :  { %v9519_v44 = vpop.eup %9518 }
0x2ef4   :  { %3070 = vrot.lane.b32.xlu0 %v9519_v44, %s9807_s27  ;;  %v9521_v29 = vpop.eup %9520 }
0x2ef5   :  { %v9523_v5 = vpop.eup %9522  ;;  %v3059_v3 = vadd.f32 1.0, %v9521_v29  ;;  %v3491_v29 = vld [vmem:[#allocation3] sm:$0xff] }
0x2ef6   :  { %v3058_v7 = vadd.f32 1.0, %v9523_v5  ;;  %v10763_v5 = vld [vmem:[%s12072_s25 + $0x8] sm:$0xff] }
0x2ef7   :  { %9524 = vrcp.f32 %v3059_v3  ;;  %v10770_v3 = vld [vmem:[%s12072_s25] sm:$0xff] }
0x2ef8   :  { %9526 = vrcp.f32 %v3058_v7  ;;  %v3492_v7 = vld [vmem:[#allocation3 + $0x8] sm:$0xff] }
0x2f04   :  { %v9525_v30 = vpop.eup %9524 }
0x2f05   :  { %v9527_v23 = vpop.eup %9526  ;;  %v3067_v14 = vmul.f32 %v9525_v30, %v2945_v48 }
0x2f06   :  { %v3066_v16 = vmul.f32 %v9527_v23, %v2944_v50 }
0x2f64   :  { %v3073_v9 = vpop.permute.xlu1 %3072 }
0x2f65   :  { %v3077_v4 = vmul.f32 %v9525_v30, %v3073_v9  ;;  %v3697_v9 = vld [vmem:[#allocation3 + $0x28] sm:$0xff] }
0x2f66   :  { %v3071_v10 = vpop.permute.xlu0 %3070 }
0x2f67   :  { %3082 = vrot.lane.b32.xlu1 %v3077_v4, %s9808_s3  ;;  %v3076_v12 = vmul.f32 %v9527_v23, %v3071_v10  ;;  %v3890_v4 = vld [vmem:[#allocation3 + $0x40] sm:$0xff] }
0x2f68   :  { %v4084_v10 = vld [vmem:[#allocation3 + $0x60] sm:$0xff] }
0x2f69   :  { %3080 = vrot.lane.b32.xlu0 %v3076_v12, %s9808_s3  ;;  %v4085_v12 = vld [vmem:[#allocation3 + $0x68] sm:$0xff] }
0x2fd9   :  { %v3083_v24 = vpop.permute.xlu1 %3082 }
0x2fda   :  { %v3087_v15 = vadd.f32 %v3083_v24, %v3067_v14  ;;  %v4278_v14 = vld [vmem:[#allocation3 + $0x80] sm:$0xff]  ;;  %v4279_v24 = vld [vmem:[#allocation3 + $0x88] sm:$0xff] }
0x2fdb   :  { %v3081_v18 = vpop.permute.xlu0 %3080 }
0x2fdc   :  { %9528 = vtanh.f32 %v3087_v15  ;;  %v3086_v19 = vadd.f32 %v3081_v18, %v3066_v16  ;;  %v4473_v16 = vld [vmem:[#allocation3 + $0xa8] sm:$0xff]  ;;  %v4666_v18 = vld [vmem:[#allocation3 + $0xc0] sm:$0xff] }
0x2fde   :  { %9530 = vtanh.f32 %v3086_v19 }
0x2fe9   :  { %v9529_v21 = vpop.eup %9528 }
0x2fea   :  { %3094 = vrot.lane.b32.xlu1 %v9529_v21, %s9807_s27  ;;  %v4860_v21 = vld [vmem:[#allocation3 + $0xe0] sm:$0xff] }
0x2feb   :  { %v9531_v33 = vpop.eup %9530 }
0x2fec   :  { %3092 = vrot.lane.b32.xlu0 %v9531_v33, %s9807_s27  ;;  %v4861_v33 = vld [vmem:[#allocation3 + $0xe8] sm:$0xff] }
0x305c   :  { %v3095_v38 = vpop.permute.xlu1 %3094 }
0x305d   :  { %v3099_v39 = vmul.f32 %v9525_v30, %v3095_v38  ;;  %v3696_v30 = vld [vmem:[#allocation3 + $0x20] sm:$0xff] }
0x305e   :  { %v3093_v8 = vpop.permute.xlu0 %3092  ;;  %v5054_v38 = vld [vmem:[#allocation3 + $0x100] sm:$0xff] }
0x305f   :  { %3104 = vrot.lane.b32.xlu1 %v3099_v39, %s9808_s3  ;;  %v3098_v37 = vmul.f32 %v9527_v23, %v3093_v8  ;;  %v3891_v23 = vld [vmem:[#allocation3 + $0x48] sm:$0xff] }
0x3060   :  { %v5055_v39 = vld [vmem:[#allocation3 + $0x108] sm:$0xff] }
0x3061   :  { %3102 = vrot.lane.b32.xlu0 %v3098_v37, %s9808_s3 }
0x30d1   :  { %v3105_v40 = vpop.permute.xlu1 %3104 }
0x30d2   :  { %3110 = vst.msk [vmem:[#allocation3 + $0x118] sm:$0xff] %vm558_vm2, %v3105_v40 }
0x30d3   :  { %v3103_v41 = vpop.permute.xlu0 %3102 }
0x30d4   :  { %3109 = vst.msk [vmem:[#allocation3 + $0x110] sm:$0xff] %vm558_vm2, %v3103_v41  ;;  %8789 = vmatprep.mubr.msk.f32.mxu0 %vm558_vm2, %v3103_v41 }
0x30d5   :  { %8790 = vmatmul.mubr.msk.f32.vlgmr.msra.gmra.mxu0 %vm558_vm2, %v3105_v40  ;;  %v509_v40 = vadd.f32 %v10684_v17, %v10062_v34 }
0x3195   :  { %v8791_v55 = vpop.f32.mrf.mxu0 }
0x3196   :  { %v3193_v13 = vadd.f32 %v8791_v55, %v499_v27  ;;  %v504_v27 = vadd.f32 %v10684_v17, %v10064_v35 }
0x3197   :  { %v3183_v28 = vpop.f32.mrf.mxu0 }
0x3198   :  { %9532 = vtanh.f32 %v3193_v13  ;;  %v3192_v6 = vadd.f32 %v3183_v28, %v494_v11  ;;  %v8056_v45 = vmul.f32 -1.442695, %v3193_v13 }
0x319a   :  { %9534 = vtanh.f32 %v3192_v6  ;;  %v8055_v46 = vmul.f32 -1.442695, %v3192_v6 }
0x319b   :  { %9536 = vpow2.f32 %v8056_v45 }
0x319c   :  { %9538 = vpow2.f32 %v8055_v46 }
0x31a5   :  { %v9533_v56 = vpop.eup %9532 }
0x31a6   :  { %3214 = vrot.lane.b32.xlu1 %v9533_v56, %s9807_s27 }
0x31a7   :  { %v9535_v42 = vpop.eup %9534 }
0x31a8   :  { %3212 = vrot.lane.b32.xlu0 %v9535_v42, %s9807_s27  ;;  %v9537_v31 = vpop.eup %9536 }
0x31a9   :  { %v9539_v53 = vpop.eup %9538  ;;  %v3201_v47 = vadd.f32 1.0, %v9537_v31 }
0x31aa   :  { %v3200_v48 = vadd.f32 1.0, %v9539_v53 }
0x31ab   :  { %9540 = vrcp.f32 %v3201_v47 }
0x31ac   :  { %9542 = vrcp.f32 %v3200_v48 }
0x31b8   :  { %v9541_v32 = vpop.eup %9540 }
0x31b9   :  { %v9543_v50 = vpop.eup %9542  ;;  %v3209_v25 = vmul.f32 %v9541_v32, %v3087_v15  ;;  %v4472_v15 = vld [vmem:[#allocation3 + $0xa0] sm:$0xff] }
0x31ba   :  { %v3208_v51 = vmul.f32 %v9543_v50, %v3086_v19  ;;  %v4667_v19 = vld [vmem:[#allocation3 + $0xc8] sm:$0xff] }
0x3218   :  { %v3215_v49 = vpop.permute.xlu1 %3214 }
0x3219   :  { %v3219_v54 = vmul.f32 %v9541_v32, %v3215_v49 }
0x321a   :  { %v3213_v57 = vpop.permute.xlu0 %3212 }
0x321b   :  { %3224 = vrot.lane.b32.xlu1 %v3219_v54, %s9808_s3  ;;  %v3218_v58 = vmul.f32 %v9543_v50, %v3213_v57 }
0x321d   :  { %3222 = vrot.lane.b32.xlu0 %v3218_v58, %s9808_s3 }
0x328d   :  { %v3225_v59 = vpop.permute.xlu1 %3224 }
0x328e   :  { %v10733_v61 = vadd.f32 %v3225_v59, %v3209_v25  ;;  %v3402_v59 = vld [vmem:[%s12073_s16 + $0x18] sm:$0xff] }
0x328f   :  { %v3223_v26 = vpop.permute.xlu0 %3222  ;;  %8803 = vmatprep.subr.mxu0 %v3402_v59 }
0x3290   :  { %9544 = vtanh.f32 %v10733_v61  ;;  %v10736_v60 = vadd.f32 %v3223_v26, %v3208_v51  ;;  %v3401_v51 = vld [vmem:[%s12073_s16 + $0x10] sm:$0xff]  ;;  %8804 = vmatpush3.msra.mxu0 %v3402_v59 }
0x3291   :  { %8805 = vmatprep.subr.mxu0 %v3401_v51 }
0x3292   :  { %9546 = vtanh.f32 %v10736_v60  ;;  %8806 = vmatpush3.msra.mxu0 %v3401_v51 }
0x329d   :  { %v9545_v62 = vpop.eup %9544 }
0x329e   :  { %3236 = vrot.lane.b32.xlu1 %v9545_v62, %s9807_s27  ;;  %v3399_v62 = vld [vmem:[%s12073_s16] sm:$0xff] }
0x329f   :  { %v9547_v63 = vpop.eup %9546 }
0x32a0   :  { %3234 = vrot.lane.b32.xlu0 %v9547_v63, %s9807_s27 }
0x3310   :  { %v3237_v43 = vpop.permute.xlu1 %3236 }
0x3311   :  { %v3241_v52 = vmul.f32 %v9541_v32, %v3237_v43 }
0x3312   :  { %v3235_v1 = vpop.permute.xlu0 %3234 }
0x3313   :  { %3246 = vrot.lane.b32.xlu1 %v3241_v52, %s9808_s3  ;;  %v3240_v20 = vmul.f32 %v9543_v50, %v3235_v1 }
0x3315   :  { %3244 = vrot.lane.b32.xlu0 %v3240_v20, %s9808_s3 }
0x3385   :  { %v3247_v44 = vpop.permute.xlu1 %3246 }
0x3386   :  { %3252 = vst.msk [vmem:[#allocation3 + $0x128] sm:$0xff] %vm558_vm2, %v3247_v44 }
0x3387   :  { %v3245_v2 = vpop.permute.xlu0 %3244 }
0x3388   :  { %3251 = vst.msk [vmem:[#allocation3 + $0x120] sm:$0xff] %vm558_vm2, %v3245_v2  ;;  %8800 = vmatprep.mubr.msk.f32.mxu1 %vm558_vm2, %v3245_v2  ;;  %v3599_v2 = vld [vmem:[#allocation3 + $0x10] sm:$0xff] }
0x3389   :  { %8801 = vmatmul.mubr.msk.f32.vlgmr.msra.gmra.mxu1 %vm558_vm2, %v3247_v44 }
0x338a   :  { %8815 = vmatpush3.msra.mxu1 %v10744_v0  ;;  %8822 = vmatprep.mubr.msk.f32.mxu1 %vm558_vm2, %v3491_v29  ;;  %v3600_v29 = vld [vmem:[#allocation3 + $0x18] sm:$0xff] }
0x338b   :  { %8816 = vmatprep.subr.mxu1 %v10755_v36 }
0x338c   :  { %8817 = vmatpush3.msra.mxu1 %v10755_v36 }
0x338d   :  { %8818 = vmatprep.subr.mxu1 %v10763_v5  ;;  %v5249_v37 = vld [vmem:[#allocation3 + $0x128] sm:$0xff] }
0x338e   :  { %8819 = vmatpush3.msra.mxu1 %v10763_v5 }
0x338f   :  { %8820 = vmatprep.subr.mxu1 %v10770_v3  ;;  %v5248_v8 = vld [vmem:[#allocation3 + $0x120] sm:$0xff] }
0x3390   :  { %8821 = vmatpush3.msra.mxu1 %v10770_v3 }
0x3391   :  { %8823 = vmatmul.mubr.msk.f32.vlgmr.msra.gmra.mxu1 %vm558_vm2, %v3492_v7  ;;  %8836 = vmatprep.subr.mxu1 %v10744_v0  ;;  %v3793_v7 = vld [vmem:[#allocation3 + $0x30] sm:$0xff] }
0x3392   :  { %8837 = vmatpush3.msra.mxu1 %v10744_v0  ;;  %8844 = vmatprep.mubr.msk.f32.mxu1 %vm558_vm2, %v3696_v30  ;;  %v3794_v30 = vld [vmem:[#allocation3 + $0x38] sm:$0xff] }
0x3393   :  { %8838 = vmatprep.subr.mxu1 %v10755_v36 }
0x3394   :  { %8839 = vmatpush3.msra.mxu1 %v10755_v36 }
0x3395   :  { %8840 = vmatprep.subr.mxu1 %v10763_v5 }
0x3396   :  { %8841 = vmatpush3.msra.mxu1 %v10763_v5 }
0x3397   :  { %8842 = vmatprep.subr.mxu1 %v10770_v3 }
0x3398   :  { %8843 = vmatpush3.msra.mxu1 %v10770_v3 }
0x3399   :  { %8845 = vmatmul.mubr.msk.f32.vlgmr.msra.gmra.mxu1 %vm558_vm2, %v3697_v9  ;;  %8858 = vmatprep.subr.mxu1 %v10744_v0  ;;  %v3987_v9 = vld [vmem:[#allocation3 + $0x50] sm:$0xff] }
0x339a   :  { %8859 = vmatpush3.msra.mxu1 %v10744_v0  ;;  %8866 = vmatprep.mubr.msk.f32.mxu1 %vm558_vm2, %v3890_v4  ;;  %v3988_v4 = vld [vmem:[#allocation3 + $0x58] sm:$0xff] }
0x339b   :  { %8860 = vmatprep.subr.mxu1 %v10755_v36 }
0x339c   :  { %8861 = vmatpush3.msra.mxu1 %v10755_v36 }
0x339d   :  { %8862 = vmatprep.subr.mxu1 %v10763_v5 }
0x339e   :  { %8863 = vmatpush3.msra.mxu1 %v10763_v5 }
0x339f   :  { %8864 = vmatprep.subr.mxu1 %v10770_v3 }
0x33a0   :  { %8865 = vmatpush3.msra.mxu1 %v10770_v3 }
0x33a1   :  { %8867 = vmatmul.mubr.msk.f32.vlgmr.msra.gmra.mxu1 %vm558_vm2, %v3891_v23  ;;  %8880 = vmatprep.subr.mxu1 %v10744_v0  ;;  %v4181_v23 = vld [vmem:[#allocation3 + $0x70] sm:$0xff] }
0x33a2   :  { %8881 = vmatpush3.msra.mxu1 %v10744_v0  ;;  %8888 = vmatprep.mubr.msk.f32.mxu1 %vm558_vm2, %v4084_v10  ;;  %v4182_v10 = vld [vmem:[#allocation3 + $0x78] sm:$0xff] }
0x33a3   :  { %8882 = vmatprep.subr.mxu1 %v10755_v36 }
0x33a4   :  { %8883 = vmatpush3.msra.mxu1 %v10755_v36 }
0x33a5   :  { %8884 = vmatprep.subr.mxu1 %v10763_v5 }
0x33a6   :  { %8885 = vmatpush3.msra.mxu1 %v10763_v5 }
0x33a7   :  { %8886 = vmatprep.subr.mxu1 %v10770_v3 }
0x33a8   :  { %8887 = vmatpush3.msra.mxu1 %v10770_v3 }
0x33a9   :  { %8889 = vmatmul.mubr.msk.f32.vlgmr.msra.gmra.mxu1 %vm558_vm2, %v4085_v12  ;;  %8902 = vmatprep.subr.mxu1 %v10744_v0  ;;  %v4375_v12 = vld [vmem:[#allocation3 + $0x90] sm:$0xff] }
0x33aa   :  { %8903 = vmatpush3.msra.mxu1 %v10744_v0  ;;  %8910 = vmatprep.mubr.msk.f32.mxu1 %vm558_vm2, %v4278_v14  ;;  %v4376_v14 = vld [vmem:[#allocation3 + $0x98] sm:$0xff] }
0x33ab   :  { %8904 = vmatprep.subr.mxu1 %v10755_v36 }
0x33ac   :  { %8905 = vmatpush3.msra.mxu1 %v10755_v36 }
0x33ad   :  { %8906 = vmatprep.subr.mxu1 %v10763_v5 }
0x33ae   :  { %8907 = vmatpush3.msra.mxu1 %v10763_v5 }
0x33af   :  { %8908 = vmatprep.subr.mxu1 %v10770_v3 }
0x33b0   :  { %8909 = vmatpush3.msra.mxu1 %v10770_v3 }
0x33b1   :  { %8911 = vmatmul.mubr.msk.f32.vlgmr.msra.gmra.mxu1 %vm558_vm2, %v4279_v24  ;;  %8924 = vmatprep.subr.mxu1 %v10744_v0  ;;  %v4569_v24 = vld [vmem:[#allocation3 + $0xb0] sm:$0xff] }
0x33b2   :  { %8925 = vmatpush3.msra.mxu1 %v10744_v0  ;;  %8932 = vmatprep.mubr.msk.f32.mxu1 %vm558_vm2, %v4472_v15  ;;  %v4570_v15 = vld [vmem:[#allocation3 + $0xb8] sm:$0xff] }
0x33b3   :  { %8926 = vmatprep.subr.mxu1 %v10755_v36 }
0x33b4   :  { %8927 = vmatpush3.msra.mxu1 %v10755_v36 }
0x33b5   :  { %8928 = vmatprep.subr.mxu1 %v10763_v5 }
0x33b6   :  { %8929 = vmatpush3.msra.mxu1 %v10763_v5 }
0x33b7   :  { %8930 = vmatprep.subr.mxu1 %v10770_v3 }
0x33b8   :  { %8931 = vmatpush3.msra.mxu1 %v10770_v3 }
0x33b9   :  { %8933 = vmatmul.mubr.msk.f32.vlgmr.msra.gmra.mxu1 %vm558_vm2, %v4473_v16  ;;  %8946 = vmatprep.subr.mxu1 %v10744_v0  ;;  %v4763_v16 = vld [vmem:[#allocation3 + $0xd0] sm:$0xff] }
0x33ba   :  { %8947 = vmatpush3.msra.mxu1 %v10744_v0  ;;  %8954 = vmatprep.mubr.msk.f32.mxu1 %vm558_vm2, %v4666_v18  ;;  %v4764_v18 = vld [vmem:[#allocation3 + $0xd8] sm:$0xff] }
0x33bb   :  { %8948 = vmatprep.subr.mxu1 %v10755_v36 }
0x33bc   :  { %8949 = vmatpush3.msra.mxu1 %v10755_v36 }
0x33bd   :  { %8950 = vmatprep.subr.mxu1 %v10763_v5 }
0x33be   :  { %8951 = vmatpush3.msra.mxu1 %v10763_v5 }
0x33bf   :  { %8952 = vmatprep.subr.mxu1 %v10770_v3 }
0x33c0   :  { %8953 = vmatpush3.msra.mxu1 %v10770_v3 }
0x33c1   :  { %8955 = vmatmul.mubr.msk.f32.vlgmr.msra.gmra.mxu1 %vm558_vm2, %v4667_v19  ;;  %8968 = vmatprep.subr.mxu1 %v10744_v0  ;;  %v4957_v19 = vld [vmem:[#allocation3 + $0xf0] sm:$0xff] }
0x33c2   :  { %8969 = vmatpush3.msra.mxu1 %v10744_v0  ;;  %8976 = vmatprep.mubr.msk.f32.mxu1 %vm558_vm2, %v4860_v21  ;;  %v4958_v21 = vld [vmem:[#allocation3 + $0xf8] sm:$0xff] }
0x33c3   :  { %8970 = vmatprep.subr.mxu1 %v10755_v36 }
0x33c4   :  { %8971 = vmatpush3.msra.mxu1 %v10755_v36 }
0x33c5   :  { %8972 = vmatprep.subr.mxu1 %v10763_v5 }
0x33c6   :  { %8973 = vmatpush3.msra.mxu1 %v10763_v5 }
0x33c7   :  { %8974 = vmatprep.subr.mxu1 %v10770_v3 }
0x33c8   :  { %8975 = vmatpush3.msra.mxu1 %v10770_v3 }
0x33c9   :  { %8977 = vmatmul.mubr.msk.f32.vlgmr.msra.gmra.mxu1 %vm558_vm2, %v4861_v33  ;;  %8990 = vmatprep.subr.mxu1 %v10744_v0  ;;  %v5151_v33 = vld [vmem:[#allocation3 + $0x110] sm:$0xff] }
0x33ca   :  { %8991 = vmatpush3.msra.mxu1 %v10744_v0  ;;  %8998 = vmatprep.mubr.msk.f32.mxu1 %vm558_vm2, %v5054_v38  ;;  %v5152_v38 = vld [vmem:[#allocation3 + $0x118] sm:$0xff] }
0x33cb   :  { %8992 = vmatprep.subr.mxu1 %v10755_v36 }
0x33cc   :  { %8993 = vmatpush3.msra.mxu1 %v10755_v36 }
0x33cd   :  { %8994 = vmatprep.subr.mxu1 %v10763_v5 }
0x33ce   :  { %8995 = vmatpush3.msra.mxu1 %v10763_v5 }
0x33cf   :  { %8996 = vmatprep.subr.mxu1 %v10770_v3 }
0x33d0   :  { %8997 = vmatpush3.msra.mxu1 %v10770_v3 }
0x33d1   :  { %8999 = vmatmul.mubr.msk.f32.vlgmr.msra.gmra.mxu1 %vm558_vm2, %v5055_v39  ;;  %9012 = vmatprep.subr.mxu1 %v10744_v0 }
0x33d2   :  { %9013 = vmatpush3.msra.mxu1 %v10744_v0  ;;  %9020 = vmatprep.mubr.msk.f32.mxu1 %vm558_vm2, %v5248_v8 }
0x33d3   :  { %9014 = vmatprep.subr.mxu1 %v10755_v36 }
0x33d4   :  { %9015 = vmatpush3.msra.mxu1 %v10755_v36 }
0x33d5   :  { %9016 = vmatprep.subr.mxu1 %v10763_v5 }
0x33d6   :  { %9017 = vmatpush3.msra.mxu1 %v10763_v5 }
0x33d7   :  { %9018 = vmatprep.subr.mxu1 %v10770_v3 }
0x33d8   :  { %9019 = vmatpush3.msra.mxu1 %v10770_v3 }
0x33d9   :  { %9021 = vmatmul.mubr.msk.f32.vlgmr.msra.gmra.mxu1 %vm558_vm2, %v5249_v37 }
0x3449   :  { %v8802_v41 = vpop.f32.mrf.mxu1 }
0x344a   :  { %v3335_v55 = vadd.f32 %v8802_v41, %v509_v40 }
0x344b   :  { %v3325_v11 = vpop.f32.mrf.mxu1 }
0x344c   :  { %9548 = vtanh.f32 %v3335_v55  ;;  %v3334_v13 = vadd.f32 %v3325_v11, %v504_v27  ;;  %v8060_v56 = vmul.f32 -1.442695, %v3335_v55 }
0x344e   :  { %9550 = vtanh.f32 %v3334_v13  ;;  %v8059_v42 = vmul.f32 -1.442695, %v3334_v13 }
0x344f   :  { %9552 = vpow2.f32 %v8060_v56 }
0x3450   :  { %9554 = vpow2.f32 %v8059_v42 }
0x3459   :  { %v9549_v28 = vpop.eup %9548 }
0x345a   :  { %3356 = vrot.lane.b32.xlu1 %v9549_v28, %s9807_s27 }
0x345b   :  { %v9551_v6 = vpop.eup %9550 }
0x345c   :  { %3354 = vrot.lane.b32.xlu0 %v9551_v6, %s9807_s27  ;;  %v9553_v34 = vpop.eup %9552 }
0x345d   :  { %v9555_v45 = vpop.eup %9554  ;;  %v3343_v46 = vadd.f32 1.0, %v9553_v34 }
0x345e   :  { %v3342_v31 = vadd.f32 1.0, %v9555_v45 }
0x345f   :  { %9556 = vrcp.f32 %v3343_v46 }
0x3460   :  { %9558 = vrcp.f32 %v3342_v31  ;;  %v11012_v31 = vld [vmem:[%s12041_s7] ss:$0 sm:$0xff] }
0x346c   :  { %v9557_v35 = vpop.eup %9556 }
0x346d   :  { %v9559_v47 = vpop.eup %9558  ;;  %v3351_v49 = vmul.f32 %v9557_v35, %v10733_v61  ;;  %v3400_v61 = vld [vmem:[%s12073_s16 + $0x8] sm:$0xff] }
0x346e   :  { %v3350_v57 = vmul.f32 %v9559_v47, %v10736_v60  ;;  %8807 = vmatprep.subr.mxu0 %v3400_v61 }
0x346f   :  { %8808 = vmatpush3.msra.mxu0 %v3400_v61 }
0x3470   :  { %8809 = vmatprep.subr.mxu0 %v3399_v62 }
0x3471   :  { %8810 = vmatpush3.msra.mxu0 %v3399_v62 }
0x3472   :  { %8825 = vmatprep.subr.mxu0 %v10744_v0 }
0x34cc   :  { %v3357_v17 = vpop.permute.xlu1 %3356 }
0x34cd   :  { %v3361_v53 = vmul.f32 %v9557_v35, %v3357_v17 }
0x34ce   :  { %v3355_v48 = vpop.permute.xlu0 %3354 }
0x34cf   :  { %3366 = vrot.lane.b32.xlu1 %v3361_v53, %s9808_s3  ;;  %v3360_v32 = vmul.f32 %v9559_v47, %v3355_v48 }
0x34d1   :  { %3364 = vrot.lane.b32.xlu0 %v3360_v32, %s9808_s3 }
0x3541   :  { %v3367_v54 = vpop.permute.xlu1 %3366 }
0x3542   :  { %v3371_v50 = vadd.f32 %v3367_v54, %v3351_v49 }
0x3543   :  { %v3365_v58 = vpop.permute.xlu0 %3364 }
0x3544   :  { %9560 = vtanh.f32 %v3371_v50  ;;  %v3370_v25 = vadd.f32 %v3365_v58, %v3350_v57 }
0x3546   :  { %9562 = vtanh.f32 %v3370_v25 }
0x3551   :  { %v9561_v26 = vpop.eup %9560 }
0x3552   :  { %3378 = vrot.lane.b32.xlu1 %v9561_v26, %s9807_s27 }
0x3553   :  { %v9563_v60 = vpop.eup %9562 }
0x3554   :  { %3376 = vrot.lane.b32.xlu0 %v9563_v60, %s9807_s27 }
0x35c4   :  { %v3379_v63 = vpop.permute.xlu1 %3378 }
0x35c5   :  { %v3383_v43 = vmul.f32 %v9557_v35, %v3379_v63 }
0x35c6   :  { %v3377_v52 = vpop.permute.xlu0 %3376 }
0x35c7   :  { %3388 = vrot.lane.b32.xlu1 %v3383_v43, %s9808_s3  ;;  %v3382_v1 = vmul.f32 %v9559_v47, %v3377_v52 }
0x35c9   :  { %3386 = vrot.lane.b32.xlu0 %v3382_v1, %s9808_s3 }
0x3639   :  { %v3389_v20 = vpop.permute.xlu1 %3388 }
0x363a   :  { %3394 = vst.msk [vmem:[#allocation3 + $0x138] sm:$0xff] %vm558_vm2, %v3389_v20 }
0x363b   :  { %v3387_v44 = vpop.permute.xlu0 %3386 }
0x363c   :  { %3393 = vst.msk [vmem:[#allocation3 + $0x130] sm:$0xff] %vm558_vm2, %v3387_v44  ;;  %8811 = vmatprep.mubr.msk.f32.mxu0 %vm558_vm2, %v3387_v44 }
0x363d   :  { %8812 = vmatmul.mubr.msk.f32.vlgmr.msra.gmra.mxu0 %vm558_vm2, %v3389_v20 }
0x363e   :  { %8826 = vmatpush3.msra.mxu0 %v10744_v0  ;;  %8833 = vmatprep.mubr.msk.f32.mxu0 %vm558_vm2, %v3599_v2 }
0x363f   :  { %8827 = vmatprep.subr.mxu0 %v10755_v36 }
0x3640   :  { %8828 = vmatpush3.msra.mxu0 %v10755_v36 }
0x3641   :  { %8829 = vmatprep.subr.mxu0 %v10763_v5  ;;  %v5346_v8 = vld [vmem:[#allocation3 + $0x138] sm:$0xff] }
0x3642   :  { %8830 = vmatpush3.msra.mxu0 %v10763_v5 }
0x3643   :  { %8831 = vmatprep.subr.mxu0 %v10770_v3  ;;  %v5345_v39 = vld [vmem:[#allocation3 + $0x130] sm:$0xff] }
0x3644   :  { %8832 = vmatpush3.msra.mxu0 %v10770_v3 }
0x3645   :  { %8834 = vmatmul.mubr.msk.f32.vlgmr.msra.gmra.mxu0 %vm558_vm2, %v3600_v29  ;;  %8847 = vmatprep.subr.mxu0 %v10744_v0 }
0x3646   :  { %8848 = vmatpush3.msra.mxu0 %v10744_v0  ;;  %8855 = vmatprep.mubr.msk.f32.mxu0 %vm558_vm2, %v3793_v7 }
0x3647   :  { %8849 = vmatprep.subr.mxu0 %v10755_v36 }
0x3648   :  { %8850 = vmatpush3.msra.mxu0 %v10755_v36 }
0x3649   :  { %8851 = vmatprep.subr.mxu0 %v10763_v5 }
0x364a   :  { %8852 = vmatpush3.msra.mxu0 %v10763_v5 }
0x364b   :  { %8853 = vmatprep.subr.mxu0 %v10770_v3 }
0x364c   :  { %8854 = vmatpush3.msra.mxu0 %v10770_v3 }
0x364d   :  { %8856 = vmatmul.mubr.msk.f32.vlgmr.msra.gmra.mxu0 %vm558_vm2, %v3794_v30  ;;  %8869 = vmatprep.subr.mxu0 %v10744_v0 }
0x364e   :  { %8870 = vmatpush3.msra.mxu0 %v10744_v0  ;;  %8877 = vmatprep.mubr.msk.f32.mxu0 %vm558_vm2, %v3987_v9 }
0x364f   :  { %8871 = vmatprep.subr.mxu0 %v10755_v36 }
0x3650   :  { %8872 = vmatpush3.msra.mxu0 %v10755_v36 }
0x3651   :  { %8873 = vmatprep.subr.mxu0 %v10763_v5 }
0x3652   :  { %8874 = vmatpush3.msra.mxu0 %v10763_v5 }
0x3653   :  { %8875 = vmatprep.subr.mxu0 %v10770_v3 }
0x3654   :  { %8876 = vmatpush3.msra.mxu0 %v10770_v3 }
0x3655   :  { %8878 = vmatmul.mubr.msk.f32.vlgmr.msra.gmra.mxu0 %vm558_vm2, %v3988_v4  ;;  %8891 = vmatprep.subr.mxu0 %v10744_v0 }
0x3656   :  { %8892 = vmatpush3.msra.mxu0 %v10744_v0  ;;  %8899 = vmatprep.mubr.msk.f32.mxu0 %vm558_vm2, %v4181_v23 }
0x3657   :  { %8893 = vmatprep.subr.mxu0 %v10755_v36 }
0x3658   :  { %8894 = vmatpush3.msra.mxu0 %v10755_v36 }
0x3659   :  { %8895 = vmatprep.subr.mxu0 %v10763_v5 }
0x365a   :  { %8896 = vmatpush3.msra.mxu0 %v10763_v5 }
0x365b   :  { %8897 = vmatprep.subr.mxu0 %v10770_v3 }
0x365c   :  { %8898 = vmatpush3.msra.mxu0 %v10770_v3 }
0x365d   :  { %8900 = vmatmul.mubr.msk.f32.vlgmr.msra.gmra.mxu0 %vm558_vm2, %v4182_v10  ;;  %8913 = vmatprep.subr.mxu0 %v10744_v0 }
0x365e   :  { %8914 = vmatpush3.msra.mxu0 %v10744_v0  ;;  %8921 = vmatprep.mubr.msk.f32.mxu0 %vm558_vm2, %v4375_v12 }
0x365f   :  { %8915 = vmatprep.subr.mxu0 %v10755_v36 }
0x3660   :  { %8916 = vmatpush3.msra.mxu0 %v10755_v36 }
0x3661   :  { %8917 = vmatprep.subr.mxu0 %v10763_v5 }
0x3662   :  { %8918 = vmatpush3.msra.mxu0 %v10763_v5 }
0x3663   :  { %8919 = vmatprep.subr.mxu0 %v10770_v3 }
0x3664   :  { %8920 = vmatpush3.msra.mxu0 %v10770_v3 }
0x3665   :  { %8922 = vmatmul.mubr.msk.f32.vlgmr.msra.gmra.mxu0 %vm558_vm2, %v4376_v14  ;;  %8935 = vmatprep.subr.mxu0 %v10744_v0 }
0x3666   :  { %8936 = vmatpush3.msra.mxu0 %v10744_v0  ;;  %8943 = vmatprep.mubr.msk.f32.mxu0 %vm558_vm2, %v4569_v24 }
0x3667   :  { %8937 = vmatprep.subr.mxu0 %v10755_v36 }
0x3668   :  { %8938 = vmatpush3.msra.mxu0 %v10755_v36 }
0x3669   :  { %8939 = vmatprep.subr.mxu0 %v10763_v5 }
0x366a   :  { %8940 = vmatpush3.msra.mxu0 %v10763_v5 }
0x366b   :  { %8941 = vmatprep.subr.mxu0 %v10770_v3 }
0x366c   :  { %8942 = vmatpush3.msra.mxu0 %v10770_v3 }
0x366d   :  { %8944 = vmatmul.mubr.msk.f32.vlgmr.msra.gmra.mxu0 %vm558_vm2, %v4570_v15  ;;  %8957 = vmatprep.subr.mxu0 %v10744_v0 }
0x366e   :  { %8958 = vmatpush3.msra.mxu0 %v10744_v0  ;;  %8965 = vmatprep.mubr.msk.f32.mxu0 %vm558_vm2, %v4763_v16 }
0x366f   :  { %8959 = vmatprep.subr.mxu0 %v10755_v36 }
0x3670   :  { %8960 = vmatpush3.msra.mxu0 %v10755_v36 }
0x3671   :  { %8961 = vmatprep.subr.mxu0 %v10763_v5 }
0x3672   :  { %8962 = vmatpush3.msra.mxu0 %v10763_v5 }
0x3673   :  { %8963 = vmatprep.subr.mxu0 %v10770_v3 }
0x3674   :  { %8964 = vmatpush3.msra.mxu0 %v10770_v3 }
0x3675   :  { %8966 = vmatmul.mubr.msk.f32.vlgmr.msra.gmra.mxu0 %vm558_vm2, %v4764_v18  ;;  %8979 = vmatprep.subr.mxu0 %v10744_v0 }
0x3676   :  { %8980 = vmatpush3.msra.mxu0 %v10744_v0  ;;  %8987 = vmatprep.mubr.msk.f32.mxu0 %vm558_vm2, %v4957_v19 }
0x3677   :  { %8981 = vmatprep.subr.mxu0 %v10755_v36 }
0x3678   :  { %8982 = vmatpush3.msra.mxu0 %v10755_v36 }
0x3679   :  { %8983 = vmatprep.subr.mxu0 %v10763_v5 }
0x367a   :  { %8984 = vmatpush3.msra.mxu0 %v10763_v5 }
0x367b   :  { %8985 = vmatprep.subr.mxu0 %v10770_v3 }
0x367c   :  { %8986 = vmatpush3.msra.mxu0 %v10770_v3 }
0x367d   :  { %8988 = vmatmul.mubr.msk.f32.vlgmr.msra.gmra.mxu0 %vm558_vm2, %v4958_v21  ;;  %9001 = vmatprep.subr.mxu0 %v10744_v0 }
0x367e   :  { %9002 = vmatpush3.msra.mxu0 %v10744_v0  ;;  %9009 = vmatprep.mubr.msk.f32.mxu0 %vm558_vm2, %v5151_v33 }
0x367f   :  { %9003 = vmatprep.subr.mxu0 %v10755_v36 }
0x3680   :  { %9004 = vmatpush3.msra.mxu0 %v10755_v36 }
0x3681   :  { %9005 = vmatprep.subr.mxu0 %v10763_v5 }
0x3682   :  { %9006 = vmatpush3.msra.mxu0 %v10763_v5 }
0x3683   :  { %9007 = vmatprep.subr.mxu0 %v10770_v3 }
0x3684   :  { %9008 = vmatpush3.msra.mxu0 %v10770_v3 }
0x3685   :  { %9010 = vmatmul.mubr.msk.f32.vlgmr.msra.gmra.mxu0 %vm558_vm2, %v5152_v38  ;;  %9023 = vmatprep.subr.mxu0 %v10744_v0 }
0x3686   :  { %9024 = vmatpush3.msra.mxu0 %v10744_v0  ;;  %9031 = vmatprep.mubr.msk.f32.mxu0 %vm558_vm2, %v5345_v39  ;;  %v8824_v0 = vpop.f32.mrf.mxu1 }
0x3687   :  { %9025 = vmatprep.subr.mxu0 %v10755_v36 }
0x3688   :  { %9026 = vmatpush3.msra.mxu0 %v10755_v36  ;;  %v10998_v37 = vpop.f32.mrf.mxu1 }
0x3689   :  { %9027 = vmatprep.subr.mxu0 %v10763_v5 }
0x368a   :  { %9028 = vmatpush3.msra.mxu0 %v10763_v5  ;;  %v8846_v40 = vpop.f32.mrf.mxu1  ;;  %v8061_v5 = vld [vmem:[%s12040_s6] ss:$0 sm:$0xff] }
0x368b   :  { %9029 = vmatprep.subr.mxu0 %v10770_v3 }
0x368c   :  { %9030 = vmatpush3.msra.mxu0 %v10770_v3  ;;  %v3770_v41 = vpop.f32.mrf.mxu1 }
0x368d   :  { %9032 = vmatmul.mubr.msk.f32.vlgmr.msra.gmra.mxu0 %vm558_vm2, %v5346_v8  ;;  %9045 = vmatprep.subr.mxu0 %v9806_v22 }
0x368e   :  { %v8868_v27 = vpop.f32.mrf.mxu1  ;;  %9053 = vmatprep.mubr.msk.f32.mxu0 %vm9810_vm4, %v9806_v22 }
0x3690   :  { %v3964_v36 = vpop.f32.mrf.mxu1 }
0x3692   :  { %v8890_v55 = vpop.f32.mrf.mxu1 }
0x3694   :  { %v4158_v11 = vpop.f32.mrf.mxu1 }
0x3696   :  { %v8912_v13 = vpop.f32.mrf.mxu1 }
0x3698   :  { %v4352_v3 = vpop.f32.mrf.mxu1 }
0x369a   :  { %v8934_v56 = vpop.f32.mrf.mxu1 }
0x369c   :  { %v4546_v32 = vpop.f32.mrf.mxu1 }
0x369e   :  { %v8956_v58 = vpop.f32.mrf.mxu1 }
0x36a0   :  { %v4740_v52 = vpop.f32.mrf.mxu1 }
0x36a2   :  { %v8978_v29 = vpop.f32.mrf.mxu1 }
0x36a4   :  { %v4934_v24 = vpop.f32.mrf.mxu1 }
0x36a6   :  { %v9000_v33 = vpop.f32.mrf.mxu1 }
0x36fd   :  { %v8813_v28 = vpop.f32.mrf.mxu0 }
0x36fe   :  { %v11003_v6 = vadd.f32 %v8813_v28, %v8061_v5 }
0x36ff   :  { %v3482_v42 = vpop.f32.mrf.mxu0 }
0x3700   :  { %v11005_v34 = vadd.f32 %v8061_v5, %v3482_v42  ;;  %v3571_v45 = vadd.f32 %v8824_v0, %v11003_v6  ;;  %v3776_v46 = vadd.f32 %v8846_v40, %v11003_v6  ;;  %v3970_v35 = vadd.f32 %v8868_v27, %v11003_v6 }
0x3701   :  { %v4164_v25 = vadd.f32 %v8890_v55, %v11003_v6  ;;  %v4358_v2 = vadd.f32 %v8912_v13, %v11003_v6  ;;  %v4552_v14 = vadd.f32 %v8934_v56, %v11003_v6  ;;  %v4746_v0 = vadd.f32 %v8956_v58, %v11003_v6 }
0x3702   :  { %v3575_v17 = vmax.f32 %v3571_v45, 0.0  ;;  %v3771_v53 = vadd.f32 %v3770_v41, %v11005_v34  ;;  %v3780_v47 = vmax.f32 %v3776_v46, 0.0  ;;  %v3965_v48 = vadd.f32 %v3964_v36, %v11005_v34 }
0x3703   :  { %v4159_v57 = vadd.f32 %v4158_v11, %v11005_v34  ;;  %v3974_v26 = vmax.f32 %v3970_v35, 0.0  ;;  %v4353_v43 = vadd.f32 %v4352_v3, %v11005_v34  ;;  %v4168_v44 = vmax.f32 %v4164_v25, 0.0  ;;  %v5128_v11 = vpop.f32.mrf.mxu1 }
0x3704   :  { %v3583_v49 = vmul.f32 %v11012_v31, %v3575_v17  ;;  %v3779_v54 = vmax.f32 %v3771_v53, 0.0  ;;  %v3973_v50 = vmax.f32 %v3965_v48, 0.0  ;;  %v3782_v61 = vmul.f32 %v11012_v31, %v3780_v47 }
0x3705   :  { %v4167_v63 = vmax.f32 %v4159_v57, 0.0  ;;  %v3976_v20 = vmul.f32 %v11012_v31, %v3974_v26  ;;  %v4361_v9 = vmax.f32 %v4353_v43, 0.0  ;;  %v4547_v4 = vadd.f32 %v4546_v32, %v11005_v34  ;;  %v11035_v15 = vpop.f32.mrf.mxu0  ;;  %v9022_v42 = vpop.f32.mrf.mxu1 }
0x3706   :  { %v3588_v59 = vsel %vm3584_vm3, %v3583_v49, 0.0  ;;  %v3781_v51 = vmul.f32 %v11012_v31, %v3779_v54  ;;  %v3975_v62 = vmul.f32 %v11012_v31, %v3973_v50  ;;  %v3786_v1 = vsel %vm3584_vm3, %v3782_v61, 0.0 }
0x3707   :  { %3589 = vadd.xlane.f32.xlu0 %v3588_v59  ;;  %v4169_v30 = vmul.f32 %v11012_v31, %v4167_v63  ;;  %v3980_v23 = vsel %vm3584_vm3, %v3976_v20, 0.0  ;;  %v4170_v10 = vmul.f32 %v11012_v31, %v4168_v44  ;;  %v4362_v12 = vmax.f32 %v4358_v2, 0.0  ;;  %v3673_v40 = vpop.f32.mrf.mxu0  ;;  %v5322_v54 = vpop.f32.mrf.mxu1 }
0x3708   :  { %v3783_v60 = vsel %vm3584_vm3, %v3781_v51, 0.0  ;;  %v3977_v7 = vsel %vm3584_vm3, %v3975_v62, 0.0  ;;  %v4363_v18 = vmul.f32 %v11012_v31, %v4361_v9  ;;  %v4555_v19 = vmax.f32 %v4547_v4, 0.0 }
0x3709   :  { %3784 = vadd.xlane.f32.xlu1 %v3783_v60  ;;  %v4171_v16 = vsel %vm3584_vm3, %v4169_v30, 0.0  ;;  %v4741_v21 = vadd.f32 %v4740_v52, %v11005_v34  ;;  %v4174_v38 = vsel %vm3584_vm3, %v4170_v10, 0.0  ;;  %v4364_v39 = vmul.f32 %v11012_v31, %v4362_v12 }
0x370a   :  { %v4556_v8 = vmax.f32 %v4552_v14, 0.0  ;;  %v4365_v41 = vsel %vm3584_vm3, %v4363_v18, 0.0  ;;  %v4557_v27 = vmul.f32 %v11012_v31, %v4555_v19  ;;  %v4935_v55 = vadd.f32 %v4934_v24, %v11005_v34 }
0x370b   :  { %3787 = vadd.xlane.f32.xlu0 %v3786_v1  ;;  %v4749_v36 = vmax.f32 %v4741_v21, 0.0  ;;  %v4368_v5 = vsel %vm3584_vm3, %v4364_v39, 0.0  ;;  %v4750_v28 = vmax.f32 %v4746_v0, 0.0  ;;  %v4940_v56 = vadd.f32 %v8978_v29, %v11003_v6 }
0x370c   :  { %v4558_v3 = vmul.f32 %v11012_v31, %v4556_v8  ;;  %v4559_v45 = vsel %vm3584_vm3, %v4557_v27, 0.0  ;;  %v4943_v35 = vmax.f32 %v4935_v55, 0.0  ;;  %v5129_v17 = vadd.f32 %v5128_v11, %v11005_v34 }
0x370d   :  { %3978 = vadd.xlane.f32.xlu1 %v3977_v7  ;;  %v8857_v13 = vpop.f32.mrf.mxu0  ;;  %v4751_v46 = vmul.f32 %v11012_v31, %v4749_v36  ;;  %v4752_v48 = vmul.f32 %v11012_v31, %v4750_v28  ;;  %v4944_v32 = vmax.f32 %v4940_v56, 0.0  ;;  %v5134_v49 = vadd.f32 %v9000_v33, %v11003_v6 }
0x370e   :  { %v4562_v47 = vsel %vm3584_vm3, %v4558_v3, 0.0  ;;  %v4945_v58 = vmul.f32 %v11012_v31, %v4943_v35  ;;  %v5137_v25 = vmax.f32 %v5129_v17, 0.0  ;;  %v5323_v59 = vadd.f32 %v5322_v54, %v11005_v34 }
0x370f   :  { %3981 = vadd.xlane.f32.xlu0 %v3980_v23  ;;  %v3867_v53 = vpop.f32.mrf.mxu0  ;;  %v4753_v57 = vsel %vm3584_vm3, %v4751_v46, 0.0  ;;  %v4756_v51 = vsel %vm3584_vm3, %v4752_v48, 0.0  ;;  %v4946_v61 = vmul.f32 %v11012_v31, %v4944_v32  ;;  %v5138_v26 = vmax.f32 %v5134_v49, 0.0 }
0x3710   :  { %v5328_v60 = vadd.f32 %v9022_v42, %v11003_v6  ;;  %v3674_v63 = vadd.f32 %v3673_v40, %v11005_v34  ;;  %v4947_v43 = vsel %vm3584_vm3, %v4945_v58, 0.0  ;;  %v5139_v52 = vmul.f32 %v11012_v31, %v5137_v25 }
0x3711   :  { %4172 = vadd.xlane.f32.xlu1 %v4171_v16  ;;  %v5331_v1 = vmax.f32 %v5323_v59, 0.0  ;;  %v4950_v44 = vsel %vm3584_vm3, %v4946_v61, 0.0  ;;  %v5140_v2 = vmul.f32 %v11012_v31, %v5138_v26  ;;  %v3566_v7 = vadd.f32 %v10998_v37, %v11005_v34 }
0x3712   :  { %v5332_v29 = vmax.f32 %v5328_v60, 0.0  ;;  %v3682_v30 = vmax.f32 %v3674_v63, 0.0  ;;  %v3868_v9 = vadd.f32 %v3867_v53, %v11005_v34  ;;  %v5141_v4 = vsel %vm3584_vm3, %v5139_v52, 0.0 }
0x3713   :  { %4175 = vadd.xlane.f32.xlu0 %v4174_v38  ;;  %v5333_v23 = vmul.f32 %v11012_v31, %v5331_v1  ;;  %v3679_v12 = vadd.f32 %v11035_v15, %v11003_v6  ;;  %v5144_v14 = vsel %vm3584_vm3, %v5140_v2, 0.0  ;;  %v3574_v16 = vmax.f32 %v3566_v7, 0.0 }
0x3714   :  { %v5334_v24 = vmul.f32 %v11012_v31, %v5332_v29  ;;  %v3684_v37 = vmul.f32 %v11012_v31, %v3682_v30  ;;  %v3876_v19 = vmax.f32 %v3868_v9, 0.0  ;;  %v3873_v39 = vadd.f32 %v8857_v13, %v11003_v6 }
0x3715   :  { %4366 = vadd.xlane.f32.xlu1 %v4365_v41  ;;  %v8879_v50 = vpop.f32.mrf.mxu0  ;;  %v5335_v33 = vsel %vm3584_vm3, %v5333_v23, 0.0  ;;  %v3683_v38 = vmax.f32 %v3679_v12, 0.0  ;;  %v3582_v8 = vmul.f32 %v11012_v31, %v3574_v16 }
0x3716   :  { %v5338_v15 = vsel %vm3584_vm3, %v5334_v24, 0.0  ;;  %v3878_v40 = vmul.f32 %v11012_v31, %v3876_v19  ;;  %v3686_v36 = vsel %vm3584_vm3, %v3684_v37, 0.0  ;;  %v4067_v13 = vadd.f32 %v8879_v50, %v11003_v6 }
0x3717   :  { %4369 = vadd.xlane.f32.xlu0 %v4368_v5  ;;  %v4061_v62 = vpop.f32.mrf.mxu0  ;;  %v3685_v11 = vmul.f32 %v11012_v31, %v3683_v38  ;;  %v3877_v5 = vmax.f32 %v3873_v39, 0.0  ;;  %v3585_v3 = vsel %vm3584_vm3, %v3582_v8, 0.0 }
0x3718   :  { %v4062_v21 = vadd.f32 %v4061_v62, %v11005_v34  ;;  %v4071_v17 = vmax.f32 %v4067_v13, 0.0 }
0x3719   :  { %4560 = vadd.xlane.f32.xlu1 %v4559_v45  ;;  %v3880_v45 = vsel %vm3584_vm3, %v3878_v40, 0.0  ;;  %v3879_v35 = vmul.f32 %v11012_v31, %v3877_v5 }
0x371a   :  { %v4070_v41 = vmax.f32 %v4062_v21, 0.0  ;;  %v4073_v58 = vmul.f32 %v11012_v31, %v4071_v17 }
0x371b   :  { %4563 = vadd.xlane.f32.xlu0 %v4562_v47  ;;  %v3689_v47 = vsel %vm3584_vm3, %v3685_v11, 0.0  ;;  %v3883_v59 = vsel %vm3584_vm3, %v3879_v35, 0.0 }
0x371c   :  { %v4072_v28 = vmul.f32 %v11012_v31, %v4070_v41  ;;  %v4077_v1 = vsel %vm3584_vm3, %v4073_v58, 0.0 }
0x371d   :  { %4754 = vadd.xlane.f32.xlu1 %v4753_v57  ;;  %v8901_v20 = vpop.f32.mrf.mxu0 }
0x371e   :  { %v4261_v53 = vadd.f32 %v8901_v20, %v11003_v6  ;;  %v4074_v54 = vsel %vm3584_vm3, %v4072_v28, 0.0 }
0x371f   :  { %4757 = vadd.xlane.f32.xlu0 %v4756_v51  ;;  %v4255_v10 = vpop.f32.mrf.mxu0 }
0x3720   :  { %v4256_v27 = vadd.f32 %v4255_v10, %v11005_v34  ;;  %v4265_v25 = vmax.f32 %v4261_v53, 0.0 }
0x3721   :  { %4948 = vadd.xlane.f32.xlu1 %v4947_v43 }
0x3722   :  { %v4264_v56 = vmax.f32 %v4256_v27, 0.0  ;;  %v4267_v43 = vmul.f32 %v11012_v31, %v4265_v25 }
0x3723   :  { %4951 = vadd.xlane.f32.xlu0 %v4950_v44 }
0x3724   :  { %v4266_v48 = vmul.f32 %v11012_v31, %v4264_v56 }
0x3725   :  { %5142 = vadd.xlane.f32.xlu1 %v5141_v4  ;;  %v8923_v18 = vpop.f32.mrf.mxu0  ;;  %v4271_v4 = vsel %vm3584_vm3, %v4267_v43, 0.0 }
0x3726   :  { %v4455_v50 = vadd.f32 %v8923_v18, %v11003_v6  ;;  %v4268_v62 = vsel %vm3584_vm3, %v4266_v48, 0.0 }
0x3727   :  { %5145 = vadd.xlane.f32.xlu0 %v5144_v14  ;;  %v4449_v0 = vpop.f32.mrf.mxu0 }
0x3728   :  { %v4450_v42 = vadd.f32 %v4449_v0, %v11005_v34  ;;  %v4459_v63 = vmax.f32 %v4455_v50, 0.0 }
0x3729   :  { %5336 = vadd.xlane.f32.xlu1 %v5335_v33 }
0x372a   :  { %v4458_v32 = vmax.f32 %v4450_v42, 0.0  ;;  %v4461_v29 = vmul.f32 %v11012_v31, %v4459_v63 }
0x372b   :  { %5339 = vadd.xlane.f32.xlu0 %v5338_v15 }
0x372c   :  { %v4460_v61 = vmul.f32 %v11012_v31, %v4458_v32  ;;  %v4465_v24 = vsel %vm3584_vm3, %v4461_v29, 0.0 }
0x372d   :  { %v8945_v55 = vpop.f32.mrf.mxu0  ;;  %3687 = vadd.xlane.f32.xlu1 %v3686_v36 }
0x372e   :  { %v4649_v52 = vadd.f32 %v8945_v55, %v11003_v6  ;;  %v4462_v2 = vsel %vm3584_vm3, %v4460_v61, 0.0 }
0x372f   :  { %3586 = vadd.xlane.f32.xlu0 %v3585_v3  ;;  %v4643_v46 = vpop.f32.mrf.mxu0 }
0x3730   :  { %v4644_v49 = vadd.f32 %v4643_v46, %v11005_v34  ;;  %v4653_v30 = vmax.f32 %v4649_v52, 0.0 }
0x3731   :  { %3881 = vadd.xlane.f32.xlu1 %v3880_v45 }
0x3732   :  { %v4652_v26 = vmax.f32 %v4644_v49, 0.0  ;;  %v4655_v16 = vmul.f32 %v11012_v31, %v4653_v30 }
0x3733   :  { %3690 = vadd.xlane.f32.xlu0 %v3689_v47 }
0x3734   :  { %v4654_v20 = vmul.f32 %v11012_v31, %v4652_v26  ;;  %v4659_v0 = vsel %vm3584_vm3, %v4655_v16, 0.0 }
0x3735   :  { %v8967_v57 = vpop.f32.mrf.mxu0  ;;  %4075 = vadd.xlane.f32.xlu1 %v4074_v54  ;;  %v9809_v54 = vmov 0  }
0x3736   :  { %v4843_v9 = vadd.f32 %v8967_v57, %v11003_v6  ;;  %v4656_v14 = vsel %vm3584_vm3, %v4654_v20, 0.0  ;;  %9243 = vset.pattern.permute.xlu0 %v9809_v54  ;;  %9242 = vset.pattern.permute.xlu1 %v9809_v54 }
0x3737   :  { %v4837_v51 = vpop.f32.mrf.mxu0  ;;  %3884 = vadd.xlane.f32.xlu0 %v3883_v59 }
0x3738   :  { %v4838_v60 = vadd.f32 %v4837_v51, %v11005_v34  ;;  %v4847_v18 = vmax.f32 %v4843_v9, 0.0 }
0x3739   :  { %4269 = vadd.xlane.f32.xlu1 %v4268_v62 }
0x373a   :  { %v4846_v44 = vmax.f32 %v4838_v60, 0.0  ;;  %v4849_v39 = vmul.f32 %v11012_v31, %v4847_v18 }
0x373b   :  { %4078 = vadd.xlane.f32.xlu0 %v4077_v1 }
0x373c   :  { %v4848_v10 = vmul.f32 %v11012_v31, %v4846_v44  ;;  %v4853_v5 = vsel %vm3584_vm3, %v4849_v39, 0.0 }
0x373d   :  { %v8989_v7 = vpop.f32.mrf.mxu0  ;;  %4463 = vadd.xlane.f32.xlu1 %v4462_v2 }
0x373e   :  { %v5037_v37 = vadd.f32 %v8989_v7, %v11003_v6  ;;  %v4850_v33 = vsel %vm3584_vm3, %v4848_v10, 0.0  ;;  %v11154_v7 = vld [vmem:[#allocation5] ss:$0 sm:$0xff] }
0x373f   :  { %v5031_v23 = vpop.f32.mrf.mxu0  ;;  %4272 = vadd.xlane.f32.xlu0 %v4271_v4 }
0x3740   :  { %v5032_v12 = vadd.f32 %v5031_v23, %v11005_v34  ;;  %v5041_v15 = vmax.f32 %v5037_v37, 0.0 }
0x3741   :  { %4657 = vadd.xlane.f32.xlu1 %v4656_v14 }
0x3742   :  { %v5040_v19 = vmax.f32 %v5032_v12, 0.0  ;;  %v5043_v36 = vmul.f32 %v11012_v31, %v5041_v15 }
0x3743   :  { %4466 = vadd.xlane.f32.xlu0 %v4465_v24 }
0x3744   :  { %v5042_v21 = vmul.f32 %v11012_v31, %v5040_v19  ;;  %v5047_v45 = vsel %vm3584_vm3, %v5043_v36, 0.0 }
0x3745   :  { %v9011_v38 = vpop.f32.mrf.mxu0  ;;  %4851 = vadd.xlane.f32.xlu1 %v4850_v33 }
0x3746   :  { %v5231_v8 = vadd.f32 %v9011_v38, %v11003_v6  ;;  %v5044_v27 = vsel %vm3584_vm3, %v5042_v21, 0.0 }
0x3747   :  { %v5225_v40 = vpop.f32.mrf.mxu0  ;;  %4660 = vadd.xlane.f32.xlu0 %v4659_v0 }
0x3748   :  { %v5226_v41 = vadd.f32 %v5225_v40, %v11005_v34  ;;  %v5235_v55 = vmax.f32 %v5231_v8, 0.0 }
0x3749   :  { %5045 = vadd.xlane.f32.xlu1 %v5044_v27 }
0x374a   :  { %v5234_v11 = vmax.f32 %v5226_v41, 0.0  ;;  %v5237_v28 = vmul.f32 %v11012_v31, %v5235_v55 }
0x374b   :  { %4854 = vadd.xlane.f32.xlu0 %v4853_v5 }
0x374c   :  { %v5236_v13 = vmul.f32 %v11012_v31, %v5234_v11  ;;  %v5241_v48 = vsel %vm3584_vm3, %v5237_v28, 0.0 }
0x374d   :  { %v9033_v3 = vpop.f32.mrf.mxu0 }
0x374e   :  { %v5425_v56 = vadd.f32 %v9033_v3, %v11003_v6  ;;  %v5238_v42 = vsel %vm3584_vm3, %v5236_v13, 0.0 }
0x374f   :  { %v5419_v46 = vpop.f32.mrf.mxu0  ;;  %5239 = vadd.xlane.f32.xlu1 %v5238_v42  ;;  %5048 = vadd.xlane.f32.xlu0 %v5047_v45 }
0x3750   :  { %v5429_v35 = vmax.f32 %v5425_v56, 0.0  ;;  %v5420_v17 = vadd.f32 %v5419_v46, %v11005_v34 }
0x3752   :  { %v5431_v53 = vmul.f32 %v11012_v31, %v5429_v35  ;;  %v5428_v47 = vmax.f32 %v5420_v17, 0.0 }
0x3753   :  { %5242 = vadd.xlane.f32.xlu0 %v5241_v48 }
0x3754   :  { %v5430_v32 = vmul.f32 %v11012_v31, %v5428_v47  ;;  %v5435_v49 = vsel %vm3584_vm3, %v5431_v53, 0.0 }
0x3756   :  { %v5432_v6 = vsel %vm3584_vm3, %v5430_v32, 0.0 }
0x3757   :  { %5433 = vadd.xlane.f32.xlu1 %v5432_v6  ;;  %5436 = vadd.xlane.f32.xlu0 %v5435_v49 }
0x3790   :  { %v3590_v50 = vpop.xlane.xlu0 %3589 }
0x3791   :  { %v11168_v24 = vadd.f32 %v11154_v7, %v3590_v50 }
0x3792   :  { %v3785_v57 = vpop.xlane.xlu1 %3784 }
0x3793   :  { %v11163_v10 = vadd.f32 %v11154_v7, %v3785_v57 }
0x3794   :  { %v3788_v34 = vpop.xlane.xlu0 %3787 }
0x3795   :  { %v11178_v21 = vadd.f32 %v11154_v7, %v3788_v34 }
0x3796   :  { %v3979_v58 = vpop.xlane.xlu1 %3978 }
0x3797   :  { %v11181_v33 = vadd.f32 %v11154_v7, %v3979_v58 }
0x3798   :  { %v3982_v25 = vpop.xlane.xlu0 %3981 }
0x3799   :  { %v11195_v36 = vadd.f32 %v11154_v7, %v3982_v25 }
0x379a   :  { %v4173_v59 = vpop.xlane.xlu1 %4172 }
0x379b   :  { %v11198_v55 = vadd.f32 %v11154_v7, %v4173_v59 }
0x379c   :  { %v4176_v51 = vpop.xlane.xlu0 %4175 }
0x379d   :  { %v11211_v46 = vadd.f32 %v11154_v7, %v4176_v51 }
0x379e   :  { %v4367_v61 = vpop.xlane.xlu1 %4366 }
0x379f   :  { %v11214_v35 = vadd.f32 %v11154_v7, %v4367_v61 }
0x37a0   :  { %v4370_v26 = vpop.xlane.xlu0 %4369 }
0x37a1   :  { %v11227_v50 = vadd.f32 %v11154_v7, %v4370_v26 }
0x37a2   :  { %v4561_v60 = vpop.xlane.xlu1 %4560 }
0x37a3   :  { %v11230_v57 = vadd.f32 %v11154_v7, %v4561_v60 }
0x37a4   :  { %v11136_v31 = vpop.xlane.xlu0 %4563 }
0x37a5   :  { %v11244_v60 = vadd.f32 %v11154_v7, %v11136_v31 }
0x37a6   :  { %v11138_v62 = vpop.xlane.xlu1 %4754 }
0x37a8   :  { %v11140_v63 = vpop.xlane.xlu0 %4757 }
0x37aa   :  { %v11142_v43 = vpop.xlane.xlu1 %4948 }
0x37ac   :  { %v11144_v52 = vpop.xlane.xlu0 %4951 }
0x37ae   :  { %v11146_v1 = vpop.xlane.xlu1 %5142 }
0x37b0   :  { %v11148_v20 = vpop.xlane.xlu0 %5145 }
0x37b2   :  { %v11150_v44 = vpop.xlane.xlu1 %5336 }
0x37b4   :  { %v11152_v2 = vpop.xlane.xlu0 %5339 }
0x37b6   :  { %v3688_v29 = vpop.xlane.xlu1 %3687 }
0x37b7   :  { %v11157_v9 = vadd.f32 %v11154_v7, %v3688_v29 }
0x37b8   :  { %v3587_v30 = vpop.xlane.xlu0 %3586 }
0x37b9   :  { %v11160_v4 = vadd.f32 %v11154_v7, %v3587_v30  ;;  %v11248_v30 = vadd.f32 %v11154_v7, %v11138_v62  ;;  %v11262_v62 = vadd.f32 %v11154_v7, %v11140_v63  ;;  %v4954_v63 = vadd.f32 %v11154_v7, %v11144_v52 }
0x37ba   :  { %v3882_v23 = vpop.xlane.xlu1 %3881  ;;  %v11295_v52 = vadd.f32 %v11154_v7, %v11148_v20 }
0x37bb   :  { %v3694_v12 = vmax.f32 %v11160_v4, %v11157_v9  ;;  %v11172_v18 = vadd.f32 %v11154_v7, %v3882_v23 }
0x37bc   :  { %v3691_v14 = vpop.xlane.xlu0 %3690 }
0x37bd   :  { %v3791_v16 = vmax.f32 %v3694_v12, %v11163_v10  ;;  %v11175_v37 = vadd.f32 %v11154_v7, %v3691_v14 }
0x37be   :  { %v4076_v19 = vpop.xlane.xlu1 %4075 }
0x37bf   :  { %v3888_v38 = vmax.f32 %v3791_v16, %v11172_v18  ;;  %v3695_v39 = vmax.f32 %v11168_v24, %v11175_v37  ;;  %v11188_v0 = vadd.f32 %v11154_v7, %v4076_v19 }
0x37c0   :  { %v3885_v15 = vpop.xlane.xlu0 %3884 }
0x37c1   :  { %v3985_v8 = vmax.f32 %v3888_v38, %v11181_v33  ;;  %v3792_v40 = vmax.f32 %v3695_v39, %v11178_v21  ;;  %v11192_v41 = vadd.f32 %v11154_v7, %v3885_v15  ;;  %v11266_v15 = vadd.f32 %v11154_v7, %v11142_v43 }
0x37c2   :  { %v4270_v27 = vpop.xlane.xlu1 %4269  ;;  %v11282_v43 = vadd.f32 %v11154_v7, %v11146_v1 }
0x37c3   :  { %v4082_v11 = vmax.f32 %v3985_v8, %v11188_v0  ;;  %v3889_v5 = vmax.f32 %v3792_v40, %v11192_v41  ;;  %v11204_v28 = vadd.f32 %v11154_v7, %v4270_v27 }
0x37c4   :  { %v4079_v13 = vpop.xlane.xlu0 %4078 }
0x37c5   :  { %v4179_v3 = vmax.f32 %v4082_v11, %v11198_v55  ;;  %v3986_v56 = vmax.f32 %v3889_v5, %v11195_v36  ;;  %v11208_v42 = vadd.f32 %v11154_v7, %v4079_v13 }
0x37c6   :  { %v4464_v45 = vpop.xlane.xlu1 %4463 }
0x37c7   :  { %v4276_v17 = vmax.f32 %v4179_v3, %v11204_v28  ;;  %v4083_v53 = vmax.f32 %v3986_v56, %v11208_v42  ;;  %v11220_v32 = vadd.f32 %v11154_v7, %v4464_v45 }
0x37c8   :  { %v4273_v47 = vpop.xlane.xlu0 %4272 }
0x37c9   :  { %v4373_v48 = vmax.f32 %v4276_v17, %v11214_v35  ;;  %v4180_v6 = vmax.f32 %v4083_v53, %v11211_v46  ;;  %v11224_v49 = vadd.f32 %v11154_v7, %v4273_v47 }
0x37ca   :  { %v4658_v54 = vpop.xlane.xlu1 %4657 }
0x37cb   :  { %v4470_v34 = vmax.f32 %v4373_v48, %v11220_v32  ;;  %v4277_v58 = vmax.f32 %v4180_v6, %v11224_v49  ;;  %v11236_v51 = vadd.f32 %v11154_v7, %v4658_v54 }
0x37cc   :  { %v4467_v25 = vpop.xlane.xlu0 %4466 }
0x37cd   :  { %v4567_v59 = vmax.f32 %v4470_v34, %v11230_v57  ;;  %v4374_v61 = vmax.f32 %v4277_v58, %v11227_v50  ;;  %v11240_v29 = vadd.f32 %v11154_v7, %v4467_v25 }
0x37ce   :  { %v4852_v26 = vpop.xlane.xlu1 %4851 }
0x37cf   :  { %v4664_v23 = vmax.f32 %v4567_v59, %v11236_v51  ;;  %v4471_v12 = vmax.f32 %v4374_v61, %v11240_v29  ;;  %v11254_v19 = vadd.f32 %v11154_v7, %v4852_v26  ;;  %v11305_v61 = vadd.f32 %v11154_v7, %v11150_v44 }
0x37d0   :  { %v4661_v14 = vpop.xlane.xlu0 %4660  ;;  %v11309_v26 = vadd.f32 %v11154_v7, %v11152_v2 }
0x37d1   :  { %v4761_v16 = vmax.f32 %v4664_v23, %v11248_v30  ;;  %v4568_v38 = vmax.f32 %v4471_v12, %v11244_v60  ;;  %v11258_v39 = vadd.f32 %v11154_v7, %v4661_v14 }
0x37d2   :  { %v5046_v31 = vpop.xlane.xlu1 %5045 }
0x37d3   :  { %v4858_v8 = vmax.f32 %v4761_v16, %v11254_v19  ;;  %v4665_v40 = vmax.f32 %v4568_v38, %v11258_v39  ;;  %v11272_v5 = vadd.f32 %v11154_v7, %v5046_v31 }
0x37d4   :  { %v4855_v27 = vpop.xlane.xlu0 %4854 }
0x37d5   :  { %v4955_v11 = vmax.f32 %v4858_v8, %v11266_v15  ;;  %v4762_v13 = vmax.f32 %v4665_v40, %v11262_v62  ;;  %v11276_v3 = vadd.f32 %v11154_v7, %v4855_v27 }
0x37d7   :  { %v5052_v56 = vmax.f32 %v4955_v11, %v11272_v5  ;;  %v4859_v45 = vmax.f32 %v4762_v13, %v11276_v3 }
0x37d8   :  { %v5240_v17 = vpop.xlane.xlu1 %5239  ;;  %v5049_v53 = vpop.xlane.xlu0 %5048 }
0x37d9   :  { %v5149_v47 = vmax.f32 %v5052_v56, %v11282_v43  ;;  %v11288_v48 = vadd.f32 %v11154_v7, %v5240_v17  ;;  %v4956_v6 = vmax.f32 %v4859_v45, %v4954_v63  ;;  %v11291_v54 = vadd.f32 %v11154_v7, %v5049_v53 }
0x37db   :  { %v5053_v1 = vmax.f32 %v4956_v6, %v11291_v54  ;;  %v5246_v58 = vmax.f32 %v5149_v47, %v11288_v48 }
0x37dc   :  { %v5243_v34 = vpop.xlane.xlu0 %5242 }
0x37dd   :  { %v5150_v25 = vmax.f32 %v5053_v1, %v11295_v52  ;;  %v11301_v59 = vadd.f32 %v11154_v7, %v5243_v34  ;;  %v5343_v14 = vmax.f32 %v5246_v58, %v11305_v61 }
0x37df   :  { %v5247_v20 = vmax.f32 %v5150_v25, %v11301_v59 }
0x37e0   :  { %v5434_v23 = vpop.xlane.xlu1 %5433  ;;  %v5437_v12 = vpop.xlane.xlu0 %5436 }
0x37e1   :  { %v11314_v16 = vadd.f32 %v11154_v7, %v5434_v23  ;;  %v5344_v38 = vmax.f32 %v5247_v20, %v11309_v26  ;;  %v11318_v31 = vadd.f32 %v11154_v7, %v5437_v12 }
0x37e3   :  { %v11321_v44 = vmax.f32 %v5343_v14, %v11314_v16  ;;  %v11324_v2 = vmax.f32 %v5344_v38, %v11318_v31 }
0x37e5   :  { %v5860_v8 = vsub.f32 %v11314_v16, %v11321_v44  ;;  %v5861_v40 = vsub.f32 %v11318_v31, %v11324_v2  ;;  %v5464_v27 = vsub.f32 %v11157_v9, %v11321_v44  ;;  %v5443_v11 = vsub.f32 %v11168_v24, %v11324_v2 }
0x37e6   :  { %v5465_v7 = vsub.f32 %v11175_v37, %v11324_v2  ;;  %v5751_v56 = vsub.f32 %v4954_v63, %v11324_v2  ;;  %v5487_v17 = vsub.f32 %v11178_v21, %v11324_v2  ;;  %v5509_v47 = vsub.f32 %v11192_v41, %v11324_v2 }
0x37e7   :  { %v5466_v13 = vmul.f32 1.442695, %v5464_v27  ;;  %v5446_v45 = vmul.f32 1.442695, %v5443_v11  ;;  %v5552_v9 = vsub.f32 %v11188_v0, %v11321_v44  ;;  %v5531_v37 = vsub.f32 %v11195_v36, %v11324_v2 }
0x37e8   :  { %v5468_v53 = vmul.f32 1.442695, %v5465_v7  ;;  %v5754_v6 = vmul.f32 1.442695, %v5751_v56  ;;  %v5490_v24 = vmul.f32 1.442695, %v5487_v17  ;;  %v5553_v1 = vsub.f32 %v11208_v42, %v11324_v2 }
0x37e9   :  { %9564 = vpow2.f32 %v5466_v13  ;;  %v5512_v63 = vmul.f32 1.442695, %v5509_v47  ;;  %v5554_v21 = vmul.f32 1.442695, %v5552_v9  ;;  %v5574_v41 = vsub.f32 %v11198_v55, %v11321_v44 }
0x37ea   :  { %9566 = vpow2.f32 %v5446_v45  ;;  %v5534_v34 = vmul.f32 1.442695, %v5531_v37  ;;  %v5575_v0 = vsub.f32 %v11211_v46, %v11324_v2  ;;  %v5556_v58 = vmul.f32 1.442695, %v5553_v1 }
0x37eb   :  { %9568 = vpow2.f32 %v5468_v53  ;;  %v5597_v36 = vsub.f32 %v11224_v49, %v11324_v2  ;;  %v5576_v25 = vmul.f32 1.442695, %v5574_v41  ;;  %v5596_v42 = vsub.f32 %v11204_v28, %v11321_v44 }
0x37ec   :  { %9570 = vpow2.f32 %v5754_v6  ;;  %v5578_v20 = vmul.f32 1.442695, %v5575_v0  ;;  %v5619_v55 = vsub.f32 %v11227_v50, %v11324_v2  ;;  %v5618_v23 = vsub.f32 %v11214_v35, %v11321_v44 }
0x37ed   :  { %9572 = vpow2.f32 %v5490_v24  ;;  %v5600_v46 = vmul.f32 1.442695, %v5597_v36  ;;  %v5641_v12 = vsub.f32 %v11240_v29, %v11324_v2  ;;  %v5598_v49 = vmul.f32 1.442695, %v5596_v42 }
0x37ee   :  { %9574 = vpow2.f32 %v5512_v63  ;;  %v5622_v38 = vmul.f32 1.442695, %v5619_v55  ;;  %v5663_v28 = vsub.f32 %v11244_v60, %v11324_v2  ;;  %v5640_v35 = vsub.f32 %v11220_v32, %v11321_v44 }
0x37ef   :  { %9576 = vpow2.f32 %v5554_v21  ;;  %v5620_v50 = vmul.f32 1.442695, %v5618_v23  ;;  %v5644_v11 = vmul.f32 1.442695, %v5641_v12  ;;  %v5729_v29 = vsub.f32 %v11276_v3, %v11324_v2 }
0x37f0   :  { %9578 = vpow2.f32 %v5534_v34  ;;  %v5773_v13 = vsub.f32 %v11291_v54, %v11324_v2  ;;  %v5795_v60 = vsub.f32 %v11295_v52, %v11324_v2  ;;  %v5817_v56 = vsub.f32 %v11301_v59, %v11324_v2 }
0x37f1   :  { %9580 = vpow2.f32 %v5556_v58  ;;  %v5666_v32 = vmul.f32 1.442695, %v5663_v28  ;;  %v5685_v17 = vsub.f32 %v11258_v39, %v11324_v2  ;;  %v5662_v47 = vsub.f32 %v11230_v57, %v11321_v44 }
0x37f2   :  { %9582 = vpow2.f32 %v5576_v25  ;;  %v5442_v6 = vsub.f32 %v11160_v4, %v11321_v44  ;;  %v5839_v24 = vsub.f32 %v11309_v26, %v11324_v2  ;;  %v5642_v63 = vmul.f32 1.442695, %v5640_v35 }
0x37f3   :  { %9584 = vpow2.f32 %v5578_v20  ;;  %v5707_v39 = vsub.f32 %v11262_v62, %v11324_v2  ;;  %v5688_v21 = vmul.f32 1.442695, %v5685_v17  ;;  %v5486_v57 = vsub.f32 %v11163_v10, %v11321_v44 }
0x37f4   :  { %9586 = vpow2.f32 %v5600_v46  ;;  %v5664_v4 = vmul.f32 1.442695, %v5662_v47  ;;  %v5684_v0 = vsub.f32 %v11236_v51, %v11321_v44  ;;  %v5444_v58 = vmul.f32 1.442695, %v5442_v6 }
0x37f5   :  { %9588 = vpow2.f32 %v5598_v49  ;;  %v5508_v62 = vsub.f32 %v11172_v18, %v11321_v44  ;;  %v5710_v42 = vmul.f32 1.442695, %v5707_v39  ;;  %v5530_v10 = vsub.f32 %v11181_v33, %v11321_v44 }
0x37f6   :  { %v11361_v14 = vpop.eup %9564  ;;  %9590 = vpow2.f32 %v5622_v38  ;;  %v5488_v55 = vmul.f32 1.442695, %v5486_v57  ;;  %v5686_v51 = vmul.f32 1.442695, %v5684_v0  ;;  %v5706_v38 = vsub.f32 %v11248_v30, %v11321_v44 }
0x37f7   :  { %v9567_v27 = vpop.eup %9566  ;;  %5474 = vperm.xlu0 %9243, %v11361_v14   ;;  %9592 = vpow2.f32 %v5644_v11  ;;  %v5510_v18 = vmul.f32 1.442695, %v5508_v62  ;;  %v5532_v33 = vmul.f32 1.442695, %v5530_v10  ;;  %v5728_v17 = vsub.f32 %v11254_v19, %v11321_v44 }
0x37f8   :  { %5457 = vperm.xlu1 %9242, %v9567_v27   ;;  %v9569_v7 = vpop.eup %9568  ;;  %9594 = vpow2.f32 %v5620_v50  ;;  %v5798_v47 = vmul.f32 1.442695, %v5795_v60  ;;  %v5820_v54 = vmul.f32 1.442695, %v5817_v56  ;;  %v5772_v59 = vsub.f32 %v11272_v5, %v11321_v44 }
0x37f9   :  { %v11376_v45 = vpop.eup %9570  ;;  %v5471_v53 = vadd.f32 %v9569_v7, %v9567_v27  ;;  %9596 = vpow2.f32 %v5666_v32  ;;  %v5732_v27 = vmul.f32 1.442695, %v5729_v29  ;;  %v5708_v32 = vmul.f32 1.442695, %v5706_v38 }
0x37fa   :  { %v9573_v3 = vpop.eup %9572  ;;  %9598 = vpow2.f32 %v5642_v63  ;;  %v5776_v29 = vmul.f32 1.442695, %v5773_v13  ;;  %v5730_v6 = vmul.f32 1.442695, %v5728_v17  ;;  %v5794_v31 = vsub.f32 %v11282_v43, %v11321_v44 }
0x37fb   :  { %5765 = vperm.xlu0 %9243, %v11376_v45   ;;  %v5493_v9 = vadd.f32 %v9573_v3, %v5471_v53  ;;  %v9575_v37 = vpop.eup %9574  ;;  %9600 = vpow2.f32 %v5688_v21  ;;  %v5864_v21 = vmul.f32 1.442695, %v5861_v40 }
0x37fc   :  { %5479 = vperm.xlu1 %9242, %v9569_v7   ;;  %v11389_v1 = vpop.eup %9576  ;;  %9602 = vpow2.f32 %v5664_v4  ;;  %v5774_v4 = vmul.f32 1.442695, %v5772_v59  ;;  %v5796_v62 = vmul.f32 1.442695, %v5794_v31  ;;  %v11517_v59 = vld [vmem:[%s12044_s10] sm:$0xff] }
0x37fd   :  { %v5515_v41 = vadd.f32 %v9575_v37, %v5493_v9  ;;  %v9579_v34 = vpop.eup %9578  ;;  %9604 = vpow2.f32 %v5444_v58  ;;  %v5750_v9 = vsub.f32 %v11266_v15, %v11321_v44  ;;  %v5842_v15 = vmul.f32 1.442695, %v5839_v24 }
0x37fe   :  { %v9581_v25 = vpop.eup %9580  ;;  %9606 = vpow2.f32 %v5710_v42 }
0x37ff   :  { %5562 = vperm.xlu0 %9243, %v11389_v1   ;;  %v5537_v36 = vadd.f32 %v9579_v34, %v5515_v41  ;;  %v11400_v20 = vpop.eup %9582  ;;  %9608 = vpow2.f32 %v5488_v55  ;;  %v5752_v39 = vmul.f32 1.442695, %v5750_v9 }
0x3800   :  { %5501 = vperm.xlu1 %9242, %v9573_v3   ;;  %v9585_v46 = vpop.eup %9584  ;;  %9610 = vpow2.f32 %v5686_v51 }
0x3801   :  { %v5559_v23 = vadd.f32 %v9581_v25, %v5537_v36  ;;  %v9587_v49 = vpop.eup %9586  ;;  %9612 = vpow2.f32 %v5510_v18  ;;  %v5816_v36 = vsub.f32 %v11288_v48, %v11321_v44  ;;  %v5838_v18 = vsub.f32 %v11305_v61, %v11321_v44 }
0x3802   :  { %v11405_v28 = vpop.eup %9588  ;;  %9614 = vpow2.f32 %v5532_v33  ;;  %v5862_v61 = vmul.f32 1.442695, %v5860_v8 }
0x3803   :  { %5584 = vperm.xlu0 %9243, %v11400_v20   ;;  %v5581_v12 = vadd.f32 %v9585_v46, %v5559_v23  ;;  %v9591_v50 = vpop.eup %9590  ;;  %9616 = vpow2.f32 %v5732_v27  ;;  %v5818_v51 = vmul.f32 1.442695, %v5816_v36 }
0x3804   :  { %5523 = vperm.xlu1 %9242, %v9575_v37   ;;  %v9593_v7 = vpop.eup %9592  ;;  %9618 = vpow2.f32 %v5708_v32 }
0x3805   :  { %v5603_v35 = vadd.f32 %v9587_v49, %v5581_v12  ;;  %v11410_v30 = vpop.eup %9594  ;;  %9620 = vpow2.f32 %v5776_v29 }
0x3806   :  { %v11415_v3 = vpop.eup %9596  ;;  %9622 = vpow2.f32 %v5798_v47 }
0x3807   :  { %5606 = vperm.xlu0 %9243, %v11405_v28   ;;  %v5625_v11 = vadd.f32 %v9591_v50, %v5603_v35  ;;  %v11424_v37 = vpop.eup %9598  ;;  %9624 = vpow2.f32 %v5730_v6 }
0x3808   :  { %5545 = vperm.xlu1 %9242, %v9579_v34   ;;  %v11429_v13 = vpop.eup %9600  ;;  %9626 = vpow2.f32 %v5820_v54  ;;  %v5899_v54 = vld [vmem:[%s12043_s9 + $0x18] sm:$0xff] }
0x3809   :  { %v5647_v53 = vadd.f32 %v9593_v7, %v5625_v11  ;;  %v11432_v52 = vpop.eup %9602  ;;  %9628 = vpow2.f32 %v5842_v15  ;;  %9034 = vmatprep.subr.mxu1 %v5899_v54  ;;  %v11501_v15 = vld [vmem:[%s12044_s10 + $0x10] sm:$0xff] }
0x380a   :  { %v11438_v63 = vpop.eup %9604  ;;  %9630 = vpow2.f32 %v5752_v39  ;;  %9035 = vmatpush3.msra.mxu1 %v5899_v54  ;;  %v11510_v39 = vld [vmem:[%s12044_s10 + $0x8] sm:$0xff] }
0x380b   :  { %5628 = vperm.xlu0 %9243, %v11410_v30   ;;  %v5669_v19 = vadd.f32 %v11415_v3, %v5647_v53  ;;  %v9607_v56 = vpop.eup %9606  ;;  %v5470_v57 = vadd.f32 %v11438_v63, %v11361_v14  ;;  %9632 = vpow2.f32 %v5864_v21  ;;  %v9754_v54 = vld [vmem:[#allocation3 + $0x68] sm:$0xff] }
0x380c   :  { %5567 = vperm.xlu1 %9242, %v9581_v25   ;;  %v11447_v41 = vpop.eup %9608  ;;  %9634 = vpow2.f32 %v5774_v4 }
0x380d   :  { %v5691_v60 = vadd.f32 %v11429_v13, %v5669_v19  ;;  %v9611_v26 = vpop.eup %9610  ;;  %v5492_v34 = vadd.f32 %v11447_v41, %v5470_v57  ;;  %9636 = vpow2.f32 %v5796_v62 }
0x380e   :  { %v11451_v5 = vpop.eup %9612  ;;  %9638 = vpow2.f32 %v5818_v51  ;;  %v9744_v51 = vld [vmem:[#allocation3 + $0x18] sm:$0xff] }
0x380f   :  { %5650 = vperm.xlu0 %9243, %v11424_v37   ;;  %v5713_v24 = vadd.f32 %v9607_v56, %v5691_v60  ;;  %v11455_v2 = vpop.eup %9614  ;;  %v5514_v40 = vadd.f32 %v11451_v5, %v5492_v34  ;;  %v11495_v60 = vld [vmem:[%s12044_s10 + $0x18] sm:$0xff] }
0x3810   :  { %5589 = vperm.xlu1 %9242, %v9585_v46   ;;  %v11458_v14 = vpop.eup %9616  ;;  %9046 = vmatpush3.msra.mxu0 %v11495_v60 }
0x3811   :  { %v5735_v0 = vadd.f32 %v11458_v14, %v5713_v24  ;;  %v5536_v58 = vadd.f32 %v11455_v2, %v5514_v40  ;;  %v9619_v25 = vpop.eup %9618  ;;  %9047 = vmatprep.subr.mxu0 %v9806_v22 }
0x3812   :  { %v9621_v10 = vpop.eup %9620  ;;  %9048 = vmatpush3.msra.mxu0 %v11501_v15 }
0x3813   :  { %5672 = vperm.xlu0 %9243, %v11432_v52   ;;  %v5757_v43 = vadd.f32 %v11376_v45, %v5735_v0  ;;  %v5558_v42 = vadd.f32 %v11389_v1, %v5536_v58  ;;  %v9623_v46 = vpop.eup %9622  ;;  %9049 = vmatprep.subr.mxu0 %v9806_v22 }
0x3814   :  { %5611 = vperm.xlu1 %9242, %v9587_v49   ;;  %v9625_v12 = vpop.eup %9624  ;;  %9050 = vmatpush3.msra.mxu0 %v11510_v39 }
0x3815   :  { %v5779_v55 = vadd.f32 %v9621_v10, %v5757_v43  ;;  %v5580_v23 = vadd.f32 %v11400_v20, %v5558_v42  ;;  %v9627_v38 = vpop.eup %9626  ;;  %v5840_v20 = vmul.f32 1.442695, %v5838_v18  ;;  %9051 = vmatprep.subr.mxu0 %v9806_v22 }
0x3816   :  { %v9629_v33 = vpop.eup %9628  ;;  %9052 = vmatpush3.msra.mxu0 %v11517_v59 }
0x3817   :  { %5694 = vperm.xlu0 %9243, %v9611_v26   ;;  %v5801_v49 = vadd.f32 %v9623_v46, %v5779_v55  ;;  %v5602_v48 = vadd.f32 %v11405_v28, %v5580_v23  ;;  %v9631_v27 = vpop.eup %9630  ;;  %9640 = vpow2.f32 %v5840_v20  ;;  %9054 = vmatmul.mubr.f32.vlgmr.msra.gmra.mxu0 %v9806_v22 }
0x3818   :  { %5633 = vperm.xlu1 %9242, %v9591_v50   ;;  %v9633_v11 = vpop.eup %9632  ;;  %9642 = vpow2.f32 %v5862_v61  ;;  %9067 = vmatprep.subr.mxu0 %v9806_v22 }
0x3819   :  { %v5823_v45 = vadd.f32 %v9627_v38, %v5801_v49  ;;  %v5624_v1 = vadd.f32 %v11410_v30, %v5602_v48  ;;  %v9635_v32 = vpop.eup %9634  ;;  %9075 = vmatprep.mubr.msk.f32.mxu0 %vm9810_vm4, %v9806_v22  ;;  %9068 = vmatpush3.msra.mxu0 %v11495_v60  ;;  %v9745_v48 = vld [vmem:[#allocation3 + $0x8] sm:$0xff] }
0x381a   :  { %v9637_v29 = vpop.eup %9636  ;;  %9069 = vmatprep.subr.mxu0 %v9806_v22 }
0x381b   :  { %5716 = vperm.xlu0 %9243, %v9619_v25   ;;  %v5845_v35 = vadd.f32 %v9629_v33, %v5823_v45  ;;  %v5646_v50 = vadd.f32 %v11424_v37, %v5624_v1  ;;  %v9639_v16 = vpop.eup %9638  ;;  %9070 = vmatpush3.msra.mxu0 %v11501_v15  ;;  %v9746_v45 = vld [vmem:[#allocation3 + $0x28] sm:$0xff] }
0x381c   :  { %5655 = vperm.xlu1 %9242, %v9593_v7   ;;  %9071 = vmatprep.subr.mxu0 %v9806_v22 }
0x381d   :  { %v5867_v28 = vadd.f32 %v9633_v11, %v5845_v35  ;;  %v5668_v7 = vadd.f32 %v11432_v52, %v5646_v50  ;;  %v5897_v52 = vld [vmem:[%s12043_s9 + $0x8] sm:$0xff]  ;;  %9072 = vmatpush3.msra.mxu0 %v11510_v39 }
0x381e   :  { %9073 = vmatprep.subr.mxu0 %v9806_v22 }
0x381f   :  { %5738 = vperm.xlu0 %9243, %v9625_v12   ;;  %v5690_v17 = vadd.f32 %v9611_v26, %v5668_v7  ;;  %9074 = vmatpush3.msra.mxu0 %v11517_v59 }
0x3820   :  { %5677 = vperm.xlu1 %9242, %v11415_v3   ;;  %9089 = vmatprep.subr.mxu0 %v9806_v22 }
0x3821   :  { %v5712_v30 = vadd.f32 %v9619_v25, %v5690_v17 }
0x3823   :  { %5760 = vperm.xlu0 %9243, %v9631_v27   ;;  %v5734_v53 = vadd.f32 %v9625_v12, %v5712_v30  ;;  %v9751_v30 = vld [vmem:[#allocation3 + $0x48] sm:$0xff] }
0x3824   :  { %5699 = vperm.xlu1 %9242, %v11429_v13   ;;  %v9641_v47 = vpop.eup %9640  ;;  %v5898_v13 = vld [vmem:[%s12043_s9 + $0x10] sm:$0xff] }
0x3825   :  { %v5756_v3 = vadd.f32 %v9631_v27, %v5734_v53  ;;  %v9643_v9 = vpop.eup %9642  ;;  %9036 = vmatprep.subr.mxu1 %v5898_v13  ;;  %v9748_v27 = vld [vmem:[#allocation3 + $0x10] sm:$0xff] }
0x3826   :  { %9037 = vmatpush3.msra.mxu1 %v5898_v13 }
0x3827   :  { %5782 = vperm.xlu0 %9243, %v9635_v32   ;;  %v5778_v44 = vadd.f32 %v9635_v32, %v5756_v3  ;;  %9038 = vmatprep.subr.mxu1 %v5897_v52  ;;  %v9752_v3 = vld [vmem:[#allocation3 + $0x30] sm:$0xff] }
0x3828   :  { %5721 = vperm.xlu1 %9242, %v9607_v56   ;;  %9039 = vmatpush3.msra.mxu1 %v5897_v52 }
0x3829   :  { %v5800_v8 = vadd.f32 %v9637_v29, %v5778_v44 }
0x382b   :  { %5804 = vperm.xlu0 %9243, %v9637_v29   ;;  %v5822_v19 = vadd.f32 %v9639_v16, %v5800_v8 }
0x382c   :  { %5452 = vperm.xlu1 %9242, %v11438_v63   ;;  %v5896_v63 = vld [vmem:[%s12043_s9] sm:$0xff] }
0x382d   :  { %v5844_v6 = vadd.f32 %v9641_v47, %v5822_v19  ;;  %9040 = vmatprep.subr.mxu1 %v5896_v63 }
0x382e   :  { %9041 = vmatpush3.msra.mxu1 %v5896_v63  ;;  %v9755_v63 = vld [vmem:[#allocation3 + $0x40] sm:$0xff] }
0x382f   :  { %5826 = vperm.xlu0 %9243, %v9639_v16   ;;  %v5866_v37 = vadd.f32 %v9643_v9, %v5844_v6  ;;  %9056 = vmatprep.subr.mxu1 %v9806_v22 }
0x3830   :  { %5496 = vperm.xlu1 %9242, %v11447_v41  }
0x3833   :  { %5848 = vperm.xlu0 %9243, %v9641_v47   ;;  %v9753_v47 = vld [vmem:[#allocation3 + $0x58] sm:$0xff] }
0x3834   :  { %5518 = vperm.xlu1 %9242, %v11451_v5  }
0x3837   :  { %5870 = vperm.xlu0 %9243, %v9643_v9  }
0x3838   :  { %5540 = vperm.xlu1 %9242, %v11455_v2  }
0x383c   :  { %5743 = vperm.xlu1 %9242, %v11458_v14  }
0x3840   :  { %5787 = vperm.xlu1 %9242, %v9621_v10  }
0x3844   :  { %5809 = vperm.xlu1 %9242, %v9623_v46  }
0x3848   :  { %5889 = vperm.xlu1 %9242, %v5867_v28   ;;  %v9750_v28 = vld [vmem:[#allocation3 + $0x20] sm:$0xff] }
0x384c   :  { %5884 = vperm.xlu1 %9242, %v5866_v37  }
0x3850   :  { %5831 = vperm.xlu1 %9242, %v9627_v38  }
0x3854   :  { %5853 = vperm.xlu1 %9242, %v9629_v33   ;;  %v9747_v33 = vld [vmem:[#allocation3] sm:$0xff] }
0x3858   :  { %5875 = vperm.xlu1 %9242, %v9633_v11   ;;  %v9749_v11 = vld [vmem:[#allocation3 + $0x38] sm:$0xff] }
0x3872   :  { %v5475_v56 = vpop.permute.xlu0 %5474 }
0x3873   :  { %v5458_v21 = vpop.permute.xlu1 %5457  ;;  %v5482_v35 = vmul.f32 %v9748_v27, %v5475_v56  ;;  %v9761_v27 = vld [vmem:[#allocation3 + $0x98] sm:$0xff] }
0x3874   :  { %v5461_v38 = vmul.f32 %v9745_v48, %v5458_v21  ;;  %v9756_v21 = vld [vmem:[#allocation3 + $0x50] sm:$0xff] }
0x3876   :  { %v11537_v57 = vpop.permute.xlu0 %5765 }
0x3877   :  { %v5480_v41 = vpop.permute.xlu1 %5479 }
0x3878   :  { %v5483_v18 = vmul.f32 %v9744_v51, %v5480_v41 }
0x387a   :  { %v5563_v26 = vpop.permute.xlu0 %5562  ;;  %v5485_v50 = vadd.f32 %v5483_v18, %v5461_v38 }
0x387b   :  { %v5502_v24 = vpop.permute.xlu1 %5501  ;;  %v5570_v41 = vmul.f32 %v9756_v21, %v5563_v26 }
0x387c   :  { %v5505_v1 = vmul.f32 %v9746_v45, %v5502_v24 }
0x387e   :  { %v5585_v5 = vpop.permute.xlu0 %5584  ;;  %v5507_v17 = vadd.f32 %v5505_v1, %v5485_v50 }
0x387f   :  { %v5524_v34 = vpop.permute.xlu1 %5523 }
0x3880   :  { %v5527_v61 = vmul.f32 %v9749_v11, %v5524_v34  ;;  %v9757_v34 = vld [vmem:[#allocation3 + $0x78] sm:$0xff]  ;;  %v9762_v11 = vld [vmem:[#allocation3 + $0x80] sm:$0xff] }
0x3882   :  { %v11539_v31 = vpop.permute.xlu0 %5606  ;;  %v5529_v8 = vadd.f32 %v5527_v61, %v5507_v17  ;;  %v9764_v17 = vld [vmem:[#allocation3 + $0x90] sm:$0xff] }
0x3883   :  { %v5546_v4 = vpop.permute.xlu1 %5545 }
0x3884   :  { %v5549_v29 = vmul.f32 %v9751_v30, %v5546_v4 }
0x3886   :  { %v11541_v14 = vpop.permute.xlu0 %5628  ;;  %v5551_v37 = vadd.f32 %v5549_v29, %v5529_v8  ;;  %v9765_v29 = vld [vmem:[#allocation3 + $0xb8] sm:$0xff] }
0x3887   :  { %v5568_v2 = vpop.permute.xlu1 %5567 }
0x3888   :  { %v5571_v19 = vmul.f32 %v9753_v47, %v5568_v2  ;;  %v9759_v2 = vld [vmem:[#allocation3 + $0x88] sm:$0xff] }
0x388a   :  { %v11543_v58 = vpop.permute.xlu0 %5650  ;;  %v5573_v24 = vadd.f32 %v5571_v19, %v5551_v37 }
0x388b   :  { %v5590_v40 = vpop.permute.xlu1 %5589 }
0x388c   :  { %v5593_v13 = vmul.f32 %v9754_v54, %v5590_v40 }
0x388e   :  { %v11545_v25 = vpop.permute.xlu0 %5672  ;;  %v5595_v38 = vadd.f32 %v5593_v13, %v5573_v24 }
0x388f   :  { %v5612_v0 = vpop.permute.xlu1 %5611 }
0x3890   :  { %v5615_v4 = vmul.f32 %v9757_v34, %v5612_v0  ;;  %v5636_v0 = vmul.f32 %v9762_v11, %v11541_v14  ;;  %v9767_v14 = vld [vmem:[#allocation3 + $0xc8] sm:$0xff] }
0x3892   :  { %v11549_v42 = vpop.permute.xlu0 %5694 }
0x3893   :  { %v5634_v62 = vpop.permute.xlu1 %5633 }
0x3894   :  { %v5637_v45 = vmul.f32 %v9759_v2, %v5634_v62  ;;  %v5658_v62 = vmul.f32 %v9764_v17, %v11543_v58  ;;  %v9769_v58 = vld [vmem:[#allocation3 + $0xd8] sm:$0xff] }
0x3896   :  { %v11555_v23 = vpop.permute.xlu0 %5716 }
0x3897   :  { %v5656_v36 = vpop.permute.xlu1 %5655 }
0x389a   :  { %v11557_v12 = vpop.permute.xlu0 %5738 }
0x389b   :  { %v11547_v43 = vpop.permute.xlu1 %5677 }
0x389e   :  { %v11559_v44 = vpop.permute.xlu0 %5760 }
0x389f   :  { %v11551_v10 = vpop.permute.xlu1 %5699 }
0x38a2   :  { %v5783_v51 = vpop.permute.xlu0 %5782 }
0x38a3   :  { %v11553_v55 = vpop.permute.xlu1 %5721 }
0x38a4   :  { %v5725_v47 = vmul.f32 %v9767_v14, %v11553_v55 }
0x38a7   :  { %v5453_v46 = vpop.permute.xlu1 %5452 }
0x38a8   :  { %v5460_v20 = vmul.f32 %v9747_v33, %v5453_v46  ;;  %v9760_v33 = vld [vmem:[#allocation3 + $0x70] sm:$0xff] }
0x38a9   :  { %v5614_v40 = vmul.f32 %v9760_v33, %v11539_v31  ;;  %v5703_v31 = vmul.f32 %v9765_v29, %v11551_v10  ;;  %v9770_v10 = vld [vmem:[#allocation3 + $0xc0] sm:$0xff] }
0x38aa   :  { %v5484_v53 = vadd.f32 %v5482_v35, %v5460_v20  ;;  %v5617_v20 = vadd.f32 %v5615_v4, %v5595_v38  ;;  %v5659_v35 = vmul.f32 %v9761_v27, %v5656_v36  ;;  %v9772_v4 = vld [vmem:[#allocation3 + $0xe8] sm:$0xff] }
0x38ab   :  { %v5497_v49 = vpop.permute.xlu1 %5496  ;;  %v9777_v27 = vld [vmem:[#allocation3 + $0x108] sm:$0xff] }
0x38ac   :  { %v5504_v7 = vmul.f32 %v9750_v28, %v5497_v49  ;;  %v9758_v49 = vld [vmem:[#allocation3 + $0x60] sm:$0xff]  ;;  %v5639_v61 = vadd.f32 %v5637_v45, %v5617_v20  ;;  %v9763_v28 = vld [vmem:[#allocation3 + $0xa8] sm:$0xff]  ;;  %v9775_v45 = vld [vmem:[#allocation3 + $0xf8] sm:$0xff] }
0x38ad   :  { %v5592_v48 = vmul.f32 %v9758_v49, %v5585_v5 }
0x38ae   :  { %v5506_v6 = vadd.f32 %v5504_v7, %v5484_v53  ;;  %v5681_v7 = vmul.f32 %v9763_v28, %v11547_v43  ;;  %v5661_v30 = vadd.f32 %v5659_v35, %v5639_v61  ;;  %v9768_v43 = vld [vmem:[#allocation3 + $0xb0] sm:$0xff] }
0x38af   :  { %v5519_v32 = vpop.permute.xlu1 %5518 }
0x38b0   :  { %v5526_v16 = vmul.f32 %v9752_v3, %v5519_v32  ;;  %v5805_v32 = vpop.permute.xlu0 %5804  ;;  %v9766_v3 = vld [vmem:[#allocation3 + $0xa0] sm:$0xff]  ;;  %v5683_v8 = vadd.f32 %v5681_v7, %v5661_v30 }
0x38b2   :  { %v5528_v52 = vadd.f32 %v5526_v16, %v5506_v6  ;;  %v5680_v16 = vmul.f32 %v9766_v3, %v11545_v25  ;;  %v5702_v6 = vmul.f32 %v9768_v43, %v11549_v42  ;;  %v9771_v25 = vld [vmem:[#allocation3 + $0xd0] sm:$0xff]  ;;  %v5769_v42 = vmul.f32 %v9772_v4, %v11537_v57 }
0x38b3   :  { %v5541_v9 = vpop.permute.xlu1 %5540  ;;  %v9778_v57 = vld [vmem:[#allocation3 + $0x110] sm:$0xff] }
0x38b4   :  { %v5548_v56 = vmul.f32 %v9755_v63, %v5541_v9  ;;  %v5705_v9 = vadd.f32 %v5703_v31, %v5683_v8  ;;  %v5827_v13 = vpop.permute.xlu0 %5826  ;;  %v5724_v63 = vmul.f32 %v9770_v10, %v11555_v23  ;;  %v9782_v31 = vld [vmem:[#allocation3 + $0x130] sm:$0xff]  ;;  %v9783_v8 = vld [vmem:[#allocation3 + $0x138] sm:$0xff] }
0x38b5   :  { %v5834_v11 = vmul.f32 %v9778_v57, %v5827_v13  ;;  %v8106_v13 = vld [vmem:[%s12045_s11] ss:$0 sm:$0xff] }
0x38b6   :  { %v5550_v46 = vadd.f32 %v5548_v56, %v5528_v52  ;;  %v5727_v56 = vadd.f32 %v5725_v47, %v5705_v9 }
0x38b7   :  { %v5744_v18 = vpop.permute.xlu1 %5743 }
0x38b8   :  { %v5572_v1 = vadd.f32 %v5570_v41, %v5550_v46  ;;  %v5747_v54 = vmul.f32 %v9769_v58, %v5744_v18  ;;  %v5746_v41 = vmul.f32 %v9771_v25, %v11557_v12  ;;  %v9773_v46 = vld [vmem:[#allocation3 + $0xe0] sm:$0xff]  ;;  %v5849_v2 = vpop.permute.xlu0 %5848 }
0x38b9   :  { %v5768_v49 = vmul.f32 %v9773_v46, %v11559_v44  ;;  %v9779_v44 = vld [vmem:[#allocation3 + $0x118] sm:$0xff] }
0x38ba   :  { %v5594_v50 = vadd.f32 %v5592_v48, %v5572_v1  ;;  %v5749_v55 = vadd.f32 %v5747_v54, %v5727_v56  ;;  %v9774_v48 = vld [vmem:[#allocation3 + $0xf0] sm:$0xff] }
0x38bb   :  { %v5788_v26 = vpop.permute.xlu1 %5787  ;;  %v5790_v38 = vmul.f32 %v9774_v48, %v5783_v51 }
0x38bc   :  { %v5616_v5 = vadd.f32 %v5614_v40, %v5594_v50  ;;  %v5771_v23 = vadd.f32 %v5769_v42, %v5749_v55  ;;  %v5791_v1 = vmul.f32 %v9775_v45, %v5788_v26  ;;  %v9776_v40 = vld [vmem:[#allocation3 + $0x100] sm:$0xff]  ;;  %v5871_v7 = vpop.permute.xlu0 %5870  ;;  %v9781_v26 = vld [vmem:[#allocation3 + $0x128] sm:$0xff] }
0x38bd   :  { %v5812_v20 = vmul.f32 %v9776_v40, %v5805_v32 }
0x38be   :  { %v5638_v53 = vadd.f32 %v5636_v0, %v5616_v5  ;;  %v5793_v0 = vadd.f32 %v5791_v1, %v5771_v23  ;;  %v9780_v5 = vld [vmem:[#allocation3 + $0x120] sm:$0xff] }
0x38bf   :  { %v5810_v36 = vpop.permute.xlu1 %5809  ;;  %v5856_v17 = vmul.f32 %v9780_v5, %v5849_v2 }
0x38c0   :  { %v5660_v19 = vadd.f32 %v5658_v62, %v5638_v53  ;;  %v5813_v35 = vmul.f32 %v9777_v27, %v5810_v36  ;;  %v5878_v53 = vmul.f32 %v9782_v31, %v5871_v7 }
0x38c2   :  { %v5682_v37 = vadd.f32 %v5680_v16, %v5660_v19  ;;  %v5815_v62 = vadd.f32 %v5813_v35, %v5793_v0 }
0x38c3   :  { %v5890_v52 = vpop.permute.xlu1 %5889 }
0x38c4   :  { %v5704_v21 = vadd.f32 %v5702_v6, %v5682_v37 }
0x38c6   :  { %v5726_v24 = vadd.f32 %v5724_v63, %v5704_v21 }
0x38c7   :  { %v5885_v34 = vpop.permute.xlu1 %5884 }
0x38c8   :  { %v5748_v18 = vadd.f32 %v5746_v41, %v5726_v24  ;;  %9644 = vrcp.f32 %v5885_v34 }
0x38c9   :  { %9646 = vrcp.f32 %v5890_v52 }
0x38ca   :  { %v5770_v33 = vadd.f32 %v5768_v49, %v5748_v18 }
0x38cb   :  { %v5832_v12 = vpop.permute.xlu1 %5831 }
0x38cc   :  { %v5792_v50 = vadd.f32 %v5790_v38, %v5770_v33  ;;  %v5835_v61 = vmul.f32 %v9779_v44, %v5832_v12 }
0x38ce   :  { %v5814_v28 = vadd.f32 %v5812_v20, %v5792_v50  ;;  %v5837_v32 = vadd.f32 %v5835_v61, %v5815_v62 }
0x38cf   :  { %v5854_v51 = vpop.permute.xlu1 %5853 }
0x38d0   :  { %v5857_v30 = vmul.f32 %v9781_v26, %v5854_v51  ;;  %v5836_v29 = vadd.f32 %v5834_v11, %v5814_v28 }
0x38d2   :  { %v5858_v3 = vadd.f32 %v5856_v17, %v5836_v29  ;;  %v5859_v16 = vadd.f32 %v5857_v30, %v5837_v32 }
0x38d3   :  { %v5876_v36 = vpop.permute.xlu1 %5875 }
0x38d4   :  { %v5879_v14 = vmul.f32 %v9783_v8, %v5876_v36  ;;  %v5880_v47 = vadd.f32 %v5878_v53, %v5858_v3 }
0x38d5   :  { %v9645_v19 = vpop.eup %9644 }
0x38d6   :  { %v5881_v43 = vadd.f32 %v5879_v14, %v5859_v16  ;;  %v5893_v6 = vmul.f32 %v9645_v19, %v5880_v47  ;;  %v9647_v9 = vpop.eup %9646 }
0x38d7   :  { %v6058_v58 = vpop.f32.mrf.mxu0 }
0x38d8   :  { %v5895_v37 = vmul.f32 %v9647_v9, %v5881_v43  ;;  %9042 = vmatprep.mubr.msk.f32.mxu1 %vm558_vm2, %v5893_v6 }
0x38d9   :  { %v9055_v54 = vpop.f32.mrf.mxu0 }
0x38da   :  { %9043 = vmatmul.mubr.msk.f32.vlgmr.msra.gmra.mxu1 %vm558_vm2, %v5895_v37 }
0x38db   :  { %9057 = vmatpush3.msra.mxu1 %v11495_v60  ;;  %9064 = vmatprep.mubr.msk.f32.mxu1 %vm9810_vm4, %v9806_v22 }
0x38dc   :  { %9058 = vmatprep.subr.mxu1 %v9806_v22 }
0x38dd   :  { %9059 = vmatpush3.msra.mxu1 %v11501_v15 }
0x38de   :  { %9060 = vmatprep.subr.mxu1 %v9806_v22 }
0x38df   :  { %9061 = vmatpush3.msra.mxu1 %v11510_v39 }
0x38e0   :  { %9062 = vmatprep.subr.mxu1 %v9806_v22 }
0x38e1   :  { %9063 = vmatpush3.msra.mxu1 %v11517_v59 }
0x38e2   :  { %9078 = vmatprep.subr.mxu1 %v9806_v22 }
0x399a   :  { %v9044_v52 = vpop.f32.mrf.mxu1 }
0x399b   :  { %v11588_v10 = vadd.f32 %v9044_v52, %v8106_v13 }
0x399c   :  { %v5979_v63 = vpop.f32.mrf.mxu1 }
0x399d   :  { %v11590_v56 = vadd.f32 %v8106_v13, %v5979_v63 }
0x399f   :  { %v6062_v21 = vadd.f32 %v6058_v58, %v11590_v56 }
0x39a1   :  { %9648 = vtanh.f32 %v6062_v21  ;;  %v8109_v41 = vmul.f32 -1.442695, %v6062_v21 }
0x39a3   :  { %9650 = vpow2.f32 %v8109_v41 }
0x39ae   :  { %v9649_v25 = vpop.eup %9648 }
0x39af   :  { %6072 = vrot.lane.b32.xlu0 %v9649_v25, %s9807_s27 }
0x39b0   :  { %v9651_v24 = vpop.eup %9650 }
0x39b1   :  { %v6066_v55 = vadd.f32 1.0, %v9651_v24 }
0x39b3   :  { %9652 = vrcp.f32 %v6066_v55 }
0x39c0   :  { %v9653_v34 = vpop.eup %9652 }
0x39c1   :  { %v6070_v46 = vmul.f32 0.0, %v9653_v34 }
0x3a21   :  { %v6073_v4 = vpop.permute.xlu0 %6072 }
0x3a22   :  { %v6075_v42 = vmul.f32 %v9653_v34, %v6073_v4 }
0x3a24   :  { %6077 = vrot.lane.b32.xlu1 %v6075_v42, %s9808_s3 }
0x3a96   :  { %v6078_v49 = vpop.permute.xlu1 %6077 }
0x3a97   :  { %v6080_v18 = vadd.f32 %v6078_v49, %v6070_v46 }
0x3a99   :  { %9654 = vtanh.f32 %v6080_v18  ;;  %v6177_v0 = vrot.slane %v6080_v18, 6 }
0x3aa6   :  { %v9655_v48 = vpop.eup %9654 }
0x3aa7   :  { %6083 = vrot.lane.b32.xlu0 %v9655_v48, %s9807_s27 }
0x3b19   :  { %v6084_v38 = vpop.permute.xlu0 %6083 }
0x3b1a   :  { %v6086_v2 = vmul.f32 %v9653_v34, %v6084_v38 }
0x3b1c   :  { %6088 = vrot.lane.b32.xlu1 %v6086_v2, %s9808_s3 }
0x3b8e   :  { %v6089_v23 = vpop.permute.xlu1 %6088 }
0x3b8f   :  { %6092 = vst.msk [vmem:[#allocation4] sm:$0x3] %vm6091_vm5, %v6089_v23  ;;  %9065 = vmatmul.mubr.msk.f32.vlgmr.msra.gmra.mxu1 %vm558_vm2, %v6089_v23 }
0x3b90   :  { %9079 = vmatpush3.msra.mxu1 %v11495_v60  ;;  %9086 = vmatprep.mubr.msk.f32.mxu1 %vm9810_vm4, %v9806_v22 }
0x3b91   :  { %9080 = vmatprep.subr.mxu1 %v9806_v22 }
0x3b92   :  { %9081 = vmatpush3.msra.mxu1 %v11501_v15 }
0x3b93   :  { %9082 = vmatprep.subr.mxu1 %v9806_v22 }
0x3b94   :  { %9083 = vmatpush3.msra.mxu1 %v11510_v39 }
0x3b95   :  { %9084 = vmatprep.subr.mxu1 %v9806_v22 }
0x3b96   :  { %9085 = vmatpush3.msra.mxu1 %v11517_v59 }
0x3b97   :  { %9100 = vmatprep.subr.mxu1 %v9806_v22 }
0x3c4f   :  { %v6161_v45 = vpop.f32.mrf.mxu1 }
0x3c50   :  { %v6166_v1 = vrot.slane %v6161_v45, 6 }
0x3c51   :  { %v9066_v33 = vpop.f32.mrf.mxu1 }
0x3c52   :  { %v6168_v12 = vadd.f32 %v6166_v1, %v11590_v56 }
0x3c54   :  { %9656 = vtanh.f32 %v6168_v12  ;;  %v8111_v20 = vmul.f32 -1.442695, %v6168_v12 }
0x3c56   :  { %9658 = vpow2.f32 %v8111_v20 }
0x3c61   :  { %v9657_v40 = vpop.eup %9656 }
0x3c62   :  { %6181 = vrot.lane.b32.xlu0 %v9657_v40, %s9807_s27 }
0x3c63   :  { %v9659_v27 = vpop.eup %9658 }
0x3c64   :  { %v6172_v35 = vadd.f32 1.0, %v9659_v27 }
0x3c66   :  { %9660 = vrcp.f32 %v6172_v35 }
0x3c73   :  { %v9661_v50 = vpop.eup %9660 }
0x3c74   :  { %v6179_v44 = vmul.f32 %v9661_v50, %v6177_v0 }
0x3cd4   :  { %v6182_v57 = vpop.permute.xlu0 %6181 }
0x3cd5   :  { %v6184_v11 = vmul.f32 %v9661_v50, %v6182_v57 }
0x3cd7   :  { %6186 = vrot.lane.b32.xlu1 %v6184_v11, %s9808_s3 }
0x3d49   :  { %v6187_v61 = vpop.permute.xlu1 %6186 }
0x3d4a   :  { %v6189_v28 = vadd.f32 %v6187_v61, %v6179_v44 }
0x3d4c   :  { %9662 = vtanh.f32 %v6189_v28  ;;  %v6290_v47 = vrot.slane %v6189_v28, 6 }
0x3d59   :  { %v9663_v7 = vpop.eup %9662 }
0x3d5a   :  { %6192 = vrot.lane.b32.xlu0 %v9663_v7, %s9807_s27 }
0x3dcc   :  { %v6193_v51 = vpop.permute.xlu0 %6192 }
0x3dcd   :  { %v11613_v5 = vmul.f32 %v9661_v50, %v6193_v51 }
0x3dcf   :  { %v6203_v17 = vrot.slane %v11613_v5, 2 }
0x3dd1   :  { %6204 = vrot.lane.b32.xlu1 %v6203_v17, %s9808_s3 }
0x3e43   :  { %v6205_v62 = vpop.permute.xlu1 %6204 }
0x3e44   :  { %9076 = vmatmul.mubr.msk.f32.vlgmr.msra.gmra.mxu0 %vm558_vm2, %v6205_v62 }
0x3e45   :  { %9090 = vmatpush3.msra.mxu0 %v11495_v60  ;;  %9097 = vmatprep.mubr.msk.f32.mxu0 %vm9810_vm4, %v9806_v22 }
0x3e46   :  { %9091 = vmatprep.subr.mxu0 %v9806_v22 }
0x3e47   :  { %9092 = vmatpush3.msra.mxu0 %v11501_v15 }
0x3e48   :  { %9093 = vmatprep.subr.mxu0 %v9806_v22 }
0x3e49   :  { %9094 = vmatpush3.msra.mxu0 %v11510_v39 }
0x3e4a   :  { %9095 = vmatprep.subr.mxu0 %v9806_v22 }
0x3e4b   :  { %9096 = vmatpush3.msra.mxu0 %v11517_v59 }
0x3e4c   :  { %9111 = vmatprep.subr.mxu0 %v9806_v22 }
0x3f04   :  { %v6274_v26 = vpop.f32.mrf.mxu0 }
0x3f05   :  { %v6279_v30 = vrot.slane %v6274_v26, 4 }
0x3f06   :  { %v9077_v29 = vpop.f32.mrf.mxu0 }
0x3f07   :  { %v6281_v31 = vadd.f32 %v6279_v30, %v11590_v56 }
0x3f09   :  { %9664 = vtanh.f32 %v6281_v31  ;;  %v8113_v32 = vmul.f32 -1.442695, %v6281_v31 }
0x3f0b   :  { %9666 = vpow2.f32 %v8113_v32 }
0x3f16   :  { %v9665_v53 = vpop.eup %9664 }
0x3f17   :  { %6294 = vrot.lane.b32.xlu0 %v9665_v53, %s9807_s27 }
0x3f18   :  { %v9667_v3 = vpop.eup %9666 }
0x3f19   :  { %v6285_v36 = vadd.f32 1.0, %v9667_v3 }
0x3f1b   :  { %9668 = vrcp.f32 %v6285_v36 }
0x3f28   :  { %v9669_v16 = vpop.eup %9668 }
0x3f29   :  { %v6292_v19 = vmul.f32 %v9669_v16, %v6290_v47 }
0x3f89   :  { %v6295_v8 = vpop.permute.xlu0 %6294 }
0x3f8a   :  { %v6297_v14 = vmul.f32 %v9669_v16, %v6295_v8 }
0x3f8c   :  { %6299 = vrot.lane.b32.xlu1 %v6297_v14, %s9808_s3 }
0x3ffe   :  { %v6300_v43 = vpop.permute.xlu1 %6299 }
0x3fff   :  { %v6302_v6 = vadd.f32 %v6300_v43, %v6292_v19 }
0x4001   :  { %9670 = vtanh.f32 %v6302_v6  ;;  %v6403_v49 = vrot.slane %v6302_v6, 6 }
0x400e   :  { %v9671_v9 = vpop.eup %9670 }
0x400f   :  { %6305 = vrot.lane.b32.xlu0 %v9671_v9, %s9807_s27 }
0x4081   :  { %v6306_v37 = vpop.permute.xlu0 %6305 }
0x4082   :  { %v11632_v58 = vmul.f32 %v9669_v16, %v6306_v37 }
0x4084   :  { %v6316_v54 = vrot.slane %v11632_v58, 4 }
0x4086   :  { %6317 = vrot.lane.b32.xlu1 %v6316_v54, %s9808_s3 }
0x40f8   :  { %v6318_v13 = vpop.permute.xlu1 %6317 }
0x40f9   :  { %9087 = vmatmul.mubr.msk.f32.vlgmr.msra.gmra.mxu1 %vm558_vm2, %v6318_v13 }
0x40fa   :  { %9101 = vmatpush3.msra.mxu1 %v11495_v60  ;;  %9108 = vmatprep.mubr.msk.f32.mxu1 %vm9810_vm4, %v9806_v22 }
0x40fb   :  { %9102 = vmatprep.subr.mxu1 %v9806_v22 }
0x40fc   :  { %9103 = vmatpush3.msra.mxu1 %v11501_v15 }
0x40fd   :  { %9104 = vmatprep.subr.mxu1 %v9806_v22 }
0x40fe   :  { %9105 = vmatpush3.msra.mxu1 %v11510_v39 }
0x40ff   :  { %9106 = vmatprep.subr.mxu1 %v9806_v22 }
0x4100   :  { %9107 = vmatpush3.msra.mxu1 %v11517_v59 }
0x4101   :  { %9122 = vmatprep.subr.mxu1 %v9806_v22 }
0x41b9   :  { %v6387_v52 = vpop.f32.mrf.mxu1 }
0x41ba   :  { %v6392_v63 = vrot.slane %v6387_v52, 2 }
0x41bb   :  { %v9088_v21 = vpop.f32.mrf.mxu1 }
0x41bc   :  { %v6394_v25 = vadd.f32 %v6392_v63, %v11590_v56 }
0x41be   :  { %9672 = vtanh.f32 %v6394_v25  ;;  %v8115_v24 = vmul.f32 -1.442695, %v6394_v25 }
0x41c0   :  { %9674 = vpow2.f32 %v8115_v24 }
0x41cb   :  { %v9673_v41 = vpop.eup %9672 }
0x41cc   :  { %6407 = vrot.lane.b32.xlu0 %v9673_v41, %s9807_s27 }
0x41cd   :  { %v9675_v55 = vpop.eup %9674 }
0x41ce   :  { %v6398_v34 = vadd.f32 1.0, %v9675_v55 }
0x41d0   :  { %9676 = vrcp.f32 %v6398_v34 }
0x41dd   :  { %v9677_v4 = vpop.eup %9676 }
0x41de   :  { %v6405_v18 = vmul.f32 %v9677_v4, %v6403_v49 }
0x423e   :  { %v6408_v42 = vpop.permute.xlu0 %6407 }
0x423f   :  { %v6410_v46 = vmul.f32 %v9677_v4, %v6408_v42 }
0x4241   :  { %6412 = vrot.lane.b32.xlu1 %v6410_v46, %s9808_s3 }
0x42b3   :  { %v6413_v48 = vpop.permute.xlu1 %6412 }
0x42b4   :  { %v6415_v38 = vadd.f32 %v6413_v48, %v6405_v18 }
0x42b6   :  { %9678 = vtanh.f32 %v6415_v38  ;;  %v6513_v44 = vrot.slane %v6415_v38, 6 }
0x42c3   :  { %v9679_v56 = vpop.eup %9678 }
0x42c4   :  { %6418 = vrot.lane.b32.xlu0 %v9679_v56, %s9807_s27 }
0x4336   :  { %v6419_v2 = vpop.permute.xlu0 %6418 }
0x4337   :  { %v11651_v23 = vmul.f32 %v9677_v4, %v6419_v2 }
0x4339   :  { %v6429_v45 = vrot.slane %v11651_v23, 6 }
0x433b   :  { %6430 = vrot.lane.b32.xlu1 %v6429_v45, %s9808_s3  ;;  %v11705_v45 = vld [vmem:[%s12046_s12 + $0x18] sm:$0xff] }
0x43ad   :  { %v6431_v1 = vpop.permute.xlu1 %6430 }
0x43ae   :  { %9098 = vmatmul.mubr.msk.f32.vlgmr.msra.gmra.mxu0 %vm558_vm2, %v6431_v1 }
0x43af   :  { %9112 = vmatpush3.msra.mxu0 %v11495_v60  ;;  %9119 = vmatprep.mubr.msk.f32.mxu0 %vm9810_vm4, %v9806_v22 }
0x43b0   :  { %9113 = vmatprep.subr.mxu0 %v9806_v22 }
0x43b1   :  { %9114 = vmatpush3.msra.mxu0 %v11501_v15 }
0x43b2   :  { %9115 = vmatprep.subr.mxu0 %v9806_v22 }
0x43b3   :  { %9116 = vmatpush3.msra.mxu0 %v11510_v39 }
0x43b4   :  { %9117 = vmatprep.subr.mxu0 %v9806_v22 }
0x43b5   :  { %9118 = vmatpush3.msra.mxu0 %v11517_v59 }
0x43b6   :  { %9133 = vmatprep.subr.mxu0 %v9806_v22 }
0x446e   :  { %v6500_v33 = vpop.f32.mrf.mxu0 }
0x446f   :  { %v6504_v12 = vadd.f32 %v6500_v33, %v11588_v10  ;;  %v11711_v33 = vld [vmem:[%s12046_s12 + $0x10] sm:$0xff] }
0x4470   :  { %v9099_v40 = vpop.f32.mrf.mxu0 }
0x4471   :  { %9680 = vtanh.f32 %v6504_v12  ;;  %v8117_v27 = vmul.f32 -1.442695, %v6504_v12  ;;  %v11720_v12 = vld [vmem:[%s12046_s12 + $0x8] sm:$0xff]  ;;  %v11727_v40 = vld [vmem:[%s12046_s12] sm:$0xff] }
0x4473   :  { %9682 = vpow2.f32 %v8117_v27 }
0x447e   :  { %v9681_v20 = vpop.eup %9680 }
0x447f   :  { %6517 = vrot.lane.b32.xlu0 %v9681_v20, %s9807_s27  ;;  %v11732_v20 = vld [vmem:[#allocation4] sm:$0x3] }
0x4480   :  { %v9683_v35 = vpop.eup %9682 }
0x4481   :  { %v6508_v50 = vadd.f32 1.0, %v9683_v35 }
0x4483   :  { %9684 = vrcp.f32 %v6508_v50 }
0x4490   :  { %v9685_v57 = vpop.eup %9684 }
0x4491   :  { %v6515_v61 = vmul.f32 %v9685_v57, %v6513_v44 }
0x44f1   :  { %v6518_v11 = vpop.permute.xlu0 %6517 }
0x44f2   :  { %v6520_v0 = vmul.f32 %v9685_v57, %v6518_v11 }
0x44f4   :  { %6522 = vrot.lane.b32.xlu1 %v6520_v0, %s9808_s3 }
0x4566   :  { %v6523_v28 = vpop.permute.xlu1 %6522 }
0x4567   :  { %v6525_v7 = vadd.f32 %v6523_v28, %v6515_v61 }
0x4569   :  { %9686 = vtanh.f32 %v6525_v7 }
0x4576   :  { %v9687_v51 = vpop.eup %9686 }
0x4577   :  { %6528 = vrot.lane.b32.xlu0 %v9687_v51, %s9807_s27 }
0x45e9   :  { %v6529_v17 = vpop.permute.xlu0 %6528 }
0x45ea   :  { %v6531_v62 = vmul.f32 %v9685_v57, %v6529_v17 }
0x45ec   :  { %6533 = vrot.lane.b32.xlu1 %v6531_v62, %s9808_s3 }
0x465e   :  { %v6534_v26 = vpop.permute.xlu1 %6533 }
0x465f   :  { %6537 = vst.msk [vmem:[#allocation4 + $0x8] sm:$0x3] %vm6091_vm5, %v6534_v26  ;;  %9109 = vmatmul.mubr.msk.f32.vlgmr.msra.gmra.mxu1 %vm558_vm2, %v6534_v26 }
0x4660   :  { %9123 = vmatpush3.msra.mxu1 %v11495_v60  ;;  %9130 = vmatprep.mubr.msk.f32.mxu1 %vm9810_vm4, %v9806_v22 }
0x4661   :  { %9124 = vmatprep.subr.mxu1 %v9806_v22 }
0x4662   :  { %9125 = vmatpush3.msra.mxu1 %v11501_v15 }
0x4663   :  { %9126 = vmatprep.subr.mxu1 %v9806_v22 }
0x4664   :  { %9127 = vmatpush3.msra.mxu1 %v11510_v39 }
0x4665   :  { %9128 = vmatprep.subr.mxu1 %v9806_v22 }
0x4666   :  { %9129 = vmatpush3.msra.mxu1 %v11517_v59  ;;  %v6622_v59 = vrot.slane %v6525_v7, 6 }
0x4667   :  { %9144 = vmatprep.subr.mxu1 %v9806_v22 }
0x471f   :  { %v6606_v30 = vpop.f32.mrf.mxu1 }
0x4720   :  { %v6611_v29 = vrot.slane %v6606_v30, 6 }
0x4721   :  { %v9110_v60 = vpop.f32.mrf.mxu1 }
0x4722   :  { %v6613_v31 = vadd.f32 %v6611_v29, %v11588_v10 }
0x4724   :  { %9688 = vtanh.f32 %v6613_v31  ;;  %v8119_v15 = vmul.f32 -1.442695, %v6613_v31 }
0x4726   :  { %9690 = vpow2.f32 %v8119_v15 }
0x4731   :  { %v9689_v53 = vpop.eup %9688 }
0x4732   :  { %6626 = vrot.lane.b32.xlu0 %v9689_v53, %s9807_s27 }
0x4733   :  { %v9691_v32 = vpop.eup %9690 }
0x4734   :  { %v6617_v3 = vadd.f32 1.0, %v9691_v32  ;;  %v6878_v32 = vld [vmem:[%s12047_s13 + $0x18] sm:$0xff] }
0x4736   :  { %9692 = vrcp.f32 %v6617_v3  ;;  %v6877_v3 = vld [vmem:[%s12047_s13 + $0x10] sm:$0xff] }
0x4743   :  { %v9693_v39 = vpop.eup %9692 }
0x4744   :  { %v6624_v8 = vmul.f32 %v9693_v39, %v6622_v59 }
0x47a4   :  { %v6627_v36 = vpop.permute.xlu0 %6626 }
0x47a5   :  { %v6629_v16 = vmul.f32 %v9693_v39, %v6627_v36  ;;  %v6875_v36 = vld [vmem:[%s12047_s13] sm:$0xff] }
0x47a7   :  { %6631 = vrot.lane.b32.xlu1 %v6629_v16, %s9808_s3 }
0x4819   :  { %v6632_v14 = vpop.permute.xlu1 %6631 }
0x481a   :  { %v6634_v47 = vadd.f32 %v6632_v14, %v6624_v8 }
0x481c   :  { %9694 = vtanh.f32 %v6634_v47  ;;  %v6734_v42 = vrot.slane %v6634_v47, 6 }
0x4829   :  { %v9695_v19 = vpop.eup %9694 }
0x482a   :  { %6637 = vrot.lane.b32.xlu0 %v9695_v19, %s9807_s27 }
0x489c   :  { %v6638_v43 = vpop.permute.xlu0 %6637 }
0x489d   :  { %v11687_v6 = vmul.f32 %v9693_v39, %v6638_v43  ;;  %v6876_v39 = vld [vmem:[%s12047_s13 + $0x8] sm:$0xff] }
0x489f   :  { %v6647_v9 = vrot.slane %v11687_v6, 2 }
0x48a1   :  { %6648 = vrot.lane.b32.xlu1 %v6647_v9, %s9808_s3 }
0x4913   :  { %v6649_v37 = vpop.permute.xlu1 %6648 }
0x4914   :  { %9120 = vmatmul.mubr.msk.f32.vlgmr.msra.gmra.mxu0 %vm558_vm2, %v6649_v37 }
0x4915   :  { %9141 = vmatprep.mubr.msk.f32.mxu0 %vm9810_vm4, %v9806_v22  ;;  %9134 = vmatpush3.msra.mxu0 %v6878_v32 }
0x4916   :  { %9135 = vmatprep.subr.mxu0 %v9806_v22 }
0x4917   :  { %9136 = vmatpush3.msra.mxu0 %v6877_v3 }
0x4918   :  { %9137 = vmatprep.subr.mxu0 %v9806_v22 }
0x4919   :  { %9138 = vmatpush3.msra.mxu0 %v6876_v39 }
0x491a   :  { %9139 = vmatprep.subr.mxu0 %v9806_v22 }
0x491b   :  { %9140 = vmatpush3.msra.mxu0 %v6875_v36 }
0x491c   :  { %9155 = vmatprep.subr.mxu0 %v9806_v22 }
0x49d4   :  { %v6718_v54 = vpop.f32.mrf.mxu0 }
0x49d5   :  { %v6723_v13 = vrot.slane %v6718_v54, 4 }
0x49d6   :  { %v9121_v52 = vpop.f32.mrf.mxu0 }
0x49d7   :  { %v6725_v63 = vadd.f32 %v6723_v13, %v11588_v10 }
0x49d9   :  { %9696 = vtanh.f32 %v6725_v63  ;;  %v8121_v25 = vmul.f32 -1.442695, %v6725_v63 }
0x49db   :  { %9698 = vpow2.f32 %v8121_v25  ;;  %v8124_v25 = vld [vmem:[%s12048_s14] ss:$0 sm:$0xff] }
0x49e6   :  { %v9697_v21 = vpop.eup %9696 }
0x49e7   :  { %6738 = vrot.lane.b32.xlu0 %v9697_v21, %s9807_s27 }
0x49e8   :  { %v9699_v41 = vpop.eup %9698 }
0x49e9   :  { %v6729_v24 = vadd.f32 1.0, %v9699_v41 }
0x49eb   :  { %9700 = vrcp.f32 %v6729_v24 }
0x49f8   :  { %v9701_v55 = vpop.eup %9700 }
0x49f9   :  { %v6736_v46 = vmul.f32 %v9701_v55, %v6734_v42  ;;  %v8127_v42 = vld [vmem:[%s12049_s15] ss:$0 sm:$0xff] }
0x4a59   :  { %v6739_v34 = vpop.permute.xlu0 %6738 }
0x4a5a   :  { %v6741_v4 = vmul.f32 %v9701_v55, %v6739_v34 }
0x4a5c   :  { %6743 = vrot.lane.b32.xlu1 %v6741_v4, %s9808_s3 }
0x4ace   :  { %v6744_v49 = vpop.permute.xlu1 %6743 }
0x4acf   :  { %v6746_v18 = vadd.f32 %v6744_v49, %v6736_v46 }
0x4ad1   :  { %9702 = vtanh.f32 %v6746_v18 }
0x4ade   :  { %v9703_v48 = vpop.eup %9702 }
0x4adf   :  { %6749 = vrot.lane.b32.xlu0 %v9703_v48, %s9807_s27 }
0x4b51   :  { %v6750_v38 = vpop.permute.xlu0 %6749 }
0x4b52   :  { %v11698_v56 = vmul.f32 %v9701_v55, %v6750_v38 }
0x4b54   :  { %v6759_v2 = vrot.slane %v11698_v56, 4 }
0x4b56   :  { %6760 = vrot.lane.b32.xlu1 %v6759_v2, %s9808_s3 }
0x4bc8   :  { %v6761_v1 = vpop.permute.xlu1 %6760 }
0x4bc9   :  { %9131 = vmatmul.mubr.msk.f32.vlgmr.msra.gmra.mxu1 %vm558_vm2, %v6761_v1 }
0x4bca   :  { %9145 = vmatpush3.msra.mxu1 %v11705_v45  ;;  %9152 = vmatprep.mubr.msk.f32.mxu1 %vm9810_vm4, %v9806_v22 }
0x4bcb   :  { %9146 = vmatprep.subr.mxu1 %v9806_v22 }
0x4bcc   :  { %9147 = vmatpush3.msra.mxu1 %v11711_v33 }
0x4bcd   :  { %9148 = vmatprep.subr.mxu1 %v9806_v22 }
0x4bce   :  { %9149 = vmatpush3.msra.mxu1 %v11720_v12 }
0x4bcf   :  { %9150 = vmatprep.subr.mxu1 %v9806_v22 }
0x4bd0   :  { %9151 = vmatpush3.msra.mxu1 %v11727_v40 }
0x4bd1   :  { %9153 = vmatmul.mubr.msk.f32.vlgmr.msra.gmra.mxu1 %vm558_vm2, %v11732_v20  ;;  %9166 = vmatprep.subr.mxu1 %v9806_v22 }
0x4bd2   :  { %9167 = vmatpush3.msra.mxu1 %v11705_v45  ;;  %9174 = vmatprep.mubr.msk.f32.mxu1 %vm9810_vm4, %v9806_v22 }
0x4bd3   :  { %9168 = vmatprep.subr.mxu1 %v9806_v22 }
0x4bd4   :  { %9169 = vmatpush3.msra.mxu1 %v11711_v33 }
0x4bd5   :  { %9170 = vmatprep.subr.mxu1 %v9806_v22 }
0x4bd6   :  { %9171 = vmatpush3.msra.mxu1 %v11720_v12 }
0x4bd7   :  { %9172 = vmatprep.subr.mxu1 %v9806_v22 }
0x4bd8   :  { %9173 = vmatpush3.msra.mxu1 %v11727_v40 }
0x4bd9   :  { %9188 = vmatprep.subr.mxu1 %v9806_v22 }
0x4c89   :  { %v6830_v27 = vpop.f32.mrf.mxu1 }
0x4c8a   :  { %v6835_v35 = vrot.slane %v6830_v27, 2 }
0x4c8b   :  { %v9132_v50 = vpop.f32.mrf.mxu1 }
0x4c8c   :  { %v6837_v57 = vadd.f32 %v6835_v35, %v11588_v10  ;;  %v6846_v10 = vrot.slane %v6746_v18, 6 }
0x4c8e   :  { %9704 = vtanh.f32 %v6837_v57  ;;  %v8123_v61 = vmul.f32 -1.442695, %v6837_v57 }
0x4c90   :  { %9706 = vpow2.f32 %v8123_v61 }
0x4c91   :  { %v11748_v11 = vpop.f32.mrf.mxu1 }
0x4c93   :  { %v9154_v0 = vpop.f32.mrf.mxu1 }
0x4c9b   :  { %v9705_v44 = vpop.eup %9704 }
0x4c9c   :  { %6850 = vrot.lane.b32.xlu0 %v9705_v44, %s9807_s27 }
0x4c9d   :  { %v9707_v28 = vpop.eup %9706 }
0x4c9e   :  { %v6841_v7 = vadd.f32 1.0, %v9707_v28 }
0x4ca0   :  { %9708 = vrcp.f32 %v6841_v7 }
0x4cad   :  { %v9709_v51 = vpop.eup %9708 }
0x4cae   :  { %v6848_v26 = vmul.f32 %v9709_v51, %v6846_v10 }
0x4d0e   :  { %v6851_v17 = vpop.permute.xlu0 %6850 }
0x4d0f   :  { %v6853_v62 = vmul.f32 %v9709_v51, %v6851_v17 }
0x4d11   :  { %6855 = vrot.lane.b32.xlu1 %v6853_v62, %s9808_s3 }
0x4d15   :  { %6197 = vrot.lane.b32.xlu1 %v11613_v5, %s9808_s3 }
0x4d19   :  { %6310 = vrot.lane.b32.xlu1 %v11632_v58, %s9808_s3  ;;  %v11773_v58 = vld [vmem:[#allocation4 + $0x8] sm:$0x3] }
0x4d1d   :  { %6642 = vrot.lane.b32.xlu1 %v11687_v6, %s9808_s3 }
0x4d83   :  { %v6856_v30 = vpop.permute.xlu1 %6855 }
0x4d84   :  { %v6858_v29 = vadd.f32 %v6856_v30, %v6848_v26 }
0x4d86   :  { %9710 = vtanh.f32 %v6858_v29 }
0x4d87   :  { %v6198_v60 = vpop.permute.xlu1 %6197 }
0x4d88   :  { %6202 = vst.msk [vmem:[#allocation4] sm:$0xc] %vm6201_vm6, %v6198_v60 }
0x4d8b   :  { %v6311_v31 = vpop.permute.xlu1 %6310 }
0x4d8c   :  { %6315 = vst.msk [vmem:[#allocation4] sm:$0x30] %vm6314_vm7, %v6311_v31 }
0x4d8f   :  { %v6643_v53 = vpop.permute.xlu1 %6642  ;;  %v11823_v37 = vld [vmem:[#allocation4 + $0x2] sm:$0x3] }
0x4d90   :  { %6646 = vst.msk [vmem:[#allocation4 + $0x8] sm:$0xc] %vm6201_vm6, %v6643_v53 }
0x4d93   :  { %v9711_v5 = vpop.eup %9710  ;;  %v11759_v15 = vld [vmem:[#allocation4 + $0x4] sm:$0x3] }
0x4d94   :  { %6861 = vrot.lane.b32.xlu0 %v9711_v5, %s9807_s27  ;;  %9175 = vmatmul.mubr.msk.f32.vlgmr.msra.gmra.mxu1 %vm558_vm2, %v11759_v15 }
0x4d95   :  { %9189 = vmatpush3.msra.mxu1 %v11705_v45  ;;  %9196 = vmatprep.mubr.msk.f32.mxu1 %vm9810_vm4, %v9806_v22 }
0x4d96   :  { %9190 = vmatprep.subr.mxu1 %v9806_v22 }
0x4d97   :  { %9191 = vmatpush3.msra.mxu1 %v11711_v33  ;;  %v11857_v63 = vld [vmem:[#allocation4 + $0xa] sm:$0x3] }
0x4d98   :  { %9192 = vmatprep.subr.mxu1 %v9806_v22 }
0x4d99   :  { %9193 = vmatpush3.msra.mxu1 %v11720_v12 }
0x4d9a   :  { %9194 = vmatprep.subr.mxu1 %v9806_v22 }
0x4d9b   :  { %9195 = vmatpush3.msra.mxu1 %v11727_v40 }
0x4d9c   :  { %9197 = vmatmul.mubr.msk.f32.vlgmr.msra.gmra.mxu1 %vm558_vm2, %v11773_v58  ;;  %9210 = vmatprep.subr.mxu1 %v9806_v22 }
0x4d9d   :  { %9211 = vmatpush3.msra.mxu1 %v11705_v45  ;;  %9218 = vmatprep.mubr.msk.f32.mxu1 %vm9810_vm4, %v9806_v22 }
0x4d9e   :  { %9212 = vmatprep.subr.mxu1 %v9806_v22 }
0x4d9f   :  { %9213 = vmatpush3.msra.mxu1 %v11711_v33 }
0x4da0   :  { %9214 = vmatprep.subr.mxu1 %v9806_v22 }
0x4da1   :  { %9215 = vmatpush3.msra.mxu1 %v11720_v12 }
0x4da2   :  { %9216 = vmatprep.subr.mxu1 %v9806_v22 }
0x4da3   :  { %9217 = vmatpush3.msra.mxu1 %v11727_v40 }
0x4e06   :  { %v6862_v16 = vpop.permute.xlu0 %6861 }
0x4e07   :  { %v6864_v59 = vmul.f32 %v9709_v51, %v6862_v16 }
0x4e09   :  { %v6888_v8 = vrot.slane %v6864_v59, 6  ;;  %6866 = vrot.lane.b32.xlu1 %v6864_v59, %s9808_s3 }
0x4e0b   :  { %6889 = vrot.lane.b32.xlu0 %v6888_v8, %s9808_s3 }
0x4e0f   :  { %6423 = vrot.lane.b32.xlu0 %v11651_v23, %s9808_s3 }
0x4e13   :  { %6754 = vrot.lane.b32.xlu0 %v11698_v56, %s9808_s3 }
0x4e54   :  { %v11809_v14 = vpop.f32.mrf.mxu1 }
0x4e56   :  { %v9176_v47 = vpop.f32.mrf.mxu1 }
0x4e5c   :  { %v11811_v19 = vpop.f32.mrf.mxu1 }
0x4e5e   :  { %v9198_v43 = vpop.f32.mrf.mxu1 }
0x4e7b   :  { %v6867_v6 = vpop.permute.xlu1 %6866 }
0x4e7c   :  { %6870 = vst.msk [vmem:[#allocation4 + $0x8] sm:$0xc0] %vm6427_vm8, %v6867_v6 }
0x4e7d   :  { %v6890_v9 = vpop.permute.xlu0 %6889 }
0x4e7e   :  { %9142 = vmatmul.mubr.msk.f32.vlgmr.msra.gmra.mxu0 %vm558_vm2, %v6890_v9 }
0x4e7f   :  { %9156 = vmatpush3.msra.mxu0 %v11705_v45  ;;  %9163 = vmatprep.mubr.msk.f32.mxu0 %vm9810_vm4, %v9806_v22 }
0x4e80   :  { %9157 = vmatprep.subr.mxu0 %v9806_v22 }
0x4e81   :  { %9158 = vmatpush3.msra.mxu0 %v11711_v33  ;;  %v6424_v23 = vpop.permute.xlu0 %6423 }
0x4e82   :  { %9159 = vmatprep.subr.mxu0 %v9806_v22  ;;  %6428 = vst.msk [vmem:[#allocation4] sm:$0xc0] %vm6427_vm8, %v6424_v23 }
0x4e83   :  { %9160 = vmatpush3.msra.mxu0 %v11720_v12  ;;  %v11871_v21 = vld [vmem:[#allocation4 + $0xe] sm:$0x3] }
0x4e84   :  { %9161 = vmatprep.subr.mxu0 %v9806_v22 }
0x4e85   :  { %9162 = vmatpush3.msra.mxu0 %v11727_v40  ;;  %v6755_v54 = vpop.permute.xlu0 %6754 }
0x4e86   :  { %9164 = vmatmul.mubr.msk.f32.vlgmr.msra.gmra.mxu0 %vm558_vm2, %v11823_v37  ;;  %9177 = vmatprep.subr.mxu0 %v9806_v22  ;;  %6758 = vst.msk [vmem:[#allocation4 + $0x8] sm:$0x30] %vm6314_vm7, %v6755_v54 }
0x4e87   :  { %9178 = vmatpush3.msra.mxu0 %v11705_v45  ;;  %9185 = vmatprep.mubr.msk.f32.mxu0 %vm9810_vm4, %v9806_v22 }
0x4e88   :  { %9179 = vmatprep.subr.mxu0 %v9806_v22 }
0x4e89   :  { %9180 = vmatpush3.msra.mxu0 %v11711_v33  ;;  %v11838_v13 = vld [vmem:[#allocation4 + $0x6] sm:$0x3] }
0x4e8a   :  { %9181 = vmatprep.subr.mxu0 %v9806_v22 }
0x4e8b   :  { %9182 = vmatpush3.msra.mxu0 %v11720_v12 }
0x4e8c   :  { %9183 = vmatprep.subr.mxu0 %v9806_v22 }
0x4e8d   :  { %9184 = vmatpush3.msra.mxu0 %v11727_v40  ;;  %v11840_v52 = vld [vmem:[#allocation4 + $0xc] sm:$0x3] }
0x4e8e   :  { %9186 = vmatmul.mubr.msk.f32.vlgmr.msra.gmra.mxu0 %vm558_vm2, %v11838_v13  ;;  %9199 = vmatprep.subr.mxu0 %v9806_v22 }
0x4e8f   :  { %9200 = vmatpush3.msra.mxu0 %v11705_v45  ;;  %9219 = vmatmul.mubr.msk.f32.vlgmr.msra.gmra.mxu1 %vm558_vm2, %v11840_v52 }
0x4e90   :  { %9201 = vmatprep.subr.mxu0 %v9806_v22  ;;  %9207 = vmatprep.mubr.msk.f32.mxu0 %vm9810_vm4, %v9806_v22 }
0x4e91   :  { %9202 = vmatpush3.msra.mxu0 %v11711_v33  ;;  %7804 = vmatprep.mubr.f32.mxu1 %v9806_v22 }
0x4e92   :  { %9203 = vmatprep.subr.mxu0 %v9806_v22 }
0x4e93   :  { %9204 = vmatpush3.msra.mxu0 %v11720_v12 }
0x4e94   :  { %9205 = vmatprep.subr.mxu0 %v9806_v22 }
0x4e95   :  { %9206 = vmatpush3.msra.mxu0 %v11727_v40 }
0x4e96   :  { %9208 = vmatmul.mubr.msk.f32.vlgmr.msra.gmra.mxu0 %vm558_vm2, %v11857_v63  ;;  %9221 = vmatprep.subr.mxu0 %v9806_v22 }
0x4e97   :  { %9222 = vmatpush3.msra.mxu0 %v11705_v45  ;;  %9229 = vmatprep.mubr.msk.f32.mxu0 %vm9810_vm4, %v9806_v22 }
0x4e98   :  { %9223 = vmatprep.subr.mxu0 %v9806_v22 }
0x4e99   :  { %9224 = vmatpush3.msra.mxu0 %v11711_v33 }
0x4e9a   :  { %9225 = vmatprep.subr.mxu0 %v9806_v22 }
0x4e9b   :  { %9226 = vmatpush3.msra.mxu0 %v11720_v12 }
0x4e9c   :  { %9227 = vmatprep.subr.mxu0 %v9806_v22 }
0x4e9d   :  { %9228 = vmatpush3.msra.mxu0 %v11727_v40 }
0x4e9e   :  { %9230 = vmatmul.mubr.msk.f32.vlgmr.msra.gmra.mxu0 %vm558_vm2, %v11871_v21  ;;  %7849 = vmatprep.subr.mxu0 %v9806_v22 }
0x4f3e   :  { %v6959_v41 = vpop.f32.mrf.mxu0 }
0x4f3f   :  { %v6960_v24 = vadd.f32 %v8124_v25, %v6959_v41 }
0x4f40   :  { %v9143_v55 = vpop.f32.mrf.mxu0 }
0x4f41   :  { %v7034_v34 = vadd.f32 %v11748_v11, %v6960_v24  ;;  %v7207_v4 = vadd.f32 %v11809_v14, %v6960_v24  ;;  %v7369_v48 = vadd.f32 %v11811_v19, %v6960_v24  ;;  %v8128_v19 = vld [vmem:[#allocation6] ss:$0 sm:$0xff] }
0x4f43   :  { %v7037_v46 = vmax.f32 %v7034_v34, 0.0  ;;  %v7210_v49 = vmax.f32 %v7207_v4, 0.0  ;;  %v7372_v12 = vmax.f32 %v7369_v48, 0.0 }
0x4f45   :  { %v7044_v18 = vmul.f32 %v8127_v42, %v7037_v46  ;;  %v7211_v45 = vmul.f32 %v8127_v42, %v7210_v49  ;;  %v7373_v50 = vmul.f32 %v8127_v42, %v7372_v12 }
0x4f46   :  { %v7125_v38 = vpop.f32.mrf.mxu0 }
0x4f47   :  { %v7126_v56 = vadd.f32 %v7125_v38, %v6960_v24  ;;  %v7045_v2 = vsel %vm243_vm0, %v7044_v18, 0.0  ;;  %v7212_v27 = vsel %vm243_vm0, %v7211_v45, 0.0  ;;  %v7374_v51 = vsel %vm243_vm0, %v7373_v50, 0.0 }
0x4f48   :  { %v9165_v1 = vpop.f32.mrf.mxu0  ;;  %7046 = vadd.xlane.f32.xlu0 %v7045_v2 }
0x4f49   :  { %v7129_v33 = vmax.f32 %v7126_v56, 0.0 }
0x4f4b   :  { %v7130_v40 = vmul.f32 %v8127_v42, %v7129_v33 }
0x4f4c   :  { %7213 = vadd.xlane.f32.xlu0 %v7212_v27 }
0x4f4d   :  { %v7131_v35 = vsel %vm243_vm0, %v7130_v40, 0.0 }
0x4f4e   :  { %7132 = vadd.xlane.f32.xlu1 %v7131_v35  ;;  %v7287_v57 = vpop.f32.mrf.mxu0 }
0x4f4f   :  { %v7288_v11 = vadd.f32 %v7287_v57, %v6960_v24  ;;  %v7530_v0 = vpop.f32.mrf.mxu1 }
0x4f50   :  { %v7531_v44 = vadd.f32 %v7530_v0, %v6960_v24  ;;  %v9187_v61 = vpop.f32.mrf.mxu0 }
0x4f51   :  { %v7291_v28 = vmax.f32 %v7288_v11, 0.0  ;;  %v9220_v7 = vpop.f32.mrf.mxu1 }
0x4f52   :  { %v7534_v17 = vmax.f32 %v7531_v44, 0.0  ;;  %7375 = vadd.xlane.f32.xlu1 %v7374_v51 }
0x4f53   :  { %v7292_v62 = vmul.f32 %v8127_v42, %v7291_v28 }
0x4f54   :  { %v7535_v10 = vmul.f32 %v8127_v42, %v7534_v17 }
0x4f55   :  { %v7293_v26 = vsel %vm243_vm0, %v7292_v62, 0.0 }
0x4f56   :  { %v7449_v30 = vpop.f32.mrf.mxu0  ;;  %7294 = vadd.xlane.f32.xlu0 %v7293_v26  ;;  %v7536_v29 = vsel %vm243_vm0, %v7535_v10, 0.0 }
0x4f57   :  { %v7450_v60 = vadd.f32 %v7449_v30, %v6960_v24  ;;  %7537 = vadd.xlane.f32.xlu1 %v7536_v29 }
0x4f58   :  { %v9209_v31 = vpop.f32.mrf.mxu0 }
0x4f59   :  { %v7453_v53 = vmax.f32 %v7450_v60, 0.0 }
0x4f5b   :  { %v7454_v5 = vmul.f32 %v8127_v42, %v7453_v53 }
0x4f5d   :  { %v7455_v32 = vsel %vm243_vm0, %v7454_v5, 0.0 }
0x4f5e   :  { %v7611_v3 = vpop.f32.mrf.mxu0  ;;  %7456 = vadd.xlane.f32.xlu0 %v7455_v32 }
0x4f5f   :  { %v7612_v39 = vadd.f32 %v7611_v3, %v6960_v24 }
0x4f60   :  { %v9231_v36 = vpop.f32.mrf.mxu0 }
0x4f61   :  { %v7615_v16 = vmax.f32 %v7612_v39, 0.0 }
0x4f63   :  { %v7616_v59 = vmul.f32 %v8127_v42, %v7615_v16 }
0x4f65   :  { %v7617_v8 = vsel %vm243_vm0, %v7616_v59, 0.0 }
0x4f66   :  { %7618 = vadd.xlane.f32.xlu0 %v7617_v8 }
0x4fd1   :  { %v7047_v14 = vpop.xlane.xlu0 %7046 }
0x4fd2   :  { %v7054_v9 = vadd.f32 %v8128_v19, %v7047_v14  ;;  %v7724_v14 = vld [vmem:[%s12050_s17 + $0x38] sm:$0xff] }
0x4fd3   :  { %7764 = vmatprep.subr.mxu1 %v7724_v14 }
0x4fd5   :  { %v7214_v43 = vpop.xlane.xlu0 %7213 }
0x4fd6   :  { %v7215_v25 = vadd.f32 %v8128_v19, %v7214_v43  ;;  %v7721_v43 = vld [vmem:[%s12050_s17 + $0x20] sm:$0xff] }
0x4fd7   :  { %v7133_v47 = vpop.xlane.xlu1 %7132 }
0x4fd8   :  { %v7134_v6 = vadd.f32 %v8128_v19, %v7133_v47  ;;  %v7723_v47 = vld [vmem:[%s12050_s17 + $0x30] sm:$0xff] }
0x4fd9   :  { %7765 = vmatpush1.msra.mxu1 %v7723_v47 }
0x4fda   :  { %v7135_v54 = vmax.f32 %v7054_v9, %v7134_v6 }
0x4fdb   :  { %v7376_v34 = vpop.xlane.xlu1 %7375 }
0x4fdc   :  { %v7216_v55 = vmax.f32 %v7135_v54, %v7215_v25  ;;  %v7377_v46 = vadd.f32 %v8128_v19, %v7376_v34  ;;  %v7827_v54 = vld [vmem:[%s12052_s19 + $0x70] sm:$0xff]  ;;  %v7825_v34 = vld [vmem:[%s12052_s19 + $0x60] sm:$0xff] }
0x4fdf   :  { %v7295_v23 = vpop.xlane.xlu0 %7294 }
0x4fe0   :  { %v7296_v41 = vadd.f32 %v8128_v19, %v7295_v23  ;;  %v7538_v18 = vpop.xlane.xlu1 %7537  ;;  %v7719_v23 = vld [vmem:[%s12050_s17 + $0x10] sm:$0xff] }
0x4fe1   :  { %v7539_v38 = vadd.f32 %v8128_v19, %v7538_v18  ;;  %v7819_v18 = vld [vmem:[%s12052_s19 + $0x30] sm:$0xff] }
0x4fe2   :  { %v7297_v4 = vmax.f32 %v7216_v55, %v7296_v41  ;;  %v7717_v55 = vld [vmem:[%s12050_s17] sm:$0xff] }
0x4fe4   :  { %v7378_v42 = vmax.f32 %v7297_v4, %v7377_v46  ;;  %v7824_v4 = vld [vmem:[%s12052_s19 + $0x58] sm:$0xff] }
0x4fe7   :  { %v7457_v24 = vpop.xlane.xlu0 %7456 }
0x4fe8   :  { %v7458_v49 = vadd.f32 %v8128_v19, %v7457_v24  ;;  %v7823_v24 = vld [vmem:[%s12052_s19 + $0x50] sm:$0xff] }
0x4fea   :  { %v7459_v48 = vmax.f32 %v7378_v42, %v7458_v49  ;;  %v7820_v42 = vld [vmem:[%s12052_s19 + $0x38] sm:$0xff] }
0x4fec   :  { %v7540_v2 = vmax.f32 %v7459_v48, %v7539_v38  ;;  %v7818_v48 = vld [vmem:[%s12052_s19 + $0x28] sm:$0xff] }
0x4fef   :  { %v7619_v56 = vpop.xlane.xlu0 %7618 }
0x4ff0   :  { %v7620_v45 = vadd.f32 %v8128_v19, %v7619_v56  ;;  %v7722_v19 = vld [vmem:[%s12050_s17 + $0x28] sm:$0xff]  ;;  %v7816_v56 = vld [vmem:[%s12052_s19 + $0x18] sm:$0xff] }
0x4ff1   :  { %7766 = vmatprep.subr.mxu1 %v7722_v19 }
0x4ff2   :  { %v7621_v1 = vmax.f32 %v7540_v2, %v7620_v45  ;;  %7767 = vmatpush1.msra.mxu1 %v7721_v43  ;;  %v7815_v2 = vld [vmem:[%s12052_s19 + $0x10] sm:$0xff] }
0x4ff4   :  { %v7622_v33 = vsub.f32 %v7054_v9, %v7621_v1  ;;  %v7633_v12 = vsub.f32 %v7134_v6, %v7621_v1  ;;  %v7644_v40 = vsub.f32 %v7215_v25, %v7621_v1  ;;  %v7655_v27 = vsub.f32 %v7296_v41, %v7621_v1  ;;  %v7720_v6 = vld [vmem:[%s12050_s17 + $0x18] sm:$0xff]  ;;  %v7718_v25 = vld [vmem:[%s12050_s17 + $0x8] sm:$0xff] }
0x4ff5   :  { %v7666_v11 = vsub.f32 %v7377_v46, %v7621_v1  ;;  %v7677_v44 = vsub.f32 %v7458_v49, %v7621_v1  ;;  %v7688_v28 = vsub.f32 %v7539_v38, %v7621_v1  ;;  %v7699_v51 = vsub.f32 %v7620_v45, %v7621_v1  ;;  %v7828_v9 = vld [vmem:[%s12052_s19 + $0x78] sm:$0xff]  ;;  %v7826_v41 = vld [vmem:[%s12052_s19 + $0x68] sm:$0xff]  ;;  %7768 = vmatprep.subr.mxu1 %v7720_v6  ;;  %v7821_v49 = vld [vmem:[%s12052_s19 + $0x40] sm:$0xff] }
0x4ff6   :  { %v7623_v35 = vmul.f32 1.442695, %v7622_v33  ;;  %v7634_v50 = vmul.f32 1.442695, %v7633_v12  ;;  %v7645_v57 = vmul.f32 1.442695, %v7644_v40  ;;  %7850 = vmatpush1.msra.mxu0 %v7828_v9  ;;  %7769 = vmatpush1.msra.mxu1 %v7719_v23 }
0x4ff7   :  { %v7656_v0 = vmul.f32 1.442695, %v7655_v27  ;;  %v7667_v61 = vmul.f32 1.442695, %v7666_v11  ;;  %v7678_v7 = vmul.f32 1.442695, %v7677_v44  ;;  %7851 = vmatprep.subr.mxu0 %v9806_v22  ;;  %7770 = vmatprep.subr.mxu1 %v7718_v25 }
0x4ff8   :  { %9712 = vpow2.f32 %v7623_v35  ;;  %v7689_v17 = vmul.f32 1.442695, %v7688_v28  ;;  %v7700_v62 = vmul.f32 1.442695, %v7699_v51  ;;  %7852 = vmatpush1.msra.mxu0 %v7827_v54  ;;  %7771 = vmatpush1.msra.mxu1 %v7717_v55  ;;  %v7822_v46 = vld [vmem:[%s12052_s19 + $0x48] sm:$0xff]  ;;  %v7817_v38 = vld [vmem:[%s12052_s19 + $0x20] sm:$0xff] }
0x4ff9   :  { %9714 = vpow2.f32 %v7634_v50  ;;  %7853 = vmatprep.subr.mxu0 %v9806_v22  ;;  %v7814_v45 = vld [vmem:[%s12052_s19 + $0x8] sm:$0xff]  ;;  %v7813_v1 = vld [vmem:[%s12052_s19] sm:$0xff]  ;;  %v7836_v12 = vld [vmem:[%s12052_s19 + $0xb8] sm:$0xff] }
0x4ffa   :  { %9716 = vpow2.f32 %v7645_v57  ;;  %7854 = vmatpush1.msra.mxu0 %v7826_v41  ;;  %v7837_v33 = vld [vmem:[%s12052_s19 + $0xc0] sm:$0xff]  ;;  %v7835_v40 = vld [vmem:[%s12052_s19 + $0xb0] sm:$0xff]  ;;  %v7834_v27 = vld [vmem:[%s12052_s19 + $0xa8] sm:$0xff] }
0x4ffb   :  { %9718 = vpow2.f32 %v7656_v0  ;;  %7855 = vmatprep.subr.mxu0 %v9806_v22  ;;  %v7833_v35 = vld [vmem:[%s12052_s19 + $0xa0] sm:$0xff] }
0x4ffc   :  { %9720 = vpow2.f32 %v7667_v61  ;;  %7856 = vmatpush1.msra.mxu0 %v7825_v34 }
0x4ffd   :  { %9722 = vpow2.f32 %v7678_v7  ;;  %7857 = vmatprep.subr.mxu0 %v9806_v22 }
0x4ffe   :  { %9724 = vpow2.f32 %v7689_v17  ;;  %7858 = vmatpush1.msra.mxu0 %v7824_v4 }
0x4fff   :  { %9726 = vpow2.f32 %v7700_v62  ;;  %7859 = vmatprep.subr.mxu0 %v9806_v22 }
0x5000   :  { %7860 = vmatpush1.msra.mxu0 %v7823_v24 }
0x5001   :  { %7861 = vmatprep.subr.mxu0 %v9806_v22 }
0x5002   :  { %7862 = vmatpush1.msra.mxu0 %v7822_v46 }
0x5003   :  { %7863 = vmatprep.subr.mxu0 %v9806_v22 }
0x5004   :  { %7864 = vmatpush1.msra.mxu0 %v7821_v49 }
0x5005   :  { %v9713_v10 = vpop.eup %9712  ;;  %7865 = vmatprep.subr.mxu0 %v9806_v22 }
0x5006   :  { %v9715_v26 = vpop.eup %9714  ;;  %7628 = vperm.xlu1 %9242, %v9713_v10   ;;  %7866 = vmatpush1.msra.mxu0 %v7820_v42 }
0x5007   :  { %7639 = vperm.xlu0 %9243, %v9715_v26   ;;  %v7636_v30 = vadd.f32 %v9715_v26, %v9713_v10  ;;  %v9717_v29 = vpop.eup %9716  ;;  %7867 = vmatprep.subr.mxu0 %v9806_v22 }
0x5008   :  { %v9719_v31 = vpop.eup %9718  ;;  %7868 = vmatpush1.msra.mxu0 %v7819_v18 }
0x5009   :  { %v7647_v60 = vadd.f32 %v9717_v29, %v7636_v30  ;;  %v9721_v5 = vpop.eup %9720  ;;  %7869 = vmatprep.subr.mxu0 %v9806_v22 }
0x500a   :  { %7650 = vperm.xlu1 %9242, %v9717_v29   ;;  %v9723_v3 = vpop.eup %9722  ;;  %7870 = vmatpush1.msra.mxu0 %v7818_v48 }
0x500b   :  { %7661 = vperm.xlu0 %9243, %v9719_v31   ;;  %v7658_v53 = vadd.f32 %v9719_v31, %v7647_v60  ;;  %v9725_v36 = vpop.eup %9724  ;;  %7871 = vmatprep.subr.mxu0 %v9806_v22 }
0x500c   :  { %v9727_v59 = vpop.eup %9726  ;;  %7872 = vmatpush1.msra.mxu0 %v7817_v38 }
0x500d   :  { %v7669_v32 = vadd.f32 %v9721_v5, %v7658_v53  ;;  %7873 = vmatprep.subr.mxu0 %v9806_v22 }
0x500e   :  { %7874 = vmatpush1.msra.mxu0 %v7816_v56 }
0x500f   :  { %7683 = vperm.xlu0 %9243, %v9723_v3   ;;  %v7680_v39 = vadd.f32 %v9723_v3, %v7669_v32  ;;  %7875 = vmatprep.subr.mxu0 %v9806_v22 }
0x5010   :  { %7876 = vmatpush1.msra.mxu0 %v7815_v2 }
0x5011   :  { %v7691_v16 = vadd.f32 %v9725_v36, %v7680_v39  ;;  %7877 = vmatprep.subr.mxu0 %v9806_v22 }
0x5012   :  { %7878 = vmatpush1.msra.mxu0 %v7814_v45 }
0x5013   :  { %7705 = vperm.xlu0 %9243, %v9727_v59   ;;  %v7702_v8 = vadd.f32 %v9727_v59, %v7691_v16  ;;  %7879 = vmatprep.subr.mxu0 %v9806_v22 }
0x5014   :  { %7880 = vmatpush1.msra.mxu0 %v7813_v1 }
0x5015   :  { %7712 = vperm.xlu1 %9242, %v7702_v8   ;;  %7895 = vmatprep.subr.mxu0 %v9806_v22  ;;  %v7725_v8 = vld [vmem:[%s12051_s18] sm:$0x3]  ;;  %s9811_s18 = smov [#allocation7]  }
0x5016   :  { %7896 = vmatpush2.msra.mxu0 %v7837_v33  ;;  %s7933_s27 = sshll.u32 %s9811_s18, 4  ;;  %s7934_s27 = int_to_ptr.vmem [resolvable:$true] %s7933_s27 }
0x5017   :  { %7897 = vmatprep.subr.mxu0 %v9806_v22  ;;  %s9784_s16 = scalar_lea.vmem %s7934_s27, 32  ;;  %p9789_p1 = scmp.lt.s32.totalorder %s7934_s27, %s7934_s27 }
0x5018   :  { %7898 = vmatpush2.msra.mxu0 %v7836_v12  ;;  %p9785_p0 = scmp.ne.s32.totalorder %s7934_s27, %s9784_s16  ;;  %p9790_p2 = scmp.lt.s32.totalorder %s9784_s16, %s9784_s16 }
0x5019   :  { %7672 = vperm.xlu1 %9242, %v9721_v5   ;;  %7899 = vmatprep.subr.mxu0 %v9806_v22 }
0x501a   :  { %7900 = vmatpush2.msra.mxu0 %v7835_v40  ;;  %p9791_p3 = por %p9790_p2, %p9789_p1 }
0x501b   :  { %7901 = vmatprep.subr.mxu0 %v9806_v22 }
0x501c   :  { %7902 = vmatpush2.msra.mxu0 %v7834_v27  ;;  %p9792_p4 = pnand %p9791_p3, %p9785_p0 }
0x501d   :  { %7694 = vperm.xlu1 %9242, %v9725_v36   ;;  %7903 = vmatprep.subr.mxu0 %v9806_v22 }
0x501e   :  { %7904 = vmatpush2.msra.mxu0 %v7833_v35 }
0x501f   :  { %7905 = vmatprep.subr.mxu0 %v9806_v22 }
0x5081   :  { %v7629_v50 = vpop.permute.xlu1 %7628 }
0x5082   :  { %v7640_v57 = vpop.permute.xlu0 %7639  ;;  %v7631_v44 = vmul.f32 %v7629_v50, %v11732_v20 }
0x5083   :  { %v7642_v0 = vmul.f32 %v7640_v57, %v11823_v37 }
0x5085   :  { %v7651_v11 = vpop.permute.xlu1 %7650  ;;  %v7643_v7 = vadd.f32 %v7642_v0, %v7631_v44 }
0x5086   :  { %v7662_v61 = vpop.permute.xlu0 %7661  ;;  %v7653_v28 = vmul.f32 %v7651_v11, %v11759_v15 }
0x5087   :  { %v7664_v10 = vmul.f32 %v7662_v61, %v11838_v13  ;;  %v7831_v13 = vld [vmem:[%s12052_s19 + $0x90] sm:$0xff] }
0x5088   :  { %v7654_v17 = vadd.f32 %v7653_v28, %v7643_v7 }
0x508a   :  { %v7684_v62 = vpop.permute.xlu0 %7683  ;;  %v7665_v30 = vadd.f32 %v7664_v10, %v7654_v17 }
0x508b   :  { %v7686_v60 = vmul.f32 %v7684_v62, %v11857_v63  ;;  %v7829_v63 = vld [vmem:[%s12052_s19 + $0x80] sm:$0xff] }
0x508e   :  { %v7706_v37 = vpop.permute.xlu0 %7705 }
0x508f   :  { %v7708_v15 = vmul.f32 %v7706_v37, %v11871_v21  ;;  %v7727_v21 = vlaneseq }
0x5090   :  { %v7713_v51 = vpop.permute.xlu1 %7712 }
0x5091   :  { %9728 = vrcp.f32 %v7713_v51  ;;  %v7728_v16 = vshrl.u32 %v7727_v21, 7 }
0x5093   :  { %v7729_v59 = vsub.s32 0, %v7728_v16  ;;  %v7733_v14 = vsub.s32 1, %v7728_v16 }
0x5094   :  { %v7673_v26 = vpop.permute.xlu1 %7672 }
0x5095   :  { %v7675_v29 = vmul.f32 %v7673_v26, %v11773_v58  ;;  %v7832_v58 = vld [vmem:[%s12052_s19 + $0x98] sm:$0xff]  ;;  %v7730_v47 = vrot.slane %v7725_v8, %v7729_v59  ;;  %v7734_v19 = vrot.slane %v7725_v8, %v7733_v14 }
0x5096   :  { %7906 = vmatpush2.msra.mxu0 %v7832_v58 }
0x5097   :  { %v7676_v31 = vadd.f32 %v7675_v29, %v7665_v30  ;;  %7907 = vmatprep.subr.mxu0 %v9806_v22 }
0x5098   :  { %v7695_v53 = vpop.permute.xlu1 %7694  ;;  %7908 = vmatpush2.msra.mxu0 %v7831_v13 }
0x5099   :  { %v7687_v20 = vadd.f32 %v7686_v60, %v7676_v31  ;;  %v7697_v5 = vmul.f32 %v7695_v53, %v11840_v52  ;;  %v7830_v52 = vld [vmem:[%s12052_s19 + $0x88] sm:$0xff]  ;;  %7909 = vmatprep.subr.mxu0 %v9806_v22 }
0x509a   :  { %7910 = vmatpush2.msra.mxu0 %v7830_v52 }
0x509b   :  { %v7698_v32 = vadd.f32 %v7697_v5, %v7687_v20  ;;  %7911 = vmatprep.subr.mxu0 %v9806_v22  ;;  %v8137_v22 = vld [vmem:[%s12053_s20] ss:$0 sm:$0xff] }
0x509c   :  { %7912 = vmatpush2.msra.mxu0 %v7829_v63 }
0x509d   :  { %v7709_v3 = vadd.f32 %v7708_v15, %v7698_v32 }
0x509e   :  { %v9729_v39 = vpop.eup %9728 }
0x509f   :  { %v7716_v36 = vmul.f32 %v9729_v39, %v7709_v3 }
0x50a1   :  { %8136 = vmatmul.mubr.msk.f32.vlgmr.msra.gmra.mxu1 %vm558_vm2, %v7716_v36 }
0x5161   :  { %v7806_v43 = vpop.f32.mrf.mxu1 }
0x5162   :  { %v7807_v6 = vadd.f32 %v7806_v43, %v7730_v47 }
0x5163   :  { %v7808_v9 = vpop.f32.mrf.mxu1 }
0x5164   :  { %v7809_v23 = vadd.f32 %v7808_v9, %v7734_v19  ;;  %v7811_v25 = vmax.f32 %v7807_v6, 0.0 }
0x5166   :  { %v7812_v54 = vmax.f32 %v7809_v23, 0.0 }
0x5168   :  { %8138 = vmatprep.mubr.msk.f32.mxu0 %vm7845_vm9, %v7812_v54 }
0x5169   :  { %7914 = vmatmul.mubr.f32.vlgmr.msra.gmra.mxu0 %v7811_v25 }
0x5229   :  { %v7915_v41 = vpop.f32.mrf.mxu0 }
0x522a   :  { %v7916_v55 = vadd.f32 %v8137_v22, %v7915_v41 }
0x522b   :  { %v7917_v34 = vpop.f32.mrf.mxu0 }
0x522c   :  { %v8139_v4 = vmul.f32 -1.442695, %v7916_v55 }
0x522e   :  { %9730 = vpow2.f32 %v8139_v4 }
0x523b   :  { %v9731_v24 = vpop.eup %9730 }
0x523c   :  { %v7922_v46 = vadd.f32 1.0, %v9731_v24 }
0x523e   :  { %9732 = vrcp.f32 %v7922_v46 }
0x524b   :  { %v9733_v49 = vpop.eup %9732 }
0x524c   :  { %7926 = vst.msk [vmem:[#allocation7] sm:$0x3] %vm7925_vm10, %v9733_v49 }
0x524d   :  { %9795 = shalt.err (!%p9792_p4)
}
0x524e   :  { %7936 = dma.vmem_to_hbm [thread:$0]  %s7934_s27, 32, %s12054_s21, [#allocation8]  }
0x524f   :  { %9804 = dma.done.wait [#allocation8], 32  }
0x5250   :  { %9805 = vsyncadd [#allocation8], 4294967264 }
0x5251   :  { %7940 = vsyncpa [#allocation8], 1 }

</bundles_post_ra>
